<compile_context>
chip_gen: v5e
topology: v5e:2x2
jax: 0.10.0
libtpu: 0.0.40
codegen_flags: <defaults>
</compile_context>

<pallas_src>
import functools

import jax
import jax.numpy as jnp
import numpy as np
from jax import lax
from jax.experimental import pallas as pl
from jax.experimental.pallas import tpu as pltpu

_LANE = 1024        # lane-dim width of the reduction tiles (multiple of 128)
_MAX_ROWS = 256     # max sublane rows per reduction grid step (v5e-safe)
_COUT_PAD = 128     # conv output channels padded to a full lane width


def _round_up(x, m):
    return ((x + m - 1) // m) * m


# ------------------- fused weighted scalar-reduction kernel -----------------
# Per-row metadata (w = weight, m = mode):
#   mode 0: w * a                        (GAN mean terms,  w = -wGAN / size)
#   mode 1: w * |a - b|                  (feature-match L1 terms)
#   mode 2: w * (exp(b) - 1 - b + a^2)   (KL term, a = mu, b = logVar)
# Segment padding inside a row contributes 0 for every mode (a = b = 0);
# whole padding rows use w = 0.

def _fused_loss_kernel(a_ref, b_ref, w_ref, m_ref, o_ref, acc_ref):
    @pl.when(pl.program_id(0) == 0)
    def _():
        acc_ref[...] = jnp.zeros_like(acc_ref)

    a = a_ref[...]                      # (TR, LANE) f32
    b = b_ref[...]                      # (TR, LANE) f32
    w = w_ref[...]                      # (TR, 1)    f32
    m = m_ref[...]                      # (TR, 1)    int32

    b_kl = jnp.where(m == 2, b, 0.0)    # keep exp() bounded off-segment
    kl_term = jnp.exp(b_kl) - 1.0 - b_kl + a * a
    term = jnp.where(m == 0, a,
                     jnp.where(m == 1, jnp.abs(a - b), kl_term))
    contrib = w * term                  # per-row weight broadcast over lanes

    tr = contrib.shape[0]
    # vreg-group-wise (pure VPU) accumulation into the (8, LANE) scratch.
    acc_ref[...] += contrib.reshape(tr // 8, 8, _LANE).sum(axis=0)

    @pl.when(pl.program_id(0) == pl.num_programs(0) - 1)
    def _():
        # single cross-lane reduce + single (1,1) store for the whole call
        o_ref[...] = jnp.sum(acc_ref[...]).reshape(1, 1)


def fused_weighted_reduce(segments):
    """segments: list of (a, b_or_None, weight, mode). Returns scalar f32."""
    a_rows, b_rows, w_rows, m_rows = [], [], [], []
    for a, b, weight, mode in segments:
        a = a.reshape(-1).astype(jnp.float32)
        b = jnp.zeros_like(a) if b is None else b.reshape(-1).astype(jnp.float32)
        n = a.shape[0]
        seg_rows = -(-n // _LANE)
        pad = seg_rows * _LANE - n
        a_rows.append(jnp.pad(a, (0, pad)).reshape(seg_rows, _LANE))
        b_rows.append(jnp.pad(b, (0, pad)).reshape(seg_rows, _LANE))
        w_rows.append(jnp.full((seg_rows, 1), weight, jnp.float32))
        m_rows.append(jnp.full((seg_rows, 1), mode, jnp.int32))

    a = jnp.concatenate(a_rows, axis=0)
    b = jnp.concatenate(b_rows, axis=0)
    w = jnp.concatenate(w_rows, axis=0)
    m = jnp.concatenate(m_rows, axis=0)

    rows = a.shape[0]
    if rows <= _MAX_ROWS:
        tr = max(8, _round_up(rows, 8))        # whole problem, one grid step
        rows_p = tr
    else:
        tr = _MAX_ROWS
        rows_p = _round_up(rows, tr)
    pad_rows = rows_p - rows
    if pad_rows:
        a = jnp.pad(a, ((0, pad_rows), (0, 0)))
        b = jnp.pad(b, ((0, pad_rows), (0, 0)))
        w = jnp.pad(w, ((0, pad_rows), (0, 0)))   # padded weight = 0
        m = jnp.pad(m, ((0, pad_rows), (0, 0)))

    out = pl.pallas_call(
        _fused_loss_kernel,
        out_shape=jax.ShapeDtypeStruct((1, 1), jnp.float32),
        grid_spec=pltpu.PrefetchScalarGridSpec(
            num_scalar_prefetch=0,
            grid=(rows_p // tr,),
            in_specs=[
                pl.BlockSpec((tr, _LANE), lambda i: (i, 0)),
                pl.BlockSpec((tr, _LANE), lambda i: (i, 0)),
                pl.BlockSpec((tr, 1), lambda i: (i, 0)),
                pl.BlockSpec((tr, 1), lambda i: (i, 0)),
            ],
            out_specs=pl.BlockSpec((1, 1), lambda i: (0, 0)),
            scratch_shapes=[pltpu.VMEM((8, _LANE), jnp.float32)],
        ),
        compiler_params=pltpu.CompilerParams(
            dimension_semantics=("arbitrary",)),
    )(a, b, w, m)
    return out[0, 0]


# ---------- Pallas conv3x3 (im2col MXU matmul) + fused perceptual L1 --------

def _conv_mm_l1_kernel(a_ref, w_ref, b_ref, o_ref, l1_ref, *, half_rows, scale):
    acc = jnp.dot(a_ref[...], w_ref[...], preferred_element_type=jnp.float32)
    y = jnp.maximum(acc + b_ref[...], 0.0)                # (M, 128) f32
    o_ref[...] = y.astype(o_ref.dtype)                    # bf16 lane-dense vst
    # Perceptual L1 on the f32 activations: rows [0, M/2) are the real batch,
    # rows [M/2, M) the fake batch; padded channels are exactly 0 on both.
    diff = jnp.abs(y[half_rows:, :] - y[:half_rows, :])
    l1_ref[...] = (scale * jnp.sum(diff)).reshape(1, 1)


def _im2col_3x3(x):
    # x: (N, H, W, C), SAME padding -> (N*H*W, 9*C) in (kh, kw, c) order
    N, H, W, C = x.shape
    xp = jnp.pad(x, ((0, 0), (1, 1), (1, 1), (0, 0)))
    cols = [xp[:, kh:kh + H, kw:kw + W, :]
            for kh in range(3) for kw in range(3)]
    patches = jnp.stack(cols, axis=3)          # (N, H, W, 9, C)
    return patches.reshape(N * H * W, 9 * C)


def conv3x3_relu_l1_pallas(x, w, b, l1_scale):
    """x: (N, H, W, Cin) f32 with N = [real | fake]; w: (3,3,Cin,Cout); b: (Cout,).

    Returns (features bf16 (N,H,W,Cout),
             scalar  l1_scale * sum |feat_fake - feat_real|  in f32).
    """
    N, H, W, C = x.shape
    Cout = w.shape[-1]
    patches = _im2col_3x3(x)                   # (M, 9C) f32
    M, K = patches.shape
    # bf16 (16, 128) tiling: M must split evenly into real/fake halves.
    assert M % 16 == 0 and (M // 2) % 8 == 0, "N*H*W must be a multiple of 16"
    Kp = _round_up(K, 128)                     # lane-dense LHS loads

    # bf16 MXU operands, f32 accumulation; Cout zero-padded to a full lane.
    patches = jnp.pad(patches, ((0, 0), (0, Kp - K))).astype(jnp.bfloat16)
    wmat = jnp.pad(w.reshape(K, Cout).astype(jnp.float32),
                   ((0, Kp - K), (0, _COUT_PAD - Cout))).astype(jnp.bfloat16)
    bias = jnp.pad(b.astype(jnp.float32),
                   (0, _COUT_PAD - Cout)).reshape(1, _COUT_PAD)

    kernel = functools.partial(_conv_mm_l1_kernel,
                               half_rows=M // 2, scale=float(l1_scale))
    feat, l1 = pl.pallas_call(
        kernel,
        out_shape=(jax.ShapeDtypeStruct((M, _COUT_PAD), jnp.bfloat16),
                   jax.ShapeDtypeStruct((1, 1), jnp.float32)),
        grid_spec=pltpu.PrefetchScalarGridSpec(
            num_scalar_prefetch=0,
            grid=(1,),                                   # single grid step
            in_specs=[
                pl.BlockSpec((M, Kp), lambda i: (0, 0)),
                pl.BlockSpec((Kp, _COUT_PAD), lambda i: (0, 0)),
                pl.BlockSpec((1, _COUT_PAD), lambda i: (0, 0)),
            ],
            out_specs=[
                pl.BlockSpec((M, _COUT_PAD), lambda i: (0, 0)),
                pl.BlockSpec((1, 1), lambda i: (0, 0)),
            ],
        ),
        compiler_params=pltpu.CompilerParams(
            dimension_semantics=("arbitrary",),
            vmem_limit_bytes=32 * 1024 * 1024),
    )(patches, wmat, bias)
    return feat[:, :Cout].reshape(N, H, W, Cout), l1[0, 0]


# ------------------------ small VGG-like feature CNN ------------------------

CNN_CHANNELS = (3, 8, 16, 16, 32, 32)
CNN_WEIGHTS = (1.0 / 32, 1.0 / 16, 1.0 / 8, 1.0 / 4, 1.0)


def init_cnn_params(key):
    params = []
    for i in range(5):
        key, kw = jax.random.split(key)
        cin, cout = CNN_CHANNELS[i], CNN_CHANNELS[i + 1]
        w = jax.random.normal(kw, (3, 3, cin, cout), jnp.float32) / np.sqrt(9.0 * cin)
        b = jnp.zeros((cout,), jnp.float32)
        params.append((w, b))
    return params


def _avg_pool2(x):
    N, H, W, C = x.shape
    return x.reshape(N, H // 2, 2, W // 2, 2, C).mean(axis=(2, 4))


# ------------------------------ GeneratorLoss -------------------------------

def generator_loss(real_image, real_outs_list, fake_image, fake_outs_list,
                   mu, log_var, cnn_params,
                   w_gan=1.0, w_fm=10.0, w_perc=10.0, w_kl=0.05):
    segments = []

    # GAN loss: -sum of means of each discriminator's final fake output.
    for fake_outs in fake_outs_list:
        o = fake_outs[-1]
        segments.append((o, None, -w_gan / o.size, 0))

    # Feature matching: mean over discriminators of sum of per-layer L1 means.
    n_disc = len(real_outs_list)
    for real_outs, fake_outs in zip(real_outs_list, fake_outs_list):
        for o_r, o_f in zip(real_outs[:-1], fake_outs[:-1]):
            segments.append((o_f, o_r, w_fm / (n_disc * o_r.size), 1))

    # KL divergence.
    segments.append((mu, log_var, 0.5 * w_kl, 2))

    # GAN + FM + KL in one fused pallas_call.
    loss = fused_weighted_reduce(segments)

    # Perceptual: real + fake batched through the CNN in ONE pass per layer;
    # each conv kernel's epilogue emits its already-scaled L1 contribution.
    B = real_image.shape[0]
    x = jnp.transpose(jnp.concatenate([real_image, fake_image], axis=0),
                      (0, 2, 3, 1)).astype(jnp.float32)   # NCHW -> NHWC
    n_layers = len(cnn_params)
    for i, (w, b) in enumerate(cnn_params):
        n_elem = B * x.shape[1] * x.shape[2] * CNN_CHANNELS[i + 1]
        scale = w_perc * CNN_WEIGHTS[i] / n_elem
        feat, l1 = conv3x3_relu_l1_pallas(x, w, b, scale)
        loss = loss + l1
        if i < n_layers - 1:
            x = _avg_pool2(feat.astype(jnp.float32))      # plain-JAX glue
    return loss


# --------------------------- pure-JAX reference ------------------------------

def _cnn_forward_ref(x_nchw, params):
    x = jnp.transpose(x_nchw, (0, 2, 3, 1)).astype(jnp.float32)
    feats = []
    for i, (w, b) in enumerate(params):
        y = lax.conv_general_dilated(
            x, w, window_strides=(1, 1), padding='SAME',
            dimension_numbers=('NHWC', 'HWIO', 'NHWC'),
            precision=lax.Precision.HIGHEST)
        x = jnp.maximum(y + b, 0.0)
        feats.append(x)
        if i < len(params) - 1:
            x = _avg_pool2(x)
    return feats


def _generator_loss_ref(real_image, real_outs_list, fake_image, fake_outs_list,
                        mu, log_var, cnn_params,
                        w_gan=1.0, w_fm=10.0, w_perc=10.0, w_kl=0.05):
    l1 = lambda a, b: jnp.mean(jnp.abs(a - b))
    gan = -sum(jnp.mean(fo[-1]) for fo in fake_outs_list)
    fm = sum(sum(l1(o_f, o_r) for o_r, o_f in zip(ro[:-1], fo[:-1]))
             for ro, fo in zip(real_outs_list, fake_outs_list)) / len(real_outs_list)
    rf = _cnn_forward_ref(real_image, cnn_params)
    ff = _cnn_forward_ref(fake_image, cnn_params)
    perc = sum(w * l1(pf, pr) for w, pr, pf in zip(CNN_WEIGHTS, rf, ff))
    kl = 0.5 * jnp.sum(jnp.exp(log_var) - 1.0 - log_var + mu ** 2)
    return w_gan * gan + w_fm * fm + w_perc * perc + w_kl * kl


# ----------------------------------- main ------------------------------------

if __name__ == "__main__":
    key = jax.random.PRNGKey(0)
    key, k_cnn, k_ri, k_fi, k_mu, k_lv = jax.random.split(key, 6)
    cnn_params = init_cnn_params(k_cnn)

    B = 2
    real_image = jax.random.normal(k_ri, (B, 3, 32, 32), jnp.float32)
    fake_image = jax.random.normal(k_fi, (B, 3, 32, 32), jnp.float32)
    mu = jax.random.normal(k_mu, (B, 32), jnp.float32)
    log_var = jax.random.normal(k_lv, (B, 32), jnp.float32) * 0.5

    # Two multi-scale discriminators, each returning 3 intermediate feature
    # maps plus one final patch output (NCHW, like PyTorch).
    disc_shapes = [
        [(B, 8, 16, 16), (B, 16, 8, 8), (B, 32, 4, 4), (B, 1, 4, 4)],
        [(B, 8, 8, 8), (B, 16, 4, 4), (B, 32, 2, 2), (B, 1, 2, 2)],
    ]
    real_outs_list, fake_outs_list = [], []
    for shapes in disc_shapes:
        r_outs, f_outs = [], []
        for s in shapes:
            key, kr, kf = jax.random.split(key, 3)
            r_outs.append(jax.random.normal(kr, s, jnp.float32))
            f_outs.append(jax.random.normal(kf, s, jnp.float32))
        real_outs_list.append(r_outs)
        fake_outs_list.append(f_outs)

    loss_fn = jax.jit(generator_loss)   # keeps im2col / pad / pool glue fused
    loss = loss_fn(real_image, real_outs_list, fake_image, fake_outs_list,
                   mu, log_var, cnn_params)
    loss = jax.block_until_ready(loss)

    ref = _generator_loss_ref(real_image, real_outs_list, fake_image,
                              fake_outs_list, mu, log_var, cnn_params)
    ref = jax.block_until_ready(ref)
    np.testing.assert_allclose(np.asarray(loss), np.asarray(ref),
                               rtol=2e-2, atol=2e-2)
    print("KERNEL_OK")
</pallas_src>

<mosaic_0001>
module attributes {stable_mosaic.version = 11 : i64} {
  func.func @_fused_loss_kernel(%arg0: i32, %arg1: memref<16x1024xf32, #tpu.memory_space<vmem>>, %arg2: memref<16x1024xf32, #tpu.memory_space<vmem>>, %arg3: memref<16x1xf32, #tpu.memory_space<vmem>>, %arg4: memref<16x1xi32, #tpu.memory_space<vmem>>, %arg5: memref<1x1xf32, #tpu.memory_space<vmem>>, %arg6: memref<8x1024xf32, #tpu.memory_space<vmem>>) attributes {dimension_semantics = [#tpu.dimension_semantics<arbitrary>], iteration_bounds = array<i64: 1>, scalar_prefetch = 0 : i64, scratch_operands = 1 : i64, tpu.core_type = #tpu.core_type<tc>, window_params = [{transform_indices = @transform_0, window_bounds = array<i64: 16, 1024>}, {transform_indices = @transform_1, window_bounds = array<i64: 16, 1024>}, {transform_indices = @transform_2, window_bounds = array<i64: 16, 1>}, {transform_indices = @transform_3, window_bounds = array<i64: 16, 1>}, {pipeline_mode = #tpu.pipeline_mode<synchronous>, transform_indices = @transform_4, window_bounds = array<i64: 1, 1>}]} {
    %c0_i32 = arith.constant 0 : i32
    %0 = arith.cmpi eq, %arg0, %c0_i32 : i32
    %1 = arith.extui %0 : i1 to i32
    %c0_i32_0 = arith.constant 0 : i32
    %2 = arith.cmpi ne, %1, %c0_i32_0 : i32
    scf.if %2 {
      %cst_17 = arith.constant 0.000000e+00 : f32
      %41 = vector.broadcast %cst_17 : f32 to vector<8x1024xf32>
      %c0_18 = arith.constant 0 : index
      %c0_19 = arith.constant 0 : index
      %42 = vector.load %arg6[%c0_18, %c0_19] : memref<8x1024xf32, #tpu.memory_space<vmem>>, vector<8x1024xf32>
      tpu.vector_store %arg6[%c0_18, %c0_19], %41 {strides = array<i32>} : memref<8x1024xf32, #tpu.memory_space<vmem>>, vector<8x1024xf32>,
    } else {
    }
    %c0 = arith.constant 0 : index
    %c0_1 = arith.constant 0 : index
    %3 = vector.load %arg1[%c0, %c0_1] : memref<16x1024xf32, #tpu.memory_space<vmem>>, vector<16x1024xf32>
    %c0_2 = arith.constant 0 : index
    %c0_3 = arith.constant 0 : index
    %4 = vector.load %arg2[%c0_2, %c0_3] : memref<16x1024xf32, #tpu.memory_space<vmem>>, vector<16x1024xf32>
    %c0_4 = arith.constant 0 : index
    %c0_5 = arith.constant 0 : index
    %5 = vector.load %arg3[%c0_4, %c0_5] : memref<16x1xf32, #tpu.memory_space<vmem>>, vector<16x1xf32>
    %c0_6 = arith.constant 0 : index
    %c0_7 = arith.constant 0 : index
    %6 = vector.load %arg4[%c0_6, %c0_7] : memref<16x1xi32, #tpu.memory_space<vmem>>, vector<16x1xi32>
    %c2_i32 = arith.constant 2 : i32
    %7 = vector.broadcast %c2_i32 : i32 to vector<16x1xi32>
    %8 = arith.cmpi eq, %6, %7 : vector<16x1xi32>
    %cst = arith.constant 0.000000e+00 : f32
    %9 = vector.shape_cast %8 : vector<16x1xi1> to vector<16x1xi1>
    %10 = vector.broadcast %9 : vector<16x1xi1> to vector<16x1024xi1>
    %11 = vector.broadcast %cst : f32 to vector<16x1024xf32>
    %12 = arith.select %10, %4, %11 : vector<16x1024xi1>, vector<16x1024xf32>
    %13 = math.exp %12 : vector<16x1024xf32>
    %cst_8 = arith.constant 1.000000e+00 : f32
    %14 = vector.broadcast %cst_8 : f32 to vector<16x1024xf32>
    %15 = arith.subf %13, %14 : vector<16x1024xf32>
    %16 = arith.subf %15, %12 : vector<16x1024xf32>
    %17 = arith.mulf %3, %3 : vector<16x1024xf32>
    %18 = arith.addf %16, %17 : vector<16x1024xf32>
    %c0_i32_9 = arith.constant 0 : i32
    %19 = vector.broadcast %c0_i32_9 : i32 to vector<16x1xi32>
    %20 = arith.cmpi eq, %6, %19 : vector<16x1xi32>
    %c1_i32 = arith.constant 1 : i32
    %21 = vector.broadcast %c1_i32 : i32 to vector<16x1xi32>
    %22 = arith.cmpi eq, %6, %21 : vector<16x1xi32>
    %23 = arith.subf %3, %4 : vector<16x1024xf32>
    %24 = math.absf %23 : vector<16x1024xf32>
    %25 = vector.shape_cast %22 : vector<16x1xi1> to vector<16x1xi1>
    %26 = vector.broadcast %25 : vector<16x1xi1> to vector<16x1024xi1>
    %27 = arith.select %26, %24, %18 : vector<16x1024xi1>, vector<16x1024xf32>
    %28 = vector.shape_cast %20 : vector<16x1xi1> to vector<16x1xi1>
    %29 = vector.broadcast %28 : vector<16x1xi1> to vector<16x1024xi1>
    %30 = arith.select %29, %3, %27 : vector<16x1024xi1>, vector<16x1024xf32>
    %31 = vector.broadcast %5 : vector<16x1xf32> to vector<16x1024xf32>
    %32 = arith.mulf %31, %30 : vector<16x1024xf32>
    %c0_10 = arith.constant 0 : index
    %c0_11 = arith.constant 0 : index
    %33 = vector.load %arg6[%c0_10, %c0_11] : memref<8x1024xf32, #tpu.memory_space<vmem>>, vector<8x1024xf32>
    %34 = vector.shape_cast %32 : vector<16x1024xf32> to vector<2x8x1024xf32>
    %cst_12 = arith.constant dense<0.000000e+00> : vector<8x1024xf32>
    %35 = vector.multi_reduction <add>, %34, %cst_12 [0] : vector<2x8x1024xf32> to vector<8x1024xf32>
    %36 = arith.addf %33, %35 : vector<8x1024xf32>
    %c0_13 = arith.constant 0 : index
    %c0_14 = arith.constant 0 : index
    %37 = vector.load %arg6[%c0_13, %c0_14] : memref<8x1024xf32, #tpu.memory_space<vmem>>, vector<8x1024xf32>
    tpu.vector_store %arg6[%c0_13, %c0_14], %36 {strides = array<i32>} : memref<8x1024xf32, #tpu.memory_space<vmem>>, vector<8x1024xf32>,
    %c0_i32_15 = arith.constant 0 : i32
    %38 = arith.cmpi eq, %arg0, %c0_i32_15 : i32
    %39 = arith.extui %38 : i1 to i32
    %c0_i32_16 = arith.constant 0 : i32
    %40 = arith.cmpi ne, %39, %c0_i32_16 : i32
    scf.if %40 {
      %c0_17 = arith.constant 0 : index
      %c0_18 = arith.constant 0 : index
      %41 = vector.load %arg6[%c0_17, %c0_18] : memref<8x1024xf32, #tpu.memory_space<vmem>>, vector<8x1024xf32>
      %42 = vector.shape_cast %41 : vector<8x1024xf32> to vector<1x8x1024xf32>
      %cst_19 = arith.constant dense<0.000000e+00> : vector<1xf32>
      %43 = vector.multi_reduction <add>, %42, %cst_19 [1, 2] : vector<1x8x1024xf32> to vector<1xf32>
      %44 = vector.shape_cast %43 : vector<1xf32> to vector<1x1x1xf32>
      %45 = vector.extract %44[0, 0, 0] : f32 from vector<1x1x1xf32>
      %46 = vector.broadcast %45 : f32 to vector<1x1xf32>
      %c0_20 = arith.constant 0 : index
      %c0_21 = arith.constant 0 : index
      %47 = vector.load %arg5[%c0_20, %c0_21] : memref<1x1xf32, #tpu.memory_space<vmem>>, vector<1x1xf32>
      tpu.vector_store %arg5[%c0_20, %c0_21], %46 {strides = array<i32>} : memref<1x1xf32, #tpu.memory_space<vmem>>, vector<1x1xf32>,
    } else {
    }
    return
  }
  func.func @transform_0(%arg0: i32) -> (i32, i32) {
    %c0_i32 = arith.constant 0 : i32
    %c0_i32_0 = arith.constant 0 : i32
    return %arg0, %c0_i32 : i32, i32
  }
  func.func @transform_1(%arg0: i32) -> (i32, i32) {
    %c0_i32 = arith.constant 0 : i32
    %c0_i32_0 = arith.constant 0 : i32
    return %arg0, %c0_i32 : i32, i32
  }
  func.func @transform_2(%arg0: i32) -> (i32, i32) {
    %c0_i32 = arith.constant 0 : i32
    %c0_i32_0 = arith.constant 0 : i32
    return %arg0, %c0_i32 : i32, i32
  }
  func.func @transform_3(%arg0: i32) -> (i32, i32) {
    %c0_i32 = arith.constant 0 : i32
    %c0_i32_0 = arith.constant 0 : i32
    return %arg0, %c0_i32 : i32, i32
  }
  func.func @transform_4(%arg0: i32) -> (i32, i32) {
    %c0_i32 = arith.constant 0 : i32
    %c0_i32_0 = arith.constant 0 : i32
    %c0_i32_1 = arith.constant 0 : i32
    return %c0_i32, %c0_i32_0 : i32, i32
  }
}

module attributes {stable_mosaic.version = 11 : i64} {
  func.func @_conv_mm_l1_kernel(%arg0: i32, %arg1: memref<4096x128xbf16, #tpu.memory_space<vmem>>, %arg2: memref<128x128xbf16, #tpu.memory_space<vmem>>, %arg3: memref<1x128xf32, #tpu.memory_space<vmem>>, %arg4: memref<4096x128xbf16, #tpu.memory_space<vmem>>, %arg5: memref<1x1xf32, #tpu.memory_space<vmem>>) attributes {dimension_semantics = [#tpu.dimension_semantics<arbitrary>], iteration_bounds = array<i64: 1>, scalar_prefetch = 0 : i64, scratch_operands = 0 : i64, tpu.core_type = #tpu.core_type<tc>, window_params = [{pipeline_mode = #tpu.pipeline_mode<synchronous>, transform_indices = @transform_0, window_bounds = array<i64: 4096, 128>}, {pipeline_mode = #tpu.pipeline_mode<synchronous>, transform_indices = @transform_1, window_bounds = array<i64: 128, 128>}, {pipeline_mode = #tpu.pipeline_mode<synchronous>, transform_indices = @transform_2, window_bounds = array<i64: 1, 128>}, {pipeline_mode = #tpu.pipeline_mode<synchronous>, transform_indices = @transform_3, window_bounds = array<i64: 4096, 128>}, {pipeline_mode = #tpu.pipeline_mode<synchronous>, transform_indices = @transform_4, window_bounds = array<i64: 1, 1>}]} {
    %c0 = arith.constant 0 : index
    %c0_0 = arith.constant 0 : index
    %0 = vector.load %arg1[%c0, %c0_0] : memref<4096x128xbf16, #tpu.memory_space<vmem>>, vector<4096x128xbf16>
    %c0_1 = arith.constant 0 : index
    %c0_2 = arith.constant 0 : index
    %1 = vector.load %arg2[%c0_1, %c0_2] : memref<128x128xbf16, #tpu.memory_space<vmem>>, vector<128x128xbf16>
    %cst = arith.constant dense<0.000000e+00> : vector<4096x128xf32>
    %2 = tpu.matmul %0, %1, %cst {dimension_numbers = #tpu.dot_dimension_numbers<[1], [0], [0], [1], [0, 0, 1, 1], [], []>} : vector<4096x128xbf16>, vector<128x128xbf16>, vector<4096x128xf32> -> vector<4096x128xf32>
    %c0_3 = arith.constant 0 : index
    %c0_4 = arith.constant 0 : index
    %3 = vector.load %arg3[%c0_3, %c0_4] : memref<1x128xf32, #tpu.memory_space<vmem>>, vector<1x128xf32>
    %4 = vector.broadcast %3 : vector<1x128xf32> to vector<4096x128xf32>
    %5 = arith.addf %2, %4 : vector<4096x128xf32>
    %cst_5 = arith.constant 0.000000e+00 : f32
    %6 = vector.broadcast %cst_5 : f32 to vector<4096x128xf32>
    %7 = arith.maximumf %5, %6 : vector<4096x128xf32>
    %8 = arith.truncf %7 : vector<4096x128xf32> to vector<4096x128xbf16>
    %c0_6 = arith.constant 0 : index
    %c0_7 = arith.constant 0 : index
    %9 = vector.load %arg4[%c0_6, %c0_7] : memref<4096x128xbf16, #tpu.memory_space<vmem>>, vector<4096x128xbf16>
    tpu.vector_store %arg4[%c0_6, %c0_7], %8 {strides = array<i32>} : memref<4096x128xbf16, #tpu.memory_space<vmem>>, vector<4096x128xbf16>,
    %10 = vector.extract_strided_slice %7 {offsets = [2048, 0], sizes = [2048, 128], strides = [1, 1]} : vector<4096x128xf32> to vector<2048x128xf32>
    %11 = vector.extract_strided_slice %7 {offsets = [0, 0], sizes = [2048, 128], strides = [1, 1]} : vector<4096x128xf32> to vector<2048x128xf32>
    %12 = arith.subf %10, %11 : vector<2048x128xf32>
    %13 = math.absf %12 : vector<2048x128xf32>
    %14 = vector.shape_cast %13 : vector<2048x128xf32> to vector<1x2048x128xf32>
    %cst_8 = arith.constant dense<0.000000e+00> : vector<1xf32>
    %15 = vector.multi_reduction <add>, %14, %cst_8 [1, 2] : vector<1x2048x128xf32> to vector<1xf32>
    %16 = vector.shape_cast %15 : vector<1xf32> to vector<1x1x1xf32>
    %17 = vector.extract %16[0, 0, 0] : f32 from vector<1x1x1xf32>
    %cst_9 = arith.constant 1.90734863E-5 : f32
    %18 = arith.mulf %cst_9, %17 : f32
    %19 = vector.broadcast %18 : f32 to vector<1x1xf32>
    %c0_10 = arith.constant 0 : index
    %c0_11 = arith.constant 0 : index
    %20 = vector.load %arg5[%c0_10, %c0_11] : memref<1x1xf32, #tpu.memory_space<vmem>>, vector<1x1xf32>
    tpu.vector_store %arg5[%c0_10, %c0_11], %19 {strides = array<i32>} : memref<1x1xf32, #tpu.memory_space<vmem>>, vector<1x1xf32>,
    return
  }
  func.func @transform_0(%arg0: i32) -> (i32, i32) {
    %c0_i32 = arith.constant 0 : i32
    %c0_i32_0 = arith.constant 0 : i32
    %c0_i32_1 = arith.constant 0 : i32
    return %c0_i32, %c0_i32_0 : i32, i32
  }
  func.func @transform_1(%arg0: i32) -> (i32, i32) {
    %c0_i32 = arith.constant 0 : i32
    %c0_i32_0 = arith.constant 0 : i32
    %c0_i32_1 = arith.constant 0 : i32
    return %c0_i32, %c0_i32_0 : i32, i32
  }
  func.func @transform_2(%arg0: i32) -> (i32, i32) {
    %c0_i32 = arith.constant 0 : i32
    %c0_i32_0 = arith.constant 0 : i32
    %c0_i32_1 = arith.constant 0 : i32
    return %c0_i32, %c0_i32_0 : i32, i32
  }
  func.func @transform_3(%arg0: i32) -> (i32, i32) {
    %c0_i32 = arith.constant 0 : i32
    %c0_i32_0 = arith.constant 0 : i32
    %c0_i32_1 = arith.constant 0 : i32
    return %c0_i32, %c0_i32_0 : i32, i32
  }
  func.func @transform_4(%arg0: i32) -> (i32, i32) {
    %c0_i32 = arith.constant 0 : i32
    %c0_i32_0 = arith.constant 0 : i32
    %c0_i32_1 = arith.constant 0 : i32
    return %c0_i32, %c0_i32_0 : i32, i32
  }
}

module attributes {stable_mosaic.version = 11 : i64} {
  func.func @_conv_mm_l1_kernel(%arg0: i32, %arg1: memref<1024x128xbf16, #tpu.memory_space<vmem>>, %arg2: memref<128x128xbf16, #tpu.memory_space<vmem>>, %arg3: memref<1x128xf32, #tpu.memory_space<vmem>>, %arg4: memref<1024x128xbf16, #tpu.memory_space<vmem>>, %arg5: memref<1x1xf32, #tpu.memory_space<vmem>>) attributes {dimension_semantics = [#tpu.dimension_semantics<arbitrary>], iteration_bounds = array<i64: 1>, scalar_prefetch = 0 : i64, scratch_operands = 0 : i64, tpu.core_type = #tpu.core_type<tc>, window_params = [{pipeline_mode = #tpu.pipeline_mode<synchronous>, transform_indices = @transform_0, window_bounds = array<i64: 1024, 128>}, {pipeline_mode = #tpu.pipeline_mode<synchronous>, transform_indices = @transform_1, window_bounds = array<i64: 128, 128>}, {pipeline_mode = #tpu.pipeline_mode<synchronous>, transform_indices = @transform_2, window_bounds = array<i64: 1, 128>}, {pipeline_mode = #tpu.pipeline_mode<synchronous>, transform_indices = @transform_3, window_bounds = array<i64: 1024, 128>}, {pipeline_mode = #tpu.pipeline_mode<synchronous>, transform_indices = @transform_4, window_bounds = array<i64: 1, 1>}]} {
    %c0 = arith.constant 0 : index
    %c0_0 = arith.constant 0 : index
    %0 = vector.load %arg1[%c0, %c0_0] : memref<1024x128xbf16, #tpu.memory_space<vmem>>, vector<1024x128xbf16>
    %c0_1 = arith.constant 0 : index
    %c0_2 = arith.constant 0 : index
    %1 = vector.load %arg2[%c0_1, %c0_2] : memref<128x128xbf16, #tpu.memory_space<vmem>>, vector<128x128xbf16>
    %cst = arith.constant dense<0.000000e+00> : vector<1024x128xf32>
    %2 = tpu.matmul %0, %1, %cst {dimension_numbers = #tpu.dot_dimension_numbers<[1], [0], [0], [1], [0, 0, 1, 1], [], []>} : vector<1024x128xbf16>, vector<128x128xbf16>, vector<1024x128xf32> -> vector<1024x128xf32>
    %c0_3 = arith.constant 0 : index
    %c0_4 = arith.constant 0 : index
    %3 = vector.load %arg3[%c0_3, %c0_4] : memref<1x128xf32, #tpu.memory_space<vmem>>, vector<1x128xf32>
    %4 = vector.broadcast %3 : vector<1x128xf32> to vector<1024x128xf32>
    %5 = arith.addf %2, %4 : vector<1024x128xf32>
    %cst_5 = arith.constant 0.000000e+00 : f32
    %6 = vector.broadcast %cst_5 : f32 to vector<1024x128xf32>
    %7 = arith.maximumf %5, %6 : vector<1024x128xf32>
    %8 = arith.truncf %7 : vector<1024x128xf32> to vector<1024x128xbf16>
    %c0_6 = arith.constant 0 : index
    %c0_7 = arith.constant 0 : index
    %9 = vector.load %arg4[%c0_6, %c0_7] : memref<1024x128xbf16, #tpu.memory_space<vmem>>, vector<1024x128xbf16>
    tpu.vector_store %arg4[%c0_6, %c0_7], %8 {strides = array<i32>} : memref<1024x128xbf16, #tpu.memory_space<vmem>>, vector<1024x128xbf16>,
    %10 = vector.extract_strided_slice %7 {offsets = [512, 0], sizes = [512, 128], strides = [1, 1]} : vector<1024x128xf32> to vector<512x128xf32>
    %11 = vector.extract_strided_slice %7 {offsets = [0, 0], sizes = [512, 128], strides = [1, 1]} : vector<1024x128xf32> to vector<512x128xf32>
    %12 = arith.subf %10, %11 : vector<512x128xf32>
    %13 = math.absf %12 : vector<512x128xf32>
    %14 = vector.shape_cast %13 : vector<512x128xf32> to vector<1x512x128xf32>
    %cst_8 = arith.constant dense<0.000000e+00> : vector<1xf32>
    %15 = vector.multi_reduction <add>, %14, %cst_8 [1, 2] : vector<1x512x128xf32> to vector<1xf32>
    %16 = vector.shape_cast %15 : vector<1xf32> to vector<1x1x1xf32>
    %17 = vector.extract %16[0, 0, 0] : f32 from vector<1x1x1xf32>
    %cst_9 = arith.constant 7.62939453E-5 : f32
    %18 = arith.mulf %cst_9, %17 : f32
    %19 = vector.broadcast %18 : f32 to vector<1x1xf32>
    %c0_10 = arith.constant 0 : index
    %c0_11 = arith.constant 0 : index
    %20 = vector.load %arg5[%c0_10, %c0_11] : memref<1x1xf32, #tpu.memory_space<vmem>>, vector<1x1xf32>
    tpu.vector_store %arg5[%c0_10, %c0_11], %19 {strides = array<i32>} : memref<1x1xf32, #tpu.memory_space<vmem>>, vector<1x1xf32>,
    return
  }
  func.func @transform_0(%arg0: i32) -> (i32, i32) {
    %c0_i32 = arith.constant 0 : i32
    %c0_i32_0 = arith.constant 0 : i32
    %c0_i32_1 = arith.constant 0 : i32
    return %c0_i32, %c0_i32_0 : i32, i32
  }
  func.func @transform_1(%arg0: i32) -> (i32, i32) {
    %c0_i32 = arith.constant 0 : i32
    %c0_i32_0 = arith.constant 0 : i32
    %c0_i32_1 = arith.constant 0 : i32
    return %c0_i32, %c0_i32_0 : i32, i32
  }
  func.func @transform_2(%arg0: i32) -> (i32, i32) {
    %c0_i32 = arith.constant 0 : i32
    %c0_i32_0 = arith.constant 0 : i32
    %c0_i32_1 = arith.constant 0 : i32
    return %c0_i32, %c0_i32_0 : i32, i32
  }
  func.func @transform_3(%arg0: i32) -> (i32, i32) {
    %c0_i32 = arith.constant 0 : i32
    %c0_i32_0 = arith.constant 0 : i32
    %c0_i32_1 = arith.constant 0 : i32
    return %c0_i32, %c0_i32_0 : i32, i32
  }
  func.func @transform_4(%arg0: i32) -> (i32, i32) {
    %c0_i32 = arith.constant 0 : i32
    %c0_i32_0 = arith.constant 0 : i32
    %c0_i32_1 = arith.constant 0 : i32
    return %c0_i32, %c0_i32_0 : i32, i32
  }
}

module attributes {stable_mosaic.version = 11 : i64} {
  func.func @_conv_mm_l1_kernel(%arg0: i32, %arg1: memref<256x256xbf16, #tpu.memory_space<vmem>>, %arg2: memref<256x128xbf16, #tpu.memory_space<vmem>>, %arg3: memref<1x128xf32, #tpu.memory_space<vmem>>, %arg4: memref<256x128xbf16, #tpu.memory_space<vmem>>, %arg5: memref<1x1xf32, #tpu.memory_space<vmem>>) attributes {dimension_semantics = [#tpu.dimension_semantics<arbitrary>], iteration_bounds = array<i64: 1>, scalar_prefetch = 0 : i64, scratch_operands = 0 : i64, tpu.core_type = #tpu.core_type<tc>, window_params = [{pipeline_mode = #tpu.pipeline_mode<synchronous>, transform_indices = @transform_0, window_bounds = array<i64: 256, 256>}, {pipeline_mode = #tpu.pipeline_mode<synchronous>, transform_indices = @transform_1, window_bounds = array<i64: 256, 128>}, {pipeline_mode = #tpu.pipeline_mode<synchronous>, transform_indices = @transform_2, window_bounds = array<i64: 1, 128>}, {pipeline_mode = #tpu.pipeline_mode<synchronous>, transform_indices = @transform_3, window_bounds = array<i64: 256, 128>}, {pipeline_mode = #tpu.pipeline_mode<synchronous>, transform_indices = @transform_4, window_bounds = array<i64: 1, 1>}]} {
    %c0 = arith.constant 0 : index
    %c0_0 = arith.constant 0 : index
    %0 = vector.load %arg1[%c0, %c0_0] : memref<256x256xbf16, #tpu.memory_space<vmem>>, vector<256x256xbf16>
    %c0_1 = arith.constant 0 : index
    %c0_2 = arith.constant 0 : index
    %1 = vector.load %arg2[%c0_1, %c0_2] : memref<256x128xbf16, #tpu.memory_space<vmem>>, vector<256x128xbf16>
    %cst = arith.constant dense<0.000000e+00> : vector<256x128xf32>
    %2 = tpu.matmul %0, %1, %cst {dimension_numbers = #tpu.dot_dimension_numbers<[1], [0], [0], [1], [0, 0, 1, 1], [], []>} : vector<256x256xbf16>, vector<256x128xbf16>, vector<256x128xf32> -> vector<256x128xf32>
    %c0_3 = arith.constant 0 : index
    %c0_4 = arith.constant 0 : index
    %3 = vector.load %arg3[%c0_3, %c0_4] : memref<1x128xf32, #tpu.memory_space<vmem>>, vector<1x128xf32>
    %4 = vector.broadcast %3 : vector<1x128xf32> to vector<256x128xf32>
    %5 = arith.addf %2, %4 : vector<256x128xf32>
    %cst_5 = arith.constant 0.000000e+00 : f32
    %6 = vector.broadcast %cst_5 : f32 to vector<256x128xf32>
    %7 = arith.maximumf %5, %6 : vector<256x128xf32>
    %8 = arith.truncf %7 : vector<256x128xf32> to vector<256x128xbf16>
    %c0_6 = arith.constant 0 : index
    %c0_7 = arith.constant 0 : index
    %9 = vector.load %arg4[%c0_6, %c0_7] : memref<256x128xbf16, #tpu.memory_space<vmem>>, vector<256x128xbf16>
    tpu.vector_store %arg4[%c0_6, %c0_7], %8 {strides = array<i32>} : memref<256x128xbf16, #tpu.memory_space<vmem>>, vector<256x128xbf16>,
    %10 = vector.extract_strided_slice %7 {offsets = [128, 0], sizes = [128, 128], strides = [1, 1]} : vector<256x128xf32> to vector<128x128xf32>
    %11 = vector.extract_strided_slice %7 {offsets = [0, 0], sizes = [128, 128], strides = [1, 1]} : vector<256x128xf32> to vector<128x128xf32>
    %12 = arith.subf %10, %11 : vector<128x128xf32>
    %13 = math.absf %12 : vector<128x128xf32>
    %14 = vector.shape_cast %13 : vector<128x128xf32> to vector<1x128x128xf32>
    %cst_8 = arith.constant dense<0.000000e+00> : vector<1xf32>
    %15 = vector.multi_reduction <add>, %14, %cst_8 [1, 2] : vector<1x128x128xf32> to vector<1xf32>
    %16 = vector.shape_cast %15 : vector<1xf32> to vector<1x1x1xf32>
    %17 = vector.extract %16[0, 0, 0] : f32 from vector<1x1x1xf32>
    %cst_9 = arith.constant 6.10351563E-4 : f32
    %18 = arith.mulf %cst_9, %17 : f32
    %19 = vector.broadcast %18 : f32 to vector<1x1xf32>
    %c0_10 = arith.constant 0 : index
    %c0_11 = arith.constant 0 : index
    %20 = vector.load %arg5[%c0_10, %c0_11] : memref<1x1xf32, #tpu.memory_space<vmem>>, vector<1x1xf32>
    tpu.vector_store %arg5[%c0_10, %c0_11], %19 {strides = array<i32>} : memref<1x1xf32, #tpu.memory_space<vmem>>, vector<1x1xf32>,
    return
  }
  func.func @transform_0(%arg0: i32) -> (i32, i32) {
    %c0_i32 = arith.constant 0 : i32
    %c0_i32_0 = arith.constant 0 : i32
    %c0_i32_1 = arith.constant 0 : i32
    return %c0_i32, %c0_i32_0 : i32, i32
  }
  func.func @transform_1(%arg0: i32) -> (i32, i32) {
    %c0_i32 = arith.constant 0 : i32
    %c0_i32_0 = arith.constant 0 : i32
    %c0_i32_1 = arith.constant 0 : i32
    return %c0_i32, %c0_i32_0 : i32, i32
  }
  func.func @transform_2(%arg0: i32) -> (i32, i32) {
    %c0_i32 = arith.constant 0 : i32
    %c0_i32_0 = arith.constant 0 : i32
    %c0_i32_1 = arith.constant 0 : i32
    return %c0_i32, %c0_i32_0 : i32, i32
  }
  func.func @transform_3(%arg0: i32) -> (i32, i32) {
    %c0_i32 = arith.constant 0 : i32
    %c0_i32_0 = arith.constant 0 : i32
    %c0_i32_1 = arith.constant 0 : i32
    return %c0_i32, %c0_i32_0 : i32, i32
  }
  func.func @transform_4(%arg0: i32) -> (i32, i32) {
    %c0_i32 = arith.constant 0 : i32
    %c0_i32_0 = arith.constant 0 : i32
    %c0_i32_1 = arith.constant 0 : i32
    return %c0_i32, %c0_i32_0 : i32, i32
  }
}

module attributes {stable_mosaic.version = 11 : i64} {
  func.func @_conv_mm_l1_kernel(%arg0: i32, %arg1: memref<64x256xbf16, #tpu.memory_space<vmem>>, %arg2: memref<256x128xbf16, #tpu.memory_space<vmem>>, %arg3: memref<1x128xf32, #tpu.memory_space<vmem>>, %arg4: memref<64x128xbf16, #tpu.memory_space<vmem>>, %arg5: memref<1x1xf32, #tpu.memory_space<vmem>>) attributes {dimension_semantics = [#tpu.dimension_semantics<arbitrary>], iteration_bounds = array<i64: 1>, scalar_prefetch = 0 : i64, scratch_operands = 0 : i64, tpu.core_type = #tpu.core_type<tc>, window_params = [{pipeline_mode = #tpu.pipeline_mode<synchronous>, transform_indices = @transform_0, window_bounds = array<i64: 64, 256>}, {pipeline_mode = #tpu.pipeline_mode<synchronous>, transform_indices = @transform_1, window_bounds = array<i64: 256, 128>}, {pipeline_mode = #tpu.pipeline_mode<synchronous>, transform_indices = @transform_2, window_bounds = array<i64: 1, 128>}, {pipeline_mode = #tpu.pipeline_mode<synchronous>, transform_indices = @transform_3, window_bounds = array<i64: 64, 128>}, {pipeline_mode = #tpu.pipeline_mode<synchronous>, transform_indices = @transform_4, window_bounds = array<i64: 1, 1>}]} {
    %c0 = arith.constant 0 : index
    %c0_0 = arith.constant 0 : index
    %0 = vector.load %arg1[%c0, %c0_0] : memref<64x256xbf16, #tpu.memory_space<vmem>>, vector<64x256xbf16>
    %c0_1 = arith.constant 0 : index
    %c0_2 = arith.constant 0 : index
    %1 = vector.load %arg2[%c0_1, %c0_2] : memref<256x128xbf16, #tpu.memory_space<vmem>>, vector<256x128xbf16>
    %cst = arith.constant dense<0.000000e+00> : vector<64x128xf32>
    %2 = tpu.matmul %0, %1, %cst {dimension_numbers = #tpu.dot_dimension_numbers<[1], [0], [0], [1], [0, 0, 1, 1], [], []>} : vector<64x256xbf16>, vector<256x128xbf16>, vector<64x128xf32> -> vector<64x128xf32>
    %c0_3 = arith.constant 0 : index
    %c0_4 = arith.constant 0 : index
    %3 = vector.load %arg3[%c0_3, %c0_4] : memref<1x128xf32, #tpu.memory_space<vmem>>, vector<1x128xf32>
    %4 = vector.broadcast %3 : vector<1x128xf32> to vector<64x128xf32>
    %5 = arith.addf %2, %4 : vector<64x128xf32>
    %cst_5 = arith.constant 0.000000e+00 : f32
    %6 = vector.broadcast %cst_5 : f32 to vector<64x128xf32>
    %7 = arith.maximumf %5, %6 : vector<64x128xf32>
    %8 = arith.truncf %7 : vector<64x128xf32> to vector<64x128xbf16>
    %c0_6 = arith.constant 0 : index
    %c0_7 = arith.constant 0 : index
    %9 = vector.load %arg4[%c0_6, %c0_7] : memref<64x128xbf16, #tpu.memory_space<vmem>>, vector<64x128xbf16>
    tpu.vector_store %arg4[%c0_6, %c0_7], %8 {strides = array<i32>} : memref<64x128xbf16, #tpu.memory_space<vmem>>, vector<64x128xbf16>,
    %10 = vector.extract_strided_slice %7 {offsets = [32, 0], sizes = [32, 128], strides = [1, 1]} : vector<64x128xf32> to vector<32x128xf32>
    %11 = vector.extract_strided_slice %7 {offsets = [0, 0], sizes = [32, 128], strides = [1, 1]} : vector<64x128xf32> to vector<32x128xf32>
    %12 = arith.subf %10, %11 : vector<32x128xf32>
    %13 = math.absf %12 : vector<32x128xf32>
    %14 = vector.shape_cast %13 : vector<32x128xf32> to vector<1x32x128xf32>
    %cst_8 = arith.constant dense<0.000000e+00> : vector<1xf32>
    %15 = vector.multi_reduction <add>, %14, %cst_8 [1, 2] : vector<1x32x128xf32> to vector<1xf32>
    %16 = vector.shape_cast %15 : vector<1xf32> to vector<1x1x1xf32>
    %17 = vector.extract %16[0, 0, 0] : f32 from vector<1x1x1xf32>
    %cst_9 = arith.constant 0.00244140625 : f32
    %18 = arith.mulf %cst_9, %17 : f32
    %19 = vector.broadcast %18 : f32 to vector<1x1xf32>
    %c0_10 = arith.constant 0 : index
    %c0_11 = arith.constant 0 : index
    %20 = vector.load %arg5[%c0_10, %c0_11] : memref<1x1xf32, #tpu.memory_space<vmem>>, vector<1x1xf32>
    tpu.vector_store %arg5[%c0_10, %c0_11], %19 {strides = array<i32>} : memref<1x1xf32, #tpu.memory_space<vmem>>, vector<1x1xf32>,
    return
  }
  func.func @transform_0(%arg0: i32) -> (i32, i32) {
    %c0_i32 = arith.constant 0 : i32
    %c0_i32_0 = arith.constant 0 : i32
    %c0_i32_1 = arith.constant 0 : i32
    return %c0_i32, %c0_i32_0 : i32, i32
  }
  func.func @transform_1(%arg0: i32) -> (i32, i32) {
    %c0_i32 = arith.constant 0 : i32
    %c0_i32_0 = arith.constant 0 : i32
    %c0_i32_1 = arith.constant 0 : i32
    return %c0_i32, %c0_i32_0 : i32, i32
  }
  func.func @transform_2(%arg0: i32) -> (i32, i32) {
    %c0_i32 = arith.constant 0 : i32
    %c0_i32_0 = arith.constant 0 : i32
    %c0_i32_1 = arith.constant 0 : i32
    return %c0_i32, %c0_i32_0 : i32, i32
  }
  func.func @transform_3(%arg0: i32) -> (i32, i32) {
    %c0_i32 = arith.constant 0 : i32
    %c0_i32_0 = arith.constant 0 : i32
    %c0_i32_1 = arith.constant 0 : i32
    return %c0_i32, %c0_i32_0 : i32, i32
  }
  func.func @transform_4(%arg0: i32) -> (i32, i32) {
    %c0_i32 = arith.constant 0 : i32
    %c0_i32_0 = arith.constant 0 : i32
    %c0_i32_1 = arith.constant 0 : i32
    return %c0_i32, %c0_i32_0 : i32, i32
  }
}

module attributes {stable_mosaic.version = 11 : i64} {
  func.func @_conv_mm_l1_kernel(%arg0: i32, %arg1: memref<16x384xbf16, #tpu.memory_space<vmem>>, %arg2: memref<384x128xbf16, #tpu.memory_space<vmem>>, %arg3: memref<1x128xf32, #tpu.memory_space<vmem>>, %arg4: memref<16x128xbf16, #tpu.memory_space<vmem>>, %arg5: memref<1x1xf32, #tpu.memory_space<vmem>>) attributes {dimension_semantics = [#tpu.dimension_semantics<arbitrary>], iteration_bounds = array<i64: 1>, scalar_prefetch = 0 : i64, scratch_operands = 0 : i64, tpu.core_type = #tpu.core_type<tc>, window_params = [{pipeline_mode = #tpu.pipeline_mode<synchronous>, transform_indices = @transform_0, window_bounds = array<i64: 16, 384>}, {pipeline_mode = #tpu.pipeline_mode<synchronous>, transform_indices = @transform_1, window_bounds = array<i64: 384, 128>}, {pipeline_mode = #tpu.pipeline_mode<synchronous>, transform_indices = @transform_2, window_bounds = array<i64: 1, 128>}, {pipeline_mode = #tpu.pipeline_mode<synchronous>, transform_indices = @transform_3, window_bounds = array<i64: 16, 128>}, {pipeline_mode = #tpu.pipeline_mode<synchronous>, transform_indices = @transform_4, window_bounds = array<i64: 1, 1>}]} {
    %c0 = arith.constant 0 : index
    %c0_0 = arith.constant 0 : index
    %0 = vector.load %arg1[%c0, %c0_0] : memref<16x384xbf16, #tpu.memory_space<vmem>>, vector<16x384xbf16>
    %c0_1 = arith.constant 0 : index
    %c0_2 = arith.constant 0 : index
    %1 = vector.load %arg2[%c0_1, %c0_2] : memref<384x128xbf16, #tpu.memory_space<vmem>>, vector<384x128xbf16>
    %cst = arith.constant dense<0.000000e+00> : vector<16x128xf32>
    %2 = tpu.matmul %0, %1, %cst {dimension_numbers = #tpu.dot_dimension_numbers<[1], [0], [0], [1], [0, 0, 1, 1], [], []>} : vector<16x384xbf16>, vector<384x128xbf16>, vector<16x128xf32> -> vector<16x128xf32>
    %c0_3 = arith.constant 0 : index
    %c0_4 = arith.constant 0 : index
    %3 = vector.load %arg3[%c0_3, %c0_4] : memref<1x128xf32, #tpu.memory_space<vmem>>, vector<1x128xf32>
    %4 = vector.broadcast %3 : vector<1x128xf32> to vector<16x128xf32>
    %5 = arith.addf %2, %4 : vector<16x128xf32>
    %cst_5 = arith.constant 0.000000e+00 : f32
    %6 = vector.broadcast %cst_5 : f32 to vector<16x128xf32>
    %7 = arith.maximumf %5, %6 : vector<16x128xf32>
    %8 = arith.truncf %7 : vector<16x128xf32> to vector<16x128xbf16>
    %c0_6 = arith.constant 0 : index
    %c0_7 = arith.constant 0 : index
    %9 = vector.load %arg4[%c0_6, %c0_7] : memref<16x128xbf16, #tpu.memory_space<vmem>>, vector<16x128xbf16>
    tpu.vector_store %arg4[%c0_6, %c0_7], %8 {strides = array<i32>} : memref<16x128xbf16, #tpu.memory_space<vmem>>, vector<16x128xbf16>,
    %10 = vector.extract_strided_slice %7 {offsets = [8, 0], sizes = [8, 128], strides = [1, 1]} : vector<16x128xf32> to vector<8x128xf32>
    %11 = vector.extract_strided_slice %7 {offsets = [0, 0], sizes = [8, 128], strides = [1, 1]} : vector<16x128xf32> to vector<8x128xf32>
    %12 = arith.subf %10, %11 : vector<8x128xf32>
    %13 = math.absf %12 : vector<8x128xf32>
    %14 = vector.shape_cast %13 : vector<8x128xf32> to vector<1x8x128xf32>
    %cst_8 = arith.constant dense<0.000000e+00> : vector<1xf32>
    %15 = vector.multi_reduction <add>, %14, %cst_8 [1, 2] : vector<1x8x128xf32> to vector<1xf32>
    %16 = vector.shape_cast %15 : vector<1xf32> to vector<1x1x1xf32>
    %17 = vector.extract %16[0, 0, 0] : f32 from vector<1x1x1xf32>
    %cst_9 = arith.constant 3.906250e-02 : f32
    %18 = arith.mulf %cst_9, %17 : f32
    %19 = vector.broadcast %18 : f32 to vector<1x1xf32>
    %c0_10 = arith.constant 0 : index
    %c0_11 = arith.constant 0 : index
    %20 = vector.load %arg5[%c0_10, %c0_11] : memref<1x1xf32, #tpu.memory_space<vmem>>, vector<1x1xf32>
    tpu.vector_store %arg5[%c0_10, %c0_11], %19 {strides = array<i32>} : memref<1x1xf32, #tpu.memory_space<vmem>>, vector<1x1xf32>,
    return
  }
  func.func @transform_0(%arg0: i32) -> (i32, i32) {
    %c0_i32 = arith.constant 0 : i32
    %c0_i32_0 = arith.constant 0 : i32
    %c0_i32_1 = arith.constant 0 : i32
    return %c0_i32, %c0_i32_0 : i32, i32
  }
  func.func @transform_1(%arg0: i32) -> (i32, i32) {
    %c0_i32 = arith.constant 0 : i32
    %c0_i32_0 = arith.constant 0 : i32
    %c0_i32_1 = arith.constant 0 : i32
    return %c0_i32, %c0_i32_0 : i32, i32
  }
  func.func @transform_2(%arg0: i32) -> (i32, i32) {
    %c0_i32 = arith.constant 0 : i32
    %c0_i32_0 = arith.constant 0 : i32
    %c0_i32_1 = arith.constant 0 : i32
    return %c0_i32, %c0_i32_0 : i32, i32
  }
  func.func @transform_3(%arg0: i32) -> (i32, i32) {
    %c0_i32 = arith.constant 0 : i32
    %c0_i32_0 = arith.constant 0 : i32
    %c0_i32_1 = arith.constant 0 : i32
    return %c0_i32, %c0_i32_0 : i32, i32
  }
  func.func @transform_4(%arg0: i32) -> (i32, i32) {
    %c0_i32 = arith.constant 0 : i32
    %c0_i32_0 = arith.constant 0 : i32
    %c0_i32_1 = arith.constant 0 : i32
    return %c0_i32, %c0_i32_0 : i32, i32
  }
}

</mosaic_0001>

<bundles_post_ra>
// kernel: generator_loss.6
= control target key start
LH: loop header
LB: loop body
LE: loop exit
PB: predicated region body
PF: predicated region fallthrough
CT: control target
= control target key end

     0   :  { %v463_v1 = vmov 0   ;;  %s1030_s0 = inlined_call_operand.vmem [shape: f32[16,1024], index: 0, kind: input, shape index: {}]   ;;  %s1031_s1 = inlined_call_operand.vmem [shape: f32[16,1024], index: 1, kind: input, shape index: {}]   ;;  %s1032_s2 = inlined_call_operand.vmem [shape: f32[16,1], index: 2, kind: input, shape index: {}]   ;;  %s1033_s3 = inlined_call_operand.vmem [shape: s32[16,1], index: 3, kind: input, shape index: {}]   ;;  %s1034_s4 = inlined_call_operand.hbm [shape: f32[1,1], index: 4, kind: output, shape index: {}]  }
   0x1   :  { %v64_v0 = vld [vmem:[%s1033_s3] sm:$0xff]  ;;  %403 = vset.pattern.permute.xlu1 %v463_v1  ;;  %402 = vset.pattern.permute.xlu0 %v463_v1  ;;  %v65_v4 = vld [vmem:[%s1033_s3 + $0x8] sm:$0xff] }
   0x2   :  { %vm192_vm0 = vcmp.eq.s32.totalorder %v64_v0, 1  ;;  %vm66_vm1 = vcmp.eq.s32.totalorder %v64_v0, 2  ;;  %404 = vset.pattern.permute.xlu2 %v463_v1 }
   0x3   :  { %v226_v2 = vsel %vm192_vm0, 1, %v463_v1  ;;  %v68_v3 = vsel %vm66_vm1, 1, %v463_v1 }
   0x4   :  { %9 = vsyncpa [#allocation4], 0  ;;  %229 = vperm.xlu1 %403, %v226_v2   ;;  %71 = vperm.xlu0 %402, %v68_v3   ;;  %vm190_vm2 = vcmp.eq.s32.totalorder %v64_v0, 0  ;;  %vm193_vm3 = vcmp.eq.s32.totalorder %v65_v4, 1  ;;  %vm67_vm4 = vcmp.eq.s32.totalorder %v65_v4, 2  ;;  %vm191_vm5 = vcmp.eq.s32.totalorder %v65_v4, 0 }
   0x5   :  { %v252_v5 = vsel %vm190_vm2, 1, %v463_v1  ;;  %v227_v6 = vsel %vm193_vm3, 1, %v463_v1  ;;  %v69_v7 = vsel %vm67_vm4, 1, %v463_v1  ;;  %v253_v8 = vsel %vm191_vm5, 1, %v463_v1  ;;  %v63_v9 = vld [vmem:[%s1032_s2 + $0x8] sm:$0xff]  ;;  %v62_v10 = vld [vmem:[%s1032_s2] sm:$0xff] }
   0x6   :  { %255 = vperm.xlu2 %404, %v252_v5   ;;  %v505_v11 = vld [vmem:[%s1030_s0] sm:$0xff]  ;;  %v510_v12 = vld [vmem:[%s1030_s0 + $0x8] sm:$0xff]  ;;  %v515_v13 = vld [vmem:[%s1030_s0 + $0x10] sm:$0xff]  ;;  %s373_s2 = sshll.u32 %s1034_s4, 4  ;;  %s464_s30 = smov [#allocation3]   ;;  %vm364_vm12 = vcmask 0   ;;  %s374_s2 = int_to_ptr.hbm [resolvable:$true] %s373_s2 }
   0x7   :  { %1045 = vst [vmem:[#allocation6_spill] sm:$0xff] %v515_v13  ;;  %v46_v14 = vld [vmem:[%s1031_s1] sm:$0xff]  ;;  %v47_v15 = vld [vmem:[%s1031_s1 + $0x8] sm:$0xff]  ;;  %v48_v17 = vld [vmem:[%s1031_s1 + $0x10] sm:$0xff]  ;;  %v563_v27 = vmul.f32 %v505_v11, %v505_v11  ;;  %v567_v28 = vmul.f32 %v510_v12, %v510_v12  ;;  %v583_v33 = vmul.f32 %v515_v13, %v515_v13  ;;  %s371_s5 = sshll.u32 %s464_s30, 4  ;;  %s372_s5 = int_to_ptr.vmem [resolvable:$true] %s371_s5 }
   0x8   :  { %v526_v16 = vld [vmem:[%s1030_s0 + $0x40] sm:$0xff]  ;;  %v194_v18 = vsub.f32 %v505_v11, %v46_v14  ;;  %v195_v19 = vsub.f32 %v510_v12, %v47_v15  ;;  %v536_v20 = vld [vmem:[%s1030_s0 + $0x48] sm:$0xff]  ;;  %v196_v21 = vsub.f32 %v515_v13, %v48_v17  ;;  %v542_v22 = vld [vmem:[%s1030_s0 + $0x50] sm:$0xff] }
   0x9   :  { %1046 = vst [vmem:[#allocation7_spill] sm:$0xff] %v526_v16  ;;  %v547_v23 = vld [vmem:[%s1031_s1 + $0x40] sm:$0xff]  ;;  %v552_v24 = vld [vmem:[%s1031_s1 + $0x48] sm:$0xff]  ;;  %v559_v26 = vld [vmem:[%s1031_s1 + $0x18] sm:$0xff]  ;;  %v600_v39 = vmul.f32 %v526_v16, %v526_v16  ;;  %v604_v40 = vmul.f32 %v536_v20, %v536_v20  ;;  %v644_v51 = vmul.f32 %v542_v22, %v542_v22 }
   0xa   :  { %1047 = vst [vmem:[#allocation8_spill] sm:$0xff] %v536_v20  ;;  %v202_v25 = vsub.f32 %v526_v16, %v547_v23  ;;  %v56_v29 = vld [vmem:[%s1031_s1 + $0x50] sm:$0xff]  ;;  %v203_v30 = vsub.f32 %v536_v20, %v552_v24  ;;  %v579_v32 = vld [vmem:[%s1031_s1 + $0x20] sm:$0xff]  ;;  %v585_v34 = vand.u32 2147483647, %v194_v18  ;;  %v593_v37 = vld [vmem:[%s1030_s0 + $0x18] sm:$0xff] }
   0xb   :  { %1048 = vst [vmem:[#allocation9_spill] sm:$0xff] %v542_v22  ;;  %v587_v35 = vand.u32 2147483647, %v195_v19  ;;  %v204_v36 = vsub.f32 %v542_v22, %v56_v29  ;;  %v596_v38 = vand.u32 2147483647, %v196_v21  ;;  %v609_v41 = vld [vmem:[%s1030_s0 + $0x20] sm:$0xff]  ;;  %v657_v55 = vmul.f32 %v593_v37, %v593_v37 }
   0xc   :  { %232 = vperm.xlu1 %403, %v227_v6   ;;  %74 = vperm.xlu0 %402, %v69_v7   ;;  %1049 = vst [vmem:[#allocation10_spill] sm:$0xff] %v593_v37  ;;  %v614_v42 = vld [vmem:[%s1030_s0 + $0x28] sm:$0xff]  ;;  %v619_v43 = vld [vmem:[%s1030_s0 + $0x30] sm:$0xff]  ;;  %v633_v47 = vand.u32 2147483647, %v202_v25  ;;  %v638_v48 = vld [vmem:[%s1030_s0 + $0x38] sm:$0xff]  ;;  %v661_v56 = vmul.f32 %v609_v41, %v609_v41 }
   0xd   :  { %1050 = vst [vmem:[#allocation11_spill] sm:$0xff] %v596_v38  ;;  %v646_v52 = vand.u32 2147483647, %v203_v30  ;;  %v653_v54 = vand.u32 2147483647, %v204_v36  ;;  %v672_v59 = vld [vmem:[%s1030_s0 + $0x58] sm:$0xff]  ;;  %v681_v61 = vmul.f32 %v614_v42, %v614_v42  ;;  %v695_v0 = vmul.f32 %v619_v43, %v619_v43 }
   0xe   :  { %258 = vperm.xlu2 %404, %v253_v8   ;;  %v677_v60 = vld [vmem:[%s1030_s0 + $0x60] sm:$0xff]  ;;  %v686_v62 = vld [vmem:[%s1031_s1 + $0x28] sm:$0xff]  ;;  %v691_v63 = vld [vmem:[%s1031_s1 + $0x30] sm:$0xff]  ;;  %v699_v1 = vmul.f32 %v638_v48, %v638_v48 }
   0xf   :  { %1051 = vst [vmem:[#allocation12_spill] sm:$0xff] %v646_v52  ;;  %v707_v4 = vld [vmem:[%s1031_s1 + $0x58] sm:$0xff]  ;;  %v780_v8 = vld [vmem:[%s1030_s0 + $0x68] sm:$0xff]  ;;  %v787_v13 = vld [vmem:[%s1030_s0 + $0x70] sm:$0xff] }
  0x10   :  { %1052 = vst [vmem:[#allocation13_spill] sm:$0xff] %v653_v54  ;;  %v712_v5 = vld [vmem:[%s1031_s1 + $0x38] sm:$0xff]  ;;  %v825_v54 = vmul.f32 %v787_v13, %v787_v13 }
  0x11   :  { %1053 = vst [vmem:[#allocation14_spill] sm:$0xff] %v681_v61 }
  0x12   :  { %1054 = vst [vmem:[#allocation15_spill] sm:$0xff] %v695_v0 }
  0x13   :  { %1055 = vst [vmem:[#allocation16_spill] sm:$0xff] %v699_v1 }
  0x14   :  { %285 = vperm.xlu1 %403, %v63_v9   ;;  %280 = vperm.xlu0 %402, %v62_v10   ;;  %1064 = vst [vmem:[#allocation25_spill] sm:$0xff] %v825_v54 }
  0x60   :  { %v790_v0 = vpop.permute.xlu2 %255 }
  0x61   :  { %vm260_vm8 = vcmp.eq.s32.totalorder %v790_v0, 1 }
  0x76   :  { %v574_v31 = vpop.permute.xlu0 %71  ;;  %v811_v20 = vpop.permute.xlu1 %229 }
  0x77   :  { %vm76_vm6 = vcmp.eq.s32.totalorder %v574_v31, 1  ;;  %v816_v31 = vld [vmem:[%s1030_s0 + $0x78] sm:$0xff]  ;;  %vm234_vm9 = vcmp.eq.s32.totalorder %v811_v20, 1 }
  0x78   :  { %v623_v44 = vsel %vm76_vm6, %v46_v14, 0.0  ;;  %v627_v45 = vsel %vm76_vm6, %v47_v15, 0.0  ;;  %v631_v46 = vsel %vm76_vm6, %v48_v17, 0.0  ;;  %v651_v53 = vsel %vm76_vm6, %v559_v26, 0.0  ;;  %v724_v14 = vld [vmem:[%s1031_s1 + $0x60] sm:$0xff] }
  0x79   :  { %v94_v49 = vmul.f32 1.442695, %v623_v44  ;;  %v96_v50 = vmul.f32 1.442695, %v627_v45  ;;  %v666_v57 = vsel %vm76_vm6, %v579_v32, 0.0  ;;  %v728_v15 = vmul.f32 %v672_v59, %v672_v59 }
  0x7a   :  { %v98_v58 = vmul.f32 1.442695, %v631_v46  ;;  %v100_v3 = vmul.f32 1.442695, %v651_v53  ;;  %v102_v9 = vmul.f32 1.442695, %v666_v57  ;;  %v732_v17 = vmul.f32 %v677_v60, %v677_v60 }
  0x7b   :  { %405 = vpow2.f32 %v94_v49  ;;  %1056 = vst [vmem:[#allocation17_spill] sm:$0xff] %v728_v15  ;;  %v739_v19 = vsel %vm76_vm6, %v686_v62, 0.0  ;;  %v744_v21 = vsel %vm76_vm6, %v691_v63, 0.0 }
  0x7c   :  { %407 = vpow2.f32 %v96_v50  ;;  %1057 = vst [vmem:[#allocation18_spill] sm:$0xff] %v732_v17  ;;  %v764_v50 = vld [vmem:[%s1031_s1 + $0x68] sm:$0xff]  ;;  %v106_v16 = vmul.f32 1.442695, %v744_v21 }
  0x7d   :  { %409 = vpow2.f32 %v98_v58  ;;  %1058 = vst [vmem:[#allocation19_spill] sm:$0xff] %v739_v19 }
  0x7e   :  { %v75_v10 = vpop.permute.xlu0 %74  ;;  %1059 = vst [vmem:[#allocation20_spill] sm:$0xff] %v744_v21  ;;  %411 = vpow2.f32 %v100_v3 }
  0x7f   :  { %vm77_vm7 = vcmp.eq.s32.totalorder %v75_v10, 1  ;;  %413 = vpow2.f32 %v102_v9  ;;  %v795_v9 = vld [vmem:[%s1031_s1 + $0x78] sm:$0xff]  ;;  %v1066_v10 = vsub.f32 %v593_v37, %v559_v26 }
  0x80   :  { %v748_v25 = vsel %vm77_vm7, %v547_v23, 0.0  ;;  %v752_v30 = vsel %vm77_vm7, %v552_v24, 0.0  ;;  %v755_v36 = vsel %vm77_vm7, %v56_v29, 0.0  ;;  %v759_v49 = vsel %vm77_vm7, %v707_v4, 0.0  ;;  %v769_v23 = vld [vmem:[%s1031_s1 + $0x70] sm:$0xff] }
  0x81   :  { %v406_v58 = vpop.eup %405  ;;  %v773_v24 = vsel %vm77_vm7, %v724_v14, 0.0  ;;  %v110_v29 = vmul.f32 1.442695, %v748_v25  ;;  %v112_v18 = vmul.f32 1.442695, %v752_v30  ;;  %v804_v61 = vsel %vm77_vm7, %v764_v50, 0.0 }
  0x82   :  { %v408_v7 = vpop.eup %407  ;;  %v382_v6 = vadd.f32 -1.0, %v406_v58  ;;  %v114_v2 = vmul.f32 1.442695, %v755_v36  ;;  %v116_v3 = vmul.f32 1.442695, %v759_v49  ;;  %v800_v58 = vsel %vm76_vm6, %v712_v5, 0.0 }
  0x83   :  { %v383_v1 = vadd.f32 -1.0, %v408_v7  ;;  %415 = vpow2.f32 %v110_v29  ;;  %v118_v22 = vmul.f32 1.442695, %v773_v24  ;;  %1060 = vst [vmem:[#allocation21_spill] sm:$0xff] %v800_v58  ;;  %v104_v7 = vmul.f32 1.442695, %v739_v19  ;;  %v410_v38 = vpop.eup %409 }
  0x84   :  { %417 = vpow2.f32 %v112_v18  ;;  %1061 = vst [vmem:[#allocation22_spill] sm:$0xff] %v804_v61  ;;  %v809_v29 = vmul.f32 %v780_v8, %v780_v8  ;;  %v820_v18 = vsel %vm77_vm7, %v769_v23, 0.0  ;;  %v108_v17 = vmul.f32 1.442695, %v800_v58  ;;  %v412_v19 = vpop.eup %411 }
  0x85   :  { %419 = vpow2.f32 %v114_v2  ;;  %1063 = vst [vmem:[#allocation24_spill] sm:$0xff] %v820_v18  ;;  %v831_v2 = vsel %vm77_vm7, %v795_v9, 0.0  ;;  %v143_v21 = vsub.f32 %v383_v1, %v627_v45  ;;  %v120_v52 = vmul.f32 1.442695, %v804_v61  ;;  %v414_v54 = vpop.eup %413 }
  0x86   :  { %1062 = vst [vmem:[#allocation23_spill] sm:$0xff] %v809_v29  ;;  %v142_v29 = vsub.f32 %v382_v6, %v623_v44  ;;  %421 = vpow2.f32 %v116_v3  ;;  %v122_v44 = vmul.f32 1.442695, %v820_v18  ;;  %v840_v6 = vmul.f32 %v816_v31, %v816_v31 }
  0x87   :  { %423 = vpow2.f32 %v118_v22  ;;  %v845_v3 = vand.u32 2147483647, %v1066_v10  ;;  %v384_v15 = vadd.f32 -1.0, %v410_v38  ;;  %v124_v22 = vmul.f32 1.442695, %v831_v2 }
  0x88   :  { %425 = vpow2.f32 %v104_v7  ;;  %1065 = vst [vmem:[#allocation26_spill] sm:$0xff] %v840_v6  ;;  %v205_v45 = vsub.f32 %v672_v59, %v707_v4  ;;  %v174_v7 = vadd.f32 %v563_v27, %v142_v29  ;;  %v175_v26 = vadd.f32 %v567_v28, %v143_v21  ;;  %v859_v6 = vpop.permute.xlu2 %258  ;;  %v1081_v4 = vld [vmem:[#allocation13_spill] sm:$0xff] }
  0x89   :  { %1067 = vst [vmem:[#allocation27_spill] sm:$0xff] %v845_v3  ;;  %v416_v58 = vpop.eup %415  ;;  %427 = vpow2.f32 %v106_v16  ;;  %v207_v16 = vsub.f32 %v780_v8, %v764_v50  ;;  %v385_v37 = vadd.f32 -1.0, %v412_v19  ;;  %v208_v27 = vsub.f32 %v787_v13, %v769_v23  ;;  %v1088_v50 = vld [vmem:[#allocation25_spill] sm:$0xff] }
  0x8a   :  { %v418_v1 = vpop.eup %417  ;;  %v390_v18 = vadd.f32 -1.0, %v416_v58  ;;  %429 = vpow2.f32 %v108_v17  ;;  %v386_v17 = vadd.f32 -1.0, %v414_v54  ;;  %v144_v29 = vsub.f32 %v384_v15, %v631_v46  ;;  %v872_v15 = vpop.permute.xlu1 %232 }
  0x8b   :  { %v420_v61 = vpop.eup %419  ;;  %v391_v10 = vadd.f32 -1.0, %v418_v1  ;;  %431 = vpow2.f32 %v120_v52  ;;  %v209_v28 = vsub.f32 %v816_v31, %v795_v9  ;;  %v1068_v19 = vsub.f32 %v609_v41, %v579_v32 }
  0x8c   :  { %v422_v38 = vpop.eup %421  ;;  %v392_v3 = vadd.f32 -1.0, %v420_v61  ;;  %433 = vpow2.f32 %v122_v44  ;;  %v150_v1 = vsub.f32 %v390_v18, %v748_v25  ;;  %v236_v61 = vsel %vm234_vm9, %v585_v34, %v174_v7 }
  0x8d   :  { %v424_v58 = vpop.eup %423  ;;  %435 = vpow2.f32 %v124_v22  ;;  %v393_v21 = vadd.f32 -1.0, %v422_v38  ;;  %v870_v54 = vand.u32 2147483647, %v1068_v19  ;;  %v151_v23 = vsub.f32 %v391_v10, %v752_v30 }
  0x8e   :  { %v426_v52 = vpop.eup %425  ;;  %v237_v44 = vsel %vm234_vm9, %v587_v35, %v175_v26  ;;  %v1069_v25 = vsub.f32 %v614_v42, %v686_v62  ;;  %v1070_v34 = vsub.f32 %v619_v43, %v691_v63  ;;  %v145_v7 = vsub.f32 %v385_v37, %v651_v53 }
  0x8f   :  { %v428_v46 = vpop.eup %427  ;;  %vm235_vm10 = vcmp.eq.s32.totalorder %v872_v15, 1  ;;  %v394_v30 = vadd.f32 -1.0, %v424_v58  ;;  %v152_v10 = vsub.f32 %v392_v3, %v755_v36  ;;  %vm261_vm11 = vcmp.eq.s32.totalorder %v859_v6, 1 }
  0x90   :  { %v881_v18 = vand.u32 2147483647, %v1069_v25  ;;  %v886_v32 = vand.u32 2147483647, %v1070_v34  ;;  %v430_v22 = vpop.eup %429  ;;  %v146_v62 = vsub.f32 %v386_v17, %v666_v57  ;;  %v176_v26 = vadd.f32 %v583_v33, %v144_v29  ;;  %v910_v25 = vpop.permute.xlu0 %280 }
  0x91   :  { %v432_v35 = vpop.eup %431  ;;  %v262_v63 = vsel %vm260_vm8, %v505_v11, %v236_v61  ;;  %v1071_v38 = vsub.f32 %v638_v48, %v712_v5  ;;  %v153_v58 = vsub.f32 %v393_v21, %v759_v49  ;;  %v182_v36 = vadd.f32 %v600_v39, %v150_v1 }
  0x92   :  { %v434_v53 = vpop.eup %433  ;;  %v263_v57 = vsel %vm260_vm8, %v510_v12, %v237_v44  ;;  %v395_v3 = vadd.f32 -1.0, %v432_v35  ;;  %v183_v17 = vadd.f32 %v604_v40, %v151_v23  ;;  %v387_v29 = vadd.f32 -1.0, %v426_v52  ;;  %v1072_v52 = vld [vmem:[#allocation22_spill] sm:$0xff] }
  0x93   :  { %v900_v37 = vand.u32 2147483647, %v1071_v38  ;;  %v436_v33 = vpop.eup %435  ;;  %v388_v11 = vadd.f32 -1.0, %v428_v46  ;;  %v396_v61 = vadd.f32 -1.0, %v434_v53  ;;  %v154_v5 = vsub.f32 %v394_v30, %v773_v24  ;;  %v1073_v46 = vld [vmem:[#allocation17_spill] sm:$0xff]  ;;  %v1076_v30 = vld [vmem:[#allocation20_spill] sm:$0xff] }
  0x94   :  { %v184_v19 = vadd.f32 %v644_v51, %v152_v10  ;;  %v389_v49 = vadd.f32 -1.0, %v430_v22  ;;  %v177_v39 = vadd.f32 %v657_v55, %v145_v7  ;;  %v288_v21 = vmul.f32 %v910_v25, %v262_v63  ;;  %v1074_v55 = vld [vmem:[#allocation12_spill] sm:$0xff]  ;;  %v1075_v22 = vld [vmem:[#allocation19_spill] sm:$0xff]  ;;  %v1079_v63 = vld [vmem:[#allocation18_spill] sm:$0xff] }
  0x95   :  { %v289_v12 = vmul.f32 %v910_v25, %v263_v57  ;;  %v397_v1 = vadd.f32 -1.0, %v436_v33  ;;  %v178_v44 = vadd.f32 %v661_v56, %v146_v62  ;;  %v244_v40 = vsel %vm235_vm10, %v633_v47, %v182_v36  ;;  %v1077_v10 = vld [vmem:[#allocation24_spill] sm:$0xff]  ;;  %v1078_v62 = vld [vmem:[#allocation21_spill] sm:$0xff]  ;;  %v1082_v36 = vld [vmem:[#allocation7_spill] sm:$0xff] }
  0x96   :  { %v155_v24 = vsub.f32 %v395_v3, %v1072_v52  ;;  %v185_v51 = vadd.f32 %v1073_v46, %v153_v58  ;;  %v221_v23 = vand.u32 2147483647, %v205_v45  ;;  %v245_v34 = vsel %vm235_vm10, %v1074_v55, %v183_v17  ;;  %v1090_v55 = vld [vmem:[#allocation16_spill] sm:$0xff] }
  0x97   :  { %v147_v7 = vsub.f32 %v387_v29, %v1075_v22  ;;  %v148_v56 = vsub.f32 %v388_v11, %v1076_v30  ;;  %v156_v35 = vsub.f32 %v396_v61, %v1077_v10  ;;  %v149_v47 = vsub.f32 %v389_v49, %v1078_v62  ;;  %v1083_v29 = vld [vmem:[#allocation8_spill] sm:$0xff]  ;;  %v1084_v11 = vld [vmem:[#allocation23_spill] sm:$0xff]  ;;  %v286_v22 = vpop.permute.xlu1 %285  ;;  %v1093_v10 = vld [vmem:[#allocation6_spill] sm:$0xff] }
  0x98   :  { %v186_v38 = vadd.f32 %v1079_v63, %v154_v5  ;;  %v1080_v53 = vsub.f32 %v677_v60, %v724_v14  ;;  %v246_v45 = vsel %vm235_vm10, %v1081_v4, %v184_v19  ;;  %v270_v57 = vsel %vm261_vm11, %v1082_v36, %v244_v40  ;;  %v1085_v5 = vld [vmem:[#allocation11_spill] sm:$0xff]  ;;  %v1086_v40 = vld [vmem:[#allocation14_spill] sm:$0xff] }
  0x99   :  { %v157_v3 = vsub.f32 %v397_v1, %v831_v2  ;;  %v223_v33 = vand.u32 2147483647, %v207_v16  ;;  %v224_v17 = vand.u32 2147483647, %v208_v27  ;;  %v271_v14 = vsel %vm261_vm11, %v1083_v29, %v245_v34  ;;  %v1087_v1 = vld [vmem:[#allocation15_spill] sm:$0xff]  ;;  %v1089_v27 = vld [vmem:[#allocation9_spill] sm:$0xff] }
  0x9a   :  { %v222_v58 = vand.u32 2147483647, %v1080_v53  ;;  %v187_v61 = vadd.f32 %v1084_v11, %v155_v24  ;;  %v238_v19 = vsel %vm234_vm9, %v1085_v5, %v176_v26  ;;  %v247_v49 = vsel %vm235_vm10, %v221_v23, %v185_v51  ;;  %v1091_v26 = vld [vmem:[#allocation27_spill] sm:$0xff] }
  0x9b   :  { %v179_v2 = vadd.f32 %v1086_v40, %v147_v7  ;;  %v180_v52 = vadd.f32 %v1087_v1, %v148_v56  ;;  %v188_v16 = vadd.f32 %v1088_v50, %v156_v35  ;;  %v272_v46 = vsel %vm261_vm11, %v1089_v27, %v246_v45  ;;  %v1092_v7 = vld [vmem:[#allocation26_spill] sm:$0xff] }
  0x9c   :  { %v181_v34 = vadd.f32 %v1090_v55, %v149_v47  ;;  %v225_v24 = vand.u32 2147483647, %v209_v28  ;;  %v239_v51 = vsel %vm234_vm9, %v1091_v26, %v177_v39  ;;  %v248_v23 = vsel %vm235_vm10, %v222_v58, %v186_v38 }
  0x9d   :  { %v189_v30 = vadd.f32 %v1092_v7, %v157_v3  ;;  %v240_v56 = vsel %vm234_vm9, %v870_v54, %v178_v44  ;;  %v264_v35 = vsel %vm260_vm8, %v1093_v10, %v238_v19  ;;  %v273_v9 = vsel %vm261_vm11, %v672_v59, %v247_v49  ;;  %v1094_v44 = vld [vmem:[#allocation10_spill] sm:$0xff] }
  0x9e   :  { %v249_v28 = vsel %vm235_vm10, %v223_v33, %v187_v61  ;;  %v296_v39 = vmul.f32 %v286_v22, %v270_v57  ;;  %v297_v62 = vmul.f32 %v286_v22, %v271_v14  ;;  %v298_v47 = vmul.f32 %v286_v22, %v272_v46 }
  0x9f   :  { %v241_v63 = vsel %vm234_vm9, %v881_v18, %v179_v2  ;;  %v250_v54 = vsel %vm235_vm10, %v224_v17, %v188_v16  ;;  %v265_v38 = vsel %vm260_vm8, %v1094_v44, %v239_v51  ;;  %v274_v59 = vsel %vm261_vm11, %v677_v60, %v248_v23 }
  0xa0   :  { %v290_v53 = vmul.f32 %v910_v25, %v264_v35  ;;  %v299_v58 = vmul.f32 %v286_v22, %v273_v9  ;;  %v312_v4 = vadd.f32 %v296_v39, %v288_v21  ;;  %v313_v45 = vadd.f32 %v297_v62, %v289_v12 }
  0xa1   :  { %v242_v18 = vsel %vm234_vm9, %v886_v32, %v180_v52  ;;  %v251_v36 = vsel %vm235_vm10, %v225_v24, %v189_v30  ;;  %v266_v57 = vsel %vm260_vm8, %v609_v41, %v240_v56  ;;  %v275_v60 = vsel %vm261_vm11, %v780_v8, %v249_v28 }
  0xa2   :  { %v291_v3 = vmul.f32 %v910_v25, %v265_v38  ;;  %v300_v33 = vmul.f32 %v286_v22, %v274_v59  ;;  %v314_v21 = vadd.f32 %v298_v47, %v290_v53  ;;  %v347_v12 = vadd.f32 %v313_v45, %v312_v4 }
  0xa3   :  { %v243_v32 = vsel %vm234_vm9, %v900_v37, %v181_v34  ;;  %v267_v15 = vsel %vm260_vm8, %v614_v42, %v241_v63  ;;  %v276_v41 = vsel %vm261_vm11, %v787_v13, %v250_v54  ;;  %v292_v17 = vmul.f32 %v910_v25, %v266_v57 }
  0xa4   :  { %v301_v8 = vmul.f32 %v286_v22, %v275_v60  ;;  %v315_v29 = vadd.f32 %v299_v58, %v291_v3  ;;  %v348_v14 = vadd.f32 %v347_v12, %v314_v21  ;;  %v268_v11 = vsel %vm260_vm8, %v619_v43, %v242_v18 }
  0xa5   :  { %v277_v20 = vsel %vm261_vm11, %v816_v31, %v251_v36  ;;  %v293_v37 = vmul.f32 %v910_v25, %v267_v15  ;;  %v302_v42 = vmul.f32 %v286_v22, %v276_v41  ;;  %v316_v61 = vadd.f32 %v300_v33, %v292_v17 }
  0xa6   :  { %v349_v5 = vadd.f32 %v348_v14, %v315_v29  ;;  %v269_v13 = vsel %vm260_vm8, %v638_v48, %v243_v32  ;;  %v294_v19 = vmul.f32 %v910_v25, %v268_v11  ;;  %v303_v49 = vmul.f32 %v286_v22, %v277_v20 }
  0xa7   :  { %v317_v40 = vadd.f32 %v301_v8, %v293_v37  ;;  %v295_v43 = vmul.f32 %v910_v25, %v269_v13 }
  0xa8   :  { %v350_v2 = vadd.f32 %v349_v5, %v316_v61  ;;  %v318_v1 = vadd.f32 %v302_v42, %v294_v19 }
  0xa9   :  { %v319_v6 = vadd.f32 %v303_v49, %v295_v43 }
  0xaa   :  { %v351_v52 = vadd.f32 %v350_v2, %v317_v40 }
  0xac   :  { %v352_v31 = vadd.f32 %v351_v52, %v318_v1 }
  0xae   :  { %v353_v50 = vadd.f32 %v352_v31, %v319_v6 }
  0xb0   :  { %354 = vadd.xlane.f32.xlu2 %v353_v50 }
 0x123   :  { %v355_v16 = vpop.xlane.xlu2 %354 }
 0x124   :  { %v356_v27 = vrot.slane %v355_v16, 4 }
 0x126   :  { %v357_v46 = vadd.f32 %v356_v27, %v355_v16 }
 0x128   :  { %v358_v55 = vrot.slane %v357_v46, 2 }
 0x12a   :  { %v359_v34 = vadd.f32 %v358_v55, %v357_v46 }
 0x12c   :  { %v360_v0 = vrot.slane %v359_v34, 1 }
 0x12e   :  { %v361_v48 = vadd.f32 %v360_v0, %v359_v34 }
 0x130   :  { %398 = vpush %v361_v48 }
 0x161   :  { %s399_s6 = spop %398 }
 0x162   :  { %v363_v25 = vstv %s399_s6 }
 0x163   :  { %365 = vst.msk [vmem:[#allocation3] sm:$0x1] %vm364_vm12, %v363_v25 }
 0x164   :  { %376 = dma.vmem_to_hbm [thread:$0]  %s372_s5, 16, %s374_s2, [#allocation4]  }
 0x165   :  { %461 = dma.done.wait [#allocation4], 16  }
 0x166   :  { %462 = vsyncadd [#allocation4], 4294967280 }
 0x167   :  { %381 = vsyncpa [#allocation4], 1 }

// kernel: generator_loss.7
= control target key start
LH: loop header
LB: loop body
LE: loop exit
PB: predicated region body
PF: predicated region fallthrough
CT: control target
= control target key end

     0   :  { %s11299_s0 = inlined_call_operand.vmem [shape: bf16[4096,128], index: 0, kind: input, shape index: {}]   ;;  %s11300_s1 = inlined_call_operand.vmem [shape: bf16[128,128], index: 1, kind: input, shape index: {}]   ;;  %s11301_s2 = inlined_call_operand.vmem [shape: f32[1,128], index: 2, kind: input, shape index: {}]   ;;  %s11302_s3 = inlined_call_operand.vmem [shape: bf16[4096,128], index: 3, kind: output, shape index: {0}]   ;;  %s11303_s4 = inlined_call_operand.hbm [shape: f32[1,1], index: 4, kind: output, shape index: {1}]  }
   0x1   :  { %v7077_v0 = vld [vmem:[%s11300_s1 + $0x38] sm:$0xff]  ;;  %v7076_v1 = vld [vmem:[%s11300_s1 + $0x30] sm:$0xff] }
   0x2   :  { %2133 = vmatpush.bf16.msra.mxu0 %v7077_v0  ;;  %8614 = vmatpush.bf16.msra.mxu2 %v7077_v0 }
   0x3   :  { %8615 = vmatpush.bf16.msra.mxu3 %v7077_v0  ;;  %8613 = vmatpush.bf16.msra.mxu1 %v7077_v0 }
   0x4   :  { %10 = vsyncpa [#allocation3], 0  ;;  %v7075_v2 = vld [vmem:[%s11300_s1 + $0x28] sm:$0xff]  ;;  %v7074_v3 = vld [vmem:[%s11300_s1 + $0x20] sm:$0xff]  ;;  %s5747_s16 = sshll.u32 %s11303_s4, 4  ;;  %vm5736_vm0 = vcmask 0   ;;  %s5748_s16 = int_to_ptr.hbm [resolvable:$true] %s5747_s16 }
   0x5   :  { %v7073_v4 = vld [vmem:[%s11300_s1 + $0x18] sm:$0xff]  ;;  %v7072_v5 = vld [vmem:[%s11300_s1 + $0x10] sm:$0xff]  ;;  %v7071_v6 = vld [vmem:[%s11300_s1 + $0x8] sm:$0xff] }
   0x6   :  { %2134 = vmatpush.bf16.msra.mxu0 %v7076_v1  ;;  %8617 = vmatpush.bf16.msra.mxu2 %v7076_v1  ;;  %v7070_v7 = vld [vmem:[%s11300_s1] sm:$0xff]  ;;  %v6815_v10 = vld [vmem:[%s11299_s0 + $0x8] sm:$0xff]  ;;  %v6816_v12 = vld [vmem:[%s11299_s0 + $0x10] sm:$0xff] }
   0x7   :  { %8618 = vmatpush.bf16.msra.mxu3 %v7076_v1  ;;  %8616 = vmatpush.bf16.msra.mxu1 %v7076_v1  ;;  %v6814_v8 = vld [vmem:[%s11299_s0] sm:$0xff]  ;;  %v6943_v11 = vld [vmem:[%s11299_s0 + $0x408] sm:$0xff]  ;;  %v6944_v13 = vld [vmem:[%s11299_s0 + $0x410] sm:$0xff] }
   0x8   :  { %v6942_v9 = vld [vmem:[%s11299_s0 + $0x400] sm:$0xff]  ;;  %v6817_v14 = vld [vmem:[%s11299_s0 + $0x18] sm:$0xff]  ;;  %v6819_v18 = vld [vmem:[%s11299_s0 + $0x28] sm:$0xff] }
   0x9   :  { %v6945_v15 = vld [vmem:[%s11299_s0 + $0x418] sm:$0xff]  ;;  %v6818_v16 = vld [vmem:[%s11299_s0 + $0x20] sm:$0xff]  ;;  %v6947_v19 = vld [vmem:[%s11299_s0 + $0x428] sm:$0xff] }
   0xa   :  { %2135 = vmatpush.bf16.msra.mxu0 %v7075_v2  ;;  %8620 = vmatpush.bf16.msra.mxu2 %v7075_v2  ;;  %v6946_v17 = vld [vmem:[%s11299_s0 + $0x420] sm:$0xff]  ;;  %v6820_v20 = vld [vmem:[%s11299_s0 + $0x30] sm:$0xff]  ;;  %v6821_v22 = vld [vmem:[%s11299_s0 + $0x38] sm:$0xff] }
   0xb   :  { %8621 = vmatpush.bf16.msra.mxu3 %v7075_v2  ;;  %8619 = vmatpush.bf16.msra.mxu1 %v7075_v2  ;;  %v6948_v21 = vld [vmem:[%s11299_s0 + $0x430] sm:$0xff]  ;;  %v6949_v23 = vld [vmem:[%s11299_s0 + $0x438] sm:$0xff]  ;;  %v8774_v24 = vld [vmem:[%s11301_s2] ss:$0 sm:$0xff] }
   0xc   :  { %v6822_v25 = vld [vmem:[%s11299_s0 + $0x40] sm:$0xff]  ;;  %v6823_v40 = vld [vmem:[%s11299_s0 + $0x48] sm:$0xff]  ;;  %v6824_v63 = vld [vmem:[%s11299_s0 + $0x50] sm:$0xff] }
   0xd   :  { %v6950_v26 = vld [vmem:[%s11299_s0 + $0x440] sm:$0xff]  ;;  %v6951_v41 = vld [vmem:[%s11299_s0 + $0x448] sm:$0xff]  ;;  %v6952_v0 = vld [vmem:[%s11299_s0 + $0x450] sm:$0xff] }
   0xe   :  { %2136 = vmatpush.bf16.msra.mxu0 %v7074_v3  ;;  %8623 = vmatpush.bf16.msra.mxu2 %v7074_v3 }
   0xf   :  { %8624 = vmatpush.bf16.msra.mxu3 %v7074_v3  ;;  %8622 = vmatpush.bf16.msra.mxu1 %v7074_v3 }
  0x12   :  { %2137 = vmatpush.bf16.msra.mxu0 %v7073_v4  ;;  %8626 = vmatpush.bf16.msra.mxu2 %v7073_v4 }
  0x13   :  { %8627 = vmatpush.bf16.msra.mxu3 %v7073_v4  ;;  %8625 = vmatpush.bf16.msra.mxu1 %v7073_v4 }
  0x16   :  { %2138 = vmatpush.bf16.msra.mxu0 %v7072_v5  ;;  %8629 = vmatpush.bf16.msra.mxu2 %v7072_v5 }
  0x17   :  { %8630 = vmatpush.bf16.msra.mxu3 %v7072_v5  ;;  %8628 = vmatpush.bf16.msra.mxu1 %v7072_v5 }
  0x1a   :  { %2139 = vmatpush.bf16.msra.mxu0 %v7071_v6  ;;  %8632 = vmatpush.bf16.msra.mxu2 %v7071_v6 }
  0x1b   :  { %8633 = vmatpush.bf16.msra.mxu3 %v7071_v6  ;;  %8631 = vmatpush.bf16.msra.mxu1 %v7071_v6 }
  0x1e   :  { %2140 = vmatpush.bf16.msra.mxu0 %v7070_v7  ;;  %8635 = vmatpush.bf16.msra.mxu2 %v7070_v7 }
  0x1f   :  { %8636 = vmatpush.bf16.msra.mxu3 %v7070_v7  ;;  %8634 = vmatpush.bf16.msra.mxu1 %v7070_v7 }
  0x21   :  { %2141 = vmatmul.bf16.vlgmr.msra.gmra.mxu0 %v6814_v8  ;;  %2781 = vmatmul.bf16.vlgmr.msra.gmra.mxu2 %v6942_v9 }
  0x31   :  { %2146 = vmatmul.bf16.gmra.mxu0 %v6815_v10  ;;  %2786 = vmatmul.bf16.gmra.mxu2 %v6943_v11 }
  0x41   :  { %2151 = vmatmul.bf16.gmra.mxu0 %v6816_v12  ;;  %2791 = vmatmul.bf16.gmra.mxu2 %v6944_v13 }
  0x51   :  { %2156 = vmatmul.bf16.gmra.mxu0 %v6817_v14  ;;  %2796 = vmatmul.bf16.gmra.mxu2 %v6945_v15 }
  0x61   :  { %2161 = vmatmul.bf16.gmra.mxu0 %v6818_v16  ;;  %2801 = vmatmul.bf16.gmra.mxu2 %v6946_v17 }
  0x71   :  { %2166 = vmatmul.bf16.gmra.mxu0 %v6819_v18  ;;  %2806 = vmatmul.bf16.gmra.mxu2 %v6947_v19 }
  0x81   :  { %2171 = vmatmul.bf16.gmra.mxu0 %v6820_v20  ;;  %2811 = vmatmul.bf16.gmra.mxu2 %v6948_v21  ;;  %v6825_v21 = vld [vmem:[%s11299_s0 + $0x58] sm:$0xff] }
  0x91   :  { %2176 = vmatmul.bf16.gmra.mxu0 %v6821_v22  ;;  %2816 = vmatmul.bf16.gmra.mxu2 %v6949_v23  ;;  %v6953_v22 = vld [vmem:[%s11299_s0 + $0x458] sm:$0xff] }
  0x9e   :  { %v2142_v27 = vpop.f32.mrf.mxu0 }
  0x9f   :  { %v2143_v28 = vadd.f32 %v8774_v24, %v2142_v27 }
  0xa1   :  { %2181 = vmatmul.bf16.gmra.mxu0 %v6822_v25  ;;  %2821 = vmatmul.bf16.gmra.mxu2 %v6950_v26  ;;  %v3422_v30 = vmax.f32 %v2143_v28, 0.0 }
  0xa4   :  { %v2782_v29 = vpop.f32.mrf.mxu2 }
  0xa5   :  { %v2783_v31 = vadd.f32 %v8774_v24, %v2782_v29 }
  0xa6   :  { %v2144_v32 = vpop.f32.mrf.mxu0 }
  0xa7   :  { %v3678_v33 = vmax.f32 %v2783_v31, 0.0  ;;  %v2145_v34 = vadd.f32 %v8774_v24, %v2144_v32 }
  0xa9   :  { %v4958_v35 = vsub.f32 %v3678_v33, %v3422_v30  ;;  %v3423_v36 = vmax.f32 %v2145_v34, 0.0 }
  0xab   :  { %v7081_v37 = vpack.c.bf16 %v3423_v36, %v3422_v30  ;;  %v5214_v47 = vand.u32 2147483647, %v4958_v35 }
  0xac   :  { %v2784_v38 = vpop.f32.mrf.mxu2 }
  0xad   :  { %7082 = vst [vmem:[%s11302_s3] sm:$0xff] %v7081_v37   ;;  %v2785_v39 = vadd.f32 %v8774_v24, %v2784_v38 }
  0xae   :  { %v2147_v42 = vpop.f32.mrf.mxu0 }
  0xaf   :  { %v3679_v43 = vmax.f32 %v2785_v39, 0.0  ;;  %v2148_v46 = vadd.f32 %v8774_v24, %v2147_v42 }
  0xb1   :  { %v7721_v44 = vpack.c.bf16 %v3679_v43, %v3678_v33  ;;  %v4959_v45 = vsub.f32 %v3679_v43, %v3423_v36  ;;  %2186 = vmatmul.bf16.gmra.mxu0 %v6823_v40  ;;  %2826 = vmatmul.bf16.gmra.mxu2 %v6951_v41  ;;  %v3424_v51 = vmax.f32 %v2148_v46, 0.0 }
  0xb3   :  { %8485 = vst [vmem:[%s11302_s3 + $0x400] sm:$0xff] %v7721_v44   ;;  %v5215_v48 = vand.u32 2147483647, %v4959_v45  ;;  %v6826_v44 = vld [vmem:[%s11299_s0 + $0x60] sm:$0xff] }
  0xb4   :  { %v2787_v49 = vpop.f32.mrf.mxu2  ;;  %v6954_v45 = vld [vmem:[%s11299_s0 + $0x460] sm:$0xff] }
  0xb5   :  { %v5470_v50 = vadd.f32 %v5215_v48, %v5214_v47  ;;  %v2788_v52 = vadd.f32 %v8774_v24, %v2787_v49 }
  0xb6   :  { %v2149_v53 = vpop.f32.mrf.mxu0 }
  0xb7   :  { %v3680_v54 = vmax.f32 %v2788_v52, 0.0  ;;  %v2150_v55 = vadd.f32 %v8774_v24, %v2149_v53 }
  0xb9   :  { %v4960_v56 = vsub.f32 %v3680_v54, %v3424_v51  ;;  %v3425_v57 = vmax.f32 %v2150_v55, 0.0 }
  0xbb   :  { %v5216_v58 = vand.u32 2147483647, %v4960_v56  ;;  %v7086_v59 = vpack.c.bf16 %v3425_v57, %v3424_v51 }
  0xbc   :  { %v2789_v60 = vpop.f32.mrf.mxu2 }
  0xbd   :  { %v5471_v61 = vadd.f32 %v5470_v50, %v5216_v58  ;;  %8358 = vst [vmem:[%s11302_s3 + $0x8] sm:$0xff] %v7086_v59   ;;  %v2790_v62 = vadd.f32 %v8774_v24, %v2789_v60 }
  0xbe   :  { %v2152_v1 = vpop.f32.mrf.mxu0 }
  0xbf   :  { %v3681_v2 = vmax.f32 %v2790_v62, 0.0  ;;  %v2153_v5 = vadd.f32 %v8774_v24, %v2152_v1 }
  0xc1   :  { %v7726_v3 = vpack.c.bf16 %v3681_v2, %v3680_v54  ;;  %v4961_v4 = vsub.f32 %v3681_v2, %v3425_v57  ;;  %2191 = vmatmul.bf16.gmra.mxu0 %v6824_v63  ;;  %2831 = vmatmul.bf16.gmra.mxu2 %v6952_v0  ;;  %v3426_v9 = vmax.f32 %v2153_v5, 0.0  ;;  %v6827_v2 = vld [vmem:[%s11299_s0 + $0x68] sm:$0xff] }
  0xc3   :  { %8486 = vst [vmem:[%s11302_s3 + $0x408] sm:$0xff] %v7726_v3   ;;  %v5217_v6 = vand.u32 2147483647, %v4961_v4  ;;  %v6955_v3 = vld [vmem:[%s11299_s0 + $0x468] sm:$0xff] }
  0xc4   :  { %v2792_v7 = vpop.f32.mrf.mxu2 }
  0xc5   :  { %v5472_v8 = vadd.f32 %v5471_v61, %v5217_v6  ;;  %v2793_v10 = vadd.f32 %v8774_v24, %v2792_v7 }
  0xc6   :  { %v2154_v11 = vpop.f32.mrf.mxu0 }
  0xc7   :  { %v3682_v12 = vmax.f32 %v2793_v10, 0.0  ;;  %v2155_v13 = vadd.f32 %v8774_v24, %v2154_v11 }
  0xc9   :  { %v4962_v14 = vsub.f32 %v3682_v12, %v3426_v9  ;;  %v3427_v15 = vmax.f32 %v2155_v13, 0.0 }
  0xcb   :  { %v5218_v16 = vand.u32 2147483647, %v4962_v14  ;;  %v7091_v17 = vpack.c.bf16 %v3427_v15, %v3426_v9 }
  0xcc   :  { %v2794_v18 = vpop.f32.mrf.mxu2 }
  0xcd   :  { %v5473_v19 = vadd.f32 %v5472_v8, %v5218_v16  ;;  %8359 = vst [vmem:[%s11302_s3 + $0x10] sm:$0xff] %v7091_v17   ;;  %v2795_v20 = vadd.f32 %v8774_v24, %v2794_v18  ;;  %v7006_v17 = vld [vmem:[%s11299_s0 + $0x600] sm:$0xff] }
  0xce   :  { %v2157_v23 = vpop.f32.mrf.mxu0  ;;  %3101 = vmatmul.bf16.vlgmr.msra.gmra.mxu3 %v7006_v17 }
  0xcf   :  { %v3683_v25 = vmax.f32 %v2795_v20, 0.0  ;;  %v2158_v28 = vadd.f32 %v8774_v24, %v2157_v23 }
  0xd1   :  { %v7731_v26 = vpack.c.bf16 %v3683_v25, %v3682_v12  ;;  %v4963_v27 = vsub.f32 %v3683_v25, %v3427_v15  ;;  %2196 = vmatmul.bf16.gmra.mxu0 %v6825_v21  ;;  %2836 = vmatmul.bf16.gmra.mxu2 %v6953_v22  ;;  %v3428_v32 = vmax.f32 %v2158_v28, 0.0  ;;  %v6878_v28 = vld [vmem:[%s11299_s0 + $0x200] sm:$0xff] }
  0xd2   :  { %2461 = vmatmul.bf16.vlgmr.msra.gmra.mxu1 %v6878_v28 }
  0xd3   :  { %8487 = vst [vmem:[%s11302_s3 + $0x410] sm:$0xff] %v7731_v26   ;;  %v5219_v29 = vand.u32 2147483647, %v4963_v27  ;;  %v6828_v26 = vld [vmem:[%s11299_s0 + $0x70] sm:$0xff] }
  0xd4   :  { %v2797_v30 = vpop.f32.mrf.mxu2  ;;  %v6956_v27 = vld [vmem:[%s11299_s0 + $0x470] sm:$0xff] }
  0xd5   :  { %v5474_v31 = vadd.f32 %v5473_v19, %v5219_v29  ;;  %v2798_v33 = vadd.f32 %v8774_v24, %v2797_v30 }
  0xd6   :  { %v2159_v34 = vpop.f32.mrf.mxu0 }
  0xd7   :  { %v3684_v35 = vmax.f32 %v2798_v33, 0.0  ;;  %v2160_v36 = vadd.f32 %v8774_v24, %v2159_v34 }
  0xd9   :  { %v4964_v37 = vsub.f32 %v3684_v35, %v3428_v32  ;;  %v3429_v38 = vmax.f32 %v2160_v36, 0.0 }
  0xdb   :  { %v5220_v39 = vand.u32 2147483647, %v4964_v37  ;;  %v7096_v40 = vpack.c.bf16 %v3429_v38, %v3428_v32 }
  0xdc   :  { %v2799_v41 = vpop.f32.mrf.mxu2 }
  0xdd   :  { %v5475_v42 = vadd.f32 %v5474_v31, %v5220_v39  ;;  %8360 = vst [vmem:[%s11302_s3 + $0x18] sm:$0xff] %v7096_v40   ;;  %v2800_v43 = vadd.f32 %v8774_v24, %v2799_v41 }
  0xde   :  { %v2162_v46 = vpop.f32.mrf.mxu0 }
  0xdf   :  { %v3685_v47 = vmax.f32 %v2800_v43, 0.0  ;;  %v2163_v50 = vadd.f32 %v8774_v24, %v2162_v46 }
  0xe1   :  { %v7736_v48 = vpack.c.bf16 %v3685_v47, %v3684_v35  ;;  %v4965_v49 = vsub.f32 %v3685_v47, %v3429_v38  ;;  %2201 = vmatmul.bf16.gmra.mxu0 %v6826_v44  ;;  %2841 = vmatmul.bf16.gmra.mxu2 %v6954_v45  ;;  %v3430_v54 = vmax.f32 %v2163_v50, 0.0  ;;  %v6829_v50 = vld [vmem:[%s11299_s0 + $0x78] sm:$0xff] }
  0xe3   :  { %8488 = vst [vmem:[%s11302_s3 + $0x418] sm:$0xff] %v7736_v48   ;;  %v5221_v51 = vand.u32 2147483647, %v4965_v49 }
  0xe4   :  { %v2802_v52 = vpop.f32.mrf.mxu2 }
  0xe5   :  { %v5476_v53 = vadd.f32 %v5475_v42, %v5221_v51  ;;  %v2803_v55 = vadd.f32 %v8774_v24, %v2802_v52  ;;  %v7007_v42 = vld [vmem:[%s11299_s0 + $0x608] sm:$0xff]  ;;  %v6957_v51 = vld [vmem:[%s11299_s0 + $0x478] sm:$0xff] }
  0xe6   :  { %v2164_v56 = vpop.f32.mrf.mxu0  ;;  %3106 = vmatmul.bf16.gmra.mxu3 %v7007_v42  ;;  %v6879_v52 = vld [vmem:[%s11299_s0 + $0x208] sm:$0xff] }
  0xe7   :  { %v3686_v57 = vmax.f32 %v2803_v55, 0.0  ;;  %v2165_v58 = vadd.f32 %v8774_v24, %v2164_v56  ;;  %2466 = vmatmul.bf16.gmra.mxu1 %v6879_v52 }
  0xe9   :  { %v4966_v59 = vsub.f32 %v3686_v57, %v3430_v54  ;;  %v3431_v60 = vmax.f32 %v2165_v58, 0.0 }
  0xeb   :  { %v5222_v61 = vand.u32 2147483647, %v4966_v59  ;;  %v7101_v62 = vpack.c.bf16 %v3431_v60, %v3430_v54 }
  0xec   :  { %v2804_v63 = vpop.f32.mrf.mxu2 }
  0xed   :  { %v5477_v0 = vadd.f32 %v5476_v53, %v5222_v61  ;;  %8361 = vst [vmem:[%s11302_s3 + $0x20] sm:$0xff] %v7101_v62   ;;  %v2805_v1 = vadd.f32 %v8774_v24, %v2804_v63 }
  0xee   :  { %v2167_v4 = vpop.f32.mrf.mxu0 }
  0xef   :  { %v3687_v5 = vmax.f32 %v2805_v1, 0.0  ;;  %v2168_v8 = vadd.f32 %v8774_v24, %v2167_v4 }
  0xf1   :  { %v7741_v6 = vpack.c.bf16 %v3687_v5, %v3686_v57  ;;  %v4967_v7 = vsub.f32 %v3687_v5, %v3431_v60  ;;  %2206 = vmatmul.bf16.gmra.mxu0 %v6827_v2  ;;  %2846 = vmatmul.bf16.gmra.mxu2 %v6955_v3  ;;  %v3432_v12 = vmax.f32 %v2168_v8, 0.0  ;;  %v7008_v2 = vld [vmem:[%s11299_s0 + $0x610] sm:$0xff] }
  0xf3   :  { %8489 = vst [vmem:[%s11302_s3 + $0x420] sm:$0xff] %v7741_v6   ;;  %v5223_v9 = vand.u32 2147483647, %v4967_v7 }
  0xf4   :  { %v2807_v10 = vpop.f32.mrf.mxu2 }
  0xf5   :  { %v5478_v11 = vadd.f32 %v5477_v0, %v5223_v9  ;;  %v2808_v13 = vadd.f32 %v8774_v24, %v2807_v10  ;;  %v6830_v10 = vld [vmem:[%s11299_s0 + $0x80] sm:$0xff] }
  0xf6   :  { %v2169_v14 = vpop.f32.mrf.mxu0  ;;  %3111 = vmatmul.bf16.gmra.mxu3 %v7008_v2 }
  0xf7   :  { %v3688_v15 = vmax.f32 %v2808_v13, 0.0  ;;  %v2170_v16 = vadd.f32 %v8774_v24, %v2169_v14 }
  0xf9   :  { %v4968_v18 = vsub.f32 %v3688_v15, %v3432_v12  ;;  %v3433_v19 = vmax.f32 %v2170_v16, 0.0 }
  0xfb   :  { %v5224_v20 = vand.u32 2147483647, %v4968_v18  ;;  %v7106_v21 = vpack.c.bf16 %v3433_v19, %v3432_v12  ;;  %v6880_v12 = vld [vmem:[%s11299_s0 + $0x210] sm:$0xff] }
  0xfc   :  { %v2809_v22 = vpop.f32.mrf.mxu2  ;;  %2471 = vmatmul.bf16.gmra.mxu1 %v6880_v12 }
  0xfd   :  { %v5479_v23 = vadd.f32 %v5478_v11, %v5224_v20  ;;  %8362 = vst [vmem:[%s11302_s3 + $0x28] sm:$0xff] %v7106_v21   ;;  %v2810_v25 = vadd.f32 %v8774_v24, %v2809_v22  ;;  %v6958_v11 = vld [vmem:[%s11299_s0 + $0x480] sm:$0xff] }
  0xfe   :  { %v2172_v29 = vpop.f32.mrf.mxu0 }
  0xff   :  { %v3689_v30 = vmax.f32 %v2810_v25, 0.0  ;;  %v2173_v33 = vadd.f32 %v8774_v24, %v2172_v29 }
 0x101   :  { %v7746_v31 = vpack.c.bf16 %v3689_v30, %v3688_v15  ;;  %v4969_v32 = vsub.f32 %v3689_v30, %v3433_v19  ;;  %2211 = vmatmul.bf16.gmra.mxu0 %v6828_v26  ;;  %2851 = vmatmul.bf16.gmra.mxu2 %v6956_v27  ;;  %v3434_v37 = vmax.f32 %v2173_v33, 0.0  ;;  %v7009_v27 = vld [vmem:[%s11299_s0 + $0x618] sm:$0xff] }
 0x103   :  { %8490 = vst [vmem:[%s11302_s3 + $0x428] sm:$0xff] %v7746_v31   ;;  %v5225_v34 = vand.u32 2147483647, %v4969_v32 }
 0x104   :  { %v2812_v35 = vpop.f32.mrf.mxu2 }
 0x105   :  { %v5480_v36 = vadd.f32 %v5479_v23, %v5225_v34  ;;  %v2813_v38 = vadd.f32 %v8774_v24, %v2812_v35  ;;  %v6831_v35 = vld [vmem:[%s11299_s0 + $0x88] sm:$0xff] }
 0x106   :  { %v2174_v39 = vpop.f32.mrf.mxu0  ;;  %3116 = vmatmul.bf16.gmra.mxu3 %v7009_v27 }
 0x107   :  { %v3690_v40 = vmax.f32 %v2813_v38, 0.0  ;;  %v2175_v41 = vadd.f32 %v8774_v24, %v2174_v39 }
 0x109   :  { %v4970_v43 = vsub.f32 %v3690_v40, %v3434_v37  ;;  %v3435_v44 = vmax.f32 %v2175_v41, 0.0 }
 0x10b   :  { %v5226_v45 = vand.u32 2147483647, %v4970_v43  ;;  %v7111_v46 = vpack.c.bf16 %v3435_v44, %v3434_v37  ;;  %v6881_v37 = vld [vmem:[%s11299_s0 + $0x218] sm:$0xff] }
 0x10c   :  { %v2814_v47 = vpop.f32.mrf.mxu2  ;;  %2476 = vmatmul.bf16.gmra.mxu1 %v6881_v37 }
 0x10d   :  { %v5481_v48 = vadd.f32 %v5480_v36, %v5226_v45  ;;  %8363 = vst [vmem:[%s11302_s3 + $0x30] sm:$0xff] %v7111_v46   ;;  %v2815_v49 = vadd.f32 %v8774_v24, %v2814_v47  ;;  %v6959_v36 = vld [vmem:[%s11299_s0 + $0x488] sm:$0xff] }
 0x10e   :  { %v2177_v53 = vpop.f32.mrf.mxu0 }
 0x10f   :  { %v3691_v54 = vmax.f32 %v2815_v49, 0.0  ;;  %v2178_v57 = vadd.f32 %v8774_v24, %v2177_v53 }
 0x111   :  { %v7751_v55 = vpack.c.bf16 %v3691_v54, %v3690_v40  ;;  %v4971_v56 = vsub.f32 %v3691_v54, %v3435_v44  ;;  %2216 = vmatmul.bf16.gmra.mxu0 %v6829_v50  ;;  %2856 = vmatmul.bf16.gmra.mxu2 %v6957_v51  ;;  %v3436_v61 = vmax.f32 %v2178_v57, 0.0  ;;  %v7010_v51 = vld [vmem:[%s11299_s0 + $0x620] sm:$0xff] }
 0x113   :  { %8491 = vst [vmem:[%s11302_s3 + $0x430] sm:$0xff] %v7751_v55   ;;  %v5227_v58 = vand.u32 2147483647, %v4971_v56 }
 0x114   :  { %v2817_v59 = vpop.f32.mrf.mxu2 }
 0x115   :  { %v5482_v60 = vadd.f32 %v5481_v48, %v5227_v58  ;;  %v2818_v62 = vadd.f32 %v8774_v24, %v2817_v59  ;;  %v6832_v59 = vld [vmem:[%s11299_s0 + $0x90] sm:$0xff] }
 0x116   :  { %v2179_v63 = vpop.f32.mrf.mxu0  ;;  %3121 = vmatmul.bf16.gmra.mxu3 %v7010_v51 }
 0x117   :  { %v3692_v0 = vmax.f32 %v2818_v62, 0.0  ;;  %v2180_v1 = vadd.f32 %v8774_v24, %v2179_v63 }
 0x119   :  { %v4972_v3 = vsub.f32 %v3692_v0, %v3436_v61  ;;  %v3437_v4 = vmax.f32 %v2180_v1, 0.0 }
 0x11b   :  { %v5228_v5 = vand.u32 2147483647, %v4972_v3  ;;  %v7116_v6 = vpack.c.bf16 %v3437_v4, %v3436_v61  ;;  %v6882_v61 = vld [vmem:[%s11299_s0 + $0x220] sm:$0xff] }
 0x11c   :  { %v2819_v7 = vpop.f32.mrf.mxu2  ;;  %2481 = vmatmul.bf16.gmra.mxu1 %v6882_v61 }
 0x11d   :  { %v5483_v8 = vadd.f32 %v5482_v60, %v5228_v5  ;;  %8364 = vst [vmem:[%s11302_s3 + $0x38] sm:$0xff] %v7116_v6   ;;  %v2820_v9 = vadd.f32 %v8774_v24, %v2819_v7  ;;  %v6960_v60 = vld [vmem:[%s11299_s0 + $0x490] sm:$0xff] }
 0x11e   :  { %v2182_v13 = vpop.f32.mrf.mxu0 }
 0x11f   :  { %v3693_v14 = vmax.f32 %v2820_v9, 0.0  ;;  %v2183_v17 = vadd.f32 %v8774_v24, %v2182_v13 }
 0x121   :  { %v7756_v15 = vpack.c.bf16 %v3693_v14, %v3692_v0  ;;  %v4973_v16 = vsub.f32 %v3693_v14, %v3437_v4  ;;  %2221 = vmatmul.bf16.gmra.mxu0 %v6830_v10  ;;  %2861 = vmatmul.bf16.gmra.mxu2 %v6958_v11  ;;  %v3438_v21 = vmax.f32 %v2183_v17, 0.0  ;;  %v7011_v11 = vld [vmem:[%s11299_s0 + $0x628] sm:$0xff] }
 0x123   :  { %8492 = vst [vmem:[%s11302_s3 + $0x438] sm:$0xff] %v7756_v15   ;;  %v5229_v18 = vand.u32 2147483647, %v4973_v16 }
 0x124   :  { %v2822_v19 = vpop.f32.mrf.mxu2 }
 0x125   :  { %v5484_v20 = vadd.f32 %v5483_v8, %v5229_v18  ;;  %v2823_v22 = vadd.f32 %v8774_v24, %v2822_v19  ;;  %v6833_v19 = vld [vmem:[%s11299_s0 + $0x98] sm:$0xff] }
 0x126   :  { %v2184_v23 = vpop.f32.mrf.mxu0  ;;  %3126 = vmatmul.bf16.gmra.mxu3 %v7011_v11 }
 0x127   :  { %v3694_v25 = vmax.f32 %v2823_v22, 0.0  ;;  %v2185_v26 = vadd.f32 %v8774_v24, %v2184_v23 }
 0x129   :  { %v4974_v28 = vsub.f32 %v3694_v25, %v3438_v21  ;;  %v3439_v29 = vmax.f32 %v2185_v26, 0.0 }
 0x12b   :  { %v5230_v30 = vand.u32 2147483647, %v4974_v28  ;;  %v7121_v31 = vpack.c.bf16 %v3439_v29, %v3438_v21  ;;  %v6883_v21 = vld [vmem:[%s11299_s0 + $0x228] sm:$0xff] }
 0x12c   :  { %v2824_v32 = vpop.f32.mrf.mxu2  ;;  %2486 = vmatmul.bf16.gmra.mxu1 %v6883_v21 }
 0x12d   :  { %v5485_v33 = vadd.f32 %v5484_v20, %v5230_v30  ;;  %8365 = vst [vmem:[%s11302_s3 + $0x40] sm:$0xff] %v7121_v31   ;;  %v2825_v34 = vadd.f32 %v8774_v24, %v2824_v32  ;;  %v6961_v20 = vld [vmem:[%s11299_s0 + $0x498] sm:$0xff] }
 0x12e   :  { %v2187_v38 = vpop.f32.mrf.mxu0 }
 0x12f   :  { %v3695_v39 = vmax.f32 %v2825_v34, 0.0  ;;  %v2188_v42 = vadd.f32 %v8774_v24, %v2187_v38 }
 0x131   :  { %v7761_v40 = vpack.c.bf16 %v3695_v39, %v3694_v25  ;;  %v4975_v41 = vsub.f32 %v3695_v39, %v3439_v29  ;;  %2226 = vmatmul.bf16.gmra.mxu0 %v6831_v35  ;;  %2866 = vmatmul.bf16.gmra.mxu2 %v6959_v36  ;;  %v3440_v46 = vmax.f32 %v2188_v42, 0.0  ;;  %v7012_v36 = vld [vmem:[%s11299_s0 + $0x630] sm:$0xff] }
 0x133   :  { %8493 = vst [vmem:[%s11302_s3 + $0x440] sm:$0xff] %v7761_v40   ;;  %v5231_v43 = vand.u32 2147483647, %v4975_v41 }
 0x134   :  { %v2827_v44 = vpop.f32.mrf.mxu2 }
 0x135   :  { %v5486_v45 = vadd.f32 %v5485_v33, %v5231_v43  ;;  %v2828_v47 = vadd.f32 %v8774_v24, %v2827_v44  ;;  %v6834_v44 = vld [vmem:[%s11299_s0 + $0xa0] sm:$0xff] }
 0x136   :  { %v2189_v48 = vpop.f32.mrf.mxu0  ;;  %3131 = vmatmul.bf16.gmra.mxu3 %v7012_v36 }
 0x137   :  { %v3696_v49 = vmax.f32 %v2828_v47, 0.0  ;;  %v2190_v50 = vadd.f32 %v8774_v24, %v2189_v48 }
 0x139   :  { %v4976_v52 = vsub.f32 %v3696_v49, %v3440_v46  ;;  %v3441_v53 = vmax.f32 %v2190_v50, 0.0 }
 0x13b   :  { %v5232_v54 = vand.u32 2147483647, %v4976_v52  ;;  %v7126_v55 = vpack.c.bf16 %v3441_v53, %v3440_v46  ;;  %v6884_v46 = vld [vmem:[%s11299_s0 + $0x230] sm:$0xff] }
 0x13c   :  { %v2829_v56 = vpop.f32.mrf.mxu2  ;;  %2491 = vmatmul.bf16.gmra.mxu1 %v6884_v46 }
 0x13d   :  { %v5487_v57 = vadd.f32 %v5486_v45, %v5232_v54  ;;  %8366 = vst [vmem:[%s11302_s3 + $0x48] sm:$0xff] %v7126_v55   ;;  %v2830_v58 = vadd.f32 %v8774_v24, %v2829_v56  ;;  %v6962_v45 = vld [vmem:[%s11299_s0 + $0x4a0] sm:$0xff] }
 0x13e   :  { %v2192_v62 = vpop.f32.mrf.mxu0 }
 0x13f   :  { %v3697_v63 = vmax.f32 %v2830_v58, 0.0  ;;  %v2193_v2 = vadd.f32 %v8774_v24, %v2192_v62 }
 0x141   :  { %v7766_v0 = vpack.c.bf16 %v3697_v63, %v3696_v49  ;;  %v4977_v1 = vsub.f32 %v3697_v63, %v3441_v53  ;;  %2231 = vmatmul.bf16.gmra.mxu0 %v6832_v59  ;;  %2871 = vmatmul.bf16.gmra.mxu2 %v6960_v60  ;;  %v3442_v6 = vmax.f32 %v2193_v2, 0.0  ;;  %v7013_v60 = vld [vmem:[%s11299_s0 + $0x638] sm:$0xff] }
 0x143   :  { %8494 = vst [vmem:[%s11302_s3 + $0x448] sm:$0xff] %v7766_v0   ;;  %v5233_v3 = vand.u32 2147483647, %v4977_v1 }
 0x144   :  { %v2832_v4 = vpop.f32.mrf.mxu2 }
 0x145   :  { %v5488_v5 = vadd.f32 %v5487_v57, %v5233_v3  ;;  %v2833_v7 = vadd.f32 %v8774_v24, %v2832_v4  ;;  %v6835_v4 = vld [vmem:[%s11299_s0 + $0xa8] sm:$0xff] }
 0x146   :  { %v2194_v8 = vpop.f32.mrf.mxu0  ;;  %3136 = vmatmul.bf16.gmra.mxu3 %v7013_v60 }
 0x147   :  { %v3698_v9 = vmax.f32 %v2833_v7, 0.0  ;;  %v2195_v10 = vadd.f32 %v8774_v24, %v2194_v8 }
 0x149   :  { %v4978_v12 = vsub.f32 %v3698_v9, %v3442_v6  ;;  %v3443_v13 = vmax.f32 %v2195_v10, 0.0 }
 0x14b   :  { %v5234_v14 = vand.u32 2147483647, %v4978_v12  ;;  %v7131_v15 = vpack.c.bf16 %v3443_v13, %v3442_v6  ;;  %v6885_v6 = vld [vmem:[%s11299_s0 + $0x238] sm:$0xff] }
 0x14c   :  { %v2834_v16 = vpop.f32.mrf.mxu2  ;;  %2496 = vmatmul.bf16.gmra.mxu1 %v6885_v6  ;;  %v6837_v6 = vld [vmem:[%s11299_s0 + $0xb8] sm:$0xff] }
 0x14d   :  { %v5489_v17 = vadd.f32 %v5488_v5, %v5234_v14  ;;  %8367 = vst [vmem:[%s11302_s3 + $0x50] sm:$0xff] %v7131_v15   ;;  %v2835_v18 = vadd.f32 %v8774_v24, %v2834_v16  ;;  %v6963_v5 = vld [vmem:[%s11299_s0 + $0x4a8] sm:$0xff] }
 0x14e   :  { %v2197_v22 = vpop.f32.mrf.mxu0 }
 0x14f   :  { %v3699_v23 = vmax.f32 %v2835_v18, 0.0  ;;  %v2198_v27 = vadd.f32 %v8774_v24, %v2197_v22 }
 0x151   :  { %v7771_v25 = vpack.c.bf16 %v3699_v23, %v3698_v9  ;;  %v4979_v26 = vsub.f32 %v3699_v23, %v3443_v13  ;;  %2236 = vmatmul.bf16.gmra.mxu0 %v6833_v19  ;;  %2876 = vmatmul.bf16.gmra.mxu2 %v6961_v20  ;;  %v3444_v31 = vmax.f32 %v2198_v27, 0.0  ;;  %v7014_v20 = vld [vmem:[%s11299_s0 + $0x640] sm:$0xff]  ;;  %v2462_v27 = vpop.f32.mrf.mxu1 }
 0x153   :  { %8495 = vst [vmem:[%s11302_s3 + $0x450] sm:$0xff] %v7771_v25   ;;  %v5235_v28 = vand.u32 2147483647, %v4979_v26 }
 0x154   :  { %v2837_v29 = vpop.f32.mrf.mxu2 }
 0x155   :  { %v5490_v30 = vadd.f32 %v5489_v17, %v5235_v28  ;;  %v2838_v32 = vadd.f32 %v8774_v24, %v2837_v29 }
 0x156   :  { %v2199_v33 = vpop.f32.mrf.mxu0  ;;  %3141 = vmatmul.bf16.gmra.mxu3 %v7014_v20 }
 0x157   :  { %v3700_v34 = vmax.f32 %v2838_v32, 0.0  ;;  %v2200_v35 = vadd.f32 %v8774_v24, %v2199_v33  ;;  %v3102_v32 = vpop.f32.mrf.mxu3  ;;  %v6886_v33 = vld [vmem:[%s11299_s0 + $0x240] sm:$0xff] }
 0x159   :  { %v4980_v37 = vsub.f32 %v3700_v34, %v3444_v31  ;;  %v3445_v38 = vmax.f32 %v2200_v35, 0.0 }
 0x15b   :  { %v5236_v39 = vand.u32 2147483647, %v4980_v37  ;;  %v7136_v40 = vpack.c.bf16 %v3445_v38, %v3444_v31  ;;  %v6964_v31 = vld [vmem:[%s11299_s0 + $0x4b0] sm:$0xff]  ;;  %v2463_v37 = vadd.f32 %v8774_v24, %v2462_v27 }
 0x15c   :  { %v2839_v41 = vpop.f32.mrf.mxu2  ;;  %2501 = vmatmul.bf16.gmra.mxu1 %v6886_v33  ;;  %v7016_v33 = vld [vmem:[%s11299_s0 + $0x650] sm:$0xff] }
 0x15d   :  { %v5491_v42 = vadd.f32 %v5490_v30, %v5236_v39  ;;  %8368 = vst [vmem:[%s11302_s3 + $0x58] sm:$0xff] %v7136_v40   ;;  %v2840_v43 = vadd.f32 %v8774_v24, %v2839_v41  ;;  %v6836_v30 = vld [vmem:[%s11299_s0 + $0xb0] sm:$0xff] }
 0x15e   :  { %v2202_v47 = vpop.f32.mrf.mxu0 }
 0x15f   :  { %v3701_v48 = vmax.f32 %v2840_v43, 0.0  ;;  %v2203_v51 = vadd.f32 %v8774_v24, %v2202_v47  ;;  %v3550_v43 = vmax.f32 %v2463_v37, 0.0  ;;  %v3103_v47 = vadd.f32 %v8774_v24, %v3102_v32 }
 0x161   :  { %v7776_v49 = vpack.c.bf16 %v3701_v48, %v3700_v34  ;;  %v4981_v50 = vsub.f32 %v3701_v48, %v3445_v38  ;;  %2241 = vmatmul.bf16.gmra.mxu0 %v6834_v44  ;;  %2881 = vmatmul.bf16.gmra.mxu2 %v6962_v45  ;;  %v3446_v55 = vmax.f32 %v2203_v51, 0.0  ;;  %v2464_v44 = vpop.f32.mrf.mxu1 }
 0x162   :  { %v2465_v48 = vadd.f32 %v8774_v24, %v2464_v44 }
 0x163   :  { %8496 = vst [vmem:[%s11302_s3 + $0x458] sm:$0xff] %v7776_v49   ;;  %v5237_v52 = vand.u32 2147483647, %v4981_v50  ;;  %v3104_v49 = vpop.f32.mrf.mxu3 }
 0x164   :  { %v2842_v53 = vpop.f32.mrf.mxu2  ;;  %v3105_v51 = vadd.f32 %v8774_v24, %v3104_v49 }
 0x165   :  { %v5492_v54 = vadd.f32 %v5491_v42, %v5237_v52  ;;  %v2843_v56 = vadd.f32 %v8774_v24, %v2842_v53 }
 0x166   :  { %v2204_v57 = vpop.f32.mrf.mxu0 }
 0x167   :  { %v3702_v58 = vmax.f32 %v2843_v56, 0.0  ;;  %v2205_v59 = vadd.f32 %v8774_v24, %v2204_v57  ;;  %v7015_v56 = vld [vmem:[%s11299_s0 + $0x648] sm:$0xff]  ;;  %v3807_v57 = vmax.f32 %v3105_v51, 0.0 }
 0x168   :  { %3146 = vmatmul.bf16.gmra.mxu3 %v7015_v56 }
 0x169   :  { %v4982_v61 = vsub.f32 %v3702_v58, %v3446_v55  ;;  %v3447_v62 = vmax.f32 %v2205_v59, 0.0 }
 0x16b   :  { %v5238_v63 = vand.u32 2147483647, %v4982_v61  ;;  %v7141_v0 = vpack.c.bf16 %v3447_v62, %v3446_v55  ;;  %v3551_v55 = vmax.f32 %v2465_v48, 0.0  ;;  %v6966_v48 = vld [vmem:[%s11299_s0 + $0x4c0] sm:$0xff] }
 0x16c   :  { %v2844_v1 = vpop.f32.mrf.mxu2 }
 0x16d   :  { %v5493_v2 = vadd.f32 %v5492_v54, %v5238_v63  ;;  %8369 = vst [vmem:[%s11302_s3 + $0x60] sm:$0xff] %v7141_v0   ;;  %v2845_v3 = vadd.f32 %v8774_v24, %v2844_v1  ;;  %v3806_v54 = vmax.f32 %v3103_v47, 0.0  ;;  %v7401_v61 = vpack.c.bf16 %v3551_v55, %v3550_v43  ;;  %v6838_v47 = vld [vmem:[%s11299_s0 + $0xc0] sm:$0xff] }
 0x16e   :  { %v2207_v7 = vpop.f32.mrf.mxu0  ;;  %v9072_v63 = vsub.f32 %v3807_v57, %v3551_v55 }
 0x16f   :  { %v3703_v8 = vmax.f32 %v2845_v3, 0.0  ;;  %v2208_v11 = vadd.f32 %v8774_v24, %v2207_v7  ;;  %v9070_v60 = vsub.f32 %v3806_v54, %v3550_v43  ;;  %8421 = vst [vmem:[%s11302_s3 + $0x200] sm:$0xff] %v7401_v61   ;;  %v2467_v3 = vpop.f32.mrf.mxu1  ;;  %v6965_v7 = vld [vmem:[%s11299_s0 + $0x4b8] sm:$0xff] }
 0x171   :  { %v7781_v9 = vpack.c.bf16 %v3703_v8, %v3702_v58  ;;  %v4983_v10 = vsub.f32 %v3703_v8, %v3447_v62  ;;  %2246 = vmatmul.bf16.gmra.mxu0 %v6835_v4  ;;  %2886 = vmatmul.bf16.gmra.mxu2 %v6963_v5  ;;  %v3448_v15 = vmax.f32 %v2208_v11, 0.0  ;;  %v8041_v62 = vpack.c.bf16 %v3807_v57, %v3806_v54  ;;  %v3107_v8 = vpop.f32.mrf.mxu3 }
 0x173   :  { %8497 = vst [vmem:[%s11302_s3 + $0x460] sm:$0xff] %v7781_v9   ;;  %v5239_v12 = vand.u32 2147483647, %v4983_v10  ;;  %v6887_v9 = vld [vmem:[%s11299_s0 + $0x248] sm:$0xff] }
 0x174   :  { %v2847_v13 = vpop.f32.mrf.mxu2  ;;  %8549 = vst [vmem:[%s11302_s3 + $0x600] sm:$0xff] %v8041_v62   ;;  %2506 = vmatmul.bf16.gmra.mxu1 %v6887_v9 }
 0x175   :  { %v5494_v14 = vadd.f32 %v5493_v2, %v5239_v12  ;;  %v2848_v16 = vadd.f32 %v8774_v24, %v2847_v13  ;;  %v2468_v13 = vadd.f32 %v8774_v24, %v2467_v3 }
 0x176   :  { %v2209_v17 = vpop.f32.mrf.mxu0 }
 0x177   :  { %v3704_v18 = vmax.f32 %v2848_v16, 0.0  ;;  %v2210_v19 = vadd.f32 %v8774_v24, %v2209_v17  ;;  %v2469_v20 = vpop.f32.mrf.mxu1 }
 0x178   :  { %3151 = vmatmul.bf16.gmra.mxu3 %v7016_v33 }
 0x179   :  { %v4984_v21 = vsub.f32 %v3704_v18, %v3448_v15  ;;  %v3449_v22 = vmax.f32 %v2210_v19, 0.0  ;;  %v3552_v19 = vmax.f32 %v2468_v13, 0.0 }
 0x17b   :  { %v5240_v23 = vand.u32 2147483647, %v4984_v21  ;;  %v7146_v25 = vpack.c.bf16 %v3449_v22, %v3448_v15 }
 0x17c   :  { %v2849_v26 = vpop.f32.mrf.mxu2 }
 0x17d   :  { %v5495_v28 = vadd.f32 %v5494_v14, %v5240_v23  ;;  %8370 = vst [vmem:[%s11302_s3 + $0x68] sm:$0xff] %v7146_v25   ;;  %v2850_v29 = vadd.f32 %v8774_v24, %v2849_v26  ;;  %v3108_v23 = vadd.f32 %v8774_v24, %v3107_v8  ;;  %v2470_v25 = vadd.f32 %v8774_v24, %v2469_v20  ;;  %v3109_v26 = vpop.f32.mrf.mxu3 }
 0x17e   :  { %v2212_v34 = vpop.f32.mrf.mxu0 }
 0x17f   :  { %v3705_v35 = vmax.f32 %v2850_v29, 0.0  ;;  %v2213_v36 = vadd.f32 %v8774_v24, %v2212_v34  ;;  %v3553_v32 = vmax.f32 %v2470_v25, 0.0  ;;  %v2472_v44 = vpop.f32.mrf.mxu1 }
 0x180   :  { %v2473_v54 = vadd.f32 %v8774_v24, %v2472_v44 }
 0x181   :  { %v7786_v38 = vpack.c.bf16 %v3705_v35, %v3704_v18  ;;  %v4985_v39 = vsub.f32 %v3705_v35, %v3449_v22  ;;  %2251 = vmatmul.bf16.gmra.mxu0 %v6836_v30  ;;  %2891 = vmatmul.bf16.gmra.mxu2 %v6964_v31  ;;  %v3450_v41 = vmax.f32 %v2213_v36, 0.0  ;;  %v3808_v31 = vmax.f32 %v3108_v23, 0.0 }
 0x182   :  { %v3554_v61 = vmax.f32 %v2473_v54, 0.0  ;;  %v7018_v54 = vld [vmem:[%s11299_s0 + $0x660] sm:$0xff] }
 0x183   :  { %8498 = vst [vmem:[%s11302_s3 + $0x468] sm:$0xff] %v7786_v38   ;;  %v5241_v40 = vand.u32 2147483647, %v4985_v39  ;;  %v9106_v37 = vsub.f32 %v3808_v31, %v3552_v19  ;;  %v7406_v38 = vpack.c.bf16 %v3553_v32, %v3552_v19 }
 0x184   :  { %v2852_v42 = vpop.f32.mrf.mxu2 }
 0x185   :  { %v5496_v45 = vadd.f32 %v5495_v28, %v5241_v40  ;;  %v2853_v46 = vadd.f32 %v8774_v24, %v2852_v42  ;;  %v3110_v28 = vadd.f32 %v8774_v24, %v3109_v26  ;;  %8422 = vst [vmem:[%s11302_s3 + $0x208] sm:$0xff] %v7406_v38   ;;  %v3112_v49 = vpop.f32.mrf.mxu3  ;;  %v6839_v26 = vld [vmem:[%s11299_s0 + $0xc8] sm:$0xff] }
 0x186   :  { %v2214_v50 = vpop.f32.mrf.mxu0 }
 0x187   :  { %v3706_v52 = vmax.f32 %v2853_v46, 0.0  ;;  %v2215_v53 = vadd.f32 %v8774_v24, %v2214_v50  ;;  %v3809_v34 = vmax.f32 %v3110_v28, 0.0  ;;  %v6888_v50 = vld [vmem:[%s11299_s0 + $0x250] sm:$0xff]  ;;  %v2474_v62 = vpop.f32.mrf.mxu1 }
 0x188   :  { %2511 = vmatmul.bf16.gmra.mxu1 %v6888_v50  ;;  %v2475_v3 = vadd.f32 %v8774_v24, %v2474_v62 }
 0x189   :  { %v4986_v58 = vsub.f32 %v3706_v52, %v3450_v41  ;;  %v3451_v59 = vmax.f32 %v2215_v53, 0.0  ;;  %v8046_v39 = vpack.c.bf16 %v3809_v34, %v3808_v31  ;;  %v9108_v40 = vsub.f32 %v3809_v34, %v3553_v32 }
 0x18b   :  { %v5242_v0 = vand.u32 2147483647, %v4986_v58  ;;  %v7151_v1 = vpack.c.bf16 %v3451_v59, %v3450_v41  ;;  %8550 = vst [vmem:[%s11302_s3 + $0x608] sm:$0xff] %v8046_v39  }
 0x18c   :  { %v2854_v2 = vpop.f32.mrf.mxu2 }
 0x18d   :  { %v5497_v4 = vadd.f32 %v5496_v45, %v5242_v0  ;;  %8371 = vst [vmem:[%s11302_s3 + $0x70] sm:$0xff] %v7151_v1   ;;  %v2855_v5 = vadd.f32 %v8774_v24, %v2854_v2  ;;  %v3113_v2 = vadd.f32 %v8774_v24, %v3112_v49 }
 0x18e   :  { %v2217_v10 = vpop.f32.mrf.mxu0 }
 0x18f   :  { %v3707_v11 = vmax.f32 %v2855_v5, 0.0  ;;  %v2218_v12 = vadd.f32 %v8774_v24, %v2217_v10  ;;  %v3810_v10 = vmax.f32 %v3113_v2, 0.0 }
 0x191   :  { %v7791_v14 = vpack.c.bf16 %v3707_v11, %v3706_v52  ;;  %v4987_v15 = vsub.f32 %v3707_v11, %v3451_v59  ;;  %2256 = vmatmul.bf16.gmra.mxu0 %v6837_v6  ;;  %2896 = vmatmul.bf16.gmra.mxu2 %v6965_v7  ;;  %v3452_v17 = vmax.f32 %v2218_v12, 0.0  ;;  %v9140_v6 = vld [vmem:[%s11301_s2] ss:$0 sm:$0xff]  ;;  %v3555_v11 = vmax.f32 %v2475_v3, 0.0  ;;  %v7017_v12 = vld [vmem:[%s11299_s0 + $0x658] sm:$0xff] }
 0x192   :  { %3156 = vmatmul.bf16.gmra.mxu3 %v7017_v12 }
 0x193   :  { %8499 = vst [vmem:[%s11302_s3 + $0x470] sm:$0xff] %v7791_v14   ;;  %v5243_v16 = vand.u32 2147483647, %v4987_v15  ;;  %v9147_v15 = vsub.f32 %v3810_v10, %v3554_v61 }
 0x194   :  { %v2857_v18 = vpop.f32.mrf.mxu2 }
 0x195   :  { %v5498_v21 = vadd.f32 %v5497_v4, %v5243_v16  ;;  %v2858_v22 = vadd.f32 %v8774_v24, %v2857_v18  ;;  %v3114_v4 = vpop.f32.mrf.mxu3  ;;  %v7411_v16 = vpack.c.bf16 %v3555_v11, %v3554_v61 }
 0x196   :  { %v2219_v27 = vpop.f32.mrf.mxu0  ;;  %v3115_v7 = vadd.f32 %v9140_v6, %v3114_v4 }
 0x197   :  { %v3708_v29 = vmax.f32 %v2858_v22, 0.0  ;;  %v2220_v30 = vadd.f32 %v8774_v24, %v2219_v27  ;;  %8423 = vst [vmem:[%s11302_s3 + $0x210] sm:$0xff] %v7411_v16   ;;  %v2477_v22 = vpop.f32.mrf.mxu1  ;;  %v6967_v27 = vld [vmem:[%s11299_s0 + $0x4c8] sm:$0xff] }
 0x198   :  { %v3811_v13 = vmax.f32 %v3115_v7, 0.0  ;;  %v2478_v33 = vadd.f32 %v9140_v6, %v2477_v22  ;;  %v6840_v7 = vld [vmem:[%s11299_s0 + $0xd0] sm:$0xff] }
 0x199   :  { %v4988_v35 = vsub.f32 %v3708_v29, %v3452_v17  ;;  %v3453_v36 = vmax.f32 %v2220_v30, 0.0 }
 0x19a   :  { %v9149_v18 = vsub.f32 %v3811_v13, %v3555_v11 }
 0x19b   :  { %v5244_v41 = vand.u32 2147483647, %v4988_v35  ;;  %v7156_v42 = vpack.c.bf16 %v3453_v36, %v3452_v17  ;;  %v8051_v17 = vpack.c.bf16 %v3811_v13, %v3810_v10  ;;  %v6890_v10 = vld [vmem:[%s11299_s0 + $0x260] sm:$0xff] }
 0x19c   :  { %v2859_v43 = vpop.f32.mrf.mxu2 }
 0x19d   :  { %v5499_v45 = vadd.f32 %v5498_v21, %v5244_v41  ;;  %8372 = vst [vmem:[%s11302_s3 + $0x78] sm:$0xff] %v7156_v42   ;;  %v2860_v46 = vadd.f32 %v8774_v24, %v2859_v43  ;;  %v3117_v28 = vpop.f32.mrf.mxu3  ;;  %v3556_v41 = vmax.f32 %v2478_v33, 0.0 }
 0x19e   :  { %v2222_v51 = vpop.f32.mrf.mxu0  ;;  %8551 = vst [vmem:[%s11302_s3 + $0x610] sm:$0xff] %v8051_v17  }
 0x19f   :  { %v3709_v52 = vmax.f32 %v2860_v46, 0.0  ;;  %v2223_v53 = vadd.f32 %v8774_v24, %v2222_v51  ;;  %v2479_v42 = vpop.f32.mrf.mxu1 }
 0x1a0   :  { %v2480_v46 = vadd.f32 %v9140_v6, %v2479_v42 }
 0x1a1   :  { %v7796_v55 = vpack.c.bf16 %v3709_v52, %v3708_v29  ;;  %v4989_v56 = vsub.f32 %v3709_v52, %v3453_v36  ;;  %2261 = vmatmul.bf16.gmra.mxu0 %v6838_v47  ;;  %2901 = vmatmul.bf16.gmra.mxu2 %v6966_v48  ;;  %v3454_v58 = vmax.f32 %v2223_v53, 0.0  ;;  %v6889_v29 = vld [vmem:[%s11299_s0 + $0x258] sm:$0xff] }
 0x1a2   :  { %2516 = vmatmul.bf16.gmra.mxu1 %v6889_v29  ;;  %v3557_v53 = vmax.f32 %v2480_v46, 0.0  ;;  %3161 = vmatmul.bf16.gmra.mxu3 %v7018_v54  ;;  %v6891_v54 = vld [vmem:[%s11299_s0 + $0x268] sm:$0xff] }
 0x1a3   :  { %8500 = vst [vmem:[%s11302_s3 + $0x478] sm:$0xff] %v7796_v55   ;;  %v5245_v57 = vand.u32 2147483647, %v4989_v56 }
 0x1a4   :  { %v2862_v59 = vpop.f32.mrf.mxu2 }
 0x1a5   :  { %v5500_v0 = vadd.f32 %v5499_v45, %v5245_v57  ;;  %v2863_v1 = vadd.f32 %v8774_v24, %v2862_v59  ;;  %v3118_v45 = vadd.f32 %v9140_v6, %v3117_v28  ;;  %v3119_v47 = vpop.f32.mrf.mxu3  ;;  %v7416_v59 = vpack.c.bf16 %v3557_v53, %v3556_v41 }
 0x1a6   :  { %v2224_v5 = vpop.f32.mrf.mxu0  ;;  %v3120_v49 = vadd.f32 %v9140_v6, %v3119_v47 }
 0x1a7   :  { %v3710_v8 = vmax.f32 %v2863_v1, 0.0  ;;  %v2225_v9 = vadd.f32 %v9140_v6, %v2224_v5  ;;  %v3812_v52 = vmax.f32 %v3118_v45, 0.0  ;;  %8424 = vst [vmem:[%s11302_s3 + $0x218] sm:$0xff] %v7416_v59   ;;  %v2482_v3 = vpop.f32.mrf.mxu1 }
 0x1a8   :  { %v3813_v55 = vmax.f32 %v3120_v49, 0.0 }
 0x1a9   :  { %v4990_v24 = vsub.f32 %v3710_v8, %v3454_v58  ;;  %v3455_v14 = vmax.f32 %v2225_v9, 0.0 }
 0x1aa   :  { %v8056_v61 = vpack.c.bf16 %v3813_v55, %v3812_v52  ;;  %v9185_v62 = vsub.f32 %v3813_v55, %v3557_v53 }
 0x1ab   :  { %v5246_v19 = vand.u32 2147483647, %v4990_v24  ;;  %v7161_v20 = vpack.c.bf16 %v3455_v14, %v3454_v58  ;;  %v9183_v58 = vsub.f32 %v3812_v52, %v3556_v41  ;;  %v2483_v24 = vadd.f32 %v9140_v6, %v2482_v3  ;;  %v6969_v52 = vld [vmem:[%s11299_s0 + $0x4d8] sm:$0xff] }
 0x1ac   :  { %v2864_v21 = vpop.f32.mrf.mxu2  ;;  %8552 = vst [vmem:[%s11302_s3 + $0x618] sm:$0xff] %v8056_v61  }
 0x1ad   :  { %v5501_v23 = vadd.f32 %v5500_v0, %v5246_v19  ;;  %8373 = vst [vmem:[%s11302_s3 + $0x80] sm:$0xff] %v7161_v20   ;;  %v2865_v25 = vadd.f32 %v9140_v6, %v2864_v21  ;;  %v3122_v9 = vpop.f32.mrf.mxu3  ;;  %v3558_v21 = vmax.f32 %v2483_v24, 0.0 }
 0x1ae   :  { %v2227_v30 = vpop.f32.mrf.mxu0 }
 0x1af   :  { %v3711_v31 = vmax.f32 %v2865_v25, 0.0  ;;  %v2228_v32 = vadd.f32 %v9140_v6, %v2227_v30  ;;  %v2484_v22 = vpop.f32.mrf.mxu1 }
 0x1b1   :  { %v7801_v34 = vpack.c.bf16 %v3711_v31, %v3710_v8  ;;  %v4991_v35 = vsub.f32 %v3711_v31, %v3455_v14  ;;  %2266 = vmatmul.bf16.gmra.mxu0 %v6839_v26  ;;  %2906 = vmatmul.bf16.gmra.mxu2 %v6967_v27  ;;  %v3456_v38 = vmax.f32 %v2228_v32, 0.0  ;;  %v6968_v8 = vld [vmem:[%s11299_s0 + $0x4d0] sm:$0xff]  ;;  %v3123_v26 = vadd.f32 %v9140_v6, %v3122_v9 }
 0x1b2   :  { %2521 = vmatmul.bf16.gmra.mxu1 %v6890_v10  ;;  %v2485_v27 = vadd.f32 %v9140_v6, %v2484_v22 }
 0x1b3   :  { %8501 = vst [vmem:[%s11302_s3 + $0x480] sm:$0xff] %v7801_v34   ;;  %v5247_v36 = vand.u32 2147483647, %v4991_v35  ;;  %v3814_v33 = vmax.f32 %v3123_v26, 0.0  ;;  %v7019_v35 = vld [vmem:[%s11299_s0 + $0x668] sm:$0xff] }
 0x1b4   :  { %v2867_v39 = vpop.f32.mrf.mxu2  ;;  %v3559_v34 = vmax.f32 %v2485_v27, 0.0  ;;  %3166 = vmatmul.bf16.gmra.mxu3 %v7019_v35  ;;  %v6970_v35 = vld [vmem:[%s11299_s0 + $0x4e0] sm:$0xff] }
 0x1b5   :  { %v5502_v43 = vadd.f32 %v5501_v23, %v5247_v36  ;;  %v2868_v44 = vadd.f32 %v9140_v6, %v2867_v39  ;;  %v3124_v28 = vpop.f32.mrf.mxu3  ;;  %v9219_v41 = vsub.f32 %v3814_v33, %v3558_v21 }
 0x1b6   :  { %v2229_v48 = vpop.f32.mrf.mxu0  ;;  %v3125_v30 = vadd.f32 %v9140_v6, %v3124_v28  ;;  %v7421_v42 = vpack.c.bf16 %v3559_v34, %v3558_v21 }
 0x1b7   :  { %v3712_v50 = vmax.f32 %v2868_v44, 0.0  ;;  %v2230_v51 = vadd.f32 %v9140_v6, %v2229_v48  ;;  %v2487_v48 = vpop.f32.mrf.mxu1 }
 0x1b8   :  { %v3815_v36 = vmax.f32 %v3125_v30, 0.0  ;;  %8425 = vst [vmem:[%s11302_s3 + $0x220] sm:$0xff] %v7421_v42   ;;  %v2488_v59 = vadd.f32 %v9140_v6, %v2487_v48 }
 0x1b9   :  { %v4992_v56 = vsub.f32 %v3712_v50, %v3456_v38  ;;  %v3457_v57 = vmax.f32 %v2230_v51, 0.0  ;;  %v6841_v51 = vld [vmem:[%s11299_s0 + $0xd8] sm:$0xff] }
 0x1ba   :  { %v9221_v44 = vsub.f32 %v3815_v36, %v3559_v34  ;;  %v6842_v34 = vld [vmem:[%s11299_s0 + $0xe0] sm:$0xff] }
 0x1bb   :  { %v5248_v0 = vand.u32 2147483647, %v4992_v56  ;;  %v7166_v1 = vpack.c.bf16 %v3457_v57, %v3456_v38 }
 0x1bc   :  { %v2869_v2 = vpop.f32.mrf.mxu2 }
 0x1bd   :  { %v5503_v4 = vadd.f32 %v5502_v43, %v5248_v0  ;;  %8374 = vst [vmem:[%s11302_s3 + $0x88] sm:$0xff] %v7166_v1   ;;  %v2870_v5 = vadd.f32 %v9140_v6, %v2869_v2  ;;  %v8061_v43 = vpack.c.bf16 %v3815_v36, %v3814_v33  ;;  %v3127_v53 = vpop.f32.mrf.mxu3 }
 0x1be   :  { %v2232_v11 = vpop.f32.mrf.mxu0  ;;  %v3128_v9 = vadd.f32 %v9140_v6, %v3127_v53 }
 0x1bf   :  { %v3713_v12 = vmax.f32 %v2870_v5, 0.0  ;;  %v2233_v13 = vadd.f32 %v9140_v6, %v2232_v11  ;;  %8553 = vst [vmem:[%s11302_s3 + $0x620] sm:$0xff] %v8061_v43   ;;  %v2489_v5 = vpop.f32.mrf.mxu1 }
 0x1c0   :  { %v2490_v10 = vadd.f32 %v9140_v6, %v2489_v5 }
 0x1c1   :  { %v7806_v14 = vpack.c.bf16 %v3713_v12, %v3712_v50  ;;  %v4993_v16 = vsub.f32 %v3713_v12, %v3457_v57  ;;  %2271 = vmatmul.bf16.gmra.mxu0 %v6840_v7  ;;  %2911 = vmatmul.bf16.gmra.mxu2 %v6968_v8  ;;  %v3458_v19 = vmax.f32 %v2233_v13, 0.0 }
 0x1c2   :  { %2526 = vmatmul.bf16.gmra.mxu1 %v6891_v54 }
 0x1c3   :  { %8502 = vst [vmem:[%s11302_s3 + $0x488] sm:$0xff] %v7806_v14   ;;  %v5249_v17 = vand.u32 2147483647, %v4993_v16  ;;  %v3816_v16 = vmax.f32 %v3128_v9, 0.0 }
 0x1c4   :  { %v2872_v20 = vpop.f32.mrf.mxu2 }
 0x1c5   :  { %v5504_v23 = vadd.f32 %v5503_v4, %v5249_v17  ;;  %v2873_v25 = vadd.f32 %v9140_v6, %v2872_v20  ;;  %v3560_v4 = vmax.f32 %v2488_v59, 0.0  ;;  %v3129_v11 = vpop.f32.mrf.mxu3  ;;  %v3561_v17 = vmax.f32 %v2490_v10, 0.0 }
 0x1c6   :  { %v2234_v29 = vpop.f32.mrf.mxu0  ;;  %v3130_v13 = vadd.f32 %v9140_v6, %v3129_v11 }
 0x1c7   :  { %v3714_v31 = vmax.f32 %v2873_v25, 0.0  ;;  %v2235_v32 = vadd.f32 %v9140_v6, %v2234_v29  ;;  %v7426_v25 = vpack.c.bf16 %v3561_v17, %v3560_v4 }
 0x1c8   :  { %v3817_v20 = vmax.f32 %v3130_v13, 0.0 }
 0x1c9   :  { %v4994_v38 = vsub.f32 %v3714_v31, %v3458_v19  ;;  %v3459_v39 = vmax.f32 %v2235_v32, 0.0  ;;  %8426 = vst [vmem:[%s11302_s3 + $0x228] sm:$0xff] %v7426_v25   ;;  %v6893_v25 = vld [vmem:[%s11299_s0 + $0x278] sm:$0xff] }
 0x1ca   :  { %v8066_v26 = vpack.c.bf16 %v3817_v20, %v3816_v16  ;;  %v9257_v27 = vsub.f32 %v3817_v20, %v3561_v17  ;;  %v6843_v20 = vld [vmem:[%s11299_s0 + $0xe8] sm:$0xff] }
 0x1cb   :  { %v5250_v45 = vand.u32 2147483647, %v4994_v38  ;;  %v7171_v46 = vpack.c.bf16 %v3459_v39, %v3458_v19  ;;  %v7020_v19 = vld [vmem:[%s11299_s0 + $0x670] sm:$0xff] }
 0x1cc   :  { %v2874_v47 = vpop.f32.mrf.mxu2  ;;  %3171 = vmatmul.bf16.gmra.mxu3 %v7020_v19  ;;  %8554 = vst [vmem:[%s11302_s3 + $0x628] sm:$0xff] %v8066_v26   ;;  %v6892_v38 = vld [vmem:[%s11299_s0 + $0x270] sm:$0xff] }
 0x1cd   :  { %v5505_v49 = vadd.f32 %v5504_v23, %v5250_v45  ;;  %8375 = vst [vmem:[%s11302_s3 + $0x90] sm:$0xff] %v7171_v46   ;;  %v2875_v50 = vadd.f32 %v9140_v6, %v2874_v47  ;;  %v9255_v23 = vsub.f32 %v3816_v16, %v3560_v4  ;;  %v3132_v36 = vpop.f32.mrf.mxu3  ;;  %v7021_v4 = vld [vmem:[%s11299_s0 + $0x678] sm:$0xff] }
 0x1ce   :  { %v2237_v55 = vpop.f32.mrf.mxu0 }
 0x1cf   :  { %v3715_v56 = vmax.f32 %v2875_v50, 0.0  ;;  %v2238_v57 = vadd.f32 %v9140_v6, %v2237_v55  ;;  %v3133_v55 = vadd.f32 %v9140_v6, %v3132_v36 }
 0x1d1   :  { %v7811_v61 = vpack.c.bf16 %v3715_v56, %v3714_v31  ;;  %v4995_v0 = vsub.f32 %v3715_v56, %v3459_v39  ;;  %2276 = vmatmul.bf16.gmra.mxu0 %v6841_v51  ;;  %2916 = vmatmul.bf16.gmra.mxu2 %v6969_v52  ;;  %v3460_v2 = vmax.f32 %v2238_v57, 0.0  ;;  %v2492_v31 = vpop.f32.mrf.mxu1 }
 0x1d2   :  { %2531 = vmatmul.bf16.gmra.mxu1 %v6892_v38  ;;  %v2493_v45 = vadd.f32 %v9140_v6, %v2492_v31 }
 0x1d3   :  { %8503 = vst [vmem:[%s11302_s3 + $0x490] sm:$0xff] %v7811_v61   ;;  %v5251_v1 = vand.u32 2147483647, %v4995_v0 }
 0x1d4   :  { %v2877_v3 = vpop.f32.mrf.mxu2  ;;  %v3562_v51 = vmax.f32 %v2493_v45, 0.0 }
 0x1d5   :  { %v5506_v7 = vadd.f32 %v5505_v49, %v5251_v1  ;;  %v2878_v8 = vadd.f32 %v9140_v6, %v2877_v3  ;;  %v3134_v57 = vpop.f32.mrf.mxu3 }
 0x1d6   :  { %v2239_v12 = vpop.f32.mrf.mxu0  ;;  %v3135_v61 = vadd.f32 %v9140_v6, %v3134_v57 }
 0x1d7   :  { %v3716_v24 = vmax.f32 %v2878_v8, 0.0  ;;  %v2240_v14 = vadd.f32 %v9140_v6, %v2239_v12 }
 0x1d8   :  { %v3819_v5 = vmax.f32 %v3135_v61, 0.0 }
 0x1d9   :  { %v4996_v21 = vsub.f32 %v3716_v24, %v3460_v2  ;;  %v3461_v22 = vmax.f32 %v2240_v14, 0.0  ;;  %v2494_v52 = vpop.f32.mrf.mxu1 }
 0x1da   :  { %v2495_v56 = vadd.f32 %v9140_v6, %v2494_v52 }
 0x1db   :  { %v5252_v28 = vand.u32 2147483647, %v4996_v21  ;;  %v7176_v29 = vpack.c.bf16 %v3461_v22, %v3460_v2  ;;  %v3818_v2 = vmax.f32 %v3133_v55, 0.0  ;;  %v6971_v21 = vld [vmem:[%s11299_s0 + $0x4e8] sm:$0xff] }
 0x1dc   :  { %v2879_v30 = vpop.f32.mrf.mxu2  ;;  %v3563_v3 = vmax.f32 %v2495_v56, 0.0  ;;  %3176 = vmatmul.bf16.gmra.mxu3 %v7021_v4 }
 0x1dd   :  { %v5507_v32 = vadd.f32 %v5506_v7, %v5252_v28  ;;  %8376 = vst [vmem:[%s11302_s3 + $0x98] sm:$0xff] %v7176_v29   ;;  %v2880_v33 = vadd.f32 %v9140_v6, %v2879_v30  ;;  %v9291_v9 = vsub.f32 %v3818_v2, %v3562_v51  ;;  %v8071_v11 = vpack.c.bf16 %v3819_v5, %v3818_v2 }
 0x1de   :  { %v2242_v39 = vpop.f32.mrf.mxu0  ;;  %v7431_v10 = vpack.c.bf16 %v3563_v3, %v3562_v51  ;;  %v9293_v12 = vsub.f32 %v3819_v5, %v3563_v3 }
 0x1df   :  { %v3717_v42 = vmax.f32 %v2880_v33, 0.0  ;;  %v2243_v43 = vadd.f32 %v9140_v6, %v2242_v39  ;;  %8555 = vst [vmem:[%s11302_s3 + $0x630] sm:$0xff] %v8071_v11  }
 0x1e0   :  { %8427 = vst [vmem:[%s11302_s3 + $0x230] sm:$0xff] %v7431_v10   ;;  %v6972_v10 = vld [vmem:[%s11299_s0 + $0x4f0] sm:$0xff] }
 0x1e1   :  { %v7816_v46 = vpack.c.bf16 %v3717_v42, %v3716_v24  ;;  %v4997_v47 = vsub.f32 %v3717_v42, %v3461_v22  ;;  %2281 = vmatmul.bf16.gmra.mxu0 %v6842_v34  ;;  %2921 = vmatmul.bf16.gmra.mxu2 %v6970_v35  ;;  %v3462_v49 = vmax.f32 %v2243_v43, 0.0  ;;  %v2497_v16 = vpop.f32.mrf.mxu1  ;;  %v3137_v22 = vpop.f32.mrf.mxu3 }
 0x1e2   :  { %2536 = vmatmul.bf16.gmra.mxu1 %v6893_v25  ;;  %v2498_v30 = vadd.f32 %v9140_v6, %v2497_v16  ;;  %v3138_v43 = vadd.f32 %v9140_v6, %v3137_v22 }
 0x1e3   :  { %8504 = vst [vmem:[%s11302_s3 + $0x498] sm:$0xff] %v7816_v46   ;;  %v5253_v48 = vand.u32 2147483647, %v4997_v47 }
 0x1e4   :  { %v2882_v50 = vpop.f32.mrf.mxu2  ;;  %v3564_v36 = vmax.f32 %v2498_v30, 0.0  ;;  %v3820_v51 = vmax.f32 %v3138_v43, 0.0  ;;  %v7023_v43 = vld [vmem:[%s11299_s0 + $0x688] sm:$0xff] }
 0x1e5   :  { %v5508_v53 = vadd.f32 %v5507_v32, %v5253_v48  ;;  %v2883_v54 = vadd.f32 %v9140_v6, %v2882_v50 }
 0x1e6   :  { %v2244_v59 = vpop.f32.mrf.mxu0  ;;  %v9327_v57 = vsub.f32 %v3820_v51, %v3564_v36 }
 0x1e7   :  { %v3718_v0 = vmax.f32 %v2883_v54, 0.0  ;;  %v2245_v1 = vadd.f32 %v9140_v6, %v2244_v59 }
 0x1e9   :  { %v4998_v7 = vsub.f32 %v3718_v0, %v3462_v49  ;;  %v3463_v8 = vmax.f32 %v2245_v1, 0.0  ;;  %v2499_v38 = vpop.f32.mrf.mxu1  ;;  %v3139_v46 = vpop.f32.mrf.mxu3 }
 0x1ea   :  { %v2500_v45 = vadd.f32 %v9140_v6, %v2499_v38  ;;  %v3140_v48 = vadd.f32 %v9140_v6, %v3139_v46 }
 0x1eb   :  { %v5254_v13 = vand.u32 2147483647, %v4998_v7  ;;  %v7181_v24 = vpack.c.bf16 %v3463_v8, %v3462_v49 }
 0x1ec   :  { %v2884_v14 = vpop.f32.mrf.mxu2  ;;  %v3565_v52 = vmax.f32 %v2500_v45, 0.0  ;;  %v3821_v54 = vmax.f32 %v3140_v48, 0.0 }
 0x1ed   :  { %v5509_v17 = vadd.f32 %v5508_v53, %v5254_v13  ;;  %8377 = vst [vmem:[%s11302_s3 + $0xa0] sm:$0xff] %v7181_v24   ;;  %v2885_v19 = vadd.f32 %v9140_v6, %v2884_v14  ;;  %v7022_v53 = vld [vmem:[%s11299_s0 + $0x680] sm:$0xff] }
 0x1ee   :  { %v2247_v26 = vpop.f32.mrf.mxu0  ;;  %v7436_v59 = vpack.c.bf16 %v3565_v52, %v3564_v36  ;;  %3181 = vmatmul.bf16.gmra.mxu3 %v7022_v53  ;;  %v8076_v61 = vpack.c.bf16 %v3821_v54, %v3820_v51  ;;  %v6894_v13 = vld [vmem:[%s11299_s0 + $0x280] sm:$0xff] }
 0x1ef   :  { %v3719_v28 = vmax.f32 %v2885_v19, 0.0  ;;  %v2248_v29 = vadd.f32 %v9140_v6, %v2247_v26 }
 0x1f0   :  { %8428 = vst [vmem:[%s11302_s3 + $0x238] sm:$0xff] %v7436_v59  }
 0x1f1   :  { %v7821_v31 = vpack.c.bf16 %v3719_v28, %v3718_v0  ;;  %v4999_v32 = vsub.f32 %v3719_v28, %v3463_v8  ;;  %2286 = vmatmul.bf16.gmra.mxu0 %v6843_v20  ;;  %2926 = vmatmul.bf16.gmra.mxu2 %v6971_v21  ;;  %v3464_v34 = vmax.f32 %v2248_v29, 0.0  ;;  %v9329_v0 = vsub.f32 %v3821_v54, %v3565_v52  ;;  %v2502_v4 = vpop.f32.mrf.mxu1  ;;  %v6844_v8 = vld [vmem:[%s11299_s0 + $0xf0] sm:$0xff]  ;;  %v3142_v11 = vpop.f32.mrf.mxu3 }
 0x1f2   :  { %8556 = vst [vmem:[%s11302_s3 + $0x638] sm:$0xff] %v8076_v61   ;;  %2541 = vmatmul.bf16.gmra.mxu1 %v6894_v13  ;;  %v6845_v61 = vld [vmem:[%s11299_s0 + $0xf8] sm:$0xff] }
 0x1f3   :  { %8505 = vst [vmem:[%s11302_s3 + $0x4a0] sm:$0xff] %v7821_v31   ;;  %v5255_v33 = vand.u32 2147483647, %v4999_v32  ;;  %v3143_v31 = vadd.f32 %v9140_v6, %v3142_v11 }
 0x1f4   :  { %v2887_v35 = vpop.f32.mrf.mxu2 }
 0x1f5   :  { %v5510_v39 = vadd.f32 %v5509_v17, %v5255_v33  ;;  %v2888_v42 = vadd.f32 %v9140_v6, %v2887_v35  ;;  %v2503_v17 = vadd.f32 %v9140_v6, %v2502_v4 }
 0x1f6   :  { %v2249_v47 = vpop.f32.mrf.mxu0 }
 0x1f7   :  { %v3720_v49 = vmax.f32 %v2888_v42, 0.0  ;;  %v2250_v50 = vadd.f32 %v9140_v6, %v2249_v47  ;;  %v3566_v26 = vmax.f32 %v2503_v17, 0.0 }
 0x1f9   :  { %v5000_v55 = vsub.f32 %v3720_v49, %v3464_v34  ;;  %v3465_v56 = vmax.f32 %v2250_v50, 0.0  ;;  %v2504_v28 = vpop.f32.mrf.mxu1  ;;  %v3144_v33 = vpop.f32.mrf.mxu3 }
 0x1fa   :  { %v2505_v32 = vadd.f32 %v9140_v6, %v2504_v28  ;;  %v3145_v35 = vadd.f32 %v9140_v6, %v3144_v33  ;;  %v7024_v33 = vld [vmem:[%s11299_s0 + $0x690] sm:$0xff] }
 0x1fb   :  { %v5256_v1 = vand.u32 2147483647, %v5000_v55  ;;  %v7186_v2 = vpack.c.bf16 %v3465_v56, %v3464_v34 }
 0x1fc   :  { %v2889_v3 = vpop.f32.mrf.mxu2  ;;  %v3567_v42 = vmax.f32 %v2505_v32, 0.0  ;;  %v3823_v45 = vmax.f32 %v3145_v35, 0.0 }
 0x1fd   :  { %v5511_v5 = vadd.f32 %v5510_v39, %v5256_v1  ;;  %8378 = vst [vmem:[%s11302_s3 + $0xa8] sm:$0xff] %v7186_v2   ;;  %v2890_v7 = vadd.f32 %v9140_v6, %v2889_v3  ;;  %v3822_v39 = vmax.f32 %v3143_v31, 0.0  ;;  %v6973_v1 = vld [vmem:[%s11299_s0 + $0x4f8] sm:$0xff]  ;;  %v6895_v3 = vld [vmem:[%s11299_s0 + $0x288] sm:$0xff] }
 0x1fe   :  { %v2252_v24 = vpop.f32.mrf.mxu0  ;;  %3186 = vmatmul.bf16.gmra.mxu3 %v7023_v43  ;;  %v9365_v51 = vsub.f32 %v3823_v45, %v3567_v42 }
 0x1ff   :  { %v3721_v14 = vmax.f32 %v2890_v7, 0.0  ;;  %v2253_v16 = vadd.f32 %v9140_v6, %v2252_v24  ;;  %v9363_v48 = vsub.f32 %v3822_v39, %v3566_v26  ;;  %v8081_v50 = vpack.c.bf16 %v3823_v45, %v3822_v39 }
 0x201   :  { %v7826_v19 = vpack.c.bf16 %v3721_v14, %v3720_v49  ;;  %v5001_v20 = vsub.f32 %v3721_v14, %v3465_v56  ;;  %2291 = vmatmul.bf16.gmra.mxu0 %v6844_v8  ;;  %2931 = vmatmul.bf16.gmra.mxu2 %v6972_v10  ;;  %v3466_v22 = vmax.f32 %v2253_v16, 0.0  ;;  %v7441_v49 = vpack.c.bf16 %v3567_v42, %v3566_v26  ;;  %v2507_v55 = vpop.f32.mrf.mxu1  ;;  %v3147_v2 = vpop.f32.mrf.mxu3 }
 0x202   :  { %8557 = vst [vmem:[%s11302_s3 + $0x640] sm:$0xff] %v8081_v50   ;;  %2546 = vmatmul.bf16.gmra.mxu1 %v6895_v3  ;;  %v2508_v8 = vadd.f32 %v9140_v6, %v2507_v55 }
 0x203   :  { %8506 = vst [vmem:[%s11302_s3 + $0x4a8] sm:$0xff] %v7826_v19   ;;  %v5257_v21 = vand.u32 2147483647, %v5001_v20 }
 0x204   :  { %v2892_v25 = vpop.f32.mrf.mxu2  ;;  %8429 = vst [vmem:[%s11302_s3 + $0x240] sm:$0xff] %v7441_v49   ;;  %v3568_v16 = vmax.f32 %v2508_v8, 0.0 }
 0x205   :  { %v5512_v29 = vadd.f32 %v5511_v5, %v5257_v21  ;;  %v2893_v30 = vadd.f32 %v9140_v6, %v2892_v25  ;;  %v3148_v21 = vadd.f32 %v9140_v6, %v3147_v2 }
 0x206   :  { %v2254_v34 = vpop.f32.mrf.mxu0 }
 0x207   :  { %v3722_v36 = vmax.f32 %v2893_v30, 0.0  ;;  %v2255_v38 = vadd.f32 %v9140_v6, %v2254_v34  ;;  %v3824_v31 = vmax.f32 %v3148_v21, 0.0 }
 0x209   :  { %v5002_v46 = vsub.f32 %v3722_v36, %v3466_v22  ;;  %v3467_v47 = vmax.f32 %v2255_v38, 0.0  ;;  %v2509_v17 = vpop.f32.mrf.mxu1  ;;  %v3149_v25 = vpop.f32.mrf.mxu3  ;;  %v9399_v38 = vsub.f32 %v3824_v31, %v3568_v16 }
 0x20a   :  { %v3150_v28 = vadd.f32 %v9140_v6, %v3149_v25 }
 0x20b   :  { %v5258_v52 = vand.u32 2147483647, %v5002_v46  ;;  %v7191_v53 = vpack.c.bf16 %v3467_v47, %v3466_v22  ;;  %v2510_v22 = vadd.f32 %v9140_v6, %v2509_v17 }
 0x20c   :  { %v2894_v54 = vpop.f32.mrf.mxu2  ;;  %v3825_v34 = vmax.f32 %v3150_v28, 0.0  ;;  %v7025_v28 = vld [vmem:[%s11299_s0 + $0x698] sm:$0xff] }
 0x20d   :  { %v5513_v56 = vadd.f32 %v5512_v29, %v5258_v52  ;;  %8379 = vst [vmem:[%s11302_s3 + $0xb0] sm:$0xff] %v7191_v53   ;;  %v2895_v59 = vadd.f32 %v9140_v6, %v2894_v54  ;;  %v3569_v32 = vmax.f32 %v2510_v22, 0.0  ;;  %v6846_v53 = vld [vmem:[%s11299_s0 + $0x100] sm:$0xff] }
 0x20e   :  { %v2257_v4 = vpop.f32.mrf.mxu0  ;;  %3191 = vmatmul.bf16.gmra.mxu3 %v7024_v33  ;;  %v8086_v42 = vpack.c.bf16 %v3825_v34, %v3824_v31  ;;  %v6974_v54 = vld [vmem:[%s11299_s0 + $0x500] sm:$0xff] }
 0x20f   :  { %v3723_v5 = vmax.f32 %v2895_v59, 0.0  ;;  %v2258_v7 = vadd.f32 %v9140_v6, %v2257_v4  ;;  %v7446_v39 = vpack.c.bf16 %v3569_v32, %v3568_v16  ;;  %v9401_v43 = vsub.f32 %v3825_v34, %v3569_v32 }
 0x210   :  { %8558 = vst [vmem:[%s11302_s3 + $0x648] sm:$0xff] %v8086_v42  }
 0x211   :  { %v7831_v10 = vpack.c.bf16 %v3723_v5, %v3722_v36  ;;  %v5003_v11 = vsub.f32 %v3723_v5, %v3467_v47  ;;  %2296 = vmatmul.bf16.gmra.mxu0 %v6845_v61  ;;  %2936 = vmatmul.bf16.gmra.mxu2 %v6973_v1  ;;  %v3468_v24 = vmax.f32 %v2258_v7, 0.0  ;;  %8430 = vst [vmem:[%s11302_s3 + $0x248] sm:$0xff] %v7446_v39   ;;  %v2512_v49 = vpop.f32.mrf.mxu1  ;;  %v3152_v55 = vpop.f32.mrf.mxu3 }
 0x212   :  { %v2513_v2 = vadd.f32 %v9140_v6, %v2512_v49  ;;  %v6847_v49 = vld [vmem:[%s11299_s0 + $0x108] sm:$0xff] }
 0x213   :  { %8507 = vst [vmem:[%s11302_s3 + $0x4b0] sm:$0xff] %v7831_v10   ;;  %v5259_v13 = vand.u32 2147483647, %v5003_v11 }
 0x214   :  { %v2897_v14 = vpop.f32.mrf.mxu2  ;;  %v3570_v10 = vmax.f32 %v2513_v2, 0.0 }
 0x215   :  { %v5514_v19 = vadd.f32 %v5513_v56, %v5259_v13  ;;  %v2898_v20 = vadd.f32 %v9140_v6, %v2897_v14  ;;  %v6896_v56 = vld [vmem:[%s11299_s0 + $0x290] sm:$0xff]  ;;  %v3153_v14 = vadd.f32 %v9140_v6, %v3152_v55 }
 0x216   :  { %v2259_v26 = vpop.f32.mrf.mxu0  ;;  %2551 = vmatmul.bf16.gmra.mxu1 %v6896_v56 }
 0x217   :  { %v3724_v29 = vmax.f32 %v2898_v20, 0.0  ;;  %v2260_v30 = vadd.f32 %v9140_v6, %v2259_v26  ;;  %v3826_v25 = vmax.f32 %v3153_v14, 0.0 }
 0x219   :  { %v5004_v35 = vsub.f32 %v3724_v29, %v3468_v24  ;;  %v3469_v36 = vmax.f32 %v2260_v30, 0.0  ;;  %v2514_v11 = vpop.f32.mrf.mxu1  ;;  %v3154_v17 = vpop.f32.mrf.mxu3  ;;  %v9435_v32 = vsub.f32 %v3826_v25, %v3570_v10 }
 0x21a   :  { %v2515_v16 = vadd.f32 %v9140_v6, %v2514_v11  ;;  %v3155_v20 = vadd.f32 %v9140_v6, %v3154_v17 }
 0x21b   :  { %v5260_v45 = vand.u32 2147483647, %v5004_v35  ;;  %v7196_v46 = vpack.c.bf16 %v3469_v36, %v3468_v24 }
 0x21c   :  { %v2899_v47 = vpop.f32.mrf.mxu2  ;;  %v3571_v26 = vmax.f32 %v2515_v16, 0.0 }
 0x21d   :  { %v5515_v50 = vadd.f32 %v5514_v19, %v5260_v45  ;;  %8380 = vst [vmem:[%s11302_s3 + $0xb8] sm:$0xff] %v7196_v46   ;;  %v2900_v52 = vadd.f32 %v9140_v6, %v2899_v47 }
 0x21e   :  { %v2262_v59 = vpop.f32.mrf.mxu0  ;;  %v7451_v33 = vpack.c.bf16 %v3571_v26, %v3570_v10  ;;  %3196 = vmatmul.bf16.gmra.mxu3 %v7025_v28 }
 0x21f   :  { %v3725_v61 = vmax.f32 %v2900_v52, 0.0  ;;  %v2263_v1 = vadd.f32 %v9140_v6, %v2262_v59 }
 0x220   :  { %8431 = vst [vmem:[%s11302_s3 + $0x250] sm:$0xff] %v7451_v33  }
 0x221   :  { %v7836_v3 = vpack.c.bf16 %v3725_v61, %v3724_v29  ;;  %v5005_v4 = vsub.f32 %v3725_v61, %v3469_v36  ;;  %2301 = vmatmul.bf16.gmra.mxu0 %v6846_v53  ;;  %2941 = vmatmul.bf16.gmra.mxu2 %v6974_v54  ;;  %v3470_v7 = vmax.f32 %v2263_v1, 0.0  ;;  %v3827_v29 = vmax.f32 %v3155_v20, 0.0  ;;  %v2517_v45 = vpop.f32.mrf.mxu1  ;;  %v3157_v52 = vpop.f32.mrf.mxu3  ;;  %v6897_v53 = vld [vmem:[%s11299_s0 + $0x298] sm:$0xff] }
 0x222   :  { %v2518_v59 = vadd.f32 %v9140_v6, %v2517_v45  ;;  %v3158_v11 = vadd.f32 %v9140_v6, %v3157_v52  ;;  %v6898_v52 = vld [vmem:[%s11299_s0 + $0x2a0] sm:$0xff] }
 0x223   :  { %8508 = vst [vmem:[%s11302_s3 + $0x4b8] sm:$0xff] %v7836_v3   ;;  %v5261_v5 = vand.u32 2147483647, %v5005_v4  ;;  %v8091_v34 = vpack.c.bf16 %v3827_v29, %v3826_v25  ;;  %v9437_v35 = vsub.f32 %v3827_v29, %v3571_v26 }
 0x224   :  { %v2902_v8 = vpop.f32.mrf.mxu2  ;;  %v3828_v20 = vmax.f32 %v3158_v11, 0.0 }
 0x225   :  { %v5516_v13 = vadd.f32 %v5515_v50, %v5261_v5  ;;  %v2903_v24 = vadd.f32 %v9140_v6, %v2902_v8  ;;  %8559 = vst [vmem:[%s11302_s3 + $0x650] sm:$0xff] %v8091_v34   ;;  %v6975_v50 = vld [vmem:[%s11299_s0 + $0x508] sm:$0xff]  ;;  %v3572_v5 = vmax.f32 %v2518_v59, 0.0 }
 0x226   :  { %v2264_v19 = vpop.f32.mrf.mxu0  ;;  %2556 = vmatmul.bf16.gmra.mxu1 %v6897_v53 }
 0x227   :  { %v3726_v21 = vmax.f32 %v2903_v24, 0.0  ;;  %v2265_v22 = vadd.f32 %v9140_v6, %v2264_v19  ;;  %v9471_v29 = vsub.f32 %v3828_v20, %v3572_v5 }
 0x229   :  { %v5006_v30 = vsub.f32 %v3726_v21, %v3470_v7  ;;  %v3471_v31 = vmax.f32 %v2265_v22, 0.0  ;;  %v3159_v24 = vpop.f32.mrf.mxu3  ;;  %v7026_v22 = vld [vmem:[%s11299_s0 + $0x6a0] sm:$0xff] }
 0x22a   :  { %v3160_v16 = vadd.f32 %v9140_v6, %v3159_v24 }
 0x22b   :  { %v5262_v36 = vand.u32 2147483647, %v5006_v30  ;;  %v7201_v39 = vpack.c.bf16 %v3471_v31, %v3470_v7  ;;  %v2519_v7 = vpop.f32.mrf.mxu1 }
 0x22c   :  { %v2904_v42 = vpop.f32.mrf.mxu2  ;;  %v3829_v25 = vmax.f32 %v3160_v16, 0.0 }
 0x22d   :  { %v5517_v46 = vadd.f32 %v5516_v13, %v5262_v36  ;;  %8381 = vst [vmem:[%s11302_s3 + $0xc0] sm:$0xff] %v7201_v39   ;;  %v2905_v47 = vadd.f32 %v9140_v6, %v2904_v42  ;;  %v2520_v13 = vadd.f32 %v9140_v6, %v2519_v7 }
 0x22e   :  { %v2267_v54 = vpop.f32.mrf.mxu0  ;;  %3201 = vmatmul.bf16.gmra.mxu3 %v7026_v22 }
 0x22f   :  { %v3727_v55 = vmax.f32 %v2905_v47, 0.0  ;;  %v2268_v56 = vadd.f32 %v9140_v6, %v2267_v54  ;;  %v6848_v47 = vld [vmem:[%s11299_s0 + $0x110] sm:$0xff] }
 0x231   :  { %v7841_v61 = vpack.c.bf16 %v3727_v55, %v3726_v21  ;;  %v5007_v1 = vsub.f32 %v3727_v55, %v3471_v31  ;;  %2306 = vmatmul.bf16.gmra.mxu0 %v6847_v49  ;;  %2946 = vmatmul.bf16.gmra.mxu2 %v6975_v50  ;;  %v3472_v3 = vmax.f32 %v2268_v56, 0.0  ;;  %v3573_v21 = vmax.f32 %v2520_v13, 0.0  ;;  %v6976_v49 = vld [vmem:[%s11299_s0 + $0x510] sm:$0xff]  ;;  %v3162_v50 = vpop.f32.mrf.mxu3 }
 0x232   :  { %v8096_v31 = vpack.c.bf16 %v3829_v25, %v3828_v20 }
 0x233   :  { %8509 = vst [vmem:[%s11302_s3 + $0x4c0] sm:$0xff] %v7841_v61   ;;  %v5263_v2 = vand.u32 2147483647, %v5007_v1  ;;  %v7456_v30 = vpack.c.bf16 %v3573_v21, %v3572_v5  ;;  %v9473_v33 = vsub.f32 %v3829_v25, %v3573_v21  ;;  %v2522_v42 = vpop.f32.mrf.mxu1  ;;  %v7027_v21 = vld [vmem:[%s11299_s0 + $0x6a8] sm:$0xff] }
 0x234   :  { %v2907_v4 = vpop.f32.mrf.mxu2  ;;  %8560 = vst [vmem:[%s11302_s3 + $0x658] sm:$0xff] %v8096_v31   ;;  %v2523_v56 = vadd.f32 %v9140_v6, %v2522_v42 }
 0x235   :  { %v5518_v8 = vadd.f32 %v5517_v46, %v5263_v2  ;;  %v2908_v10 = vadd.f32 %v9140_v6, %v2907_v4  ;;  %8432 = vst [vmem:[%s11302_s3 + $0x258] sm:$0xff] %v7456_v30  }
 0x236   :  { %v2269_v14 = vpop.f32.mrf.mxu0  ;;  %2561 = vmatmul.bf16.gmra.mxu1 %v6898_v52  ;;  %v3574_v4 = vmax.f32 %v2523_v56, 0.0 }
 0x237   :  { %v3728_v17 = vmax.f32 %v2908_v10, 0.0  ;;  %v2270_v19 = vadd.f32 %v9140_v6, %v2269_v14  ;;  %v3163_v10 = vadd.f32 %v9140_v6, %v3162_v50  ;;  %v6977_v50 = vld [vmem:[%s11299_s0 + $0x518] sm:$0xff] }
 0x239   :  { %v5008_v26 = vsub.f32 %v3728_v17, %v3472_v3  ;;  %v3473_v28 = vmax.f32 %v2270_v19, 0.0  ;;  %v3164_v13 = vpop.f32.mrf.mxu3  ;;  %v3830_v19 = vmax.f32 %v3163_v10, 0.0  ;;  %v9538_v10 = vld [vmem:[%s11301_s2] ss:$0 sm:$0xff] }
 0x23a   :  { %v3165_v14 = vadd.f32 %v9140_v6, %v3164_v13 }
 0x23b   :  { %v5264_v34 = vand.u32 2147483647, %v5008_v26  ;;  %v7206_v36 = vpack.c.bf16 %v3473_v28, %v3472_v3  ;;  %v2524_v5 = vpop.f32.mrf.mxu1 }
 0x23c   :  { %v2909_v39 = vpop.f32.mrf.mxu2  ;;  %v2525_v11 = vadd.f32 %v9140_v6, %v2524_v5  ;;  %v3831_v22 = vmax.f32 %v3165_v14, 0.0 }
 0x23d   :  { %v5519_v45 = vadd.f32 %v5518_v8, %v5264_v34  ;;  %8382 = vst [vmem:[%s11302_s3 + $0xc8] sm:$0xff] %v7206_v36   ;;  %v2910_v46 = vadd.f32 %v9140_v6, %v2909_v39 }
 0x23e   :  { %v2272_v53 = vpop.f32.mrf.mxu0  ;;  %v3575_v20 = vmax.f32 %v2525_v11, 0.0  ;;  %3206 = vmatmul.bf16.gmra.mxu3 %v7027_v21  ;;  %v8101_v31 = vpack.c.bf16 %v3831_v22, %v3830_v19 }
 0x23f   :  { %v3729_v54 = vmax.f32 %v2910_v46, 0.0  ;;  %v2273_v55 = vadd.f32 %v9140_v6, %v2272_v53  ;;  %v6899_v53 = vld [vmem:[%s11299_s0 + $0x2a8] sm:$0xff] }
 0x240   :  { %v7461_v30 = vpack.c.bf16 %v3575_v20, %v3574_v4  ;;  %v9509_v34 = vsub.f32 %v3831_v22, %v3575_v20  ;;  %8561 = vst [vmem:[%s11302_s3 + $0x660] sm:$0xff] %v8101_v31   ;;  %v7028_v22 = vld [vmem:[%s11299_s0 + $0x6b0] sm:$0xff] }
 0x241   :  { %v7846_v59 = vpack.c.bf16 %v3729_v54, %v3728_v17  ;;  %v5009_v61 = vsub.f32 %v3729_v54, %v3473_v28  ;;  %2311 = vmatmul.bf16.gmra.mxu0 %v6848_v47  ;;  %2951 = vmatmul.bf16.gmra.mxu2 %v6976_v49  ;;  %v3474_v2 = vmax.f32 %v2273_v55, 0.0  ;;  %v9507_v28 = vsub.f32 %v3830_v19, %v3574_v4  ;;  %v6849_v49 = vld [vmem:[%s11299_s0 + $0x118] sm:$0xff]  ;;  %v3167_v52 = vpop.f32.mrf.mxu3 }
 0x242   :  { %8433 = vst [vmem:[%s11302_s3 + $0x260] sm:$0xff] %v7461_v30   ;;  %v3168_v11 = vadd.f32 %v9538_v10, %v3167_v52 }
 0x243   :  { %8510 = vst [vmem:[%s11302_s3 + $0x4c8] sm:$0xff] %v7846_v59   ;;  %v5265_v1 = vand.u32 2147483647, %v5009_v61 }
 0x244   :  { %v2912_v3 = vpop.f32.mrf.mxu2  ;;  %v3832_v20 = vmax.f32 %v3168_v11, 0.0 }
 0x245   :  { %v5520_v7 = vadd.f32 %v5519_v45, %v5265_v1  ;;  %v2913_v8 = vadd.f32 %v9140_v6, %v2912_v3  ;;  %v2527_v45 = vpop.f32.mrf.mxu1 }
 0x246   :  { %v2274_v24 = vpop.f32.mrf.mxu0  ;;  %2566 = vmatmul.bf16.gmra.mxu1 %v6899_v53  ;;  %v2528_v59 = vadd.f32 %v9140_v6, %v2527_v45  ;;  %v6850_v53 = vld [vmem:[%s11299_s0 + $0x120] sm:$0xff] }
 0x247   :  { %v3730_v16 = vmax.f32 %v2913_v8, 0.0  ;;  %v2275_v17 = vadd.f32 %v9140_v6, %v2274_v24 }
 0x248   :  { %v3576_v5 = vmax.f32 %v2528_v59, 0.0 }
 0x249   :  { %v5010_v25 = vsub.f32 %v3730_v16, %v3474_v2  ;;  %v3475_v26 = vmax.f32 %v2275_v17, 0.0  ;;  %v3169_v24 = vpop.f32.mrf.mxu3 }
 0x24a   :  { %v9548_v31 = vsub.f32 %v3832_v20, %v3576_v5 }
 0x24b   :  { %v5266_v36 = vand.u32 2147483647, %v5010_v25  ;;  %v7211_v39 = vpack.c.bf16 %v3475_v26, %v3474_v2 }
 0x24c   :  { %v2914_v42 = vpop.f32.mrf.mxu2 }
 0x24d   :  { %v5521_v46 = vadd.f32 %v5520_v7, %v5266_v36  ;;  %8383 = vst [vmem:[%s11302_s3 + $0xd0] sm:$0xff] %v7211_v39   ;;  %v2915_v47 = vadd.f32 %v9140_v6, %v2914_v42  ;;  %v2529_v7 = vpop.f32.mrf.mxu1 }
 0x24e   :  { %v2277_v54 = vpop.f32.mrf.mxu0  ;;  %v2530_v13 = vadd.f32 %v9538_v10, %v2529_v7  ;;  %3211 = vmatmul.bf16.gmra.mxu3 %v7028_v22 }
 0x24f   :  { %v3731_v55 = vmax.f32 %v2915_v47, 0.0  ;;  %v2278_v56 = vadd.f32 %v9140_v6, %v2277_v54  ;;  %v6978_v54 = vld [vmem:[%s11299_s0 + $0x520] sm:$0xff] }
 0x250   :  { %v3577_v21 = vmax.f32 %v2530_v13, 0.0 }
 0x251   :  { %v7851_v61 = vpack.c.bf16 %v3731_v55, %v3730_v16  ;;  %v5011_v1 = vsub.f32 %v3731_v55, %v3475_v26  ;;  %2316 = vmatmul.bf16.gmra.mxu0 %v6849_v49  ;;  %2956 = vmatmul.bf16.gmra.mxu2 %v6977_v50  ;;  %v3476_v3 = vmax.f32 %v2278_v56, 0.0  ;;  %v3170_v16 = vadd.f32 %v9538_v10, %v3169_v24  ;;  %v3172_v55 = vpop.f32.mrf.mxu3  ;;  %v6900_v56 = vld [vmem:[%s11299_s0 + $0x2b0] sm:$0xff] }
 0x252   :  { %v7466_v36 = vpack.c.bf16 %v3577_v21, %v3576_v5 }
 0x253   :  { %8511 = vst [vmem:[%s11302_s3 + $0x4d0] sm:$0xff] %v7851_v61   ;;  %v5267_v2 = vand.u32 2147483647, %v5011_v1  ;;  %v3833_v25 = vmax.f32 %v3170_v16, 0.0 }
 0x254   :  { %v2917_v4 = vpop.f32.mrf.mxu2  ;;  %8434 = vst [vmem:[%s11302_s3 + $0x268] sm:$0xff] %v7466_v36  }
 0x255   :  { %v5522_v8 = vadd.f32 %v5521_v46, %v5267_v2  ;;  %v2918_v6 = vadd.f32 %v9538_v10, %v2917_v4  ;;  %v8106_v39 = vpack.c.bf16 %v3833_v25, %v3832_v20  ;;  %v9550_v42 = vsub.f32 %v3833_v25, %v3577_v21  ;;  %v2532_v49 = vpop.f32.mrf.mxu1 }
 0x256   :  { %v2279_v14 = vpop.f32.mrf.mxu0  ;;  %2571 = vmatmul.bf16.gmra.mxu1 %v6900_v56  ;;  %v2533_v2 = vadd.f32 %v9538_v10, %v2532_v49 }
 0x257   :  { %v3732_v17 = vmax.f32 %v2918_v6, 0.0  ;;  %v2280_v19 = vadd.f32 %v9538_v10, %v2279_v14  ;;  %8562 = vst [vmem:[%s11302_s3 + $0x668] sm:$0xff] %v8106_v39   ;;  %v3173_v14 = vadd.f32 %v9538_v10, %v3172_v55 }
 0x258   :  { %v3578_v6 = vmax.f32 %v2533_v2, 0.0 }
 0x259   :  { %v5012_v26 = vsub.f32 %v3732_v17, %v3476_v3  ;;  %v3477_v30 = vmax.f32 %v2280_v19, 0.0  ;;  %v3834_v25 = vmax.f32 %v3173_v14, 0.0 }
 0x25b   :  { %v5268_v45 = vand.u32 2147483647, %v5012_v26  ;;  %v7216_v46 = vpack.c.bf16 %v3477_v30, %v3476_v3 }
 0x25c   :  { %v2919_v47 = vpop.f32.mrf.mxu2 }
 0x25d   :  { %v5523_v50 = vadd.f32 %v5522_v8, %v5268_v45  ;;  %8384 = vst [vmem:[%s11302_s3 + $0xd8] sm:$0xff] %v7216_v46   ;;  %v2920_v52 = vadd.f32 %v9538_v10, %v2919_v47  ;;  %v2534_v11 = vpop.f32.mrf.mxu1  ;;  %v9584_v46 = vsub.f32 %v3834_v25, %v3578_v6 }
 0x25e   :  { %v2282_v59 = vpop.f32.mrf.mxu0  ;;  %v2535_v16 = vadd.f32 %v9538_v10, %v2534_v11 }
 0x25f   :  { %v3733_v61 = vmax.f32 %v2920_v52, 0.0  ;;  %v2283_v1 = vadd.f32 %v9538_v10, %v2282_v59 }
 0x260   :  { %v3579_v26 = vmax.f32 %v2535_v16, 0.0 }
 0x261   :  { %v7856_v3 = vpack.c.bf16 %v3733_v61, %v3732_v17  ;;  %v5013_v4 = vsub.f32 %v3733_v61, %v3477_v30  ;;  %2321 = vmatmul.bf16.gmra.mxu0 %v6850_v53  ;;  %2961 = vmatmul.bf16.gmra.mxu2 %v6978_v54  ;;  %v3478_v7 = vmax.f32 %v2283_v1, 0.0  ;;  %v3174_v17 = vpop.f32.mrf.mxu3  ;;  %v7029_v30 = vld [vmem:[%s11299_s0 + $0x6b8] sm:$0xff]  ;;  %v6851_v61 = vld [vmem:[%s11299_s0 + $0x128] sm:$0xff] }
 0x262   :  { %v3175_v20 = vadd.f32 %v9538_v10, %v3174_v17  ;;  %v7471_v47 = vpack.c.bf16 %v3579_v26, %v3578_v6  ;;  %3216 = vmatmul.bf16.gmra.mxu3 %v7029_v30  ;;  %v6979_v1 = vld [vmem:[%s11299_s0 + $0x528] sm:$0xff] }
 0x263   :  { %8512 = vst [vmem:[%s11302_s3 + $0x4d8] sm:$0xff] %v7856_v3   ;;  %v5269_v5 = vand.u32 2147483647, %v5013_v4  ;;  %v6901_v3 = vld [vmem:[%s11299_s0 + $0x2b8] sm:$0xff] }
 0x264   :  { %v2922_v8 = vpop.f32.mrf.mxu2  ;;  %v3835_v36 = vmax.f32 %v3175_v20, 0.0  ;;  %8435 = vst [vmem:[%s11302_s3 + $0x270] sm:$0xff] %v7471_v47  }
 0x265   :  { %v5524_v13 = vadd.f32 %v5523_v50, %v5269_v5  ;;  %v2923_v24 = vadd.f32 %v9538_v10, %v2922_v8  ;;  %v2537_v55 = vpop.f32.mrf.mxu1 }
 0x266   :  { %v2284_v19 = vpop.f32.mrf.mxu0  ;;  %v8111_v49 = vpack.c.bf16 %v3835_v36, %v3834_v25  ;;  %v9586_v50 = vsub.f32 %v3835_v36, %v3579_v26  ;;  %2576 = vmatmul.bf16.gmra.mxu1 %v6901_v3  ;;  %v2538_v8 = vadd.f32 %v9538_v10, %v2537_v55 }
 0x267   :  { %v3734_v21 = vmax.f32 %v2923_v24, 0.0  ;;  %v2285_v22 = vadd.f32 %v9538_v10, %v2284_v19 }
 0x268   :  { %11314 = vst [vmem:[#allocation5_spill] sm:$0xff] %v9586_v50  ;;  %v3580_v16 = vmax.f32 %v2538_v8, 0.0  ;;  %v6852_v8 = vld [vmem:[%s11299_s0 + $0x130] sm:$0xff] }
 0x269   :  { %v5014_v39 = vsub.f32 %v3734_v21, %v3478_v7  ;;  %v3479_v45 = vmax.f32 %v2285_v22, 0.0  ;;  %8563 = vst [vmem:[%s11302_s3 + $0x670] sm:$0xff] %v8111_v49   ;;  %v3177_v2 = vpop.f32.mrf.mxu3  ;;  %v7030_v49 = vld [vmem:[%s11299_s0 + $0x6c0] sm:$0xff] }
 0x26a   :  { %v3178_v22 = vadd.f32 %v9538_v10, %v3177_v2 }
 0x26b   :  { %v5270_v52 = vand.u32 2147483647, %v5014_v39  ;;  %v7221_v53 = vpack.c.bf16 %v3479_v45, %v3478_v7 }
 0x26c   :  { %v2924_v54 = vpop.f32.mrf.mxu2 }
 0x26d   :  { %v5525_v56 = vadd.f32 %v5524_v13, %v5270_v52  ;;  %8385 = vst [vmem:[%s11302_s3 + $0xe0] sm:$0xff] %v7221_v53   ;;  %v2925_v59 = vadd.f32 %v9538_v10, %v2924_v54  ;;  %v2539_v17 = vpop.f32.mrf.mxu1 }
 0x26e   :  { %v2287_v4 = vpop.f32.mrf.mxu0  ;;  %v2540_v25 = vadd.f32 %v9538_v10, %v2539_v17 }
 0x26f   :  { %v3735_v5 = vmax.f32 %v2925_v59, 0.0  ;;  %v2288_v7 = vadd.f32 %v9538_v10, %v2287_v4 }
 0x270   :  { %v3581_v47 = vmax.f32 %v2540_v25, 0.0 }
 0x271   :  { %v7861_v6 = vpack.c.bf16 %v3735_v5, %v3734_v21  ;;  %v5015_v11 = vsub.f32 %v3735_v5, %v3479_v45  ;;  %2326 = vmatmul.bf16.gmra.mxu0 %v6851_v61  ;;  %2966 = vmatmul.bf16.gmra.mxu2 %v6979_v1  ;;  %v3480_v24 = vmax.f32 %v2288_v7, 0.0  ;;  %v3179_v21 = vpop.f32.mrf.mxu3  ;;  %v3836_v45 = vmax.f32 %v3178_v22, 0.0 }
 0x272   :  { %v3180_v30 = vadd.f32 %v9538_v10, %v3179_v21  ;;  %3221 = vmatmul.bf16.gmra.mxu3 %v7030_v49 }
 0x273   :  { %8513 = vst [vmem:[%s11302_s3 + $0x4e0] sm:$0xff] %v7861_v6   ;;  %v5271_v13 = vand.u32 2147483647, %v5015_v11  ;;  %v9620_v55 = vsub.f32 %v3836_v45, %v3580_v16  ;;  %v6980_v6 = vld [vmem:[%s11299_s0 + $0x530] sm:$0xff] }
 0x274   :  { %v2927_v14 = vpop.f32.mrf.mxu2  ;;  %v3837_v52 = vmax.f32 %v3180_v30, 0.0 }
 0x275   :  { %v5526_v19 = vadd.f32 %v5525_v56, %v5271_v13  ;;  %v2928_v20 = vadd.f32 %v9538_v10, %v2927_v14  ;;  %11315 = vst [vmem:[#allocation6_spill] sm:$0xff] %v9620_v55  ;;  %v7476_v56 = vpack.c.bf16 %v3581_v47, %v3580_v16  ;;  %v2542_v4 = vpop.f32.mrf.mxu1  ;;  %v6902_v13 = vld [vmem:[%s11299_s0 + $0x2c0] sm:$0xff] }
 0x276   :  { %v2289_v26 = vpop.f32.mrf.mxu0  ;;  %v8116_v59 = vpack.c.bf16 %v3837_v52, %v3836_v45  ;;  %v9622_v61 = vsub.f32 %v3837_v52, %v3581_v47  ;;  %2581 = vmatmul.bf16.gmra.mxu1 %v6902_v13  ;;  %v2543_v17 = vadd.f32 %v9538_v10, %v2542_v4 }
 0x277   :  { %v3736_v36 = vmax.f32 %v2928_v20, 0.0  ;;  %v2290_v39 = vadd.f32 %v9538_v10, %v2289_v26  ;;  %8436 = vst [vmem:[%s11302_s3 + $0x278] sm:$0xff] %v7476_v56  }
 0x278   :  { %11316 = vst [vmem:[#allocation7_spill] sm:$0xff] %v9622_v61  ;;  %v3582_v26 = vmax.f32 %v2543_v17, 0.0 }
 0x279   :  { %v5016_v53 = vsub.f32 %v3736_v36, %v3480_v24  ;;  %v3481_v54 = vmax.f32 %v2290_v39, 0.0  ;;  %8564 = vst [vmem:[%s11302_s3 + $0x678] sm:$0xff] %v8116_v59   ;;  %v3182_v11 = vpop.f32.mrf.mxu3 }
 0x27a   :  { %v3183_v47 = vadd.f32 %v9538_v10, %v3182_v11 }
 0x27b   :  { %v5272_v1 = vand.u32 2147483647, %v5016_v53  ;;  %v7226_v2 = vpack.c.bf16 %v3481_v54, %v3480_v24 }
 0x27c   :  { %v2929_v3 = vpop.f32.mrf.mxu2  ;;  %v3838_v59 = vmax.f32 %v3183_v47, 0.0 }
 0x27d   :  { %v5527_v5 = vadd.f32 %v5526_v19, %v5272_v1  ;;  %8386 = vst [vmem:[%s11302_s3 + $0xe8] sm:$0xff] %v7226_v2   ;;  %v2930_v7 = vadd.f32 %v9538_v10, %v2929_v3  ;;  %v2544_v30 = vpop.f32.mrf.mxu1  ;;  %v7031_v2 = vld [vmem:[%s11299_s0 + $0x6c8] sm:$0xff] }
 0x27e   :  { %v2292_v24 = vpop.f32.mrf.mxu0  ;;  %v2545_v49 = vadd.f32 %v9538_v10, %v2544_v30 }
 0x27f   :  { %v3737_v14 = vmax.f32 %v2930_v7, 0.0  ;;  %v2293_v16 = vadd.f32 %v9538_v10, %v2292_v24  ;;  %v9656_v7 = vsub.f32 %v3838_v59, %v3582_v26 }
 0x280   :  { %v3583_v1 = vmax.f32 %v2545_v49, 0.0 }
 0x281   :  { %v7866_v19 = vpack.c.bf16 %v3737_v14, %v3736_v36  ;;  %v5017_v20 = vsub.f32 %v3737_v14, %v3481_v54  ;;  %2331 = vmatmul.bf16.gmra.mxu0 %v6852_v8  ;;  %2971 = vmatmul.bf16.gmra.mxu2 %v6980_v6  ;;  %v3482_v25 = vmax.f32 %v2293_v16, 0.0  ;;  %v3184_v36 = vpop.f32.mrf.mxu3  ;;  %11317 = vst [vmem:[#allocation8_spill] sm:$0xff] %v9656_v7 }
 0x282   :  { %v3185_v53 = vadd.f32 %v9538_v10, %v3184_v36  ;;  %v7481_v8 = vpack.c.bf16 %v3583_v1, %v3582_v26  ;;  %3226 = vmatmul.bf16.gmra.mxu3 %v7031_v2 }
 0x283   :  { %8514 = vst [vmem:[%s11302_s3 + $0x4e8] sm:$0xff] %v7866_v19   ;;  %v5273_v22 = vand.u32 2147483647, %v5017_v20  ;;  %v6853_v20 = vld [vmem:[%s11299_s0 + $0x138] sm:$0xff] }
 0x284   :  { %v2932_v21 = vpop.f32.mrf.mxu2  ;;  %v3839_v3 = vmax.f32 %v3185_v53, 0.0  ;;  %8437 = vst [vmem:[%s11302_s3 + $0x280] sm:$0xff] %v7481_v8  }
 0x285   :  { %v5528_v39 = vadd.f32 %v5527_v5, %v5273_v22  ;;  %v2933_v45 = vadd.f32 %v9538_v10, %v2932_v21  ;;  %v2547_v16 = vpop.f32.mrf.mxu1  ;;  %v6981_v22 = vld [vmem:[%s11299_s0 + $0x538] sm:$0xff]  ;;  %v6903_v21 = vld [vmem:[%s11299_s0 + $0x2c8] sm:$0xff] }
 0x286   :  { %v2294_v52 = vpop.f32.mrf.mxu0  ;;  %v8121_v6 = vpack.c.bf16 %v3839_v3, %v3838_v59  ;;  %v9658_v11 = vsub.f32 %v3839_v3, %v3583_v1  ;;  %2586 = vmatmul.bf16.gmra.mxu1 %v6903_v21 }
 0x287   :  { %v3738_v54 = vmax.f32 %v2933_v45, 0.0  ;;  %v2295_v56 = vadd.f32 %v9538_v10, %v2294_v52  ;;  %v2548_v45 = vadd.f32 %v9538_v10, %v2547_v16  ;;  %v7032_v16 = vld [vmem:[%s11299_s0 + $0x6d0] sm:$0xff] }
 0x288   :  { %11318 = vst [vmem:[#allocation9_spill] sm:$0xff] %v9658_v11 }
 0x289   :  { %v5018_v4 = vsub.f32 %v3738_v54, %v3482_v25  ;;  %v3483_v5 = vmax.f32 %v2295_v56, 0.0  ;;  %8565 = vst [vmem:[%s11302_s3 + $0x680] sm:$0xff] %v8121_v6   ;;  %v3584_v56 = vmax.f32 %v2548_v45, 0.0 }
 0x28b   :  { %v5274_v13 = vand.u32 2147483647, %v5018_v4  ;;  %v7231_v24 = vpack.c.bf16 %v3483_v5, %v3482_v25  ;;  %v3187_v25 = vpop.f32.mrf.mxu3 }
 0x28c   :  { %v2934_v14 = vpop.f32.mrf.mxu2  ;;  %v3188_v3 = vadd.f32 %v9538_v10, %v3187_v25 }
 0x28d   :  { %v5529_v17 = vadd.f32 %v5528_v39, %v5274_v13  ;;  %8387 = vst [vmem:[%s11302_s3 + $0xf0] sm:$0xff] %v7231_v24   ;;  %v2935_v19 = vadd.f32 %v9538_v10, %v2934_v14  ;;  %v2549_v59 = vpop.f32.mrf.mxu1 }
 0x28e   :  { %v2297_v26 = vpop.f32.mrf.mxu0  ;;  %v2550_v4 = vadd.f32 %v9538_v10, %v2549_v59  ;;  %v3840_v24 = vmax.f32 %v3188_v3, 0.0  ;;  %v6904_v59 = vld [vmem:[%s11299_s0 + $0x2d0] sm:$0xff] }
 0x28f   :  { %v3739_v30 = vmax.f32 %v2935_v19, 0.0  ;;  %v2298_v39 = vadd.f32 %v9538_v10, %v2297_v26 }
 0x290   :  { %v3585_v14 = vmax.f32 %v2550_v4, 0.0 }
 0x291   :  { %v7871_v47 = vpack.c.bf16 %v3739_v30, %v3738_v54  ;;  %v5019_v49 = vsub.f32 %v3739_v30, %v3483_v5  ;;  %2336 = vmatmul.bf16.gmra.mxu0 %v6853_v20  ;;  %2976 = vmatmul.bf16.gmra.mxu2 %v6981_v22  ;;  %v3484_v52 = vmax.f32 %v2298_v39, 0.0  ;;  %v9692_v22 = vsub.f32 %v3840_v24, %v3584_v56 }
 0x292   :  { %v7486_v25 = vpack.c.bf16 %v3585_v14, %v3584_v56  ;;  %3231 = vmatmul.bf16.gmra.mxu3 %v7032_v16 }
 0x293   :  { %8515 = vst [vmem:[%s11302_s3 + $0x4f0] sm:$0xff] %v7871_v47   ;;  %v5275_v36 = vand.u32 2147483647, %v5019_v49  ;;  %v3189_v54 = vpop.f32.mrf.mxu3 }
 0x294   :  { %v2937_v53 = vpop.f32.mrf.mxu2  ;;  %v3190_v8 = vadd.f32 %v9538_v10, %v3189_v54  ;;  %11319 = vst [vmem:[#allocation10_spill] sm:$0xff] %v9692_v22 }
 0x295   :  { %v5530_v1 = vadd.f32 %v5529_v17, %v5275_v36  ;;  %v2938_v2 = vadd.f32 %v9538_v10, %v2937_v53  ;;  %8438 = vst [vmem:[%s11302_s3 + $0x288] sm:$0xff] %v7486_v25   ;;  %v2552_v47 = vpop.f32.mrf.mxu1  ;;  %v6982_v53 = vld [vmem:[%s11299_s0 + $0x540] sm:$0xff] }
 0x296   :  { %v2299_v5 = vpop.f32.mrf.mxu0  ;;  %v3841_v17 = vmax.f32 %v3190_v8, 0.0  ;;  %2591 = vmatmul.bf16.gmra.mxu1 %v6904_v59  ;;  %v2553_v4 = vadd.f32 %v9538_v10, %v2552_v47 }
 0x297   :  { %v3740_v6 = vmax.f32 %v2938_v2, 0.0  ;;  %v2300_v13 = vadd.f32 %v9538_v10, %v2299_v5 }
 0x298   :  { %v8126_v21 = vpack.c.bf16 %v3841_v17, %v3840_v24  ;;  %v9694_v26 = vsub.f32 %v3841_v17, %v3585_v14  ;;  %v3586_v14 = vmax.f32 %v2553_v4, 0.0 }
 0x299   :  { %v5020_v19 = vsub.f32 %v3740_v6, %v3484_v52  ;;  %v3485_v20 = vmax.f32 %v2300_v13, 0.0 }
 0x29a   :  { %11320 = vst [vmem:[#allocation11_spill] sm:$0xff] %v9694_v26 }
 0x29b   :  { %v5276_v30 = vand.u32 2147483647, %v5020_v19  ;;  %v7236_v39 = vpack.c.bf16 %v3485_v20, %v3484_v52  ;;  %8566 = vst [vmem:[%s11302_s3 + $0x688] sm:$0xff] %v8126_v21   ;;  %v6854_v52 = vld [vmem:[%s11299_s0 + $0x140] sm:$0xff]  ;;  %v3192_v56 = vpop.f32.mrf.mxu3 }
 0x29c   :  { %v2939_v45 = vpop.f32.mrf.mxu2  ;;  %v3193_v25 = vadd.f32 %v9538_v10, %v3192_v56 }
 0x29d   :  { %v5531_v49 = vadd.f32 %v5530_v1, %v5276_v30  ;;  %8388 = vst [vmem:[%s11302_s3 + $0xf8] sm:$0xff] %v7236_v39   ;;  %v2940_v36 = vadd.f32 %v9538_v10, %v2939_v45  ;;  %v2554_v16 = vpop.f32.mrf.mxu1 }
 0x29e   :  { %v2302_v1 = vpop.f32.mrf.mxu0  ;;  %v2555_v21 = vadd.f32 %v9538_v10, %v2554_v16  ;;  %v3842_v47 = vmax.f32 %v3193_v25, 0.0  ;;  %v6983_v16 = vld [vmem:[%s11299_s0 + $0x548] sm:$0xff]  ;;  %v6905_v25 = vld [vmem:[%s11299_s0 + $0x2d8] sm:$0xff] }
 0x29f   :  { %v3741_v2 = vmax.f32 %v2940_v36, 0.0  ;;  %v2303_v3 = vadd.f32 %v9538_v10, %v2302_v1 }
 0x2a0   :  { %v3587_v36 = vmax.f32 %v2555_v21, 0.0  ;;  %v9728_v1 = vsub.f32 %v3842_v47, %v3586_v14 }
 0x2a1   :  { %v7876_v54 = vpack.c.bf16 %v3741_v2, %v3740_v6  ;;  %v5021_v5 = vsub.f32 %v3741_v2, %v3485_v20  ;;  %2341 = vmatmul.bf16.gmra.mxu0 %v6854_v52  ;;  %2981 = vmatmul.bf16.gmra.mxu2 %v6982_v53  ;;  %v3486_v13 = vmax.f32 %v2303_v3, 0.0  ;;  %v7033_v52 = vld [vmem:[%s11299_s0 + $0x6d8] sm:$0xff] }
 0x2a2   :  { %11321 = vst [vmem:[#allocation12_spill] sm:$0xff] %v9728_v1  ;;  %v7491_v56 = vpack.c.bf16 %v3587_v36, %v3586_v14  ;;  %3236 = vmatmul.bf16.gmra.mxu3 %v7033_v52 }
 0x2a3   :  { %8516 = vst [vmem:[%s11302_s3 + $0x4f8] sm:$0xff] %v7876_v54   ;;  %v5277_v8 = vand.u32 2147483647, %v5021_v5  ;;  %v3194_v6 = vpop.f32.mrf.mxu3 }
 0x2a4   :  { %v2942_v24 = vpop.f32.mrf.mxu2  ;;  %v3195_v30 = vadd.f32 %v9538_v10, %v3194_v6  ;;  %8439 = vst [vmem:[%s11302_s3 + $0x290] sm:$0xff] %v7491_v56  }
 0x2a5   :  { %v5532_v17 = vadd.f32 %v5531_v49, %v5277_v8  ;;  %v2943_v19 = vadd.f32 %v9538_v10, %v2942_v24  ;;  %v2557_v8 = vpop.f32.mrf.mxu1 }
 0x2a6   :  { %v2304_v20 = vpop.f32.mrf.mxu0  ;;  %v3843_v49 = vmax.f32 %v3195_v30, 0.0  ;;  %2596 = vmatmul.bf16.gmra.mxu1 %v6905_v25  ;;  %v7034_v25 = vld [vmem:[%s11299_s0 + $0x6e0] sm:$0xff] }
 0x2a7   :  { %v3742_v39 = vmax.f32 %v2943_v19, 0.0  ;;  %v2305_v45 = vadd.f32 %v9538_v10, %v2304_v20  ;;  %v2558_v20 = vadd.f32 %v9538_v10, %v2557_v8 }
 0x2a8   :  { %v8131_v2 = vpack.c.bf16 %v3843_v49, %v3842_v47  ;;  %v9730_v3 = vsub.f32 %v3843_v49, %v3587_v36 }
 0x2a9   :  { %v5022_v53 = vsub.f32 %v3742_v39, %v3486_v13  ;;  %v3487_v59 = vmax.f32 %v2305_v45, 0.0  ;;  %v3588_v49 = vmax.f32 %v2558_v20, 0.0 }
 0x2aa   :  { %11322 = vst [vmem:[#allocation13_spill] sm:$0xff] %v9730_v3 }
 0x2ab   :  { %v5278_v4 = vand.u32 2147483647, %v5022_v53  ;;  %v7241_v54 = vpack.c.bf16 %v3487_v59, %v3486_v13  ;;  %8567 = vst [vmem:[%s11302_s3 + $0x690] sm:$0xff] %v8131_v2   ;;  %v6855_v13 = vld [vmem:[%s11299_s0 + $0x148] sm:$0xff]  ;;  %v3197_v19 = vpop.f32.mrf.mxu3 }
 0x2ac   :  { %v2944_v5 = vpop.f32.mrf.mxu2 }
 0x2ad   :  { %v5533_v24 = vadd.f32 %v5532_v17, %v5278_v4  ;;  %8389 = vst [vmem:[%s11302_s3 + $0x100] sm:$0xff] %v7241_v54   ;;  %v2945_v14 = vadd.f32 %v9538_v10, %v2944_v5  ;;  %v2559_v53 = vpop.f32.mrf.mxu1  ;;  %v3198_v4 = vadd.f32 %v9538_v10, %v3197_v19 }
 0x2ae   :  { %v2307_v17 = vpop.f32.mrf.mxu0  ;;  %v2560_v54 = vadd.f32 %v9538_v10, %v2559_v53 }
 0x2af   :  { %v3743_v21 = vmax.f32 %v2945_v14, 0.0  ;;  %v2308_v6 = vadd.f32 %v9538_v10, %v2307_v17 }
 0x2b1   :  { %v7881_v30 = vpack.c.bf16 %v3743_v21, %v3742_v39  ;;  %v5023_v45 = vsub.f32 %v3743_v21, %v3487_v59  ;;  %2346 = vmatmul.bf16.gmra.mxu0 %v6855_v13  ;;  %2986 = vmatmul.bf16.gmra.mxu2 %v6983_v16  ;;  %v3488_v36 = vmax.f32 %v2308_v6, 0.0  ;;  %v3844_v13 = vmax.f32 %v3198_v4, 0.0  ;;  %v6984_v4 = vld [vmem:[%s11299_s0 + $0x550] sm:$0xff] }
 0x2b2   :  { %v3589_v16 = vmax.f32 %v2560_v54, 0.0  ;;  %3241 = vmatmul.bf16.gmra.mxu3 %v7034_v25 }
 0x2b3   :  { %8517 = vst [vmem:[%s11302_s3 + $0x500] sm:$0xff] %v7881_v30   ;;  %v5279_v47 = vand.u32 2147483647, %v5023_v45  ;;  %v3199_v39 = vpop.f32.mrf.mxu3  ;;  %v9764_v6 = vsub.f32 %v3844_v13, %v3588_v49 }
 0x2b4   :  { %v2947_v52 = vpop.f32.mrf.mxu2  ;;  %v3200_v5 = vadd.f32 %v9538_v10, %v3199_v39  ;;  %v7496_v19 = vpack.c.bf16 %v3589_v16, %v3588_v49  ;;  %v6906_v39 = vld [vmem:[%s11299_s0 + $0x2e0] sm:$0xff] }
 0x2b5   :  { %v5534_v56 = vadd.f32 %v5533_v24, %v5279_v47  ;;  %v2948_v2 = vadd.f32 %v9538_v10, %v2947_v52  ;;  %11323 = vst [vmem:[#allocation14_spill] sm:$0xff] %v9764_v6  ;;  %v2562_v53 = vpop.f32.mrf.mxu1 }
 0x2b6   :  { %v2309_v59 = vpop.f32.mrf.mxu0  ;;  %v3845_v24 = vmax.f32 %v3200_v5, 0.0  ;;  %8440 = vst [vmem:[%s11302_s3 + $0x298] sm:$0xff] %v7496_v19   ;;  %2601 = vmatmul.bf16.gmra.mxu1 %v6906_v39 }
 0x2b7   :  { %v3744_v8 = vmax.f32 %v2948_v2, 0.0  ;;  %v2310_v14 = vadd.f32 %v9538_v10, %v2309_v59 }
 0x2b8   :  { %v8136_v20 = vpack.c.bf16 %v3845_v24, %v3844_v13  ;;  %v9766_v30 = vsub.f32 %v3845_v24, %v3589_v16 }
 0x2b9   :  { %v5024_v17 = vsub.f32 %v3744_v8, %v3488_v36  ;;  %v3489_v21 = vmax.f32 %v2310_v14, 0.0  ;;  %v2563_v14 = vadd.f32 %v9538_v10, %v2562_v53 }
 0x2ba   :  { %11324 = vst [vmem:[#allocation15_spill] sm:$0xff] %v9766_v30 }
 0x2bb   :  { %v5280_v45 = vand.u32 2147483647, %v5024_v17  ;;  %v7246_v47 = vpack.c.bf16 %v3489_v21, %v3488_v36  ;;  %8568 = vst [vmem:[%s11302_s3 + $0x698] sm:$0xff] %v8136_v20   ;;  %v6856_v36 = vld [vmem:[%s11299_s0 + $0x150] sm:$0xff]  ;;  %v3202_v54 = vpop.f32.mrf.mxu3  ;;  %v3590_v19 = vmax.f32 %v2563_v14, 0.0 }
 0x2bc   :  { %v2949_v52 = vpop.f32.mrf.mxu2 }
 0x2bd   :  { %v5535_v2 = vadd.f32 %v5534_v56, %v5280_v45  ;;  %8390 = vst [vmem:[%s11302_s3 + $0x108] sm:$0xff] %v7246_v47   ;;  %v2950_v49 = vadd.f32 %v9538_v10, %v2949_v52  ;;  %v2564_v20 = vpop.f32.mrf.mxu1  ;;  %v3203_v52 = vadd.f32 %v9538_v10, %v3202_v54 }
 0x2be   :  { %v2312_v56 = vpop.f32.mrf.mxu0  ;;  %v2565_v53 = vadd.f32 %v9538_v10, %v2564_v20 }
 0x2bf   :  { %v3745_v59 = vmax.f32 %v2950_v49, 0.0  ;;  %v2313_v5 = vadd.f32 %v9538_v10, %v2312_v56  ;;  %v3846_v39 = vmax.f32 %v3203_v52, 0.0 }
 0x2c0   :  { %v3591_v56 = vmax.f32 %v2565_v53, 0.0 }
 0x2c1   :  { %v7886_v13 = vpack.c.bf16 %v3745_v59, %v3744_v8  ;;  %v5025_v16 = vsub.f32 %v3745_v59, %v3489_v21  ;;  %2351 = vmatmul.bf16.gmra.mxu0 %v6856_v36  ;;  %2991 = vmatmul.bf16.gmra.mxu2 %v6984_v4  ;;  %v3490_v24 = vmax.f32 %v2313_v5, 0.0  ;;  %v7035_v59 = vld [vmem:[%s11299_s0 + $0x6e8] sm:$0xff] }
 0x2c2   :  { %v7501_v54 = vpack.c.bf16 %v3591_v56, %v3590_v19  ;;  %3246 = vmatmul.bf16.gmra.mxu3 %v7035_v59 }
 0x2c3   :  { %8518 = vst [vmem:[%s11302_s3 + $0x508] sm:$0xff] %v7886_v13   ;;  %v5281_v25 = vand.u32 2147483647, %v5025_v16  ;;  %v3204_v8 = vpop.f32.mrf.mxu3  ;;  %v9800_v13 = vsub.f32 %v3846_v39, %v3590_v19 }
 0x2c4   :  { %v2952_v17 = vpop.f32.mrf.mxu2  ;;  %v3205_v49 = vadd.f32 %v9538_v10, %v3204_v8  ;;  %8441 = vst [vmem:[%s11302_s3 + $0x2a0] sm:$0xff] %v7501_v54   ;;  %v6985_v8 = vld [vmem:[%s11299_s0 + $0x558] sm:$0xff] }
 0x2c5   :  { %v5536_v45 = vadd.f32 %v5535_v2, %v5281_v25  ;;  %v2953_v47 = vadd.f32 %v9538_v10, %v2952_v17  ;;  %11325 = vst [vmem:[#allocation16_spill] sm:$0xff] %v9800_v13  ;;  %v2567_v52 = vpop.f32.mrf.mxu1 }
 0x2c6   :  { %v2314_v21 = vpop.f32.mrf.mxu0  ;;  %v3847_v2 = vmax.f32 %v3205_v49, 0.0  ;;  %v6907_v49 = vld [vmem:[%s11299_s0 + $0x2e8] sm:$0xff] }
 0x2c7   :  { %v3746_v36 = vmax.f32 %v2953_v47, 0.0  ;;  %v2315_v4 = vadd.f32 %v9538_v10, %v2314_v21  ;;  %2606 = vmatmul.bf16.gmra.mxu1 %v6907_v49 }
 0x2c8   :  { %v8141_v16 = vpack.c.bf16 %v3847_v2, %v3846_v39  ;;  %v9802_v25 = vsub.f32 %v3847_v2, %v3591_v56  ;;  %v2568_v56 = vadd.f32 %v9538_v10, %v2567_v52 }
 0x2c9   :  { %v5026_v5 = vsub.f32 %v3746_v36, %v3490_v24  ;;  %v3491_v14 = vmax.f32 %v2315_v4, 0.0 }
 0x2ca   :  { %11326 = vst [vmem:[#allocation17_spill] sm:$0xff] %v9802_v25 }
 0x2cb   :  { %v5282_v17 = vand.u32 2147483647, %v5026_v5  ;;  %v7251_v20 = vpack.c.bf16 %v3491_v14, %v3490_v24  ;;  %8569 = vst [vmem:[%s11302_s3 + $0x6a0] sm:$0xff] %v8141_v16   ;;  %v6857_v24 = vld [vmem:[%s11299_s0 + $0x158] sm:$0xff]  ;;  %v3207_v21 = vpop.f32.mrf.mxu3 }
 0x2cc   :  { %v2954_v47 = vpop.f32.mrf.mxu2  ;;  %v3208_v49 = vadd.f32 %v9538_v10, %v3207_v21 }
 0x2cd   :  { %v5537_v53 = vadd.f32 %v5536_v45, %v5282_v17  ;;  %8391 = vst [vmem:[%s11302_s3 + $0x110] sm:$0xff] %v7251_v20   ;;  %v2955_v19 = vadd.f32 %v9538_v10, %v2954_v47  ;;  %v3592_v17 = vmax.f32 %v2568_v56, 0.0  ;;  %v2569_v20 = vpop.f32.mrf.mxu1 }
 0x2ce   :  { %v2317_v45 = vpop.f32.mrf.mxu0  ;;  %v2570_v52 = vadd.f32 %v9538_v10, %v2569_v20 }
 0x2cf   :  { %v3747_v4 = vmax.f32 %v2955_v19, 0.0  ;;  %v2318_v39 = vadd.f32 %v9538_v10, %v2317_v45 }
 0x2d1   :  { %v7891_v59 = vpack.c.bf16 %v3747_v4, %v3746_v36  ;;  %v5027_v2 = vsub.f32 %v3747_v4, %v3491_v14  ;;  %2356 = vmatmul.bf16.gmra.mxu0 %v6857_v24  ;;  %2996 = vmatmul.bf16.gmra.mxu2 %v6985_v8  ;;  %v3492_v54 = vmax.f32 %v2318_v39, 0.0  ;;  %v3848_v4 = vmax.f32 %v3208_v49, 0.0  ;;  %v7036_v39 = vld [vmem:[%s11299_s0 + $0x6f0] sm:$0xff] }
 0x2d2   :  { %3251 = vmatmul.bf16.gmra.mxu3 %v7036_v39 }
 0x2d3   :  { %8519 = vst [vmem:[%s11302_s3 + $0x510] sm:$0xff] %v7891_v59   ;;  %v5283_v5 = vand.u32 2147483647, %v5027_v2  ;;  %v3209_v36 = vpop.f32.mrf.mxu3  ;;  %v3593_v59 = vmax.f32 %v2570_v52, 0.0 }
 0x2d4   :  { %v2957_v16 = vpop.f32.mrf.mxu2  ;;  %v3210_v24 = vadd.f32 %v9538_v10, %v3209_v36 }
 0x2d5   :  { %v5538_v47 = vadd.f32 %v5537_v53, %v5283_v5  ;;  %v2958_v19 = vadd.f32 %v9538_v10, %v2957_v16  ;;  %v9836_v5 = vsub.f32 %v3848_v4, %v3592_v17  ;;  %v7506_v21 = vpack.c.bf16 %v3593_v59, %v3592_v17  ;;  %v2572_v52 = vpop.f32.mrf.mxu1 }
 0x2d6   :  { %v2319_v14 = vpop.f32.mrf.mxu0  ;;  %v3849_v53 = vmax.f32 %v3210_v24, 0.0  ;;  %v6986_v24 = vld [vmem:[%s11299_s0 + $0x560] sm:$0xff] }
 0x2d7   :  { %v3748_v8 = vmax.f32 %v2958_v19, 0.0  ;;  %v2320_v45 = vadd.f32 %v9538_v10, %v2319_v14  ;;  %11327 = vst [vmem:[#allocation18_spill] sm:$0xff] %v9836_v5 }
 0x2d8   :  { %v8146_v16 = vpack.c.bf16 %v3849_v53, %v3848_v4  ;;  %v9838_v20 = vsub.f32 %v3849_v53, %v3593_v59  ;;  %8442 = vst [vmem:[%s11302_s3 + $0x2a8] sm:$0xff] %v7506_v21   ;;  %v6908_v4 = vld [vmem:[%s11299_s0 + $0x2f0] sm:$0xff]  ;;  %v2573_v53 = vadd.f32 %v9538_v10, %v2572_v52 }
 0x2d9   :  { %v5028_v56 = vsub.f32 %v3748_v8, %v3492_v54  ;;  %v3493_v2 = vmax.f32 %v2320_v45, 0.0  ;;  %2611 = vmatmul.bf16.gmra.mxu1 %v6908_v4 }
 0x2da   :  { %11328 = vst [vmem:[#allocation19_spill] sm:$0xff] %v9838_v20 }
 0x2db   :  { %v5284_v36 = vand.u32 2147483647, %v5028_v56  ;;  %v7256_v19 = vpack.c.bf16 %v3493_v2, %v3492_v54  ;;  %8570 = vst [vmem:[%s11302_s3 + $0x6a8] sm:$0xff] %v8146_v16   ;;  %v6858_v54 = vld [vmem:[%s11299_s0 + $0x160] sm:$0xff]  ;;  %v3212_v45 = vpop.f32.mrf.mxu3 }
 0x2dc   :  { %v2959_v49 = vpop.f32.mrf.mxu2  ;;  %v3213_v4 = vadd.f32 %v9538_v10, %v3212_v45 }
 0x2dd   :  { %v5539_v14 = vadd.f32 %v5538_v47, %v5284_v36  ;;  %8392 = vst [vmem:[%s11302_s3 + $0x118] sm:$0xff] %v7256_v19   ;;  %v2960_v17 = vadd.f32 %v9538_v10, %v2959_v49  ;;  %v3594_v49 = vmax.f32 %v2573_v53, 0.0  ;;  %v2574_v20 = vpop.f32.mrf.mxu1 }
 0x2de   :  { %v2322_v47 = vpop.f32.mrf.mxu0  ;;  %v2575_v52 = vadd.f32 %v9538_v10, %v2574_v20 }
 0x2df   :  { %v3749_v59 = vmax.f32 %v2960_v17, 0.0  ;;  %v2323_v39 = vadd.f32 %v9538_v10, %v2322_v47 }
 0x2e1   :  { %v7896_v56 = vpack.c.bf16 %v3749_v59, %v3748_v8  ;;  %v5029_v21 = vsub.f32 %v3749_v59, %v3493_v2  ;;  %2361 = vmatmul.bf16.gmra.mxu0 %v6858_v54  ;;  %3001 = vmatmul.bf16.gmra.mxu2 %v6986_v24  ;;  %v3494_v36 = vmax.f32 %v2323_v39, 0.0  ;;  %v3850_v59 = vmax.f32 %v3213_v4, 0.0  ;;  %v7037_v39 = vld [vmem:[%s11299_s0 + $0x6f8] sm:$0xff] }
 0x2e2   :  { %3256 = vmatmul.bf16.gmra.mxu3 %v7037_v39 }
 0x2e3   :  { %8520 = vst [vmem:[%s11302_s3 + $0x518] sm:$0xff] %v7896_v56   ;;  %v5285_v16 = vand.u32 2147483647, %v5029_v21  ;;  %v3214_v8 = vpop.f32.mrf.mxu3  ;;  %v3595_v56 = vmax.f32 %v2575_v52, 0.0 }
 0x2e4   :  { %v2962_v19 = vpop.f32.mrf.mxu2  ;;  %v3215_v54 = vadd.f32 %v9538_v10, %v3214_v8 }
 0x2e5   :  { %v5540_v5 = vadd.f32 %v5539_v14, %v5285_v16  ;;  %v2963_v17 = vadd.f32 %v9538_v10, %v2962_v19  ;;  %v9872_v16 = vsub.f32 %v3850_v59, %v3594_v49  ;;  %v7511_v45 = vpack.c.bf16 %v3595_v56, %v3594_v49  ;;  %v2577_v52 = vpop.f32.mrf.mxu1 }
 0x2e6   :  { %v2324_v2 = vpop.f32.mrf.mxu0  ;;  %v3851_v14 = vmax.f32 %v3215_v54, 0.0  ;;  %v6987_v54 = vld [vmem:[%s11299_s0 + $0x568] sm:$0xff] }
 0x2e7   :  { %v3750_v24 = vmax.f32 %v2963_v17, 0.0  ;;  %v2325_v47 = vadd.f32 %v9538_v10, %v2324_v2  ;;  %11329 = vst [vmem:[#allocation20_spill] sm:$0xff] %v9872_v16 }
 0x2e8   :  { %v8151_v20 = vpack.c.bf16 %v3851_v14, %v3850_v59  ;;  %v9874_v19 = vsub.f32 %v3851_v14, %v3595_v56  ;;  %8443 = vst [vmem:[%s11302_s3 + $0x2b0] sm:$0xff] %v7511_v45   ;;  %v6909_v59 = vld [vmem:[%s11299_s0 + $0x2f8] sm:$0xff]  ;;  %v2578_v14 = vadd.f32 %v9538_v10, %v2577_v52 }
 0x2e9   :  { %v5030_v53 = vsub.f32 %v3750_v24, %v3494_v36  ;;  %v3495_v21 = vmax.f32 %v2325_v47, 0.0  ;;  %2616 = vmatmul.bf16.gmra.mxu1 %v6909_v59 }
 0x2ea   :  { %11330 = vst [vmem:[#allocation21_spill] sm:$0xff] %v9874_v19 }
 0x2eb   :  { %v5286_v8 = vand.u32 2147483647, %v5030_v53  ;;  %v7261_v17 = vpack.c.bf16 %v3495_v21, %v3494_v36  ;;  %8571 = vst [vmem:[%s11302_s3 + $0x6b0] sm:$0xff] %v8151_v20   ;;  %v6859_v36 = vld [vmem:[%s11299_s0 + $0x168] sm:$0xff]  ;;  %v3217_v47 = vpop.f32.mrf.mxu3 }
 0x2ec   :  { %v2964_v4 = vpop.f32.mrf.mxu2  ;;  %v3218_v59 = vadd.f32 %v9538_v10, %v3217_v47 }
 0x2ed   :  { %v5541_v2 = vadd.f32 %v5540_v5, %v5286_v8  ;;  %8393 = vst [vmem:[%s11302_s3 + $0x120] sm:$0xff] %v7261_v17   ;;  %v2965_v49 = vadd.f32 %v9538_v10, %v2964_v4  ;;  %v3596_v4 = vmax.f32 %v2578_v14, 0.0  ;;  %v2579_v19 = vpop.f32.mrf.mxu1 }
 0x2ee   :  { %v2327_v5 = vpop.f32.mrf.mxu0  ;;  %v2580_v52 = vadd.f32 %v9538_v10, %v2579_v19 }
 0x2ef   :  { %v3751_v56 = vmax.f32 %v2965_v49, 0.0  ;;  %v2328_v39 = vadd.f32 %v9538_v10, %v2327_v5 }
 0x2f1   :  { %v7901_v53 = vpack.c.bf16 %v3751_v56, %v3750_v24  ;;  %v5031_v45 = vsub.f32 %v3751_v56, %v3495_v21  ;;  %2366 = vmatmul.bf16.gmra.mxu0 %v6859_v36  ;;  %3006 = vmatmul.bf16.gmra.mxu2 %v6987_v54  ;;  %v3496_v8 = vmax.f32 %v2328_v39, 0.0  ;;  %v3852_v56 = vmax.f32 %v3218_v59, 0.0  ;;  %v7038_v39 = vld [vmem:[%s11299_s0 + $0x700] sm:$0xff] }
 0x2f2   :  { %3261 = vmatmul.bf16.gmra.mxu3 %v7038_v39 }
 0x2f3   :  { %8521 = vst [vmem:[%s11302_s3 + $0x520] sm:$0xff] %v7901_v53   ;;  %v5287_v20 = vand.u32 2147483647, %v5031_v45  ;;  %v3219_v24 = vpop.f32.mrf.mxu3  ;;  %v3597_v53 = vmax.f32 %v2580_v52, 0.0 }
 0x2f4   :  { %v2967_v17 = vpop.f32.mrf.mxu2  ;;  %v3220_v36 = vadd.f32 %v9538_v10, %v3219_v24 }
 0x2f5   :  { %v5542_v16 = vadd.f32 %v5541_v2, %v5287_v20  ;;  %v2968_v49 = vadd.f32 %v9538_v10, %v2967_v17  ;;  %v9908_v20 = vsub.f32 %v3852_v56, %v3596_v4  ;;  %v7516_v47 = vpack.c.bf16 %v3597_v53, %v3596_v4  ;;  %v2582_v52 = vpop.f32.mrf.mxu1 }
 0x2f6   :  { %v2329_v21 = vpop.f32.mrf.mxu0  ;;  %v3853_v2 = vmax.f32 %v3220_v36, 0.0  ;;  %v6988_v36 = vld [vmem:[%s11299_s0 + $0x570] sm:$0xff] }
 0x2f7   :  { %v3752_v54 = vmax.f32 %v2968_v49, 0.0  ;;  %v2330_v5 = vadd.f32 %v9538_v10, %v2329_v21  ;;  %11331 = vst [vmem:[#allocation22_spill] sm:$0xff] %v9908_v20 }
 0x2f8   :  { %v8156_v19 = vpack.c.bf16 %v3853_v2, %v3852_v56  ;;  %v9910_v17 = vsub.f32 %v3853_v2, %v3597_v53  ;;  %8444 = vst [vmem:[%s11302_s3 + $0x2b8] sm:$0xff] %v7516_v47   ;;  %v6910_v56 = vld [vmem:[%s11299_s0 + $0x300] sm:$0xff] }
 0x2f9   :  { %v5032_v14 = vsub.f32 %v3752_v54, %v3496_v8  ;;  %v3497_v45 = vmax.f32 %v2330_v5, 0.0  ;;  %2621 = vmatmul.bf16.gmra.mxu1 %v6910_v56 }
 0x2fa   :  { %11332 = vst [vmem:[#allocation23_spill] sm:$0xff] %v9910_v17 }
 0x2fb   :  { %v5288_v24 = vand.u32 2147483647, %v5032_v14  ;;  %v7266_v49 = vpack.c.bf16 %v3497_v45, %v3496_v8  ;;  %8572 = vst [vmem:[%s11302_s3 + $0x6b8] sm:$0xff] %v8156_v19   ;;  %v6860_v8 = vld [vmem:[%s11299_s0 + $0x170] sm:$0xff]  ;;  %v3222_v5 = vpop.f32.mrf.mxu3 }
 0x2fc   :  { %v2969_v59 = vpop.f32.mrf.mxu2 }
 0x2fd   :  { %v5543_v21 = vadd.f32 %v5542_v16, %v5288_v24  ;;  %8394 = vst [vmem:[%s11302_s3 + $0x128] sm:$0xff] %v7266_v49   ;;  %v2970_v4 = vadd.f32 %v9538_v10, %v2969_v59  ;;  %v9934_v10 = vld [vmem:[%s11301_s2] ss:$0 sm:$0xff] }
 0x2fe   :  { %v2332_v16 = vpop.f32.mrf.mxu0  ;;  %v2583_v2 = vadd.f32 %v9934_v10, %v2582_v52 }
 0x2ff   :  { %v3753_v53 = vmax.f32 %v2970_v4, 0.0  ;;  %v2333_v39 = vadd.f32 %v9934_v10, %v2332_v16  ;;  %v2584_v4 = vpop.f32.mrf.mxu1  ;;  %v3223_v16 = vadd.f32 %v9934_v10, %v3222_v5 }
 0x300   :  { %v3598_v59 = vmax.f32 %v2583_v2, 0.0  ;;  %v2585_v52 = vadd.f32 %v9934_v10, %v2584_v4 }
 0x301   :  { %v7906_v14 = vpack.c.bf16 %v3753_v53, %v3752_v54  ;;  %v5033_v47 = vsub.f32 %v3753_v53, %v3497_v45  ;;  %2371 = vmatmul.bf16.gmra.mxu0 %v6860_v8  ;;  %3011 = vmatmul.bf16.gmra.mxu2 %v6988_v36  ;;  %v3498_v24 = vmax.f32 %v2333_v39, 0.0  ;;  %v7039_v39 = vld [vmem:[%s11299_s0 + $0x708] sm:$0xff] }
 0x302   :  { %3266 = vmatmul.bf16.gmra.mxu3 %v7039_v39 }
 0x303   :  { %8522 = vst [vmem:[%s11302_s3 + $0x528] sm:$0xff] %v7906_v14   ;;  %v5289_v19 = vand.u32 2147483647, %v5033_v47  ;;  %v3224_v54 = vpop.f32.mrf.mxu3  ;;  %v3854_v14 = vmax.f32 %v3223_v16, 0.0  ;;  %v3599_v47 = vmax.f32 %v2585_v52, 0.0 }
 0x304   :  { %v2972_v49 = vpop.f32.mrf.mxu2  ;;  %v3225_v8 = vadd.f32 %v9934_v10, %v3224_v54 }
 0x305   :  { %v5544_v56 = vadd.f32 %v5543_v21, %v5289_v19  ;;  %v2973_v17 = vadd.f32 %v9934_v10, %v2972_v49  ;;  %v9949_v49 = vsub.f32 %v3854_v14, %v3598_v59  ;;  %v7521_v5 = vpack.c.bf16 %v3599_v47, %v3598_v59 }
 0x306   :  { %v2334_v45 = vpop.f32.mrf.mxu0  ;;  %v3855_v21 = vmax.f32 %v3225_v8, 0.0  ;;  %v6989_v8 = vld [vmem:[%s11299_s0 + $0x578] sm:$0xff] }
 0x307   :  { %v3754_v36 = vmax.f32 %v2973_v17, 0.0  ;;  %v2335_v53 = vadd.f32 %v9934_v10, %v2334_v45  ;;  %11333 = vst [vmem:[#allocation24_spill] sm:$0xff] %v9949_v49  ;;  %v2587_v52 = vpop.f32.mrf.mxu1 }
 0x308   :  { %v8161_v4 = vpack.c.bf16 %v3855_v21, %v3854_v14  ;;  %v9951_v20 = vsub.f32 %v3855_v21, %v3599_v47  ;;  %8445 = vst [vmem:[%s11302_s3 + $0x2c0] sm:$0xff] %v7521_v5   ;;  %v6911_v14 = vld [vmem:[%s11299_s0 + $0x308] sm:$0xff]  ;;  %v2588_v21 = vadd.f32 %v9934_v10, %v2587_v52 }
 0x309   :  { %v5034_v2 = vsub.f32 %v3754_v36, %v3498_v24  ;;  %v3499_v19 = vmax.f32 %v2335_v53, 0.0  ;;  %2626 = vmatmul.bf16.gmra.mxu1 %v6911_v14 }
 0x30a   :  { %11334 = vst [vmem:[#allocation25_spill] sm:$0xff] %v9951_v20 }
 0x30b   :  { %v5290_v54 = vand.u32 2147483647, %v5034_v2  ;;  %v7271_v17 = vpack.c.bf16 %v3499_v19, %v3498_v24  ;;  %8573 = vst [vmem:[%s11302_s3 + $0x6c0] sm:$0xff] %v8161_v4   ;;  %v6861_v24 = vld [vmem:[%s11299_s0 + $0x178] sm:$0xff]  ;;  %v3227_v53 = vpop.f32.mrf.mxu3 }
 0x30c   :  { %v2974_v16 = vpop.f32.mrf.mxu2  ;;  %v3228_v14 = vadd.f32 %v9934_v10, %v3227_v53 }
 0x30d   :  { %v5545_v45 = vadd.f32 %v5544_v56, %v5290_v54  ;;  %8395 = vst [vmem:[%s11302_s3 + $0x130] sm:$0xff] %v7271_v17   ;;  %v2975_v59 = vadd.f32 %v9934_v10, %v2974_v16  ;;  %v3600_v16 = vmax.f32 %v2588_v21, 0.0 }
 0x30e   :  { %v2337_v56 = vpop.f32.mrf.mxu0 }
 0x30f   :  { %v3755_v47 = vmax.f32 %v2975_v59, 0.0  ;;  %v2338_v39 = vadd.f32 %v9934_v10, %v2337_v56  ;;  %v2589_v20 = vpop.f32.mrf.mxu1 }
 0x310   :  { %v2590_v52 = vadd.f32 %v9934_v10, %v2589_v20 }
 0x311   :  { %v7911_v2 = vpack.c.bf16 %v3755_v47, %v3754_v36  ;;  %v5035_v5 = vsub.f32 %v3755_v47, %v3499_v19  ;;  %2376 = vmatmul.bf16.gmra.mxu0 %v6861_v24  ;;  %3016 = vmatmul.bf16.gmra.mxu2 %v6989_v8  ;;  %v3500_v54 = vmax.f32 %v2338_v39, 0.0  ;;  %v3856_v47 = vmax.f32 %v3228_v14, 0.0  ;;  %v7040_v39 = vld [vmem:[%s11299_s0 + $0x710] sm:$0xff] }
 0x312   :  { %3271 = vmatmul.bf16.gmra.mxu3 %v7040_v39 }
 0x313   :  { %8523 = vst [vmem:[%s11302_s3 + $0x530] sm:$0xff] %v7911_v2   ;;  %v5291_v4 = vand.u32 2147483647, %v5035_v5  ;;  %v3229_v36 = vpop.f32.mrf.mxu3  ;;  %v3601_v2 = vmax.f32 %v2590_v52, 0.0 }
 0x314   :  { %v2977_v17 = vpop.f32.mrf.mxu2  ;;  %v3230_v24 = vadd.f32 %v9934_v10, %v3229_v36 }
 0x315   :  { %v5546_v49 = vadd.f32 %v5545_v45, %v5291_v4  ;;  %v2978_v59 = vadd.f32 %v9934_v10, %v2977_v17  ;;  %v9985_v4 = vsub.f32 %v3856_v47, %v3600_v16  ;;  %v7526_v53 = vpack.c.bf16 %v3601_v2, %v3600_v16 }
 0x316   :  { %v2339_v19 = vpop.f32.mrf.mxu0  ;;  %v3857_v45 = vmax.f32 %v3230_v24, 0.0  ;;  %v6990_v24 = vld [vmem:[%s11299_s0 + $0x580] sm:$0xff] }
 0x317   :  { %v3756_v8 = vmax.f32 %v2978_v59, 0.0  ;;  %v2340_v56 = vadd.f32 %v9934_v10, %v2339_v19  ;;  %11335 = vst [vmem:[#allocation26_spill] sm:$0xff] %v9985_v4  ;;  %v2592_v52 = vpop.f32.mrf.mxu1 }
 0x318   :  { %v8166_v20 = vpack.c.bf16 %v3857_v45, %v3856_v47  ;;  %v9987_v17 = vsub.f32 %v3857_v45, %v3601_v2  ;;  %8446 = vst [vmem:[%s11302_s3 + $0x2c8] sm:$0xff] %v7526_v53   ;;  %v6912_v47 = vld [vmem:[%s11299_s0 + $0x310] sm:$0xff]  ;;  %v2593_v45 = vadd.f32 %v9934_v10, %v2592_v52 }
 0x319   :  { %v5036_v21 = vsub.f32 %v3756_v8, %v3500_v54  ;;  %v3501_v5 = vmax.f32 %v2340_v56, 0.0  ;;  %2631 = vmatmul.bf16.gmra.mxu1 %v6912_v47 }
 0x31a   :  { %11336 = vst [vmem:[#allocation27_spill] sm:$0xff] %v9987_v17 }
 0x31b   :  { %v5292_v36 = vand.u32 2147483647, %v5036_v21  ;;  %v7276_v59 = vpack.c.bf16 %v3501_v5, %v3500_v54  ;;  %8574 = vst [vmem:[%s11302_s3 + $0x6c8] sm:$0xff] %v8166_v20   ;;  %v6862_v54 = vld [vmem:[%s11299_s0 + $0x180] sm:$0xff]  ;;  %v3232_v56 = vpop.f32.mrf.mxu3 }
 0x31c   :  { %v2979_v14 = vpop.f32.mrf.mxu2  ;;  %v3233_v47 = vadd.f32 %v9934_v10, %v3232_v56 }
 0x31d   :  { %v5547_v19 = vadd.f32 %v5546_v49, %v5292_v36  ;;  %8396 = vst [vmem:[%s11302_s3 + $0x138] sm:$0xff] %v7276_v59   ;;  %v2980_v16 = vadd.f32 %v9934_v10, %v2979_v14  ;;  %v3602_v14 = vmax.f32 %v2593_v45, 0.0 }
 0x31e   :  { %v2342_v49 = vpop.f32.mrf.mxu0 }
 0x31f   :  { %v3757_v2 = vmax.f32 %v2980_v16, 0.0  ;;  %v2343_v39 = vadd.f32 %v9934_v10, %v2342_v49  ;;  %v2594_v17 = vpop.f32.mrf.mxu1 }
 0x320   :  { %v2595_v52 = vadd.f32 %v9934_v10, %v2594_v17 }
 0x321   :  { %v7916_v21 = vpack.c.bf16 %v3757_v2, %v3756_v8  ;;  %v5037_v53 = vsub.f32 %v3757_v2, %v3501_v5  ;;  %2381 = vmatmul.bf16.gmra.mxu0 %v6862_v54  ;;  %3021 = vmatmul.bf16.gmra.mxu2 %v6990_v24  ;;  %v3502_v36 = vmax.f32 %v2343_v39, 0.0  ;;  %v3858_v2 = vmax.f32 %v3233_v47, 0.0  ;;  %v7041_v39 = vld [vmem:[%s11299_s0 + $0x718] sm:$0xff] }
 0x322   :  { %3276 = vmatmul.bf16.gmra.mxu3 %v7041_v39 }
 0x323   :  { %8524 = vst [vmem:[%s11302_s3 + $0x538] sm:$0xff] %v7916_v21   ;;  %v5293_v20 = vand.u32 2147483647, %v5037_v53  ;;  %v3234_v8 = vpop.f32.mrf.mxu3  ;;  %v3603_v21 = vmax.f32 %v2595_v52, 0.0 }
 0x324   :  { %v2982_v59 = vpop.f32.mrf.mxu2  ;;  %v3235_v54 = vadd.f32 %v9934_v10, %v3234_v8 }
 0x325   :  { %v5548_v4 = vadd.f32 %v5547_v19, %v5293_v20  ;;  %v2983_v16 = vadd.f32 %v9934_v10, %v2982_v59  ;;  %v10021_v20 = vsub.f32 %v3858_v2, %v3602_v14  ;;  %v7531_v56 = vpack.c.bf16 %v3603_v21, %v3602_v14 }
 0x326   :  { %v2344_v5 = vpop.f32.mrf.mxu0  ;;  %v3859_v19 = vmax.f32 %v3235_v54, 0.0  ;;  %v6991_v54 = vld [vmem:[%s11299_s0 + $0x588] sm:$0xff] }
 0x327   :  { %v3758_v24 = vmax.f32 %v2983_v16, 0.0  ;;  %v2345_v49 = vadd.f32 %v9934_v10, %v2344_v5  ;;  %11337 = vst [vmem:[#allocation28_spill] sm:$0xff] %v10021_v20  ;;  %v2597_v52 = vpop.f32.mrf.mxu1 }
 0x328   :  { %v8171_v17 = vpack.c.bf16 %v3859_v19, %v3858_v2  ;;  %v10023_v59 = vsub.f32 %v3859_v19, %v3603_v21  ;;  %8447 = vst [vmem:[%s11302_s3 + $0x2d0] sm:$0xff] %v7531_v56   ;;  %v6913_v2 = vld [vmem:[%s11299_s0 + $0x318] sm:$0xff]  ;;  %v2598_v19 = vadd.f32 %v9934_v10, %v2597_v52 }
 0x329   :  { %v5038_v45 = vsub.f32 %v3758_v24, %v3502_v36  ;;  %v3503_v53 = vmax.f32 %v2345_v49, 0.0  ;;  %2636 = vmatmul.bf16.gmra.mxu1 %v6913_v2 }
 0x32a   :  { %11338 = vst [vmem:[#allocation29_spill] sm:$0xff] %v10023_v59 }
 0x32b   :  { %v5294_v8 = vand.u32 2147483647, %v5038_v45  ;;  %v7281_v16 = vpack.c.bf16 %v3503_v53, %v3502_v36  ;;  %8575 = vst [vmem:[%s11302_s3 + $0x6d0] sm:$0xff] %v8171_v17   ;;  %v6863_v36 = vld [vmem:[%s11299_s0 + $0x188] sm:$0xff]  ;;  %v3237_v49 = vpop.f32.mrf.mxu3 }
 0x32c   :  { %v2984_v47 = vpop.f32.mrf.mxu2  ;;  %v3238_v2 = vadd.f32 %v9934_v10, %v3237_v49 }
 0x32d   :  { %v5549_v5 = vadd.f32 %v5548_v4, %v5294_v8  ;;  %8397 = vst [vmem:[%s11302_s3 + $0x140] sm:$0xff] %v7281_v16   ;;  %v2985_v14 = vadd.f32 %v9934_v10, %v2984_v47  ;;  %v3604_v47 = vmax.f32 %v2598_v19, 0.0 }
 0x32e   :  { %v2347_v4 = vpop.f32.mrf.mxu0 }
 0x32f   :  { %v3759_v21 = vmax.f32 %v2985_v14, 0.0  ;;  %v2348_v39 = vadd.f32 %v9934_v10, %v2347_v4  ;;  %v2599_v59 = vpop.f32.mrf.mxu1 }
 0x330   :  { %v2600_v52 = vadd.f32 %v9934_v10, %v2599_v59 }
 0x331   :  { %v7921_v45 = vpack.c.bf16 %v3759_v21, %v3758_v24  ;;  %v5039_v56 = vsub.f32 %v3759_v21, %v3503_v53  ;;  %2386 = vmatmul.bf16.gmra.mxu0 %v6863_v36  ;;  %3026 = vmatmul.bf16.gmra.mxu2 %v6991_v54  ;;  %v3504_v8 = vmax.f32 %v2348_v39, 0.0  ;;  %v3860_v21 = vmax.f32 %v3238_v2, 0.0  ;;  %v7042_v39 = vld [vmem:[%s11299_s0 + $0x720] sm:$0xff] }
 0x332   :  { %3281 = vmatmul.bf16.gmra.mxu3 %v7042_v39 }
 0x333   :  { %8525 = vst [vmem:[%s11302_s3 + $0x540] sm:$0xff] %v7921_v45   ;;  %v5295_v17 = vand.u32 2147483647, %v5039_v56  ;;  %v3239_v24 = vpop.f32.mrf.mxu3  ;;  %v3605_v45 = vmax.f32 %v2600_v52, 0.0 }
 0x334   :  { %v2987_v16 = vpop.f32.mrf.mxu2  ;;  %v3240_v36 = vadd.f32 %v9934_v10, %v3239_v24 }
 0x335   :  { %v5550_v20 = vadd.f32 %v5549_v5, %v5295_v17  ;;  %v2988_v14 = vadd.f32 %v9934_v10, %v2987_v16  ;;  %v10057_v17 = vsub.f32 %v3860_v21, %v3604_v47  ;;  %v7536_v49 = vpack.c.bf16 %v3605_v45, %v3604_v47 }
 0x336   :  { %v2349_v53 = vpop.f32.mrf.mxu0  ;;  %v3861_v5 = vmax.f32 %v3240_v36, 0.0  ;;  %v6992_v36 = vld [vmem:[%s11299_s0 + $0x590] sm:$0xff] }
 0x337   :  { %v3760_v54 = vmax.f32 %v2988_v14, 0.0  ;;  %v2350_v4 = vadd.f32 %v9934_v10, %v2349_v53  ;;  %11339 = vst [vmem:[#allocation30_spill] sm:$0xff] %v10057_v17  ;;  %v2602_v52 = vpop.f32.mrf.mxu1 }
 0x338   :  { %v8176_v59 = vpack.c.bf16 %v3861_v5, %v3860_v21  ;;  %v10059_v16 = vsub.f32 %v3861_v5, %v3605_v45  ;;  %8448 = vst [vmem:[%s11302_s3 + $0x2d8] sm:$0xff] %v7536_v49   ;;  %v6914_v21 = vld [vmem:[%s11299_s0 + $0x320] sm:$0xff]  ;;  %v2603_v5 = vadd.f32 %v9934_v10, %v2602_v52 }
 0x339   :  { %v5040_v19 = vsub.f32 %v3760_v54, %v3504_v8  ;;  %v3505_v56 = vmax.f32 %v2350_v4, 0.0  ;;  %2641 = vmatmul.bf16.gmra.mxu1 %v6914_v21 }
 0x33a   :  { %11340 = vst [vmem:[#allocation31_spill] sm:$0xff] %v10059_v16 }
 0x33b   :  { %v5296_v24 = vand.u32 2147483647, %v5040_v19  ;;  %v7286_v14 = vpack.c.bf16 %v3505_v56, %v3504_v8  ;;  %8576 = vst [vmem:[%s11302_s3 + $0x6d8] sm:$0xff] %v8176_v59   ;;  %v6864_v8 = vld [vmem:[%s11299_s0 + $0x190] sm:$0xff]  ;;  %v3242_v4 = vpop.f32.mrf.mxu3 }
 0x33c   :  { %v2989_v2 = vpop.f32.mrf.mxu2  ;;  %v3243_v21 = vadd.f32 %v9934_v10, %v3242_v4 }
 0x33d   :  { %v5551_v53 = vadd.f32 %v5550_v20, %v5296_v24  ;;  %8398 = vst [vmem:[%s11302_s3 + $0x148] sm:$0xff] %v7286_v14   ;;  %v2990_v47 = vadd.f32 %v9934_v10, %v2989_v2  ;;  %v3606_v2 = vmax.f32 %v2603_v5, 0.0 }
 0x33e   :  { %v2352_v20 = vpop.f32.mrf.mxu0 }
 0x33f   :  { %v3761_v45 = vmax.f32 %v2990_v47, 0.0  ;;  %v2353_v39 = vadd.f32 %v9934_v10, %v2352_v20  ;;  %v2604_v16 = vpop.f32.mrf.mxu1 }
 0x340   :  { %v2605_v52 = vadd.f32 %v9934_v10, %v2604_v16 }
 0x341   :  { %v7926_v19 = vpack.c.bf16 %v3761_v45, %v3760_v54  ;;  %v5041_v49 = vsub.f32 %v3761_v45, %v3505_v56  ;;  %2391 = vmatmul.bf16.gmra.mxu0 %v6864_v8  ;;  %3031 = vmatmul.bf16.gmra.mxu2 %v6992_v36  ;;  %v3506_v24 = vmax.f32 %v2353_v39, 0.0  ;;  %v3862_v45 = vmax.f32 %v3243_v21, 0.0  ;;  %v7043_v39 = vld [vmem:[%s11299_s0 + $0x728] sm:$0xff] }
 0x342   :  { %3286 = vmatmul.bf16.gmra.mxu3 %v7043_v39 }
 0x343   :  { %8526 = vst [vmem:[%s11302_s3 + $0x548] sm:$0xff] %v7926_v19   ;;  %v5297_v59 = vand.u32 2147483647, %v5041_v49  ;;  %v3244_v54 = vpop.f32.mrf.mxu3  ;;  %v3607_v19 = vmax.f32 %v2605_v52, 0.0 }
 0x344   :  { %v2992_v14 = vpop.f32.mrf.mxu2  ;;  %v3245_v8 = vadd.f32 %v9934_v10, %v3244_v54 }
 0x345   :  { %v5552_v17 = vadd.f32 %v5551_v53, %v5297_v59  ;;  %v2993_v47 = vadd.f32 %v9934_v10, %v2992_v14  ;;  %v10093_v59 = vsub.f32 %v3862_v45, %v3606_v2  ;;  %v7541_v4 = vpack.c.bf16 %v3607_v19, %v3606_v2 }
 0x346   :  { %v2354_v56 = vpop.f32.mrf.mxu0  ;;  %v3863_v53 = vmax.f32 %v3245_v8, 0.0  ;;  %v6993_v8 = vld [vmem:[%s11299_s0 + $0x598] sm:$0xff] }
 0x347   :  { %v3762_v36 = vmax.f32 %v2993_v47, 0.0  ;;  %v2355_v20 = vadd.f32 %v9934_v10, %v2354_v56  ;;  %11341 = vst [vmem:[#allocation32_spill] sm:$0xff] %v10093_v59  ;;  %v2607_v52 = vpop.f32.mrf.mxu1 }
 0x348   :  { %v8181_v16 = vpack.c.bf16 %v3863_v53, %v3862_v45  ;;  %v10095_v14 = vsub.f32 %v3863_v53, %v3607_v19  ;;  %8449 = vst [vmem:[%s11302_s3 + $0x2e0] sm:$0xff] %v7541_v4   ;;  %v6915_v45 = vld [vmem:[%s11299_s0 + $0x328] sm:$0xff]  ;;  %v2608_v53 = vadd.f32 %v9934_v10, %v2607_v52 }
 0x349   :  { %v5042_v5 = vsub.f32 %v3762_v36, %v3506_v24  ;;  %v3507_v49 = vmax.f32 %v2355_v20, 0.0  ;;  %2646 = vmatmul.bf16.gmra.mxu1 %v6915_v45 }
 0x34a   :  { %11342 = vst [vmem:[#allocation33_spill] sm:$0xff] %v10095_v14 }
 0x34b   :  { %v5298_v54 = vand.u32 2147483647, %v5042_v5  ;;  %v7291_v47 = vpack.c.bf16 %v3507_v49, %v3506_v24  ;;  %8577 = vst [vmem:[%s11302_s3 + $0x6e0] sm:$0xff] %v8181_v16   ;;  %v6865_v24 = vld [vmem:[%s11299_s0 + $0x198] sm:$0xff]  ;;  %v3247_v20 = vpop.f32.mrf.mxu3 }
 0x34c   :  { %v2994_v21 = vpop.f32.mrf.mxu2  ;;  %v3248_v45 = vadd.f32 %v9934_v10, %v3247_v20 }
 0x34d   :  { %v5553_v56 = vadd.f32 %v5552_v17, %v5298_v54  ;;  %8399 = vst [vmem:[%s11302_s3 + $0x150] sm:$0xff] %v7291_v47   ;;  %v2995_v2 = vadd.f32 %v9934_v10, %v2994_v21  ;;  %v3608_v21 = vmax.f32 %v2608_v53, 0.0 }
 0x34e   :  { %v2357_v17 = vpop.f32.mrf.mxu0 }
 0x34f   :  { %v3763_v19 = vmax.f32 %v2995_v2, 0.0  ;;  %v2358_v39 = vadd.f32 %v9934_v10, %v2357_v17  ;;  %v2609_v14 = vpop.f32.mrf.mxu1 }
 0x350   :  { %v2610_v52 = vadd.f32 %v9934_v10, %v2609_v14 }
 0x351   :  { %v7931_v5 = vpack.c.bf16 %v3763_v19, %v3762_v36  ;;  %v5043_v4 = vsub.f32 %v3763_v19, %v3507_v49  ;;  %2396 = vmatmul.bf16.gmra.mxu0 %v6865_v24  ;;  %3036 = vmatmul.bf16.gmra.mxu2 %v6993_v8  ;;  %v3508_v54 = vmax.f32 %v2358_v39, 0.0  ;;  %v3864_v19 = vmax.f32 %v3248_v45, 0.0  ;;  %v7044_v39 = vld [vmem:[%s11299_s0 + $0x730] sm:$0xff] }
 0x352   :  { %3291 = vmatmul.bf16.gmra.mxu3 %v7044_v39 }
 0x353   :  { %8527 = vst [vmem:[%s11302_s3 + $0x550] sm:$0xff] %v7931_v5   ;;  %v5299_v16 = vand.u32 2147483647, %v5043_v4  ;;  %v3249_v36 = vpop.f32.mrf.mxu3  ;;  %v3609_v5 = vmax.f32 %v2610_v52, 0.0 }
 0x354   :  { %v2997_v47 = vpop.f32.mrf.mxu2  ;;  %v3250_v24 = vadd.f32 %v9934_v10, %v3249_v36 }
 0x355   :  { %v5554_v59 = vadd.f32 %v5553_v56, %v5299_v16  ;;  %v2998_v2 = vadd.f32 %v9934_v10, %v2997_v47  ;;  %v10129_v16 = vsub.f32 %v3864_v19, %v3608_v21  ;;  %v7546_v20 = vpack.c.bf16 %v3609_v5, %v3608_v21 }
 0x356   :  { %v2359_v49 = vpop.f32.mrf.mxu0  ;;  %v3865_v56 = vmax.f32 %v3250_v24, 0.0  ;;  %v6994_v24 = vld [vmem:[%s11299_s0 + $0x5a0] sm:$0xff] }
 0x357   :  { %v3764_v8 = vmax.f32 %v2998_v2, 0.0  ;;  %v2360_v17 = vadd.f32 %v9934_v10, %v2359_v49  ;;  %11343 = vst [vmem:[#allocation34_spill] sm:$0xff] %v10129_v16  ;;  %v2612_v52 = vpop.f32.mrf.mxu1 }
 0x358   :  { %v8186_v14 = vpack.c.bf16 %v3865_v56, %v3864_v19  ;;  %v10131_v47 = vsub.f32 %v3865_v56, %v3609_v5  ;;  %8450 = vst [vmem:[%s11302_s3 + $0x2e8] sm:$0xff] %v7546_v20   ;;  %v6916_v19 = vld [vmem:[%s11299_s0 + $0x330] sm:$0xff]  ;;  %v2613_v56 = vadd.f32 %v9934_v10, %v2612_v52 }
 0x359   :  { %v5044_v53 = vsub.f32 %v3764_v8, %v3508_v54  ;;  %v3509_v4 = vmax.f32 %v2360_v17, 0.0  ;;  %2651 = vmatmul.bf16.gmra.mxu1 %v6916_v19 }
 0x35a   :  { %11344 = vst [vmem:[#allocation35_spill] sm:$0xff] %v10131_v47 }
 0x35b   :  { %v5300_v36 = vand.u32 2147483647, %v5044_v53  ;;  %v7296_v2 = vpack.c.bf16 %v3509_v4, %v3508_v54  ;;  %8578 = vst [vmem:[%s11302_s3 + $0x6e8] sm:$0xff] %v8186_v14   ;;  %v6866_v54 = vld [vmem:[%s11299_s0 + $0x1a0] sm:$0xff]  ;;  %v3252_v17 = vpop.f32.mrf.mxu3 }
 0x35c   :  { %v2999_v45 = vpop.f32.mrf.mxu2  ;;  %v3253_v19 = vadd.f32 %v9934_v10, %v3252_v17 }
 0x35d   :  { %v5555_v49 = vadd.f32 %v5554_v59, %v5300_v36  ;;  %8400 = vst [vmem:[%s11302_s3 + $0x158] sm:$0xff] %v7296_v2   ;;  %v3000_v21 = vadd.f32 %v9934_v10, %v2999_v45  ;;  %v3610_v45 = vmax.f32 %v2613_v56, 0.0 }
 0x35e   :  { %v2362_v59 = vpop.f32.mrf.mxu0 }
 0x35f   :  { %v3765_v5 = vmax.f32 %v3000_v21, 0.0  ;;  %v2363_v39 = vadd.f32 %v9934_v10, %v2362_v59  ;;  %v2614_v47 = vpop.f32.mrf.mxu1 }
 0x360   :  { %v2615_v52 = vadd.f32 %v9934_v10, %v2614_v47 }
 0x361   :  { %v7936_v53 = vpack.c.bf16 %v3765_v5, %v3764_v8  ;;  %v5045_v20 = vsub.f32 %v3765_v5, %v3509_v4  ;;  %2401 = vmatmul.bf16.gmra.mxu0 %v6866_v54  ;;  %3041 = vmatmul.bf16.gmra.mxu2 %v6994_v24  ;;  %v3510_v36 = vmax.f32 %v2363_v39, 0.0  ;;  %v3866_v5 = vmax.f32 %v3253_v19, 0.0  ;;  %v7045_v39 = vld [vmem:[%s11299_s0 + $0x738] sm:$0xff] }
 0x362   :  { %3296 = vmatmul.bf16.gmra.mxu3 %v7045_v39 }
 0x363   :  { %8528 = vst [vmem:[%s11302_s3 + $0x558] sm:$0xff] %v7936_v53   ;;  %v5301_v14 = vand.u32 2147483647, %v5045_v20  ;;  %v3254_v8 = vpop.f32.mrf.mxu3  ;;  %v3611_v53 = vmax.f32 %v2615_v52, 0.0 }
 0x364   :  { %v3002_v2 = vpop.f32.mrf.mxu2  ;;  %v3255_v54 = vadd.f32 %v9934_v10, %v3254_v8 }
 0x365   :  { %v5556_v16 = vadd.f32 %v5555_v49, %v5301_v14  ;;  %v3003_v21 = vadd.f32 %v9934_v10, %v3002_v2  ;;  %v10165_v14 = vsub.f32 %v3866_v5, %v3610_v45  ;;  %v7551_v17 = vpack.c.bf16 %v3611_v53, %v3610_v45 }
 0x366   :  { %v2364_v4 = vpop.f32.mrf.mxu0  ;;  %v3867_v49 = vmax.f32 %v3255_v54, 0.0  ;;  %v6995_v54 = vld [vmem:[%s11299_s0 + $0x5a8] sm:$0xff] }
 0x367   :  { %v3766_v24 = vmax.f32 %v3003_v21, 0.0  ;;  %v2365_v59 = vadd.f32 %v9934_v10, %v2364_v4  ;;  %11345 = vst [vmem:[#allocation36_spill] sm:$0xff] %v10165_v14  ;;  %v2617_v52 = vpop.f32.mrf.mxu1 }
 0x368   :  { %v8191_v47 = vpack.c.bf16 %v3867_v49, %v3866_v5  ;;  %v10167_v2 = vsub.f32 %v3867_v49, %v3611_v53  ;;  %8451 = vst [vmem:[%s11302_s3 + $0x2f0] sm:$0xff] %v7551_v17   ;;  %v6917_v5 = vld [vmem:[%s11299_s0 + $0x338] sm:$0xff]  ;;  %v2618_v49 = vadd.f32 %v9934_v10, %v2617_v52 }
 0x369   :  { %v5046_v56 = vsub.f32 %v3766_v24, %v3510_v36  ;;  %v3511_v20 = vmax.f32 %v2365_v59, 0.0  ;;  %2656 = vmatmul.bf16.gmra.mxu1 %v6917_v5 }
 0x36a   :  { %11346 = vst [vmem:[#allocation37_spill] sm:$0xff] %v10167_v2 }
 0x36b   :  { %v5302_v8 = vand.u32 2147483647, %v5046_v56  ;;  %v7301_v21 = vpack.c.bf16 %v3511_v20, %v3510_v36  ;;  %8579 = vst [vmem:[%s11302_s3 + $0x6f0] sm:$0xff] %v8191_v47   ;;  %v6867_v36 = vld [vmem:[%s11299_s0 + $0x1a8] sm:$0xff]  ;;  %v3257_v59 = vpop.f32.mrf.mxu3 }
 0x36c   :  { %v3004_v19 = vpop.f32.mrf.mxu2  ;;  %v3258_v5 = vadd.f32 %v9934_v10, %v3257_v59 }
 0x36d   :  { %v5557_v4 = vadd.f32 %v5556_v16, %v5302_v8  ;;  %8401 = vst [vmem:[%s11302_s3 + $0x160] sm:$0xff] %v7301_v21   ;;  %v3005_v45 = vadd.f32 %v9934_v10, %v3004_v19  ;;  %v3612_v19 = vmax.f32 %v2618_v49, 0.0 }
 0x36e   :  { %v2367_v16 = vpop.f32.mrf.mxu0 }
 0x36f   :  { %v3767_v53 = vmax.f32 %v3005_v45, 0.0  ;;  %v2368_v39 = vadd.f32 %v9934_v10, %v2367_v16  ;;  %v2619_v2 = vpop.f32.mrf.mxu1 }
 0x370   :  { %v2620_v52 = vadd.f32 %v9934_v10, %v2619_v2 }
 0x371   :  { %v7941_v56 = vpack.c.bf16 %v3767_v53, %v3766_v24  ;;  %v5047_v17 = vsub.f32 %v3767_v53, %v3511_v20  ;;  %2406 = vmatmul.bf16.gmra.mxu0 %v6867_v36  ;;  %3046 = vmatmul.bf16.gmra.mxu2 %v6995_v54  ;;  %v3512_v8 = vmax.f32 %v2368_v39, 0.0  ;;  %v3868_v53 = vmax.f32 %v3258_v5, 0.0  ;;  %v7046_v39 = vld [vmem:[%s11299_s0 + $0x740] sm:$0xff] }
 0x372   :  { %3301 = vmatmul.bf16.gmra.mxu3 %v7046_v39 }
 0x373   :  { %8529 = vst [vmem:[%s11302_s3 + $0x560] sm:$0xff] %v7941_v56   ;;  %v5303_v47 = vand.u32 2147483647, %v5047_v17  ;;  %v3259_v24 = vpop.f32.mrf.mxu3  ;;  %v3613_v56 = vmax.f32 %v2620_v52, 0.0 }
 0x374   :  { %v3007_v21 = vpop.f32.mrf.mxu2  ;;  %v3260_v36 = vadd.f32 %v9934_v10, %v3259_v24 }
 0x375   :  { %v5558_v14 = vadd.f32 %v5557_v4, %v5303_v47  ;;  %v3008_v45 = vadd.f32 %v9934_v10, %v3007_v21  ;;  %v10201_v47 = vsub.f32 %v3868_v53, %v3612_v19  ;;  %v7556_v59 = vpack.c.bf16 %v3613_v56, %v3612_v19 }
 0x376   :  { %v2369_v20 = vpop.f32.mrf.mxu0  ;;  %v3869_v4 = vmax.f32 %v3260_v36, 0.0  ;;  %v6996_v36 = vld [vmem:[%s11299_s0 + $0x5b0] sm:$0xff] }
 0x377   :  { %v3768_v54 = vmax.f32 %v3008_v45, 0.0  ;;  %v2370_v16 = vadd.f32 %v9934_v10, %v2369_v20  ;;  %11347 = vst [vmem:[#allocation38_spill] sm:$0xff] %v10201_v47  ;;  %v2622_v52 = vpop.f32.mrf.mxu1 }
 0x378   :  { %v8196_v2 = vpack.c.bf16 %v3869_v4, %v3868_v53  ;;  %v10203_v21 = vsub.f32 %v3869_v4, %v3613_v56  ;;  %8452 = vst [vmem:[%s11302_s3 + $0x2f8] sm:$0xff] %v7556_v59   ;;  %v6918_v53 = vld [vmem:[%s11299_s0 + $0x340] sm:$0xff]  ;;  %v2623_v4 = vadd.f32 %v9934_v10, %v2622_v52 }
 0x379   :  { %v5048_v49 = vsub.f32 %v3768_v54, %v3512_v8  ;;  %v3513_v17 = vmax.f32 %v2370_v16, 0.0  ;;  %2661 = vmatmul.bf16.gmra.mxu1 %v6918_v53 }
 0x37a   :  { %11348 = vst [vmem:[#allocation39_spill] sm:$0xff] %v10203_v21 }
 0x37b   :  { %v5304_v24 = vand.u32 2147483647, %v5048_v49  ;;  %v7306_v45 = vpack.c.bf16 %v3513_v17, %v3512_v8  ;;  %8580 = vst [vmem:[%s11302_s3 + $0x6f8] sm:$0xff] %v8196_v2   ;;  %v6868_v8 = vld [vmem:[%s11299_s0 + $0x1b0] sm:$0xff]  ;;  %v3262_v16 = vpop.f32.mrf.mxu3 }
 0x37c   :  { %v3009_v5 = vpop.f32.mrf.mxu2  ;;  %v3263_v53 = vadd.f32 %v9934_v10, %v3262_v16 }
 0x37d   :  { %v5559_v20 = vadd.f32 %v5558_v14, %v5304_v24  ;;  %8402 = vst [vmem:[%s11302_s3 + $0x168] sm:$0xff] %v7306_v45   ;;  %v3010_v19 = vadd.f32 %v9934_v10, %v3009_v5  ;;  %v3614_v5 = vmax.f32 %v2623_v4, 0.0 }
 0x37e   :  { %v2372_v14 = vpop.f32.mrf.mxu0 }
 0x37f   :  { %v3769_v56 = vmax.f32 %v3010_v19, 0.0  ;;  %v2373_v39 = vadd.f32 %v9934_v10, %v2372_v14  ;;  %v2624_v21 = vpop.f32.mrf.mxu1 }
 0x380   :  { %v2625_v52 = vadd.f32 %v9934_v10, %v2624_v21 }
 0x381   :  { %v7946_v49 = vpack.c.bf16 %v3769_v56, %v3768_v54  ;;  %v5049_v59 = vsub.f32 %v3769_v56, %v3513_v17  ;;  %2411 = vmatmul.bf16.gmra.mxu0 %v6868_v8  ;;  %3051 = vmatmul.bf16.gmra.mxu2 %v6996_v36  ;;  %v3514_v24 = vmax.f32 %v2373_v39, 0.0  ;;  %v3870_v56 = vmax.f32 %v3263_v53, 0.0  ;;  %v7047_v39 = vld [vmem:[%s11299_s0 + $0x748] sm:$0xff] }
 0x382   :  { %3306 = vmatmul.bf16.gmra.mxu3 %v7047_v39 }
 0x383   :  { %8530 = vst [vmem:[%s11302_s3 + $0x568] sm:$0xff] %v7946_v49   ;;  %v5305_v2 = vand.u32 2147483647, %v5049_v59  ;;  %v3264_v54 = vpop.f32.mrf.mxu3  ;;  %v3615_v49 = vmax.f32 %v2625_v52, 0.0 }
 0x384   :  { %v3012_v45 = vpop.f32.mrf.mxu2  ;;  %v3265_v8 = vadd.f32 %v9934_v10, %v3264_v54 }
 0x385   :  { %v5560_v47 = vadd.f32 %v5559_v20, %v5305_v2  ;;  %v3013_v19 = vadd.f32 %v9934_v10, %v3012_v45  ;;  %v10237_v2 = vsub.f32 %v3870_v56, %v3614_v5  ;;  %v7561_v16 = vpack.c.bf16 %v3615_v49, %v3614_v5 }
 0x386   :  { %v2374_v17 = vpop.f32.mrf.mxu0  ;;  %v3871_v20 = vmax.f32 %v3265_v8, 0.0  ;;  %v6997_v8 = vld [vmem:[%s11299_s0 + $0x5b8] sm:$0xff] }
 0x387   :  { %v3770_v36 = vmax.f32 %v3013_v19, 0.0  ;;  %v2375_v14 = vadd.f32 %v9934_v10, %v2374_v17  ;;  %11349 = vst [vmem:[#allocation40_spill] sm:$0xff] %v10237_v2  ;;  %v2627_v52 = vpop.f32.mrf.mxu1 }
 0x388   :  { %v8201_v21 = vpack.c.bf16 %v3871_v20, %v3870_v56  ;;  %v10239_v45 = vsub.f32 %v3871_v20, %v3615_v49  ;;  %8453 = vst [vmem:[%s11302_s3 + $0x300] sm:$0xff] %v7561_v16   ;;  %v6919_v56 = vld [vmem:[%s11299_s0 + $0x348] sm:$0xff]  ;;  %v2628_v20 = vadd.f32 %v9934_v10, %v2627_v52 }
 0x389   :  { %v5050_v4 = vsub.f32 %v3770_v36, %v3514_v24  ;;  %v3515_v59 = vmax.f32 %v2375_v14, 0.0  ;;  %2666 = vmatmul.bf16.gmra.mxu1 %v6919_v56 }
 0x38a   :  { %11350 = vst [vmem:[#allocation41_spill] sm:$0xff] %v10239_v45 }
 0x38b   :  { %v5306_v54 = vand.u32 2147483647, %v5050_v4  ;;  %v7311_v19 = vpack.c.bf16 %v3515_v59, %v3514_v24  ;;  %8581 = vst [vmem:[%s11302_s3 + $0x700] sm:$0xff] %v8201_v21   ;;  %v6869_v24 = vld [vmem:[%s11299_s0 + $0x1b8] sm:$0xff]  ;;  %v3267_v14 = vpop.f32.mrf.mxu3 }
 0x38c   :  { %v3014_v53 = vpop.f32.mrf.mxu2  ;;  %v3268_v56 = vadd.f32 %v9934_v10, %v3267_v14 }
 0x38d   :  { %v5561_v17 = vadd.f32 %v5560_v47, %v5306_v54  ;;  %8403 = vst [vmem:[%s11302_s3 + $0x170] sm:$0xff] %v7311_v19   ;;  %v3015_v5 = vadd.f32 %v9934_v10, %v3014_v53  ;;  %v3616_v53 = vmax.f32 %v2628_v20, 0.0 }
 0x38e   :  { %v2377_v47 = vpop.f32.mrf.mxu0 }
 0x38f   :  { %v3771_v49 = vmax.f32 %v3015_v5, 0.0  ;;  %v2378_v39 = vadd.f32 %v9934_v10, %v2377_v47  ;;  %v2629_v45 = vpop.f32.mrf.mxu1 }
 0x390   :  { %v2630_v52 = vadd.f32 %v9934_v10, %v2629_v45 }
 0x391   :  { %v7951_v4 = vpack.c.bf16 %v3771_v49, %v3770_v36  ;;  %v5051_v16 = vsub.f32 %v3771_v49, %v3515_v59  ;;  %2416 = vmatmul.bf16.gmra.mxu0 %v6869_v24  ;;  %3056 = vmatmul.bf16.gmra.mxu2 %v6997_v8  ;;  %v3516_v54 = vmax.f32 %v2378_v39, 0.0  ;;  %v3872_v49 = vmax.f32 %v3268_v56, 0.0  ;;  %v7048_v39 = vld [vmem:[%s11299_s0 + $0x750] sm:$0xff] }
 0x392   :  { %3311 = vmatmul.bf16.gmra.mxu3 %v7048_v39 }
 0x393   :  { %8531 = vst [vmem:[%s11302_s3 + $0x570] sm:$0xff] %v7951_v4   ;;  %v5307_v21 = vand.u32 2147483647, %v5051_v16  ;;  %v3269_v36 = vpop.f32.mrf.mxu3  ;;  %v3617_v4 = vmax.f32 %v2630_v52, 0.0 }
 0x394   :  { %v3017_v19 = vpop.f32.mrf.mxu2  ;;  %v3270_v24 = vadd.f32 %v9934_v10, %v3269_v36 }
 0x395   :  { %v5562_v2 = vadd.f32 %v5561_v17, %v5307_v21  ;;  %v3018_v5 = vadd.f32 %v9934_v10, %v3017_v19  ;;  %v10273_v21 = vsub.f32 %v3872_v49, %v3616_v53  ;;  %v7566_v14 = vpack.c.bf16 %v3617_v4, %v3616_v53 }
 0x396   :  { %v2379_v59 = vpop.f32.mrf.mxu0  ;;  %v3873_v17 = vmax.f32 %v3270_v24, 0.0  ;;  %v6998_v24 = vld [vmem:[%s11299_s0 + $0x5c0] sm:$0xff] }
 0x397   :  { %v3772_v8 = vmax.f32 %v3018_v5, 0.0  ;;  %v2380_v47 = vadd.f32 %v9934_v10, %v2379_v59  ;;  %11351 = vst [vmem:[#allocation42_spill] sm:$0xff] %v10273_v21  ;;  %v2632_v52 = vpop.f32.mrf.mxu1 }
 0x398   :  { %v8206_v45 = vpack.c.bf16 %v3873_v17, %v3872_v49  ;;  %v10275_v19 = vsub.f32 %v3873_v17, %v3617_v4  ;;  %8454 = vst [vmem:[%s11302_s3 + $0x308] sm:$0xff] %v7566_v14   ;;  %v6920_v49 = vld [vmem:[%s11299_s0 + $0x350] sm:$0xff]  ;;  %v2633_v17 = vadd.f32 %v9934_v10, %v2632_v52 }
 0x399   :  { %v5052_v20 = vsub.f32 %v3772_v8, %v3516_v54  ;;  %v3517_v16 = vmax.f32 %v2380_v47, 0.0  ;;  %2671 = vmatmul.bf16.gmra.mxu1 %v6920_v49 }
 0x39a   :  { %11352 = vst [vmem:[#allocation43_spill] sm:$0xff] %v10275_v19 }
 0x39b   :  { %v5308_v36 = vand.u32 2147483647, %v5052_v20  ;;  %v7316_v5 = vpack.c.bf16 %v3517_v16, %v3516_v54  ;;  %8582 = vst [vmem:[%s11302_s3 + $0x708] sm:$0xff] %v8206_v45   ;;  %v6870_v54 = vld [vmem:[%s11299_s0 + $0x1c0] sm:$0xff]  ;;  %v3272_v47 = vpop.f32.mrf.mxu3 }
 0x39c   :  { %v3019_v56 = vpop.f32.mrf.mxu2  ;;  %v3273_v49 = vadd.f32 %v9934_v10, %v3272_v47 }
 0x39d   :  { %v5563_v59 = vadd.f32 %v5562_v2, %v5308_v36  ;;  %8404 = vst [vmem:[%s11302_s3 + $0x178] sm:$0xff] %v7316_v5   ;;  %v3020_v53 = vadd.f32 %v9934_v10, %v3019_v56  ;;  %v3618_v56 = vmax.f32 %v2633_v17, 0.0 }
 0x39e   :  { %v2382_v2 = vpop.f32.mrf.mxu0 }
 0x39f   :  { %v3773_v4 = vmax.f32 %v3020_v53, 0.0  ;;  %v2383_v39 = vadd.f32 %v9934_v10, %v2382_v2  ;;  %v2634_v19 = vpop.f32.mrf.mxu1 }
 0x3a0   :  { %v2635_v52 = vadd.f32 %v9934_v10, %v2634_v19 }
 0x3a1   :  { %v7956_v20 = vpack.c.bf16 %v3773_v4, %v3772_v8  ;;  %v5053_v14 = vsub.f32 %v3773_v4, %v3517_v16  ;;  %2421 = vmatmul.bf16.gmra.mxu0 %v6870_v54  ;;  %3061 = vmatmul.bf16.gmra.mxu2 %v6998_v24  ;;  %v3518_v36 = vmax.f32 %v2383_v39, 0.0  ;;  %v3874_v4 = vmax.f32 %v3273_v49, 0.0  ;;  %v7049_v39 = vld [vmem:[%s11299_s0 + $0x758] sm:$0xff] }
 0x3a2   :  { %3316 = vmatmul.bf16.gmra.mxu3 %v7049_v39 }
 0x3a3   :  { %8532 = vst [vmem:[%s11302_s3 + $0x578] sm:$0xff] %v7956_v20   ;;  %v5309_v45 = vand.u32 2147483647, %v5053_v14  ;;  %v3274_v8 = vpop.f32.mrf.mxu3  ;;  %v3619_v20 = vmax.f32 %v2635_v52, 0.0 }
 0x3a4   :  { %v3022_v5 = vpop.f32.mrf.mxu2  ;;  %v3275_v54 = vadd.f32 %v9934_v10, %v3274_v8 }
 0x3a5   :  { %v5564_v21 = vadd.f32 %v5563_v59, %v5309_v45  ;;  %v3023_v53 = vadd.f32 %v9934_v10, %v3022_v5  ;;  %v10309_v45 = vsub.f32 %v3874_v4, %v3618_v56  ;;  %v7571_v47 = vpack.c.bf16 %v3619_v20, %v3618_v56  ;;  %v10325_v56 = vld [vmem:[%s11301_s2] ss:$0 sm:$0xff] }
 0x3a6   :  { %v2384_v16 = vpop.f32.mrf.mxu0  ;;  %v3875_v59 = vmax.f32 %v3275_v54, 0.0  ;;  %v6999_v54 = vld [vmem:[%s11299_s0 + $0x5c8] sm:$0xff] }
 0x3a7   :  { %v3774_v24 = vmax.f32 %v3023_v53, 0.0  ;;  %v2385_v2 = vadd.f32 %v9934_v10, %v2384_v16  ;;  %11353 = vst [vmem:[#allocation44_spill] sm:$0xff] %v10309_v45  ;;  %v2637_v49 = vpop.f32.mrf.mxu1  ;;  %v6871_v16 = vld [vmem:[%s11299_s0 + $0x1c8] sm:$0xff] }
 0x3a8   :  { %v8211_v19 = vpack.c.bf16 %v3875_v59, %v3874_v4  ;;  %v10311_v5 = vsub.f32 %v3875_v59, %v3619_v20  ;;  %8455 = vst [vmem:[%s11302_s3 + $0x310] sm:$0xff] %v7571_v47   ;;  %v2638_v59 = vadd.f32 %v10325_v56, %v2637_v49 }
 0x3a9   :  { %v5054_v17 = vsub.f32 %v3774_v24, %v3518_v36  ;;  %v3519_v14 = vmax.f32 %v2385_v2, 0.0  ;;  %v6921_v2 = vld [vmem:[%s11299_s0 + $0x358] sm:$0xff] }
 0x3aa   :  { %11354 = vst [vmem:[#allocation45_spill] sm:$0xff] %v10311_v5  ;;  %2676 = vmatmul.bf16.gmra.mxu1 %v6921_v2 }
 0x3ab   :  { %v5310_v8 = vand.u32 2147483647, %v5054_v17  ;;  %v7321_v53 = vpack.c.bf16 %v3519_v14, %v3518_v36  ;;  %8583 = vst [vmem:[%s11302_s3 + $0x710] sm:$0xff] %v8211_v19  }
 0x3ac   :  { %v3024_v10 = vpop.f32.mrf.mxu2 }
 0x3ad   :  { %v5565_v52 = vadd.f32 %v5564_v21, %v5310_v8  ;;  %8405 = vst [vmem:[%s11302_s3 + $0x180] sm:$0xff] %v7321_v53   ;;  %v3025_v36 = vadd.f32 %v10325_v56, %v3024_v10  ;;  %v3277_v21 = vpop.f32.mrf.mxu3  ;;  %v3620_v10 = vmax.f32 %v2638_v59, 0.0 }
 0x3ae   :  { %v2387_v4 = vpop.f32.mrf.mxu0  ;;  %v3278_v2 = vadd.f32 %v10325_v56, %v3277_v21 }
 0x3af   :  { %v3775_v20 = vmax.f32 %v3025_v36, 0.0  ;;  %v2388_v39 = vadd.f32 %v10325_v56, %v2387_v4  ;;  %v2639_v5 = vpop.f32.mrf.mxu1 }
 0x3b0   :  { %v2640_v49 = vadd.f32 %v10325_v56, %v2639_v5 }
 0x3b1   :  { %v7961_v17 = vpack.c.bf16 %v3775_v20, %v3774_v24  ;;  %v5055_v47 = vsub.f32 %v3775_v20, %v3519_v14  ;;  %2426 = vmatmul.bf16.gmra.mxu0 %v6871_v16  ;;  %3066 = vmatmul.bf16.gmra.mxu2 %v6999_v54  ;;  %v3520_v8 = vmax.f32 %v2388_v39, 0.0  ;;  %v3876_v20 = vmax.f32 %v3278_v2, 0.0  ;;  %v7050_v39 = vld [vmem:[%s11299_s0 + $0x760] sm:$0xff] }
 0x3b2   :  { %3321 = vmatmul.bf16.gmra.mxu3 %v7050_v39 }
 0x3b3   :  { %8533 = vst [vmem:[%s11302_s3 + $0x580] sm:$0xff] %v7961_v17   ;;  %v5311_v19 = vand.u32 2147483647, %v5055_v47  ;;  %v3621_v17 = vmax.f32 %v2640_v49, 0.0 }
 0x3b4   :  { %v3027_v53 = vpop.f32.mrf.mxu2 }
 0x3b5   :  { %v5566_v45 = vadd.f32 %v5565_v52, %v5311_v19  ;;  %v3028_v36 = vadd.f32 %v10325_v56, %v3027_v53  ;;  %v3279_v24 = vpop.f32.mrf.mxu3  ;;  %v10350_v19 = vsub.f32 %v3876_v20, %v3620_v10  ;;  %v7576_v21 = vpack.c.bf16 %v3621_v17, %v3620_v10 }
 0x3b6   :  { %v2389_v14 = vpop.f32.mrf.mxu0  ;;  %v3280_v16 = vadd.f32 %v10325_v56, %v3279_v24 }
 0x3b7   :  { %v3776_v54 = vmax.f32 %v3028_v36, 0.0  ;;  %v2390_v4 = vadd.f32 %v10325_v56, %v2389_v14  ;;  %11355 = vst [vmem:[#allocation46_spill] sm:$0xff] %v10350_v19  ;;  %v2642_v49 = vpop.f32.mrf.mxu1 }
 0x3b8   :  { %v3877_v52 = vmax.f32 %v3280_v16, 0.0  ;;  %8456 = vst [vmem:[%s11302_s3 + $0x318] sm:$0xff] %v7576_v21   ;;  %v7000_v16 = vld [vmem:[%s11299_s0 + $0x5d0] sm:$0xff] }
 0x3b9   :  { %v5056_v59 = vsub.f32 %v3776_v54, %v3520_v8  ;;  %v3521_v47 = vmax.f32 %v2390_v4, 0.0 }
 0x3ba   :  { %v8216_v5 = vpack.c.bf16 %v3877_v52, %v3876_v20  ;;  %v10352_v53 = vsub.f32 %v3877_v52, %v3621_v17  ;;  %v6922_v20 = vld [vmem:[%s11299_s0 + $0x360] sm:$0xff]  ;;  %v2643_v52 = vadd.f32 %v10325_v56, %v2642_v49 }
 0x3bb   :  { %v5312_v24 = vand.u32 2147483647, %v5056_v59  ;;  %v7326_v36 = vpack.c.bf16 %v3521_v47, %v3520_v8  ;;  %v6872_v8 = vld [vmem:[%s11299_s0 + $0x1d0] sm:$0xff]  ;;  %2681 = vmatmul.bf16.gmra.mxu1 %v6922_v20 }
 0x3bc   :  { %11356 = vst [vmem:[#allocation47_spill] sm:$0xff] %v10352_v53  ;;  %v3029_v2 = vpop.f32.mrf.mxu2 }
 0x3bd   :  { %8584 = vst [vmem:[%s11302_s3 + $0x718] sm:$0xff] %v8216_v5   ;;  %v5567_v14 = vadd.f32 %v5566_v45, %v5312_v24  ;;  %v3030_v10 = vadd.f32 %v10325_v56, %v3029_v2  ;;  %v3282_v4 = vpop.f32.mrf.mxu3  ;;  %v3622_v2 = vmax.f32 %v2643_v52, 0.0 }
 0x3be   :  { %8406 = vst [vmem:[%s11302_s3 + $0x188] sm:$0xff] %v7326_v36   ;;  %v2392_v45 = vpop.f32.mrf.mxu0  ;;  %v3283_v20 = vadd.f32 %v10325_v56, %v3282_v4 }
 0x3bf   :  { %v3777_v17 = vmax.f32 %v3030_v10, 0.0  ;;  %v2393_v39 = vadd.f32 %v10325_v56, %v2392_v45  ;;  %v2644_v53 = vpop.f32.mrf.mxu1 }
 0x3c0   :  { %v2645_v49 = vadd.f32 %v10325_v56, %v2644_v53 }
 0x3c1   :  { %v7966_v59 = vpack.c.bf16 %v3777_v17, %v3776_v54  ;;  %v5057_v21 = vsub.f32 %v3777_v17, %v3521_v47  ;;  %2431 = vmatmul.bf16.gmra.mxu0 %v6872_v8  ;;  %3071 = vmatmul.bf16.gmra.mxu2 %v7000_v16  ;;  %v3522_v24 = vmax.f32 %v2393_v39, 0.0  ;;  %v3878_v17 = vmax.f32 %v3283_v20, 0.0  ;;  %v7051_v39 = vld [vmem:[%s11299_s0 + $0x768] sm:$0xff] }
 0x3c2   :  { %3326 = vmatmul.bf16.gmra.mxu3 %v7051_v39 }
 0x3c3   :  { %8534 = vst [vmem:[%s11302_s3 + $0x588] sm:$0xff] %v7966_v59   ;;  %v5313_v5 = vand.u32 2147483647, %v5057_v21  ;;  %v3623_v59 = vmax.f32 %v2645_v49, 0.0 }
 0x3c4   :  { %v3032_v36 = vpop.f32.mrf.mxu2 }
 0x3c5   :  { %v5568_v19 = vadd.f32 %v5567_v14, %v5313_v5  ;;  %v3033_v10 = vadd.f32 %v10325_v56, %v3032_v36  ;;  %v3284_v54 = vpop.f32.mrf.mxu3  ;;  %v10386_v5 = vsub.f32 %v3878_v17, %v3622_v2  ;;  %v7581_v4 = vpack.c.bf16 %v3623_v59, %v3622_v2 }
 0x3c6   :  { %v2394_v47 = vpop.f32.mrf.mxu0  ;;  %v3285_v8 = vadd.f32 %v10325_v56, %v3284_v54 }
 0x3c7   :  { %v3778_v16 = vmax.f32 %v3033_v10, 0.0  ;;  %v2395_v45 = vadd.f32 %v10325_v56, %v2394_v47  ;;  %11357 = vst [vmem:[#allocation48_spill] sm:$0xff] %v10386_v5  ;;  %v2647_v49 = vpop.f32.mrf.mxu1 }
 0x3c8   :  { %v3879_v14 = vmax.f32 %v3285_v8, 0.0  ;;  %8457 = vst [vmem:[%s11302_s3 + $0x320] sm:$0xff] %v7581_v4   ;;  %v7001_v8 = vld [vmem:[%s11299_s0 + $0x5d8] sm:$0xff] }
 0x3c9   :  { %v5058_v52 = vsub.f32 %v3778_v16, %v3522_v24  ;;  %v3523_v21 = vmax.f32 %v2395_v45, 0.0 }
 0x3ca   :  { %v8221_v53 = vpack.c.bf16 %v3879_v14, %v3878_v17  ;;  %v10388_v36 = vsub.f32 %v3879_v14, %v3623_v59  ;;  %v6923_v17 = vld [vmem:[%s11299_s0 + $0x368] sm:$0xff]  ;;  %v2648_v14 = vadd.f32 %v10325_v56, %v2647_v49 }
 0x3cb   :  { %v5314_v54 = vand.u32 2147483647, %v5058_v52  ;;  %v7331_v10 = vpack.c.bf16 %v3523_v21, %v3522_v24  ;;  %v6873_v24 = vld [vmem:[%s11299_s0 + $0x1d8] sm:$0xff]  ;;  %2686 = vmatmul.bf16.gmra.mxu1 %v6923_v17 }
 0x3cc   :  { %11358 = vst [vmem:[#allocation49_spill] sm:$0xff] %v10388_v36  ;;  %v3034_v20 = vpop.f32.mrf.mxu2 }
 0x3cd   :  { %8585 = vst [vmem:[%s11302_s3 + $0x720] sm:$0xff] %v8221_v53   ;;  %v5569_v47 = vadd.f32 %v5568_v19, %v5314_v54  ;;  %v3035_v2 = vadd.f32 %v10325_v56, %v3034_v20  ;;  %v3287_v45 = vpop.f32.mrf.mxu3  ;;  %v3624_v20 = vmax.f32 %v2648_v14, 0.0 }
 0x3ce   :  { %8407 = vst [vmem:[%s11302_s3 + $0x190] sm:$0xff] %v7331_v10   ;;  %v2397_v19 = vpop.f32.mrf.mxu0  ;;  %v3288_v17 = vadd.f32 %v10325_v56, %v3287_v45 }
 0x3cf   :  { %v3779_v59 = vmax.f32 %v3035_v2, 0.0  ;;  %v2398_v39 = vadd.f32 %v10325_v56, %v2397_v19  ;;  %v2649_v36 = vpop.f32.mrf.mxu1 }
 0x3d0   :  { %v2650_v49 = vadd.f32 %v10325_v56, %v2649_v36 }
 0x3d1   :  { %v7971_v52 = vpack.c.bf16 %v3779_v59, %v3778_v16  ;;  %v5059_v4 = vsub.f32 %v3779_v59, %v3523_v21  ;;  %2436 = vmatmul.bf16.gmra.mxu0 %v6873_v24  ;;  %3076 = vmatmul.bf16.gmra.mxu2 %v7001_v8  ;;  %v3524_v54 = vmax.f32 %v2398_v39, 0.0  ;;  %v3880_v59 = vmax.f32 %v3288_v17, 0.0  ;;  %v7052_v39 = vld [vmem:[%s11299_s0 + $0x770] sm:$0xff] }
 0x3d2   :  { %3331 = vmatmul.bf16.gmra.mxu3 %v7052_v39 }
 0x3d3   :  { %8535 = vst [vmem:[%s11302_s3 + $0x590] sm:$0xff] %v7971_v52   ;;  %v5315_v53 = vand.u32 2147483647, %v5059_v4  ;;  %v3625_v52 = vmax.f32 %v2650_v49, 0.0 }
 0x3d4   :  { %v3037_v10 = vpop.f32.mrf.mxu2 }
 0x3d5   :  { %v5570_v5 = vadd.f32 %v5569_v47, %v5315_v53  ;;  %v3038_v2 = vadd.f32 %v10325_v56, %v3037_v10  ;;  %v3289_v16 = vpop.f32.mrf.mxu3  ;;  %v10422_v53 = vsub.f32 %v3880_v59, %v3624_v20  ;;  %v7586_v45 = vpack.c.bf16 %v3625_v52, %v3624_v20 }
 0x3d6   :  { %v2399_v21 = vpop.f32.mrf.mxu0  ;;  %v3290_v24 = vadd.f32 %v10325_v56, %v3289_v16 }
 0x3d7   :  { %v3780_v8 = vmax.f32 %v3038_v2, 0.0  ;;  %v2400_v19 = vadd.f32 %v10325_v56, %v2399_v21  ;;  %11359 = vst [vmem:[#allocation50_spill] sm:$0xff] %v10422_v53  ;;  %v2652_v49 = vpop.f32.mrf.mxu1 }
 0x3d8   :  { %v3881_v47 = vmax.f32 %v3290_v24, 0.0  ;;  %8458 = vst [vmem:[%s11302_s3 + $0x328] sm:$0xff] %v7586_v45   ;;  %v7002_v24 = vld [vmem:[%s11299_s0 + $0x5e0] sm:$0xff] }
 0x3d9   :  { %v5060_v14 = vsub.f32 %v3780_v8, %v3524_v54  ;;  %v3525_v4 = vmax.f32 %v2400_v19, 0.0 }
 0x3da   :  { %v8226_v36 = vpack.c.bf16 %v3881_v47, %v3880_v59  ;;  %v10424_v10 = vsub.f32 %v3881_v47, %v3625_v52  ;;  %v6924_v59 = vld [vmem:[%s11299_s0 + $0x370] sm:$0xff]  ;;  %v2653_v47 = vadd.f32 %v10325_v56, %v2652_v49 }
 0x3db   :  { %v5316_v16 = vand.u32 2147483647, %v5060_v14  ;;  %v7336_v2 = vpack.c.bf16 %v3525_v4, %v3524_v54  ;;  %v6874_v54 = vld [vmem:[%s11299_s0 + $0x1e0] sm:$0xff]  ;;  %2691 = vmatmul.bf16.gmra.mxu1 %v6924_v59 }
 0x3dc   :  { %11360 = vst [vmem:[#allocation51_spill] sm:$0xff] %v10424_v10  ;;  %v3039_v17 = vpop.f32.mrf.mxu2 }
 0x3dd   :  { %8586 = vst [vmem:[%s11302_s3 + $0x728] sm:$0xff] %v8226_v36   ;;  %v5571_v21 = vadd.f32 %v5570_v5, %v5316_v16  ;;  %v3040_v20 = vadd.f32 %v10325_v56, %v3039_v17  ;;  %v3292_v19 = vpop.f32.mrf.mxu3  ;;  %v3626_v17 = vmax.f32 %v2653_v47, 0.0 }
 0x3de   :  { %8408 = vst [vmem:[%s11302_s3 + $0x198] sm:$0xff] %v7336_v2   ;;  %v2402_v5 = vpop.f32.mrf.mxu0  ;;  %v3293_v59 = vadd.f32 %v10325_v56, %v3292_v19 }
 0x3df   :  { %v3781_v52 = vmax.f32 %v3040_v20, 0.0  ;;  %v2403_v39 = vadd.f32 %v10325_v56, %v2402_v5  ;;  %v2654_v10 = vpop.f32.mrf.mxu1 }
 0x3e0   :  { %v2655_v49 = vadd.f32 %v10325_v56, %v2654_v10 }
 0x3e1   :  { %v7976_v14 = vpack.c.bf16 %v3781_v52, %v3780_v8  ;;  %v5061_v45 = vsub.f32 %v3781_v52, %v3525_v4  ;;  %2441 = vmatmul.bf16.gmra.mxu0 %v6874_v54  ;;  %3081 = vmatmul.bf16.gmra.mxu2 %v7002_v24  ;;  %v3526_v16 = vmax.f32 %v2403_v39, 0.0  ;;  %v3882_v52 = vmax.f32 %v3293_v59, 0.0  ;;  %v7053_v39 = vld [vmem:[%s11299_s0 + $0x778] sm:$0xff] }
 0x3e2   :  { %3336 = vmatmul.bf16.gmra.mxu3 %v7053_v39 }
 0x3e3   :  { %8536 = vst [vmem:[%s11302_s3 + $0x598] sm:$0xff] %v7976_v14   ;;  %v5317_v36 = vand.u32 2147483647, %v5061_v45  ;;  %v3627_v14 = vmax.f32 %v2655_v49, 0.0 }
 0x3e4   :  { %v3042_v2 = vpop.f32.mrf.mxu2 }
 0x3e5   :  { %v5572_v53 = vadd.f32 %v5571_v21, %v5317_v36  ;;  %v3043_v20 = vadd.f32 %v10325_v56, %v3042_v2  ;;  %v3294_v8 = vpop.f32.mrf.mxu3  ;;  %v10458_v36 = vsub.f32 %v3882_v52, %v3626_v17  ;;  %v7591_v19 = vpack.c.bf16 %v3627_v14, %v3626_v17 }
 0x3e6   :  { %v2404_v4 = vpop.f32.mrf.mxu0  ;;  %v3295_v54 = vadd.f32 %v10325_v56, %v3294_v8 }
 0x3e7   :  { %v3782_v24 = vmax.f32 %v3043_v20, 0.0  ;;  %v2405_v5 = vadd.f32 %v10325_v56, %v2404_v4  ;;  %11361 = vst [vmem:[#allocation52_spill] sm:$0xff] %v10458_v36  ;;  %v2657_v49 = vpop.f32.mrf.mxu1 }
 0x3e8   :  { %v3883_v21 = vmax.f32 %v3295_v54, 0.0  ;;  %8459 = vst [vmem:[%s11302_s3 + $0x330] sm:$0xff] %v7591_v19   ;;  %v7003_v54 = vld [vmem:[%s11299_s0 + $0x5e8] sm:$0xff] }
 0x3e9   :  { %v5062_v47 = vsub.f32 %v3782_v24, %v3526_v16  ;;  %v3527_v45 = vmax.f32 %v2405_v5, 0.0 }
 0x3ea   :  { %v8231_v10 = vpack.c.bf16 %v3883_v21, %v3882_v52  ;;  %v10460_v2 = vsub.f32 %v3883_v21, %v3627_v14  ;;  %v6925_v52 = vld [vmem:[%s11299_s0 + $0x378] sm:$0xff]  ;;  %v2658_v21 = vadd.f32 %v10325_v56, %v2657_v49 }
 0x3eb   :  { %v5318_v8 = vand.u32 2147483647, %v5062_v47  ;;  %v7341_v20 = vpack.c.bf16 %v3527_v45, %v3526_v16  ;;  %v6875_v16 = vld [vmem:[%s11299_s0 + $0x1e8] sm:$0xff]  ;;  %2696 = vmatmul.bf16.gmra.mxu1 %v6925_v52 }
 0x3ec   :  { %11362 = vst [vmem:[#allocation53_spill] sm:$0xff] %v10460_v2  ;;  %v3044_v59 = vpop.f32.mrf.mxu2 }
 0x3ed   :  { %8587 = vst [vmem:[%s11302_s3 + $0x730] sm:$0xff] %v8231_v10   ;;  %v5573_v4 = vadd.f32 %v5572_v53, %v5318_v8  ;;  %v3045_v17 = vadd.f32 %v10325_v56, %v3044_v59  ;;  %v3297_v5 = vpop.f32.mrf.mxu3  ;;  %v3628_v59 = vmax.f32 %v2658_v21, 0.0 }
 0x3ee   :  { %8409 = vst [vmem:[%s11302_s3 + $0x1a0] sm:$0xff] %v7341_v20   ;;  %v2407_v53 = vpop.f32.mrf.mxu0  ;;  %v3298_v52 = vadd.f32 %v10325_v56, %v3297_v5 }
 0x3ef   :  { %v3783_v14 = vmax.f32 %v3045_v17, 0.0  ;;  %v2408_v39 = vadd.f32 %v10325_v56, %v2407_v53  ;;  %v2659_v2 = vpop.f32.mrf.mxu1 }
 0x3f0   :  { %v2660_v49 = vadd.f32 %v10325_v56, %v2659_v2 }
 0x3f1   :  { %v7981_v47 = vpack.c.bf16 %v3783_v14, %v3782_v24  ;;  %v5063_v19 = vsub.f32 %v3783_v14, %v3527_v45  ;;  %2446 = vmatmul.bf16.gmra.mxu0 %v6875_v16  ;;  %3086 = vmatmul.bf16.gmra.mxu2 %v7003_v54  ;;  %v3528_v8 = vmax.f32 %v2408_v39, 0.0  ;;  %v3884_v14 = vmax.f32 %v3298_v52, 0.0  ;;  %v7054_v39 = vld [vmem:[%s11299_s0 + $0x780] sm:$0xff] }
 0x3f2   :  { %3341 = vmatmul.bf16.gmra.mxu3 %v7054_v39 }
 0x3f3   :  { %8537 = vst [vmem:[%s11302_s3 + $0x5a0] sm:$0xff] %v7981_v47   ;;  %v5319_v10 = vand.u32 2147483647, %v5063_v19  ;;  %v3629_v47 = vmax.f32 %v2660_v49, 0.0 }
 0x3f4   :  { %v3047_v20 = vpop.f32.mrf.mxu2 }
 0x3f5   :  { %v5574_v36 = vadd.f32 %v5573_v4, %v5319_v10  ;;  %v3048_v17 = vadd.f32 %v10325_v56, %v3047_v20  ;;  %v3299_v24 = vpop.f32.mrf.mxu3  ;;  %v10494_v10 = vsub.f32 %v3884_v14, %v3628_v59  ;;  %v7596_v5 = vpack.c.bf16 %v3629_v47, %v3628_v59 }
 0x3f6   :  { %v2409_v45 = vpop.f32.mrf.mxu0  ;;  %v3300_v16 = vadd.f32 %v10325_v56, %v3299_v24 }
 0x3f7   :  { %v3784_v54 = vmax.f32 %v3048_v17, 0.0  ;;  %v2410_v53 = vadd.f32 %v10325_v56, %v2409_v45  ;;  %11363 = vst [vmem:[#allocation54_spill] sm:$0xff] %v10494_v10  ;;  %v2662_v49 = vpop.f32.mrf.mxu1 }
 0x3f8   :  { %v3885_v4 = vmax.f32 %v3300_v16, 0.0  ;;  %8460 = vst [vmem:[%s11302_s3 + $0x338] sm:$0xff] %v7596_v5   ;;  %v7004_v16 = vld [vmem:[%s11299_s0 + $0x5f0] sm:$0xff] }
 0x3f9   :  { %v5064_v21 = vsub.f32 %v3784_v54, %v3528_v8  ;;  %v3529_v19 = vmax.f32 %v2410_v53, 0.0 }
 0x3fa   :  { %v8236_v2 = vpack.c.bf16 %v3885_v4, %v3884_v14  ;;  %v10496_v20 = vsub.f32 %v3885_v4, %v3629_v47  ;;  %v6926_v14 = vld [vmem:[%s11299_s0 + $0x380] sm:$0xff]  ;;  %v2663_v4 = vadd.f32 %v10325_v56, %v2662_v49 }
 0x3fb   :  { %v5320_v24 = vand.u32 2147483647, %v5064_v21  ;;  %v7346_v17 = vpack.c.bf16 %v3529_v19, %v3528_v8  ;;  %v6876_v8 = vld [vmem:[%s11299_s0 + $0x1f0] sm:$0xff]  ;;  %2701 = vmatmul.bf16.gmra.mxu1 %v6926_v14 }
 0x3fc   :  { %11364 = vst [vmem:[#allocation55_spill] sm:$0xff] %v10496_v20  ;;  %v3049_v52 = vpop.f32.mrf.mxu2 }
 0x3fd   :  { %8588 = vst [vmem:[%s11302_s3 + $0x738] sm:$0xff] %v8236_v2   ;;  %v5575_v45 = vadd.f32 %v5574_v36, %v5320_v24  ;;  %v3050_v59 = vadd.f32 %v10325_v56, %v3049_v52  ;;  %v3302_v53 = vpop.f32.mrf.mxu3  ;;  %v3630_v52 = vmax.f32 %v2663_v4, 0.0 }
 0x3fe   :  { %8410 = vst [vmem:[%s11302_s3 + $0x1a8] sm:$0xff] %v7346_v17   ;;  %v2412_v36 = vpop.f32.mrf.mxu0  ;;  %v3303_v14 = vadd.f32 %v10325_v56, %v3302_v53 }
 0x3ff   :  { %v3785_v47 = vmax.f32 %v3050_v59, 0.0  ;;  %v2413_v39 = vadd.f32 %v10325_v56, %v2412_v36  ;;  %v2664_v20 = vpop.f32.mrf.mxu1 }
 0x400   :  { %v2665_v49 = vadd.f32 %v10325_v56, %v2664_v20 }
 0x401   :  { %v7986_v21 = vpack.c.bf16 %v3785_v47, %v3784_v54  ;;  %v5065_v5 = vsub.f32 %v3785_v47, %v3529_v19  ;;  %2451 = vmatmul.bf16.gmra.mxu0 %v6876_v8  ;;  %3091 = vmatmul.bf16.gmra.mxu2 %v7004_v16  ;;  %v3530_v24 = vmax.f32 %v2413_v39, 0.0  ;;  %v3886_v47 = vmax.f32 %v3303_v14, 0.0  ;;  %v7055_v39 = vld [vmem:[%s11299_s0 + $0x788] sm:$0xff] }
 0x402   :  { %3346 = vmatmul.bf16.gmra.mxu3 %v7055_v39 }
 0x403   :  { %8538 = vst [vmem:[%s11302_s3 + $0x5a8] sm:$0xff] %v7986_v21   ;;  %v5321_v2 = vand.u32 2147483647, %v5065_v5  ;;  %v3631_v21 = vmax.f32 %v2665_v49, 0.0 }
 0x404   :  { %v3052_v17 = vpop.f32.mrf.mxu2 }
 0x405   :  { %v5576_v10 = vadd.f32 %v5575_v45, %v5321_v2  ;;  %v3053_v59 = vadd.f32 %v10325_v56, %v3052_v17  ;;  %v3304_v54 = vpop.f32.mrf.mxu3  ;;  %v10530_v2 = vsub.f32 %v3886_v47, %v3630_v52  ;;  %v7601_v53 = vpack.c.bf16 %v3631_v21, %v3630_v52 }
 0x406   :  { %v2414_v19 = vpop.f32.mrf.mxu0  ;;  %v3305_v8 = vadd.f32 %v10325_v56, %v3304_v54 }
 0x407   :  { %v3786_v16 = vmax.f32 %v3053_v59, 0.0  ;;  %v2415_v36 = vadd.f32 %v10325_v56, %v2414_v19  ;;  %11365 = vst [vmem:[#allocation56_spill] sm:$0xff] %v10530_v2  ;;  %v2667_v49 = vpop.f32.mrf.mxu1 }
 0x408   :  { %v3887_v45 = vmax.f32 %v3305_v8, 0.0  ;;  %8461 = vst [vmem:[%s11302_s3 + $0x340] sm:$0xff] %v7601_v53   ;;  %v7005_v8 = vld [vmem:[%s11299_s0 + $0x5f8] sm:$0xff] }
 0x409   :  { %v5066_v4 = vsub.f32 %v3786_v16, %v3530_v24  ;;  %v3531_v5 = vmax.f32 %v2415_v36, 0.0 }
 0x40a   :  { %v8241_v20 = vpack.c.bf16 %v3887_v45, %v3886_v47  ;;  %v10532_v17 = vsub.f32 %v3887_v45, %v3631_v21  ;;  %v6927_v47 = vld [vmem:[%s11299_s0 + $0x388] sm:$0xff]  ;;  %v2668_v45 = vadd.f32 %v10325_v56, %v2667_v49 }
 0x40b   :  { %v5322_v54 = vand.u32 2147483647, %v5066_v4  ;;  %v7351_v59 = vpack.c.bf16 %v3531_v5, %v3530_v24  ;;  %v6877_v24 = vld [vmem:[%s11299_s0 + $0x1f8] sm:$0xff]  ;;  %2706 = vmatmul.bf16.gmra.mxu1 %v6927_v47 }
 0x40c   :  { %11366 = vst [vmem:[#allocation57_spill] sm:$0xff] %v10532_v17  ;;  %v3054_v14 = vpop.f32.mrf.mxu2 }
 0x40d   :  { %8589 = vst [vmem:[%s11302_s3 + $0x740] sm:$0xff] %v8241_v20   ;;  %v5577_v19 = vadd.f32 %v5576_v10, %v5322_v54  ;;  %v3055_v52 = vadd.f32 %v10325_v56, %v3054_v14  ;;  %v3307_v36 = vpop.f32.mrf.mxu3  ;;  %v3632_v14 = vmax.f32 %v2668_v45, 0.0 }
 0x40e   :  { %8411 = vst [vmem:[%s11302_s3 + $0x1b0] sm:$0xff] %v7351_v59   ;;  %v2417_v10 = vpop.f32.mrf.mxu0  ;;  %v3308_v47 = vadd.f32 %v10325_v56, %v3307_v36 }
 0x40f   :  { %v3787_v21 = vmax.f32 %v3055_v52, 0.0  ;;  %v2418_v39 = vadd.f32 %v10325_v56, %v2417_v10  ;;  %v2669_v17 = vpop.f32.mrf.mxu1 }
 0x410   :  { %v2670_v49 = vadd.f32 %v10325_v56, %v2669_v17 }
 0x411   :  { %v7991_v4 = vpack.c.bf16 %v3787_v21, %v3786_v16  ;;  %v5067_v53 = vsub.f32 %v3787_v21, %v3531_v5  ;;  %2456 = vmatmul.bf16.gmra.mxu0 %v6877_v24  ;;  %3096 = vmatmul.bf16.gmra.mxu2 %v7005_v8  ;;  %v3532_v54 = vmax.f32 %v2418_v39, 0.0  ;;  %v3888_v21 = vmax.f32 %v3308_v47, 0.0  ;;  %v7056_v39 = vld [vmem:[%s11299_s0 + $0x790] sm:$0xff] }
 0x412   :  { %3351 = vmatmul.bf16.gmra.mxu3 %v7056_v39 }
 0x413   :  { %8539 = vst [vmem:[%s11302_s3 + $0x5b0] sm:$0xff] %v7991_v4   ;;  %v5323_v20 = vand.u32 2147483647, %v5067_v53  ;;  %v3633_v4 = vmax.f32 %v2670_v49, 0.0 }
 0x414   :  { %v3057_v59 = vpop.f32.mrf.mxu2 }
 0x415   :  { %v5578_v2 = vadd.f32 %v5577_v19, %v5323_v20  ;;  %v3058_v52 = vadd.f32 %v10325_v56, %v3057_v59  ;;  %v3309_v16 = vpop.f32.mrf.mxu3  ;;  %v10566_v20 = vsub.f32 %v3888_v21, %v3632_v14  ;;  %v7606_v36 = vpack.c.bf16 %v3633_v4, %v3632_v14 }
 0x416   :  { %v2419_v5 = vpop.f32.mrf.mxu0  ;;  %v3310_v24 = vadd.f32 %v10325_v56, %v3309_v16 }
 0x417   :  { %v3788_v8 = vmax.f32 %v3058_v52, 0.0  ;;  %v2420_v10 = vadd.f32 %v10325_v56, %v2419_v5  ;;  %11367 = vst [vmem:[#allocation58_spill] sm:$0xff] %v10566_v20  ;;  %v2672_v49 = vpop.f32.mrf.mxu1 }
 0x418   :  { %v3889_v19 = vmax.f32 %v3310_v24, 0.0  ;;  %8462 = vst [vmem:[%s11302_s3 + $0x348] sm:$0xff] %v7606_v36   ;;  %v2673_v39 = vadd.f32 %v10325_v56, %v2672_v49 }
 0x419   :  { %v5068_v45 = vsub.f32 %v3788_v8, %v3532_v54  ;;  %v3533_v53 = vmax.f32 %v2420_v10, 0.0 }
 0x41a   :  { %v8246_v17 = vpack.c.bf16 %v3889_v19, %v3888_v21  ;;  %v10568_v59 = vsub.f32 %v3889_v19, %v3633_v4 }
 0x41b   :  { %v5324_v16 = vand.u32 2147483647, %v5068_v45  ;;  %v7356_v52 = vpack.c.bf16 %v3533_v53, %v3532_v54  ;;  %v6928_v54 = vld [vmem:[%s11299_s0 + $0x390] sm:$0xff] }
 0x41c   :  { %11368 = vst [vmem:[#allocation59_spill] sm:$0xff] %v10568_v59  ;;  %v3059_v47 = vpop.f32.mrf.mxu2  ;;  %2711 = vmatmul.bf16.gmra.mxu1 %v6928_v54 }
 0x41d   :  { %8590 = vst [vmem:[%s11302_s3 + $0x748] sm:$0xff] %v8246_v17   ;;  %v5579_v5 = vadd.f32 %v5578_v2, %v5324_v16  ;;  %v3060_v14 = vadd.f32 %v10325_v56, %v3059_v47  ;;  %v3312_v24 = vpop.f32.mrf.mxu3  ;;  %v3634_v16 = vmax.f32 %v2673_v39, 0.0 }
 0x41e   :  { %8412 = vst [vmem:[%s11302_s3 + $0x1b8] sm:$0xff] %v7356_v52   ;;  %v2422_v10 = vpop.f32.mrf.mxu0 }
 0x41f   :  { %v3789_v21 = vmax.f32 %v3060_v14, 0.0  ;;  %v2423_v4 = vadd.f32 %v10325_v56, %v2422_v10  ;;  %v2674_v52 = vpop.f32.mrf.mxu1  ;;  %v3313_v14 = vadd.f32 %v10325_v56, %v3312_v24 }
 0x420   :  { %v2675_v54 = vadd.f32 %v10325_v56, %v2674_v52 }
 0x421   :  { %v7996_v19 = vpack.c.bf16 %v3789_v21, %v3788_v8  ;;  %v5069_v2 = vsub.f32 %v3789_v21, %v3533_v53  ;;  %v3534_v36 = vmax.f32 %v2423_v4, 0.0  ;;  %v7057_v4 = vld [vmem:[%s11299_s0 + $0x798] sm:$0xff] }
 0x422   :  { %3356 = vmatmul.bf16.gmra.mxu3 %v7057_v4 }
 0x423   :  { %8540 = vst [vmem:[%s11302_s3 + $0x5b8] sm:$0xff] %v7996_v19   ;;  %v5325_v45 = vand.u32 2147483647, %v5069_v2  ;;  %v3890_v19 = vmax.f32 %v3313_v14, 0.0  ;;  %v3635_v2 = vmax.f32 %v2675_v54, 0.0 }
 0x424   :  { %v3062_v17 = vpop.f32.mrf.mxu2 }
 0x425   :  { %v5580_v47 = vadd.f32 %v5579_v5, %v5325_v45  ;;  %v3063_v59 = vadd.f32 %v10325_v56, %v3062_v17  ;;  %v3314_v10 = vpop.f32.mrf.mxu3  ;;  %v10596_v17 = vsub.f32 %v3890_v19, %v3634_v16  ;;  %v7611_v24 = vpack.c.bf16 %v3635_v2, %v3634_v16 }
 0x426   :  { %v2424_v49 = vpop.f32.mrf.mxu0  ;;  %v3315_v8 = vadd.f32 %v10325_v56, %v3314_v10 }
 0x427   :  { %v3790_v53 = vmax.f32 %v3063_v59, 0.0  ;;  %v2425_v21 = vadd.f32 %v10325_v56, %v2424_v49  ;;  %11369 = vst [vmem:[#allocation60_spill] sm:$0xff] %v10596_v17  ;;  %v2677_v54 = vpop.f32.mrf.mxu1 }
 0x428   :  { %v3891_v5 = vmax.f32 %v3315_v8, 0.0  ;;  %8463 = vst [vmem:[%s11302_s3 + $0x350] sm:$0xff] %v7611_v24   ;;  %v2678_v4 = vadd.f32 %v10325_v56, %v2677_v54 }
 0x429   :  { %v5070_v39 = vsub.f32 %v3790_v53, %v3534_v36  ;;  %v3535_v45 = vmax.f32 %v2425_v21, 0.0 }
 0x42a   :  { %v8251_v52 = vpack.c.bf16 %v3891_v5, %v3890_v19  ;;  %v10598_v20 = vsub.f32 %v3891_v5, %v3635_v2 }
 0x42b   :  { %v5326_v10 = vand.u32 2147483647, %v5070_v39  ;;  %v7361_v59 = vpack.c.bf16 %v3535_v45, %v3534_v36  ;;  %v6929_v36 = vld [vmem:[%s11299_s0 + $0x398] sm:$0xff] }
 0x42c   :  { %11370 = vst [vmem:[#allocation61_spill] sm:$0xff] %v10598_v20  ;;  %v3064_v14 = vpop.f32.mrf.mxu2  ;;  %2716 = vmatmul.bf16.gmra.mxu1 %v6929_v36 }
 0x42d   :  { %8591 = vst [vmem:[%s11302_s3 + $0x750] sm:$0xff] %v8251_v52   ;;  %v5581_v49 = vadd.f32 %v5580_v47, %v5326_v10  ;;  %v3065_v16 = vadd.f32 %v10325_v56, %v3064_v14  ;;  %v3317_v8 = vpop.f32.mrf.mxu3  ;;  %v3636_v10 = vmax.f32 %v2678_v4, 0.0 }
 0x42e   :  { %8413 = vst [vmem:[%s11302_s3 + $0x1c0] sm:$0xff] %v7361_v59   ;;  %v2427_v21 = vpop.f32.mrf.mxu0 }
 0x42f   :  { %v3791_v19 = vmax.f32 %v3065_v16, 0.0  ;;  %v2428_v2 = vadd.f32 %v10325_v56, %v2427_v21  ;;  %v2679_v59 = vpop.f32.mrf.mxu1  ;;  %v3318_v16 = vadd.f32 %v10325_v56, %v3317_v8 }
 0x430   :  { %v2680_v36 = vadd.f32 %v10325_v56, %v2679_v59 }
 0x431   :  { %v8001_v5 = vpack.c.bf16 %v3791_v19, %v3790_v53  ;;  %v5071_v47 = vsub.f32 %v3791_v19, %v3535_v45  ;;  %v3536_v24 = vmax.f32 %v2428_v2, 0.0  ;;  %v7058_v2 = vld [vmem:[%s11299_s0 + $0x7a0] sm:$0xff] }
 0x432   :  { %3361 = vmatmul.bf16.gmra.mxu3 %v7058_v2 }
 0x433   :  { %8541 = vst [vmem:[%s11302_s3 + $0x5c0] sm:$0xff] %v8001_v5   ;;  %v5327_v39 = vand.u32 2147483647, %v5071_v47  ;;  %v3892_v5 = vmax.f32 %v3318_v16, 0.0  ;;  %v3637_v47 = vmax.f32 %v2680_v36, 0.0 }
 0x434   :  { %v3067_v52 = vpop.f32.mrf.mxu2 }
 0x435   :  { %v5582_v14 = vadd.f32 %v5581_v49, %v5327_v39  ;;  %v3068_v20 = vadd.f32 %v10325_v56, %v3067_v52  ;;  %v3319_v21 = vpop.f32.mrf.mxu3  ;;  %v10626_v52 = vsub.f32 %v3892_v5, %v3636_v10  ;;  %v7616_v8 = vpack.c.bf16 %v3637_v47, %v3636_v10 }
 0x436   :  { %v2429_v54 = vpop.f32.mrf.mxu0  ;;  %v3320_v53 = vadd.f32 %v10325_v56, %v3319_v21 }
 0x437   :  { %v3792_v45 = vmax.f32 %v3068_v20, 0.0  ;;  %v2430_v19 = vadd.f32 %v10325_v56, %v2429_v54  ;;  %11371 = vst [vmem:[#allocation62_spill] sm:$0xff] %v10626_v52 }
 0x438   :  { %v3893_v49 = vmax.f32 %v3320_v53, 0.0  ;;  %8464 = vst [vmem:[%s11302_s3 + $0x358] sm:$0xff] %v7616_v8   ;;  %v2682_v36 = vpop.f32.mrf.mxu1 }
 0x439   :  { %v5072_v4 = vsub.f32 %v3792_v45, %v3536_v24  ;;  %v3537_v39 = vmax.f32 %v2430_v19, 0.0  ;;  %v2683_v2 = vadd.f32 %v10325_v56, %v2682_v36 }
 0x43a   :  { %v8256_v59 = vpack.c.bf16 %v3893_v49, %v3892_v5  ;;  %v10628_v17 = vsub.f32 %v3893_v49, %v3637_v47 }
 0x43b   :  { %v5328_v21 = vand.u32 2147483647, %v5072_v4  ;;  %v7366_v20 = vpack.c.bf16 %v3537_v39, %v3536_v24  ;;  %v6930_v24 = vld [vmem:[%s11299_s0 + $0x3a0] sm:$0xff] }
 0x43c   :  { %11372 = vst [vmem:[#allocation63_spill] sm:$0xff] %v10628_v17  ;;  %v3069_v16 = vpop.f32.mrf.mxu2  ;;  %2721 = vmatmul.bf16.gmra.mxu1 %v6930_v24 }
 0x43d   :  { %8592 = vst [vmem:[%s11302_s3 + $0x758] sm:$0xff] %v8256_v59   ;;  %v5583_v54 = vadd.f32 %v5582_v14, %v5328_v21  ;;  %v3070_v10 = vadd.f32 %v10325_v56, %v3069_v16  ;;  %v3322_v53 = vpop.f32.mrf.mxu3  ;;  %v3638_v21 = vmax.f32 %v2683_v2, 0.0 }
 0x43e   :  { %8414 = vst [vmem:[%s11302_s3 + $0x1c8] sm:$0xff] %v7366_v20   ;;  %v2432_v19 = vpop.f32.mrf.mxu0 }
 0x43f   :  { %v3793_v5 = vmax.f32 %v3070_v10, 0.0  ;;  %v2433_v47 = vadd.f32 %v10325_v56, %v2432_v19  ;;  %v3323_v10 = vadd.f32 %v10325_v56, %v3322_v53 }
 0x440   :  { %v2684_v20 = vpop.f32.mrf.mxu1 }
 0x441   :  { %v8006_v49 = vpack.c.bf16 %v3793_v5, %v3792_v45  ;;  %v5073_v14 = vsub.f32 %v3793_v5, %v3537_v39  ;;  %v3538_v8 = vmax.f32 %v2433_v47, 0.0  ;;  %v2685_v24 = vadd.f32 %v10325_v56, %v2684_v20  ;;  %v7059_v47 = vld [vmem:[%s11299_s0 + $0x7a8] sm:$0xff] }
 0x442   :  { %3366 = vmatmul.bf16.gmra.mxu3 %v7059_v47 }
 0x443   :  { %8542 = vst [vmem:[%s11302_s3 + $0x5c8] sm:$0xff] %v8006_v49   ;;  %v5329_v4 = vand.u32 2147483647, %v5073_v14  ;;  %v3894_v49 = vmax.f32 %v3323_v10, 0.0  ;;  %v3639_v14 = vmax.f32 %v2685_v24, 0.0 }
 0x444   :  { %v3072_v59 = vpop.f32.mrf.mxu2 }
 0x445   :  { %v5584_v16 = vadd.f32 %v5583_v54, %v5329_v4  ;;  %v3073_v17 = vadd.f32 %v10325_v56, %v3072_v59  ;;  %v3324_v19 = vpop.f32.mrf.mxu3  ;;  %v10656_v59 = vsub.f32 %v3894_v49, %v3638_v21  ;;  %v7621_v53 = vpack.c.bf16 %v3639_v14, %v3638_v21 }
 0x446   :  { %v2434_v36 = vpop.f32.mrf.mxu0  ;;  %v3325_v45 = vadd.f32 %v10325_v56, %v3324_v19 }
 0x447   :  { %v3794_v39 = vmax.f32 %v3073_v17, 0.0  ;;  %v2435_v5 = vadd.f32 %v10325_v56, %v2434_v36  ;;  %11373 = vst [vmem:[#allocation64_spill] sm:$0xff] %v10656_v59 }
 0x448   :  { %v3895_v54 = vmax.f32 %v3325_v45, 0.0  ;;  %8465 = vst [vmem:[%s11302_s3 + $0x360] sm:$0xff] %v7621_v53   ;;  %v2687_v24 = vpop.f32.mrf.mxu1 }
 0x449   :  { %v5074_v2 = vsub.f32 %v3794_v39, %v3538_v8  ;;  %v3539_v4 = vmax.f32 %v2435_v5, 0.0 }
 0x44a   :  { %v8261_v20 = vpack.c.bf16 %v3895_v54, %v3894_v49  ;;  %v10658_v52 = vsub.f32 %v3895_v54, %v3639_v14  ;;  %v2688_v54 = vadd.f32 %v10325_v56, %v2687_v24 }
 0x44b   :  { %v5330_v19 = vand.u32 2147483647, %v5074_v2  ;;  %v7371_v17 = vpack.c.bf16 %v3539_v4, %v3538_v8  ;;  %v6931_v8 = vld [vmem:[%s11299_s0 + $0x3a8] sm:$0xff] }
 0x44c   :  { %11374 = vst [vmem:[#allocation65_spill] sm:$0xff] %v10658_v52  ;;  %v3074_v10 = vpop.f32.mrf.mxu2  ;;  %2726 = vmatmul.bf16.gmra.mxu1 %v6931_v8 }
 0x44d   :  { %8593 = vst [vmem:[%s11302_s3 + $0x760] sm:$0xff] %v8261_v20   ;;  %v5585_v36 = vadd.f32 %v5584_v16, %v5330_v19  ;;  %v3075_v21 = vadd.f32 %v10325_v56, %v3074_v10  ;;  %v3327_v45 = vpop.f32.mrf.mxu3 }
 0x44e   :  { %8415 = vst [vmem:[%s11302_s3 + $0x1d0] sm:$0xff] %v7371_v17   ;;  %v2437_v5 = vpop.f32.mrf.mxu0  ;;  %v3640_v17 = vmax.f32 %v2688_v54, 0.0  ;;  %v3328_v10 = vadd.f32 %v10325_v56, %v3327_v45 }
 0x44f   :  { %v3795_v49 = vmax.f32 %v3075_v21, 0.0  ;;  %v10678_v2 = vadd.f32 %v10325_v56, %v2437_v5  ;;  %v7060_v5 = vld [vmem:[%s11299_s0 + $0x7b0] sm:$0xff] }
 0x450   :  { %v2689_v20 = vpop.f32.mrf.mxu1 }
 0x451   :  { %v8011_v14 = vpack.c.bf16 %v3795_v49, %v3794_v39  ;;  %v5075_v47 = vsub.f32 %v3795_v49, %v3539_v4  ;;  %v2690_v39 = vadd.f32 %v10325_v56, %v2689_v20  ;;  %v3896_v49 = vmax.f32 %v3328_v10, 0.0 }
 0x452   :  { %3371 = vmatmul.bf16.gmra.mxu3 %v7060_v5 }
 0x453   :  { %8543 = vst [vmem:[%s11302_s3 + $0x5d0] sm:$0xff] %v8011_v14   ;;  %v5331_v16 = vand.u32 2147483647, %v5075_v47  ;;  %v3641_v14 = vmax.f32 %v2690_v39, 0.0  ;;  %v11305_v47 = vmax.f32 %v10678_v2, 0.0  ;;  %v10693_v54 = vsub.f32 %v3896_v49, %v3640_v17 }
 0x454   :  { %v3077_v53 = vpop.f32.mrf.mxu2 }
 0x455   :  { %v10680_v19 = vadd.f32 %v5585_v36, %v5331_v16  ;;  %v3329_v4 = vpop.f32.mrf.mxu3  ;;  %11375 = vst [vmem:[#allocation66_spill] sm:$0xff] %v10693_v54  ;;  %v7626_v16 = vpack.c.bf16 %v3641_v14, %v3640_v17 }
 0x456   :  { %v2439_v21 = vpop.f32.mrf.mxu0  ;;  %v3330_v24 = vadd.f32 %v10325_v56, %v3329_v4 }
 0x457   :  { %v10686_v8 = vadd.f32 %v10325_v56, %v2439_v21  ;;  %v10698_v21 = vadd.f32 %v10325_v56, %v3077_v53  ;;  %8466 = vst [vmem:[%s11302_s3 + $0x368] sm:$0xff] %v7626_v16  }
 0x458   :  { %v3897_v36 = vmax.f32 %v3330_v24, 0.0  ;;  %v2692_v17 = vpop.f32.mrf.mxu1 }
 0x459   :  { %v11304_v45 = vmax.f32 %v10686_v8, 0.0  ;;  %v11307_v5 = vmax.f32 %v10698_v21, 0.0 }
 0x45a   :  { %v8266_v20 = vpack.c.bf16 %v3897_v36, %v3896_v49  ;;  %v10695_v4 = vsub.f32 %v3897_v36, %v3641_v14  ;;  %v6932_v49 = vld [vmem:[%s11299_s0 + $0x3b0] sm:$0xff] }
 0x45b   :  { %v7376_v10 = vpack.c.bf16 %v11304_v45, %v11305_v47 }
 0x45c   :  { %11376 = vst [vmem:[#allocation67_spill] sm:$0xff] %v10695_v4  ;;  %v3079_v39 = vpop.f32.mrf.mxu2  ;;  %2731 = vmatmul.bf16.gmra.mxu1 %v6932_v49 }
 0x45d   :  { %8594 = vst [vmem:[%s11302_s3 + $0x768] sm:$0xff] %v8266_v20   ;;  %v10714_v53 = vadd.f32 %v10325_v56, %v3079_v39  ;;  %v3332_v24 = vpop.f32.mrf.mxu3  ;;  %v10728_v56 = vld [vmem:[%s11301_s2] ss:$0 sm:$0xff] }
 0x45e   :  { %8416 = vst [vmem:[%s11302_s3 + $0x1d8] sm:$0xff] %v7376_v10   ;;  %v2442_v14 = vpop.f32.mrf.mxu0  ;;  %v2693_v20 = vadd.f32 %v10728_v56, %v2692_v17  ;;  %v3333_v47 = vadd.f32 %v10728_v56, %v3332_v24 }
 0x45f   :  { %v11306_v36 = vmax.f32 %v10714_v53, 0.0  ;;  %v10735_v49 = vadd.f32 %v10728_v56, %v2442_v14 }
 0x460   :  { %v2694_v39 = vpop.f32.mrf.mxu1  ;;  %v3642_v45 = vmax.f32 %v2693_v20, 0.0  ;;  %v3898_v52 = vmax.f32 %v3333_v47, 0.0 }
 0x461   :  { %v8016_v16 = vpack.c.bf16 %v11306_v36, %v11307_v5  ;;  %v2695_v36 = vadd.f32 %v10728_v56, %v2694_v39  ;;  %v11309_v20 = vmax.f32 %v10735_v49, 0.0 }
 0x462   :  { %v10748_v25 = vsub.f32 %v3898_v52, %v3642_v45 }
 0x463   :  { %8544 = vst [vmem:[%s11302_s3 + $0x5d8] sm:$0xff] %v8016_v16   ;;  %v3643_v59 = vmax.f32 %v2695_v36, 0.0  ;;  %v7061_v16 = vld [vmem:[%s11299_s0 + $0x7b8] sm:$0xff] }
 0x464   :  { %v3082_v10 = vpop.f32.mrf.mxu2  ;;  %11377 = vst [vmem:[#allocation68_spill] sm:$0xff] %v10748_v25  ;;  %3376 = vmatmul.bf16.gmra.mxu3 %v7061_v16  ;;  %v6933_v36 = vld [vmem:[%s11299_s0 + $0x3b8] sm:$0xff] }
 0x465   :  { %v3334_v5 = vpop.f32.mrf.mxu3  ;;  %v7631_v39 = vpack.c.bf16 %v3643_v59, %v3642_v45 }
 0x466   :  { %v2444_v4 = vpop.f32.mrf.mxu0  ;;  %v3335_v54 = vadd.f32 %v10728_v56, %v3334_v5 }
 0x467   :  { %v10741_v17 = vadd.f32 %v10728_v56, %v2444_v4  ;;  %v10753_v4 = vadd.f32 %v10728_v56, %v3082_v10  ;;  %8467 = vst [vmem:[%s11302_s3 + $0x370] sm:$0xff] %v7631_v39  }
 0x468   :  { %v3899_v14 = vmax.f32 %v3335_v54, 0.0 }
 0x469   :  { %v11308_v24 = vmax.f32 %v10741_v17, 0.0  ;;  %v11311_v16 = vmax.f32 %v10753_v4, 0.0 }
 0x46a   :  { %v8271_v13 = vpack.c.bf16 %v3899_v14, %v3898_v52  ;;  %v10750_v5 = vsub.f32 %v3899_v14, %v3643_v59  ;;  %v2697_v52 = vpop.f32.mrf.mxu1 }
 0x46b   :  { %v7381_v47 = vpack.c.bf16 %v11308_v24, %v11309_v20  ;;  %v2698_v39 = vadd.f32 %v10728_v56, %v2697_v52 }
 0x46c   :  { %11378 = vst [vmem:[#allocation69_spill] sm:$0xff] %v10750_v5  ;;  %v3084_v54 = vpop.f32.mrf.mxu2  ;;  %2736 = vmatmul.bf16.gmra.mxu1 %v6933_v36 }
 0x46d   :  { %8595 = vst [vmem:[%s11302_s3 + $0x770] sm:$0xff] %v8271_v13   ;;  %v10769_v59 = vadd.f32 %v10728_v56, %v3084_v54  ;;  %v3337_v45 = vpop.f32.mrf.mxu3  ;;  %v3644_v20 = vmax.f32 %v2698_v39, 0.0 }
 0x46e   :  { %8417 = vst [vmem:[%s11302_s3 + $0x1e0] sm:$0xff] %v7381_v47   ;;  %v2447_v10 = vpop.f32.mrf.mxu0  ;;  %v3338_v5 = vadd.f32 %v10728_v56, %v3337_v45 }
 0x46f   :  { %v11310_v14 = vmax.f32 %v10769_v59, 0.0  ;;  %v10785_v24 = vadd.f32 %v10728_v56, %v2447_v10 }
 0x471   :  { %v8021_v13 = vpack.c.bf16 %v11310_v14, %v11311_v16  ;;  %v3900_v16 = vmax.f32 %v3338_v5, 0.0  ;;  %v11313_v39 = vmax.f32 %v10785_v24, 0.0 }
 0x472   :  { %v2699_v54 = vpop.f32.mrf.mxu1 }
 0x473   :  { %8545 = vst [vmem:[%s11302_s3 + $0x5e0] sm:$0xff] %v8021_v13   ;;  %v2700_v36 = vadd.f32 %v10728_v56, %v2699_v54  ;;  %v7062_v13 = vld [vmem:[%s11299_s0 + $0x7c0] sm:$0xff]  ;;  %v10798_v3 = vsub.f32 %v3900_v16, %v3644_v20 }
 0x474   :  { %v3087_v47 = vpop.f32.mrf.mxu2  ;;  %3381 = vmatmul.bf16.gmra.mxu3 %v7062_v13 }
 0x475   :  { %v3339_v25 = vpop.f32.mrf.mxu3  ;;  %v3645_v6 = vmax.f32 %v2700_v36, 0.0  ;;  %11379 = vst [vmem:[#allocation70_spill] sm:$0xff] %v10798_v3 }
 0x476   :  { %v2449_v30 = vpop.f32.mrf.mxu0  ;;  %v3340_v14 = vadd.f32 %v10728_v56, %v3339_v25 }
 0x477   :  { %v10791_v52 = vadd.f32 %v10728_v56, %v2449_v30  ;;  %v7636_v54 = vpack.c.bf16 %v3645_v6, %v3644_v20  ;;  %v3088_v30 = vadd.f32 %v10728_v56, %v3087_v47  ;;  %v6934_v47 = vld [vmem:[%s11299_s0 + $0x3c0] sm:$0xff] }
 0x478   :  { %v3901_v10 = vmax.f32 %v3340_v14, 0.0 }
 0x479   :  { %v11312_v45 = vmax.f32 %v10791_v52, 0.0  ;;  %8468 = vst [vmem:[%s11302_s3 + $0x378] sm:$0xff] %v7636_v54   ;;  %v3800_v13 = vmax.f32 %v3088_v30, 0.0 }
 0x47a   :  { %v8276_v1 = vpack.c.bf16 %v3901_v10, %v3900_v16  ;;  %v10800_v25 = vsub.f32 %v3901_v10, %v3645_v6  ;;  %v2702_v20 = vpop.f32.mrf.mxu1 }
 0x47b   :  { %v7386_v5 = vpack.c.bf16 %v11312_v45, %v11313_v39 }
 0x47c   :  { %11380 = vst [vmem:[#allocation71_spill] sm:$0xff] %v10800_v25  ;;  %v3089_v14 = vpop.f32.mrf.mxu2  ;;  %2741 = vmatmul.bf16.gmra.mxu1 %v6934_v47 }
 0x47d   :  { %8596 = vst [vmem:[%s11302_s3 + $0x778] sm:$0xff] %v8276_v1   ;;  %v10817_v6 = vadd.f32 %v10728_v56, %v3089_v14  ;;  %v3342_v16 = vpop.f32.mrf.mxu3  ;;  %v2703_v1 = vadd.f32 %v10728_v56, %v2702_v20 }
 0x47e   :  { %8418 = vst [vmem:[%s11302_s3 + $0x1e8] sm:$0xff] %v7386_v5   ;;  %v2452_v36 = vpop.f32.mrf.mxu0  ;;  %v3343_v25 = vadd.f32 %v10728_v56, %v3342_v16 }
 0x47f   :  { %v3801_v10 = vmax.f32 %v10817_v6, 0.0  ;;  %v2453_v45 = vadd.f32 %v10728_v56, %v2452_v36  ;;  %v3646_v39 = vmax.f32 %v2703_v1, 0.0  ;;  %v11381_v36 = vmax.f32 %v10678_v2, 0.0 }
 0x480   :  { %v3902_v20 = vmax.f32 %v3343_v25, 0.0  ;;  %v11382_v1 = vmax.f32 %v10698_v21, 0.0 }
 0x481   :  { %v8026_v54 = vpack.c.bf16 %v3801_v10, %v3800_v13 }
 0x482   :  { %v2704_v14 = vpop.f32.mrf.mxu1  ;;  %v5076_v16 = vsub.f32 %v11382_v1, %v11381_v36  ;;  %v10842_v61 = vsub.f32 %v3902_v20, %v3646_v39  ;;  %v11387_v1 = vmax.f32 %v10741_v17, 0.0  ;;  %v11390_v17 = vmax.f32 %v10791_v52, 0.0 }
 0x483   :  { %8546 = vst [vmem:[%s11302_s3 + $0x5e8] sm:$0xff] %v8026_v54   ;;  %v2705_v3 = vadd.f32 %v10728_v56, %v2704_v14  ;;  %v7063_v54 = vld [vmem:[%s11299_s0 + $0x7c8] sm:$0xff]  ;;  %v3546_v14 = vmax.f32 %v2453_v45, 0.0 }
 0x484   :  { %v3092_v5 = vpop.f32.mrf.mxu2  ;;  %3386 = vmatmul.bf16.gmra.mxu3 %v7063_v54  ;;  %v5332_v45 = vand.u32 2147483647, %v5076_v16  ;;  %v11388_v16 = vmax.f32 %v10769_v59, 0.0  ;;  %v5081_v59 = vsub.f32 %v3801_v10, %v11390_v17  ;;  %v7064_v10 = vld [vmem:[%s11299_s0 + $0x7d0] sm:$0xff] }
 0x485   :  { %v3344_v30 = vpop.f32.mrf.mxu3  ;;  %v3647_v22 = vmax.f32 %v2705_v3, 0.0  ;;  %v11384_v3 = vmax.f32 %v10714_v53, 0.0  ;;  %v3093_v2 = vadd.f32 %v10728_v56, %v3092_v5 }
 0x486   :  { %v2454_v26 = vpop.f32.mrf.mxu0  ;;  %v3345_v6 = vadd.f32 %v10728_v56, %v3344_v30  ;;  %v5587_v36 = vadd.f32 %v10680_v19, %v5332_v45 }
 0x487   :  { %v10832_v47 = vadd.f32 %v10728_v56, %v2454_v26  ;;  %v7641_v30 = vpack.c.bf16 %v3647_v22, %v3646_v39  ;;  %v11383_v26 = vmax.f32 %v10686_v8, 0.0  ;;  %v11386_v39 = vmax.f32 %v10753_v4, 0.0 }
 0x488   :  { %v3903_v11 = vmax.f32 %v3345_v6, 0.0  ;;  %v11385_v6 = vmax.f32 %v10735_v49, 0.0  ;;  %v6935_v49 = vld [vmem:[%s11299_s0 + $0x3c8] sm:$0xff] }
 0x489   :  { %v3547_v7 = vmax.f32 %v10832_v47, 0.0  ;;  %v5077_v25 = vsub.f32 %v11384_v3, %v11383_v26  ;;  %8469 = vst [vmem:[%s11302_s3 + $0x380] sm:$0xff] %v7641_v30   ;;  %v5079_v30 = vsub.f32 %v11388_v16, %v11387_v1  ;;  %v11389_v26 = vmax.f32 %v10785_v24, 0.0 }
 0x48a   :  { %v8281_v55 = vpack.c.bf16 %v3903_v11, %v3902_v20  ;;  %v10848_v50 = vsub.f32 %v3903_v11, %v3647_v22  ;;  %v5078_v47 = vsub.f32 %v11386_v39, %v11385_v6  ;;  %v2707_v11 = vpop.f32.mrf.mxu1  ;;  %v3802_v20 = vmax.f32 %v3093_v2, 0.0 }
 0x48b   :  { %v7391_v21 = vpack.c.bf16 %v3547_v7, %v3546_v14  ;;  %v5333_v5 = vand.u32 2147483647, %v5077_v25  ;;  %v5080_v3 = vsub.f32 %v3800_v13, %v11389_v26  ;;  %v5335_v2 = vand.u32 2147483647, %v5079_v30 }
 0x48c   :  { %v3094_v8 = vpop.f32.mrf.mxu2  ;;  %8597 = vst [vmem:[%s11302_s3 + $0x780] sm:$0xff] %v8281_v55   ;;  %2746 = vmatmul.bf16.gmra.mxu1 %v6935_v49  ;;  %v5334_v55 = vand.u32 2147483647, %v5078_v47  ;;  %v2708_v24 = vadd.f32 %v10728_v56, %v2707_v11  ;;  %v5082_v49 = vsub.f32 %v3802_v20, %v3546_v14 }
 0x48d   :  { %8419 = vst [vmem:[%s11302_s3 + $0x1f0] sm:$0xff] %v7391_v21   ;;  %v3095_v22 = vadd.f32 %v10728_v56, %v3094_v8  ;;  %v3347_v53 = vpop.f32.mrf.mxu3  ;;  %v5588_v6 = vadd.f32 %v5587_v36, %v5333_v5  ;;  %v5336_v19 = vand.u32 2147483647, %v5080_v3  ;;  %v5337_v3 = vand.u32 2147483647, %v5081_v59 }
 0x48e   :  { %v2457_v4 = vpop.f32.mrf.mxu0  ;;  %v3348_v13 = vadd.f32 %v10728_v56, %v3347_v53  ;;  %v3648_v30 = vmax.f32 %v2708_v24, 0.0  ;;  %v5338_v17 = vand.u32 2147483647, %v5082_v49 }
 0x48f   :  { %v3803_v54 = vmax.f32 %v3095_v22, 0.0  ;;  %v2458_v39 = vadd.f32 %v10728_v56, %v2457_v4  ;;  %v5589_v25 = vadd.f32 %v5588_v6, %v5334_v55 }
 0x490   :  { %v3904_v52 = vmax.f32 %v3348_v13, 0.0 }
 0x491   :  { %v8031_v21 = vpack.c.bf16 %v3803_v54, %v3802_v20  ;;  %v3548_v5 = vmax.f32 %v2458_v39, 0.0  ;;  %v5590_v11 = vadd.f32 %v5589_v25, %v5335_v2  ;;  %v5083_v14 = vsub.f32 %v3803_v54, %v3547_v7 }
 0x492   :  { %v2709_v47 = vpop.f32.mrf.mxu1 }
 0x493   :  { %8547 = vst [vmem:[%s11302_s3 + $0x5f0] sm:$0xff] %v8031_v21   ;;  %v2710_v36 = vadd.f32 %v10728_v56, %v2709_v47  ;;  %v10890_v21 = vsub.f32 %v3904_v52, %v3648_v30  ;;  %v5591_v47 = vadd.f32 %v5590_v11, %v5336_v19  ;;  %v5339_v7 = vand.u32 2147483647, %v5083_v14  ;;  %v6936_v19 = vld [vmem:[%s11299_s0 + $0x3d0] sm:$0xff] }
 0x494   :  { %v3097_v45 = vpop.f32.mrf.mxu2  ;;  %3391 = vmatmul.bf16.gmra.mxu3 %v7064_v10 }
 0x495   :  { %v3098_v8 = vadd.f32 %v10728_v56, %v3097_v45  ;;  %v3349_v22 = vpop.f32.mrf.mxu3  ;;  %v3649_v26 = vmax.f32 %v2710_v36, 0.0  ;;  %v5592_v2 = vadd.f32 %v5591_v47, %v5337_v3 }
 0x496   :  { %v2459_v4 = vpop.f32.mrf.mxu0  ;;  %v3350_v55 = vadd.f32 %v10728_v56, %v3349_v22 }
 0x497   :  { %v3804_v1 = vmax.f32 %v3098_v8, 0.0  ;;  %v2460_v16 = vadd.f32 %v10728_v56, %v2459_v4  ;;  %v7646_v6 = vpack.c.bf16 %v3649_v26, %v3648_v30  ;;  %v5593_v22 = vadd.f32 %v5592_v2, %v5338_v17 }
 0x498   :  { %v3905_v53 = vmax.f32 %v3350_v55, 0.0 }
 0x499   :  { %v3549_v20 = vmax.f32 %v2460_v16, 0.0  ;;  %v5084_v8 = vsub.f32 %v3804_v1, %v3548_v5  ;;  %8470 = vst [vmem:[%s11302_s3 + $0x388] sm:$0xff] %v7646_v6   ;;  %v5594_v4 = vadd.f32 %v5593_v22, %v5339_v7 }
 0x49a   :  { %v8286_v39 = vpack.c.bf16 %v3905_v53, %v3904_v52  ;;  %v10892_v45 = vsub.f32 %v3905_v53, %v3649_v26  ;;  %v2712_v25 = vpop.f32.mrf.mxu1  ;;  %v5342_v52 = vand.u32 2147483647, %v9070_v60  ;;  %v7065_v60 = vld [vmem:[%s11299_s0 + $0x7d8] sm:$0xff] }
 0x49b   :  { %v7396_v24 = vpack.c.bf16 %v3549_v20, %v3548_v5  ;;  %v5340_v49 = vand.u32 2147483647, %v5084_v8  ;;  %v2713_v26 = vadd.f32 %v10728_v56, %v2712_v25 }
 0x49c   :  { %v3099_v13 = vpop.f32.mrf.mxu2  ;;  %8598 = vst [vmem:[%s11302_s3 + $0x788] sm:$0xff] %v8286_v39   ;;  %2751 = vmatmul.bf16.gmra.mxu1 %v6936_v19  ;;  %v5346_v19 = vand.u32 2147483647, %v9147_v15 }
 0x49d   :  { %8420 = vst [vmem:[%s11302_s3 + $0x1f8] sm:$0xff] %v7396_v24   ;;  %v3100_v54 = vadd.f32 %v10728_v56, %v3099_v13  ;;  %v3352_v59 = vpop.f32.mrf.mxu3  ;;  %v5595_v16 = vadd.f32 %v5594_v4, %v5340_v49  ;;  %v3650_v39 = vmax.f32 %v2713_v26, 0.0  ;;  %v5344_v24 = vand.u32 2147483647, %v9106_v37 }
 0x49e   :  { %v3353_v53 = vadd.f32 %v10728_v56, %v3352_v59 }
 0x49f   :  { %v3805_v5 = vmax.f32 %v3100_v54, 0.0  ;;  %v5345_v54 = vand.u32 2147483647, %v9108_v40  ;;  %v5347_v40 = vand.u32 2147483647, %v9149_v18 }
 0x4a0   :  { %v3906_v47 = vmax.f32 %v3353_v53, 0.0  ;;  %v5351_v18 = vand.u32 2147483647, %v9221_v44 }
 0x4a1   :  { %v8036_v36 = vpack.c.bf16 %v3805_v5, %v3804_v1  ;;  %v5085_v55 = vsub.f32 %v3805_v5, %v3549_v20  ;;  %v5343_v1 = vand.u32 2147483647, %v9072_v63  ;;  %v6937_v5 = vld [vmem:[%s11299_s0 + $0x3d8] sm:$0xff] }
 0x4a2   :  { %v2714_v10 = vpop.f32.mrf.mxu1  ;;  %v10920_v25 = vsub.f32 %v3906_v47, %v3650_v39 }
 0x4a3   :  { %8548 = vst [vmem:[%s11302_s3 + $0x5f8] sm:$0xff] %v8036_v36   ;;  %v5341_v30 = vand.u32 2147483647, %v5085_v55  ;;  %v2715_v3 = vadd.f32 %v10728_v56, %v2714_v10  ;;  %v5348_v36 = vand.u32 2147483647, %v9183_v58 }
 0x4a4   :  { %3396 = vmatmul.bf16.gmra.mxu3 %v7065_v60 }
 0x4a5   :  { %v5596_v11 = vadd.f32 %v5595_v16, %v5341_v30  ;;  %v3354_v14 = vpop.f32.mrf.mxu3  ;;  %v3651_v17 = vmax.f32 %v2715_v3, 0.0  ;;  %v5349_v16 = vand.u32 2147483647, %v9185_v62 }
 0x4a6   :  { %v3355_v20 = vadd.f32 %v10728_v56, %v3354_v14 }
 0x4a7   :  { %v5597_v6 = vadd.f32 %v5596_v11, %v5342_v52  ;;  %v7651_v2 = vpack.c.bf16 %v3651_v17, %v3650_v39  ;;  %v5350_v52 = vand.u32 2147483647, %v9219_v41  ;;  %v7066_v41 = vld [vmem:[%s11299_s0 + $0x7e0] sm:$0xff]  ;;  %v5352_v39 = vand.u32 2147483647, %v9255_v23 }
 0x4a8   :  { %v3907_v8 = vmax.f32 %v3355_v20, 0.0 }
 0x4a9   :  { %v5598_v13 = vadd.f32 %v5597_v6, %v5343_v1  ;;  %8471 = vst [vmem:[%s11302_s3 + $0x390] sm:$0xff] %v7651_v2   ;;  %v5354_v2 = vand.u32 2147483647, %v9291_v9 }
 0x4aa   :  { %v8291_v7 = vpack.c.bf16 %v3907_v8, %v3906_v47  ;;  %v10922_v63 = vsub.f32 %v3907_v8, %v3651_v17  ;;  %v2717_v37 = vpop.f32.mrf.mxu1 }
 0x4ab   :  { %v5599_v59 = vadd.f32 %v5598_v13, %v5344_v24  ;;  %v2718_v11 = vadd.f32 %v10728_v56, %v2717_v37  ;;  %v5353_v24 = vand.u32 2147483647, %v9257_v27  ;;  %v5355_v27 = vand.u32 2147483647, %v9293_v12 }
 0x4ac   :  { %8599 = vst [vmem:[%s11302_s3 + $0x790] sm:$0xff] %v8291_v7   ;;  %2756 = vmatmul.bf16.gmra.mxu1 %v6937_v5  ;;  %v5359_v12 = vand.u32 2147483647, %v9365_v51 }
 0x4ad   :  { %v5600_v22 = vadd.f32 %v5599_v59, %v5345_v54  ;;  %v3357_v49 = vpop.f32.mrf.mxu3  ;;  %v3652_v1 = vmax.f32 %v2718_v11, 0.0  ;;  %v6938_v59 = vld [vmem:[%s11299_s0 + $0x3e0] sm:$0xff] }
 0x4ae   :  { %v3358_v26 = vadd.f32 %v10728_v56, %v3357_v49  ;;  %v5357_v49 = vand.u32 2147483647, %v9329_v0 }
 0x4af   :  { %v5601_v4 = vadd.f32 %v5600_v22, %v5346_v19  ;;  %v5356_v19 = vand.u32 2147483647, %v9327_v57 }
 0x4b0   :  { %v3908_v20 = vmax.f32 %v3358_v26, 0.0  ;;  %v5360_v26 = vand.u32 2147483647, %v9399_v38 }
 0x4b1   :  { %v5602_v55 = vadd.f32 %v5601_v4, %v5347_v40  ;;  %v5358_v40 = vand.u32 2147483647, %v9363_v48  ;;  %v7067_v48 = vld [vmem:[%s11299_s0 + $0x7e8] sm:$0xff] }
 0x4b2   :  { %v2719_v10 = vpop.f32.mrf.mxu1  ;;  %v10948_v17 = vsub.f32 %v3908_v20, %v3652_v1 }
 0x4b3   :  { %v5603_v30 = vadd.f32 %v5602_v55, %v5348_v36  ;;  %v2720_v53 = vadd.f32 %v10728_v56, %v2719_v10 }
 0x4b4   :  { %3401 = vmatmul.bf16.gmra.mxu3 %v7066_v41 }
 0x4b5   :  { %v5604_v15 = vadd.f32 %v5603_v30, %v5349_v16  ;;  %v3359_v3 = vpop.f32.mrf.mxu3  ;;  %v3653_v62 = vmax.f32 %v2720_v53, 0.0 }
 0x4b6   :  { %v3360_v14 = vadd.f32 %v10728_v56, %v3359_v3 }
 0x4b7   :  { %v5605_v58 = vadd.f32 %v5604_v15, %v5350_v52  ;;  %v7656_v60 = vpack.c.bf16 %v3653_v62, %v3652_v1 }
 0x4b8   :  { %v3909_v6 = vmax.f32 %v3360_v14, 0.0 }
 0x4b9   :  { %v5606_v47 = vadd.f32 %v5605_v58, %v5351_v18  ;;  %8472 = vst [vmem:[%s11302_s3 + $0x398] sm:$0xff] %v7656_v60   ;;  %v5361_v58 = vand.u32 2147483647, %v9401_v43  ;;  %v5363_v43 = vand.u32 2147483647, %v9437_v35 }
 0x4ba   :  { %v8296_v8 = vpack.c.bf16 %v3909_v6, %v3908_v20  ;;  %v10950_v44 = vsub.f32 %v3909_v6, %v3653_v62  ;;  %v2722_v23 = vpop.f32.mrf.mxu1  ;;  %v5362_v20 = vand.u32 2147483647, %v9435_v32  ;;  %v6939_v6 = vld [vmem:[%s11299_s0 + $0x3e8] sm:$0xff]  ;;  %v5367_v35 = vand.u32 2147483647, %v9509_v34 }
 0x4bb   :  { %v5607_v13 = vadd.f32 %v5606_v47, %v5352_v39  ;;  %v2723_v36 = vadd.f32 %v10728_v56, %v2722_v23  ;;  %v5364_v47 = vand.u32 2147483647, %v9471_v29 }
 0x4bc   :  { %8600 = vst [vmem:[%s11302_s3 + $0x798] sm:$0xff] %v8296_v8   ;;  %2761 = vmatmul.bf16.gmra.mxu1 %v6938_v59  ;;  %v5365_v8 = vand.u32 2147483647, %v9473_v33 }
 0x4bd   :  { %v5608_v7 = vadd.f32 %v5607_v13, %v5353_v24  ;;  %v3362_v54 = vpop.f32.mrf.mxu3  ;;  %v3654_v10 = vmax.f32 %v2723_v36, 0.0  ;;  %v5366_v13 = vand.u32 2147483647, %v9507_v28  ;;  %v7068_v28 = vld [vmem:[%s11299_s0 + $0x7f0] sm:$0xff]  ;;  %v5369_v36 = vand.u32 2147483647, %v9550_v42 }
 0x4be   :  { %v3363_v55 = vadd.f32 %v10728_v56, %v3362_v54 }
 0x4bf   :  { %v5609_v37 = vadd.f32 %v5608_v7, %v5354_v2 }
 0x4c0   :  { %v3910_v15 = vmax.f32 %v3363_v55, 0.0 }
 0x4c1   :  { %v5610_v22 = vadd.f32 %v5609_v37, %v5355_v27 }
 0x4c2   :  { %v2724_v4 = vpop.f32.mrf.mxu1  ;;  %v10976_v3 = vsub.f32 %v3910_v15, %v3654_v10 }
 0x4c3   :  { %v5611_v5 = vadd.f32 %v5610_v22, %v5356_v19  ;;  %v2725_v16 = vadd.f32 %v10728_v56, %v2724_v4 }
 0x4c4   :  { %3406 = vmatmul.bf16.gmra.mxu3 %v7067_v48 }
 0x4c5   :  { %v5612_v9 = vadd.f32 %v5611_v5, %v5357_v49  ;;  %v3364_v30 = vpop.f32.mrf.mxu3  ;;  %v3655_v0 = vmax.f32 %v2725_v16, 0.0  ;;  %v5368_v49 = vand.u32 2147483647, %v9548_v31  ;;  %v5370_v16 = vand.u32 2147483647, %v9584_v46 }
 0x4c6   :  { %v3365_v52 = vadd.f32 %v10728_v56, %v3364_v30 }
 0x4c7   :  { %v5613_v57 = vadd.f32 %v5612_v9, %v5358_v40  ;;  %v7661_v18 = vpack.c.bf16 %v3655_v0, %v3654_v10 }
 0x4c8   :  { %v3911_v11 = vmax.f32 %v3365_v52, 0.0  ;;  %v6940_v52 = vld [vmem:[%s11299_s0 + $0x3f0] sm:$0xff] }
 0x4c9   :  { %v5614_v53 = vadd.f32 %v5613_v57, %v5359_v12  ;;  %8473 = vst [vmem:[%s11302_s3 + $0x3a0] sm:$0xff] %v7661_v18   ;;  %v11391_v57 = vld [vmem:[#allocation5_spill] sm:$0xff]  ;;  %v11394_v18 = vld [vmem:[#allocation8_spill] sm:$0xff] }
 0x4ca   :  { %v8301_v14 = vpack.c.bf16 %v3911_v11, %v3910_v15  ;;  %v10978_v51 = vsub.f32 %v3911_v11, %v3655_v0  ;;  %v2727_v38 = vpop.f32.mrf.mxu1  ;;  %v5371_v42 = vand.u32 2147483647, %v11391_v57  ;;  %v11392_v15 = vld [vmem:[#allocation6_spill] sm:$0xff]  ;;  %v11393_v11 = vld [vmem:[#allocation7_spill] sm:$0xff]  ;;  %v11402_v57 = vld [vmem:[#allocation16_spill] sm:$0xff] }
 0x4cb   :  { %v5615_v1 = vadd.f32 %v5614_v53, %v5360_v26  ;;  %v2728_v2 = vadd.f32 %v10728_v56, %v2727_v38  ;;  %v5372_v0 = vand.u32 2147483647, %v11392_v15  ;;  %v5373_v26 = vand.u32 2147483647, %v11393_v11 }
 0x4cc   :  { %8601 = vst [vmem:[%s11302_s3 + $0x7a0] sm:$0xff] %v8301_v14   ;;  %2766 = vmatmul.bf16.gmra.mxu1 %v6939_v6  ;;  %v5374_v14 = vand.u32 2147483647, %v11394_v18 }
 0x4cd   :  { %v5616_v62 = vadd.f32 %v5615_v1, %v5361_v58  ;;  %v3367_v41 = vpop.f32.mrf.mxu3  ;;  %v3656_v37 = vmax.f32 %v2728_v2, 0.0 }
 0x4ce   :  { %v3368_v7 = vadd.f32 %v10728_v56, %v3367_v41  ;;  %v11395_v41 = vld [vmem:[#allocation9_spill] sm:$0xff] }
 0x4cf   :  { %v5617_v39 = vadd.f32 %v5616_v62, %v5362_v20  ;;  %v5375_v6 = vand.u32 2147483647, %v11395_v41 }
 0x4d0   :  { %v3912_v19 = vmax.f32 %v3368_v7, 0.0 }
 0x4d1   :  { %v5618_v60 = vadd.f32 %v5617_v39, %v5363_v43 }
 0x4d2   :  { %v2729_v23 = vpop.f32.mrf.mxu1  ;;  %v11004_v40 = vsub.f32 %v3912_v19, %v3656_v37 }
 0x4d3   :  { %v5619_v24 = vadd.f32 %v5618_v60, %v5364_v47  ;;  %v2730_v54 = vadd.f32 %v10728_v56, %v2729_v23  ;;  %v11396_v23 = vld [vmem:[#allocation10_spill] sm:$0xff] }
 0x4d4   :  { %3411 = vmatmul.bf16.gmra.mxu3 %v7068_v28 }
 0x4d5   :  { %v5620_v32 = vadd.f32 %v5619_v24, %v5365_v8  ;;  %v3369_v59 = vpop.f32.mrf.mxu3  ;;  %v3657_v33 = vmax.f32 %v2730_v54, 0.0  ;;  %v7069_v24 = vld [vmem:[%s11299_s0 + $0x7f8] sm:$0xff] }
 0x4d6   :  { %v3370_v27 = vadd.f32 %v10728_v56, %v3369_v59 }
 0x4d7   :  { %v5621_v29 = vadd.f32 %v5620_v32, %v5366_v13  ;;  %v7666_v4 = vpack.c.bf16 %v3657_v33, %v3656_v37  ;;  %v5376_v32 = vand.u32 2147483647, %v11396_v23 }
 0x4d8   :  { %v3913_v22 = vmax.f32 %v3370_v27, 0.0  ;;  %v11397_v27 = vld [vmem:[#allocation11_spill] sm:$0xff] }
 0x4d9   :  { %v5622_v5 = vadd.f32 %v5621_v29, %v5367_v35  ;;  %8474 = vst [vmem:[%s11302_s3 + $0x3a8] sm:$0xff] %v7666_v4   ;;  %v5377_v29 = vand.u32 2147483647, %v11397_v27  ;;  %v11399_v4 = vld [vmem:[#allocation13_spill] sm:$0xff] }
 0x4da   :  { %v8306_v9 = vpack.c.bf16 %v3913_v22, %v3912_v19  ;;  %v11006_v34 = vsub.f32 %v3913_v22, %v3657_v33  ;;  %v2732_v31 = vpop.f32.mrf.mxu1  ;;  %v11398_v33 = vld [vmem:[#allocation12_spill] sm:$0xff]  ;;  %v11407_v27 = vld [vmem:[#allocation21_spill] sm:$0xff] }
 0x4db   :  { %v5623_v55 = vadd.f32 %v5622_v5, %v5368_v49  ;;  %v2733_v1 = vadd.f32 %v10728_v56, %v2732_v31  ;;  %v5378_v28 = vand.u32 2147483647, %v11398_v33  ;;  %v6941_v5 = vld [vmem:[%s11299_s0 + $0x3f8] sm:$0xff] }
 0x4dc   :  { %8602 = vst [vmem:[%s11302_s3 + $0x7a8] sm:$0xff] %v8306_v9   ;;  %2771 = vmatmul.bf16.gmra.mxu1 %v6940_v52  ;;  %v5379_v9 = vand.u32 2147483647, %v11399_v4  ;;  %v11410_v4 = vld [vmem:[#allocation24_spill] sm:$0xff] }
 0x4dd   :  { %v5624_v30 = vadd.f32 %v5623_v55, %v5369_v36  ;;  %v3372_v12 = vpop.f32.mrf.mxu3  ;;  %v3658_v47 = vmax.f32 %v2733_v1, 0.0  ;;  %v11400_v55 = vld [vmem:[#allocation14_spill] sm:$0xff] }
 0x4de   :  { %v3373_v38 = vadd.f32 %v10728_v56, %v3372_v12  ;;  %v5380_v31 = vand.u32 2147483647, %v11400_v55 }
 0x4df   :  { %v5625_v10 = vadd.f32 %v5624_v30, %v5370_v16  ;;  %v11401_v30 = vld [vmem:[#allocation15_spill] sm:$0xff] }
 0x4e0   :  { %v3914_v60 = vmax.f32 %v3373_v38, 0.0  ;;  %v5381_v12 = vand.u32 2147483647, %v11401_v30 }
 0x4e1   :  { %v5626_v48 = vadd.f32 %v5625_v10, %v5371_v42  ;;  %v5382_v42 = vand.u32 2147483647, %v11402_v57 }
 0x4e2   :  { %v2734_v58 = vpop.f32.mrf.mxu1  ;;  %v11032_v7 = vsub.f32 %v3914_v60, %v3658_v47 }
 0x4e3   :  { %v5627_v53 = vadd.f32 %v5626_v48, %v5372_v0  ;;  %v2735_v20 = vadd.f32 %v10728_v56, %v2734_v58 }
 0x4e4   :  { %3416 = vmatmul.bf16.gmra.mxu3 %v7069_v24 }
 0x4e5   :  { %v5628_v46 = vadd.f32 %v5627_v53, %v5373_v26  ;;  %v3374_v62 = vpop.f32.mrf.mxu3  ;;  %v3659_v8 = vmax.f32 %v2735_v20, 0.0  ;;  %v11403_v53 = vld [vmem:[#allocation17_spill] sm:$0xff] }
 0x4e6   :  { %v3375_v43 = vadd.f32 %v10728_v56, %v3374_v62  ;;  %v5383_v18 = vand.u32 2147483647, %v11403_v53  ;;  %v11404_v62 = vld [vmem:[#allocation18_spill] sm:$0xff] }
 0x4e7   :  { %v5629_v39 = vadd.f32 %v5628_v46, %v5374_v14  ;;  %v7671_v54 = vpack.c.bf16 %v3659_v8, %v3658_v47  ;;  %v5384_v41 = vand.u32 2147483647, %v11404_v62 }
 0x4e8   :  { %v3915_v13 = vmax.f32 %v3375_v43, 0.0 }
 0x4e9   :  { %v5630_v2 = vadd.f32 %v5629_v39, %v5375_v6  ;;  %8475 = vst [vmem:[%s11302_s3 + $0x3b0] sm:$0xff] %v7671_v54  }
 0x4ea   :  { %v8311_v59 = vpack.c.bf16 %v3915_v13, %v3914_v60  ;;  %v11034_v35 = vsub.f32 %v3915_v13, %v3659_v8  ;;  %v2737_v19 = vpop.f32.mrf.mxu1  ;;  %v11405_v8 = vld [vmem:[#allocation19_spill] sm:$0xff] }
 0x4eb   :  { %v5631_v37 = vadd.f32 %v5630_v2, %v5376_v32  ;;  %v2738_v0 = vadd.f32 %v10728_v56, %v2737_v19  ;;  %v5385_v24 = vand.u32 2147483647, %v11405_v8  ;;  %v11406_v32 = vld [vmem:[#allocation20_spill] sm:$0xff]  ;;  %v11408_v19 = vld [vmem:[#allocation22_spill] sm:$0xff] }
 0x4ec   :  { %8603 = vst [vmem:[%s11302_s3 + $0x7b0] sm:$0xff] %v8311_v59   ;;  %2776 = vmatmul.bf16.gmra.mxu1 %v6941_v5  ;;  %v5386_v2 = vand.u32 2147483647, %v11406_v32  ;;  %v5388_v33 = vand.u32 2147483647, %v11408_v19  ;;  %v11416_v32 = vld [vmem:[#allocation30_spill] sm:$0xff] }
 0x4ed   :  { %v5632_v22 = vadd.f32 %v5631_v37, %v5377_v29  ;;  %v3377_v49 = vpop.f32.mrf.mxu3  ;;  %v3660_v46 = vmax.f32 %v2738_v0, 0.0  ;;  %v5387_v29 = vand.u32 2147483647, %v11407_v27 }
 0x4ee   :  { %v3378_v48 = vadd.f32 %v10728_v56, %v3377_v49 }
 0x4ef   :  { %v5633_v36 = vadd.f32 %v5632_v22, %v5378_v28  ;;  %v11409_v22 = vld [vmem:[#allocation23_spill] sm:$0xff] }
 0x4f0   :  { %v3916_v1 = vmax.f32 %v3378_v48, 0.0  ;;  %v5389_v49 = vand.u32 2147483647, %v11409_v22 }
 0x4f1   :  { %v5634_v16 = vadd.f32 %v5633_v36, %v5379_v9  ;;  %v5390_v9 = vand.u32 2147483647, %v11410_v4 }
 0x4f2   :  { %v2739_v10 = vpop.f32.mrf.mxu1  ;;  %v11057_v43 = vsub.f32 %v3916_v1, %v3660_v46 }
 0x4f3   :  { %v5635_v52 = vadd.f32 %v5634_v16, %v5380_v31  ;;  %v2740_v11 = vadd.f32 %v10728_v56, %v2739_v10 }
 0x4f5   :  { %v5636_v15 = vadd.f32 %v5635_v52, %v5381_v12  ;;  %v3379_v26 = vpop.f32.mrf.mxu3  ;;  %v3661_v38 = vmax.f32 %v2740_v11, 0.0  ;;  %v11411_v52 = vld [vmem:[#allocation25_spill] sm:$0xff] }
 0x4f6   :  { %v3380_v14 = vadd.f32 %v10728_v56, %v3379_v26  ;;  %v5391_v57 = vand.u32 2147483647, %v11411_v52  ;;  %v11412_v26 = vld [vmem:[#allocation26_spill] sm:$0xff] }
 0x4f7   :  { %v5637_v58 = vadd.f32 %v5636_v15, %v5382_v42  ;;  %v7676_v39 = vpack.c.bf16 %v3661_v38, %v3660_v46  ;;  %v5392_v53 = vand.u32 2147483647, %v11412_v26  ;;  %v11421_v26 = vld [vmem:[#allocation35_spill] sm:$0xff] }
 0x4f8   :  { %v3917_v20 = vmax.f32 %v3380_v14, 0.0 }
 0x4f9   :  { %v5638_v6 = vadd.f32 %v5637_v58, %v5383_v18  ;;  %8476 = vst [vmem:[%s11302_s3 + $0x3b8] sm:$0xff] %v7676_v39  }
 0x4fa   :  { %v8316_v47 = vpack.c.bf16 %v3917_v20, %v3916_v1  ;;  %v11059_v60 = vsub.f32 %v3917_v20, %v3661_v38  ;;  %v2742_v23 = vpop.f32.mrf.mxu1  ;;  %v11413_v38 = vld [vmem:[#allocation27_spill] sm:$0xff] }
 0x4fb   :  { %v5639_v13 = vadd.f32 %v5638_v6, %v5384_v41  ;;  %v2743_v31 = vadd.f32 %v10728_v56, %v2742_v23  ;;  %v5393_v20 = vand.u32 2147483647, %v11413_v38  ;;  %v11414_v6 = vld [vmem:[#allocation28_spill] sm:$0xff] }
 0x4fc   :  { %8604 = vst [vmem:[%s11302_s3 + $0x7b8] sm:$0xff] %v8316_v47   ;;  %v5394_v39 = vand.u32 2147483647, %v11414_v6 }
 0x4fd   :  { %v5640_v54 = vadd.f32 %v5639_v13, %v5385_v24  ;;  %v3382_v59 = vpop.f32.mrf.mxu3  ;;  %v3662_v15 = vmax.f32 %v2743_v31, 0.0  ;;  %v11415_v24 = vld [vmem:[#allocation29_spill] sm:$0xff] }
 0x4fe   :  { %v3383_v16 = vadd.f32 %v10728_v56, %v3382_v59  ;;  %v5395_v13 = vand.u32 2147483647, %v11415_v24  ;;  %v11417_v59 = vld [vmem:[#allocation31_spill] sm:$0xff] }
 0x4ff   :  { %v5641_v37 = vadd.f32 %v5640_v54, %v5386_v2  ;;  %v5396_v2 = vand.u32 2147483647, %v11416_v32  ;;  %v5397_v27 = vand.u32 2147483647, %v11417_v59 }
 0x500   :  { %v3918_v0 = vmax.f32 %v3383_v16, 0.0 }
 0x501   :  { %v5642_v28 = vadd.f32 %v5641_v37, %v5387_v29  ;;  %v11418_v37 = vld [vmem:[#allocation32_spill] sm:$0xff] }
 0x502   :  { %v2744_v36 = vpop.f32.mrf.mxu1  ;;  %v11079_v14 = vsub.f32 %v3918_v0, %v3662_v15  ;;  %v5398_v19 = vand.u32 2147483647, %v11418_v37 }
 0x503   :  { %v5643_v5 = vadd.f32 %v5642_v28, %v5388_v33  ;;  %v2745_v30 = vadd.f32 %v10728_v56, %v2744_v36 }
 0x505   :  { %v5644_v55 = vadd.f32 %v5643_v5, %v5389_v49  ;;  %v3384_v12 = vpop.f32.mrf.mxu3  ;;  %v3663_v48 = vmax.f32 %v2745_v30, 0.0 }
 0x506   :  { %v3385_v42 = vadd.f32 %v10728_v56, %v3384_v12 }
 0x507   :  { %v5645_v10 = vadd.f32 %v5644_v55, %v5390_v9  ;;  %v7681_v58 = vpack.c.bf16 %v3663_v48, %v3662_v15  ;;  %v11419_v9 = vld [vmem:[#allocation33_spill] sm:$0xff] }
 0x508   :  { %v3919_v11 = vmax.f32 %v3385_v42, 0.0  ;;  %v5399_v36 = vand.u32 2147483647, %v11419_v9 }
 0x509   :  { %v5646_v18 = vadd.f32 %v5645_v10, %v5391_v57  ;;  %8477 = vst [vmem:[%s11302_s3 + $0x3c0] sm:$0xff] %v7681_v58   ;;  %v11420_v57 = vld [vmem:[#allocation34_spill] sm:$0xff] }
 0x50a   :  { %v8321_v46 = vpack.c.bf16 %v3919_v11, %v3918_v0  ;;  %v11081_v1 = vsub.f32 %v3919_v11, %v3663_v48  ;;  %v2747_v41 = vpop.f32.mrf.mxu1  ;;  %v5400_v42 = vand.u32 2147483647, %v11420_v57 }
 0x50b   :  { %v5647_v62 = vadd.f32 %v5646_v18, %v5392_v53  ;;  %v2748_v22 = vadd.f32 %v10728_v56, %v2747_v41  ;;  %v5401_v53 = vand.u32 2147483647, %v11421_v26  ;;  %v11423_v41 = vld [vmem:[#allocation37_spill] sm:$0xff] }
 0x50c   :  { %8605 = vst [vmem:[%s11302_s3 + $0x7c0] sm:$0xff] %v8321_v46   ;;  %v11422_v46 = vld [vmem:[#allocation36_spill] sm:$0xff]  ;;  %v5403_v6 = vand.u32 2147483647, %v11423_v41  ;;  %v11432_v41 = vld [vmem:[#allocation46_spill] sm:$0xff] }
 0x50d   :  { %v5648_v47 = vadd.f32 %v5647_v62, %v5393_v20  ;;  %v3387_v8 = vpop.f32.mrf.mxu3  ;;  %v3664_v16 = vmax.f32 %v2748_v22, 0.0  ;;  %v5402_v38 = vand.u32 2147483647, %v11422_v46 }
 0x50e   :  { %v3388_v49 = vadd.f32 %v10728_v56, %v3387_v8 }
 0x50f   :  { %v5649_v23 = vadd.f32 %v5648_v47, %v5394_v39  ;;  %v11424_v47 = vld [vmem:[#allocation38_spill] sm:$0xff] }
 0x510   :  { %v3920_v30 = vmax.f32 %v3388_v49, 0.0  ;;  %v5404_v8 = vand.u32 2147483647, %v11424_v47  ;;  %v11433_v47 = vld [vmem:[#allocation47_spill] sm:$0xff] }
 0x511   :  { %v5650_v54 = vadd.f32 %v5649_v23, %v5395_v13  ;;  %v11425_v13 = vld [vmem:[#allocation39_spill] sm:$0xff] }
 0x512   :  { %v2749_v33 = vpop.f32.mrf.mxu1  ;;  %v11101_v15 = vsub.f32 %v3920_v30, %v3664_v16  ;;  %v5405_v23 = vand.u32 2147483647, %v11425_v13  ;;  %v11434_v13 = vld [vmem:[#allocation48_spill] sm:$0xff] }
 0x513   :  { %v5651_v29 = vadd.f32 %v5650_v54, %v5396_v2  ;;  %v2750_v5 = vadd.f32 %v10728_v56, %v2749_v33  ;;  %v11426_v2 = vld [vmem:[#allocation40_spill] sm:$0xff] }
 0x514   :  { %v5406_v54 = vand.u32 2147483647, %v11426_v2 }
 0x515   :  { %v5652_v28 = vadd.f32 %v5651_v29, %v5397_v27  ;;  %v3389_v4 = vpop.f32.mrf.mxu3  ;;  %v3665_v12 = vmax.f32 %v2750_v5, 0.0 }
 0x516   :  { %v3390_v55 = vadd.f32 %v10728_v56, %v3389_v4 }
 0x517   :  { %v5653_v31 = vadd.f32 %v5652_v28, %v5398_v19  ;;  %v7686_v0 = vpack.c.bf16 %v3665_v12, %v3664_v16  ;;  %v11427_v28 = vld [vmem:[#allocation41_spill] sm:$0xff] }
 0x518   :  { %v3921_v52 = vmax.f32 %v3390_v55, 0.0  ;;  %v5407_v22 = vand.u32 2147483647, %v11427_v28 }
 0x519   :  { %v5654_v10 = vadd.f32 %v5653_v31, %v5399_v36  ;;  %8478 = vst [vmem:[%s11302_s3 + $0x3c8] sm:$0xff] %v7686_v0   ;;  %v11428_v31 = vld [vmem:[#allocation42_spill] sm:$0xff] }
 0x51a   :  { %v8326_v48 = vpack.c.bf16 %v3921_v52, %v3920_v30  ;;  %v11103_v11 = vsub.f32 %v3921_v52, %v3665_v12  ;;  %v2752_v58 = vpop.f32.mrf.mxu1  ;;  %v5408_v16 = vand.u32 2147483647, %v11428_v31 }
 0x51b   :  { %v5655_v18 = vadd.f32 %v5654_v10, %v5400_v42  ;;  %v2753_v29 = vadd.f32 %v10728_v56, %v2752_v58  ;;  %v11429_v10 = vld [vmem:[#allocation43_spill] sm:$0xff] }
 0x51c   :  { %8606 = vst [vmem:[%s11302_s3 + $0x7c8] sm:$0xff] %v8326_v48   ;;  %v5409_v0 = vand.u32 2147483647, %v11429_v10 }
 0x51d   :  { %v5656_v20 = vadd.f32 %v5655_v18, %v5401_v53  ;;  %v3392_v62 = vpop.f32.mrf.mxu3  ;;  %v3666_v4 = vmax.f32 %v2753_v29, 0.0  ;;  %v11430_v53 = vld [vmem:[#allocation44_spill] sm:$0xff] }
 0x51e   :  { %v3393_v37 = vadd.f32 %v10728_v56, %v3392_v62  ;;  %v5410_v18 = vand.u32 2147483647, %v11430_v53 }
 0x51f   :  { %v5657_v39 = vadd.f32 %v5656_v20, %v5402_v38  ;;  %v11431_v38 = vld [vmem:[#allocation45_spill] sm:$0xff] }
 0x520   :  { %v3922_v9 = vmax.f32 %v3393_v37, 0.0  ;;  %v5411_v20 = vand.u32 2147483647, %v11431_v38 }
 0x521   :  { %v5658_v24 = vadd.f32 %v5657_v39, %v5403_v6  ;;  %v5412_v6 = vand.u32 2147483647, %v11432_v41 }
 0x522   :  { %v2754_v59 = vpop.f32.mrf.mxu1  ;;  %v11123_v12 = vsub.f32 %v3922_v9, %v3666_v4 }
 0x523   :  { %v5659_v32 = vadd.f32 %v5658_v24, %v5404_v8  ;;  %v2755_v19 = vadd.f32 %v10728_v56, %v2754_v59  ;;  %v5413_v8 = vand.u32 2147483647, %v11433_v47 }
 0x525   :  { %v5660_v27 = vadd.f32 %v5659_v32, %v5405_v23  ;;  %v3394_v33 = vpop.f32.mrf.mxu3  ;;  %v3667_v36 = vmax.f32 %v2755_v19, 0.0  ;;  %v5414_v23 = vand.u32 2147483647, %v11434_v13  ;;  %v11435_v19 = vld [vmem:[#allocation49_spill] sm:$0xff] }
 0x526   :  { %v3395_v49 = vadd.f32 %v10728_v56, %v3394_v33  ;;  %v5415_v33 = vand.u32 2147483647, %v11435_v19 }
 0x527   :  { %v5661_v5 = vadd.f32 %v5660_v27, %v5406_v54  ;;  %v7691_v52 = vpack.c.bf16 %v3667_v36, %v3666_v4  ;;  %v11144_v27 = vld [vmem:[%s11301_s2] ss:$0 sm:$0xff] }
 0x528   :  { %v3923_v55 = vmax.f32 %v3395_v49, 0.0 }
 0x529   :  { %v5662_v30 = vadd.f32 %v5661_v5, %v5407_v22  ;;  %8479 = vst [vmem:[%s11302_s3 + $0x3d0] sm:$0xff] %v7691_v52  }
 0x52a   :  { %v8331_v57 = vpack.c.bf16 %v3923_v55, %v3922_v9  ;;  %v11125_v42 = vsub.f32 %v3923_v55, %v3667_v36  ;;  %v2757_v26 = vpop.f32.mrf.mxu1  ;;  %v11436_v36 = vld [vmem:[#allocation50_spill] sm:$0xff] }
 0x52b   :  { %v5663_v48 = vadd.f32 %v5662_v30, %v5408_v16  ;;  %v2758_v54 = vadd.f32 %v10728_v56, %v2757_v26  ;;  %v5416_v55 = vand.u32 2147483647, %v11436_v36  ;;  %v11438_v26 = vld [vmem:[#allocation52_spill] sm:$0xff] }
 0x52c   :  { %8607 = vst [vmem:[%s11302_s3 + $0x7d0] sm:$0xff] %v8331_v57   ;;  %v11437_v57 = vld [vmem:[#allocation51_spill] sm:$0xff]  ;;  %v5418_v53 = vand.u32 2147483647, %v11438_v26 }
 0x52d   :  { %v5664_v58 = vadd.f32 %v5663_v48, %v5409_v0  ;;  %v3397_v46 = vpop.f32.mrf.mxu3  ;;  %v3668_v49 = vmax.f32 %v2758_v54, 0.0  ;;  %v5417_v10 = vand.u32 2147483647, %v11437_v57 }
 0x52e   :  { %v3398_v59 = vadd.f32 %v10728_v56, %v3397_v46  ;;  %v11439_v46 = vld [vmem:[#allocation53_spill] sm:$0xff] }
 0x52f   :  { %v5665_v62 = vadd.f32 %v5664_v58, %v5410_v18  ;;  %v5419_v38 = vand.u32 2147483647, %v11439_v46 }
 0x530   :  { %v3924_v5 = vmax.f32 %v3398_v59, 0.0 }
 0x531   :  { %v5666_v39 = vadd.f32 %v5665_v62, %v5411_v20  ;;  %v11440_v62 = vld [vmem:[#allocation54_spill] sm:$0xff] }
 0x532   :  { %v2759_v32 = vpop.f32.mrf.mxu1  ;;  %v11150_v31 = vsub.f32 %v3924_v5, %v3668_v49  ;;  %v5420_v41 = vand.u32 2147483647, %v11440_v62 }
 0x533   :  { %v5667_v24 = vadd.f32 %v5666_v39, %v5412_v6  ;;  %v2760_v29 = vadd.f32 %v11144_v27, %v2759_v32  ;;  %v11441_v39 = vld [vmem:[#allocation55_spill] sm:$0xff] }
 0x534   :  { %v5421_v47 = vand.u32 2147483647, %v11441_v39 }
 0x535   :  { %v5668_v2 = vadd.f32 %v5667_v24, %v5413_v8  ;;  %v3399_v37 = vpop.f32.mrf.mxu3  ;;  %v3669_v4 = vmax.f32 %v2760_v29, 0.0  ;;  %v11442_v24 = vld [vmem:[#allocation56_spill] sm:$0xff] }
 0x536   :  { %v3400_v28 = vadd.f32 %v11144_v27, %v3399_v37  ;;  %v5422_v13 = vand.u32 2147483647, %v11442_v24  ;;  %v11443_v37 = vld [vmem:[#allocation57_spill] sm:$0xff] }
 0x537   :  { %v5669_v22 = vadd.f32 %v5668_v2, %v5414_v23  ;;  %v7696_v16 = vpack.c.bf16 %v3669_v4, %v3668_v49  ;;  %v5423_v19 = vand.u32 2147483647, %v11443_v37 }
 0x538   :  { %v3925_v9 = vmax.f32 %v3400_v28, 0.0 }
 0x539   :  { %v5670_v56 = vadd.f32 %v5669_v22, %v5415_v33  ;;  %8480 = vst [vmem:[%s11302_s3 + $0x3d8] sm:$0xff] %v7696_v16  }
 0x53a   :  { %v8336_v30 = vpack.c.bf16 %v3925_v9, %v3924_v5  ;;  %v11152_v52 = vsub.f32 %v3925_v9, %v3669_v4  ;;  %v2762_v48 = vpop.f32.mrf.mxu1  ;;  %v11444_v9 = vld [vmem:[#allocation58_spill] sm:$0xff] }
 0x53b   :  { %v5671_v0 = vadd.f32 %v5670_v56, %v5416_v55  ;;  %v2763_v2 = vadd.f32 %v11144_v27, %v2762_v48  ;;  %v5424_v36 = vand.u32 2147483647, %v11444_v9 }
 0x53c   :  { %8608 = vst [vmem:[%s11302_s3 + $0x7d8] sm:$0xff] %v8336_v30  }
 0x53d   :  { %v5672_v18 = vadd.f32 %v5671_v0, %v5417_v10  ;;  %v3402_v58 = vpop.f32.mrf.mxu3  ;;  %v3670_v22 = vmax.f32 %v2763_v2, 0.0  ;;  %v11445_v10 = vld [vmem:[#allocation59_spill] sm:$0xff] }
 0x53e   :  { %v3403_v54 = vadd.f32 %v11144_v27, %v3402_v58  ;;  %v5425_v0 = vand.u32 2147483647, %v11445_v10 }
 0x53f   :  { %v5673_v20 = vadd.f32 %v5672_v18, %v5418_v53  ;;  %v11446_v53 = vld [vmem:[#allocation60_spill] sm:$0xff] }
 0x540   :  { %v3926_v49 = vmax.f32 %v3403_v54, 0.0  ;;  %v5426_v18 = vand.u32 2147483647, %v11446_v53 }
 0x541   :  { %v5674_v6 = vadd.f32 %v5673_v20, %v5419_v38  ;;  %v11447_v38 = vld [vmem:[#allocation61_spill] sm:$0xff] }
 0x542   :  { %v2764_v23 = vpop.f32.mrf.mxu1  ;;  %v11172_v56 = vsub.f32 %v3926_v49, %v3670_v22  ;;  %v5427_v20 = vand.u32 2147483647, %v11447_v38 }
 0x543   :  { %v5675_v8 = vadd.f32 %v5674_v6, %v5420_v41  ;;  %v2765_v59 = vadd.f32 %v11144_v27, %v2764_v23  ;;  %v11448_v41 = vld [vmem:[#allocation62_spill] sm:$0xff] }
 0x544   :  { %v5428_v6 = vand.u32 2147483647, %v11448_v41 }
 0x545   :  { %v5676_v32 = vadd.f32 %v5675_v8, %v5421_v47  ;;  %v3404_v29 = vpop.f32.mrf.mxu3  ;;  %v3671_v5 = vmax.f32 %v2765_v59, 0.0  ;;  %v11449_v47 = vld [vmem:[#allocation63_spill] sm:$0xff] }
 0x546   :  { %v3405_v33 = vadd.f32 %v11144_v27, %v3404_v29  ;;  %v5429_v8 = vand.u32 2147483647, %v11449_v47 }
 0x547   :  { %v5677_v28 = vadd.f32 %v5676_v32, %v5422_v13  ;;  %v7701_v16 = vpack.c.bf16 %v3671_v5, %v3670_v22  ;;  %v11450_v13 = vld [vmem:[#allocation64_spill] sm:$0xff] }
 0x548   :  { %v3927_v4 = vmax.f32 %v3405_v33, 0.0  ;;  %v5430_v23 = vand.u32 2147483647, %v11450_v13 }
 0x549   :  { %v5678_v55 = vadd.f32 %v5677_v28, %v5423_v19  ;;  %8481 = vst [vmem:[%s11302_s3 + $0x3e0] sm:$0xff] %v7701_v16   ;;  %v11451_v19 = vld [vmem:[#allocation65_spill] sm:$0xff] }
 0x54a   :  { %v8341_v30 = vpack.c.bf16 %v3927_v4, %v3926_v49  ;;  %v11174_v57 = vsub.f32 %v3927_v4, %v3671_v5  ;;  %v2767_v26 = vpop.f32.mrf.mxu1  ;;  %v5431_v33 = vand.u32 2147483647, %v11451_v19 }
 0x54b   :  { %v5679_v48 = vadd.f32 %v5678_v55, %v5424_v36  ;;  %v11189_v54 = vadd.f32 %v11144_v27, %v2767_v26  ;;  %v11452_v36 = vld [vmem:[#allocation66_spill] sm:$0xff] }
 0x54c   :  { %8609 = vst [vmem:[%s11302_s3 + $0x7e0] sm:$0xff] %v8341_v30   ;;  %v5432_v55 = vand.u32 2147483647, %v11452_v36 }
 0x54d   :  { %v5680_v58 = vadd.f32 %v5679_v48, %v5425_v0  ;;  %v3407_v46 = vpop.f32.mrf.mxu3  ;;  %v3672_v49 = vmax.f32 %v11189_v54, 0.0  ;;  %v11453_v48 = vld [vmem:[#allocation67_spill] sm:$0xff] }
 0x54e   :  { %v11192_v59 = vadd.f32 %v11144_v27, %v3407_v46  ;;  %v5433_v26 = vand.u32 2147483647, %v11453_v48 }
 0x54f   :  { %v5681_v62 = vadd.f32 %v5680_v58, %v5426_v18  ;;  %v11454_v58 = vld [vmem:[#allocation68_spill] sm:$0xff] }
 0x550   :  { %v3928_v5 = vmax.f32 %v11192_v59, 0.0  ;;  %v5434_v46 = vand.u32 2147483647, %v11454_v58  ;;  %v5442_v58 = vand.u32 2147483647, %v10920_v25 }
 0x551   :  { %v5682_v39 = vadd.f32 %v5681_v62, %v5427_v20  ;;  %v11455_v62 = vld [vmem:[#allocation69_spill] sm:$0xff] }
 0x552   :  { %v2769_v32 = vpop.f32.mrf.mxu1  ;;  %v5435_v41 = vand.u32 2147483647, %v11455_v62 }
 0x553   :  { %v5683_v24 = vadd.f32 %v5682_v39, %v5428_v6  ;;  %v2770_v29 = vadd.f32 %v11144_v27, %v2769_v32  ;;  %v11456_v39 = vld [vmem:[#allocation70_spill] sm:$0xff]  ;;  %v5438_v32 = vand.u32 2147483647, %v10842_v61 }
 0x554   :  { %v5436_v47 = vand.u32 2147483647, %v11456_v39  ;;  %v5446_v39 = vand.u32 2147483647, %v10976_v3  ;;  %v5448_v3 = vand.u32 2147483647, %v11004_v40 }
 0x555   :  { %v5684_v2 = vadd.f32 %v5683_v24, %v5429_v8  ;;  %v3409_v37 = vpop.f32.mrf.mxu3  ;;  %v3673_v4 = vmax.f32 %v2770_v29, 0.0  ;;  %v11457_v24 = vld [vmem:[#allocation71_spill] sm:$0xff] }
 0x556   :  { %v3410_v28 = vadd.f32 %v11144_v27, %v3409_v37  ;;  %v5437_v13 = vand.u32 2147483647, %v11457_v24 }
 0x557   :  { %v5685_v22 = vadd.f32 %v5684_v2, %v5430_v23  ;;  %v7706_v30 = vpack.c.bf16 %v3673_v4, %v3672_v49 }
 0x558   :  { %v3929_v9 = vmax.f32 %v3410_v28, 0.0 }
 0x559   :  { %v5686_v16 = vadd.f32 %v5685_v22, %v5431_v33  ;;  %8482 = vst [vmem:[%s11302_s3 + $0x3e8] sm:$0xff] %v7706_v30   ;;  %v5439_v22 = vand.u32 2147483647, %v10848_v50 }
 0x55a   :  { %v8346_v10 = vpack.c.bf16 %v3929_v9, %v3928_v5  ;;  %v11204_v0 = vsub.f32 %v3929_v9, %v3673_v4  ;;  %v2772_v18 = vpop.f32.mrf.mxu1 }
 0x55b   :  { %v5687_v53 = vadd.f32 %v5686_v16, %v5432_v55  ;;  %v11219_v37 = vadd.f32 %v11144_v27, %v2772_v18 }
 0x55c   :  { %8610 = vst [vmem:[%s11302_s3 + $0x7e8] sm:$0xff] %v8346_v10   ;;  %v5440_v10 = vand.u32 2147483647, %v10890_v21 }
 0x55d   :  { %v5688_v38 = vadd.f32 %v5687_v53, %v5433_v26  ;;  %v3412_v20 = vpop.f32.mrf.mxu3  ;;  %v3674_v61 = vmax.f32 %v11219_v37, 0.0  ;;  %v5441_v53 = vand.u32 2147483647, %v10892_v45 }
 0x55e   :  { %v11222_v19 = vadd.f32 %v11144_v27, %v3412_v20  ;;  %v5443_v20 = vand.u32 2147483647, %v10922_v63 }
 0x55f   :  { %v5689_v6 = vadd.f32 %v5688_v38, %v5434_v46 }
 0x560   :  { %v3930_v36 = vmax.f32 %v11222_v19, 0.0 }
 0x561   :  { %v5690_v8 = vadd.f32 %v5689_v6, %v5435_v41  ;;  %v5444_v41 = vand.u32 2147483647, %v10948_v17  ;;  %v5445_v6 = vand.u32 2147483647, %v10950_v44 }
 0x562   :  { %v2774_v2 = vpop.f32.mrf.mxu1 }
 0x563   :  { %v5691_v23 = vadd.f32 %v5690_v8, %v5436_v47  ;;  %v11225_v33 = vadd.f32 %v11144_v27, %v2774_v2 }
 0x565   :  { %v5692_v29 = vadd.f32 %v5691_v23, %v5437_v13  ;;  %v3414_v28 = vpop.f32.mrf.mxu3  ;;  %v3675_v55 = vmax.f32 %v11225_v33, 0.0 }
 0x566   :  { %v11229_v4 = vadd.f32 %v11144_v27, %v3414_v28 }
 0x567   :  { %v5693_v9 = vadd.f32 %v5692_v29, %v5438_v32  ;;  %v7711_v50 = vpack.c.bf16 %v3675_v55, %v3674_v61  ;;  %v5447_v32 = vand.u32 2147483647, %v10978_v51 }
 0x568   :  { %v3931_v16 = vmax.f32 %v11229_v4, 0.0 }
 0x569   :  { %v5694_v30 = vadd.f32 %v5693_v9, %v5439_v22  ;;  %8483 = vst [vmem:[%s11302_s3 + $0x3f0] sm:$0xff] %v7711_v50   ;;  %v5449_v50 = vand.u32 2147483647, %v11006_v34  ;;  %v5453_v34 = vand.u32 2147483647, %v11059_v60 }
 0x56a   :  { %v8351_v48 = vpack.c.bf16 %v3931_v16, %v3930_v36  ;;  %v2777_v21 = vpop.f32.mrf.mxu1  ;;  %v5460_v60 = vand.u32 2147483647, %v11150_v31 }
 0x56b   :  { %v5695_v26 = vadd.f32 %v5694_v30, %v5440_v10  ;;  %v2778_v24 = vadd.f32 %v11144_v27, %v2777_v21 }
 0x56c   :  { %8611 = vst [vmem:[%s11302_s3 + $0x7f0] sm:$0xff] %v8351_v48  }
 0x56d   :  { %v5696_v18 = vadd.f32 %v5695_v26, %v5441_v53  ;;  %v3417_v46 = vpop.f32.mrf.mxu3  ;;  %v3676_v17 = vmax.f32 %v2778_v24, 0.0  ;;  %v5451_v26 = vand.u32 2147483647, %v11034_v35  ;;  %v5452_v53 = vand.u32 2147483647, %v11057_v43 }
 0x56e   :  { %v3418_v13 = vadd.f32 %v11144_v27, %v3417_v46  ;;  %v5458_v35 = vand.u32 2147483647, %v11123_v12  ;;  %v5459_v43 = vand.u32 2147483647, %v11125_v42  ;;  %v5463_v12 = vand.u32 2147483647, %v11174_v57 }
 0x56f   :  { %v5697_v38 = vadd.f32 %v5696_v18, %v5442_v58  ;;  %v5454_v58 = vand.u32 2147483647, %v11079_v14  ;;  %v5461_v14 = vand.u32 2147483647, %v11152_v52  ;;  %v5210_v42 = vsub.f32 %v3930_v36, %v3674_v61 }
 0x570   :  { %v3932_v29 = vmax.f32 %v3418_v13, 0.0  ;;  %v5465_v52 = vand.u32 2147483647, %v11204_v0 }
 0x571   :  { %v5698_v62 = vadd.f32 %v5697_v38, %v5443_v20  ;;  %v5455_v38 = vand.u32 2147483647, %v11081_v1  ;;  %v5462_v1 = vand.u32 2147483647, %v11172_v56  ;;  %v5211_v56 = vsub.f32 %v3931_v16, %v3675_v55 }
 0x572   :  { %v2779_v47 = vpop.f32.mrf.mxu1  ;;  %v5466_v59 = vand.u32 2147483647, %v5210_v42 }
 0x573   :  { %v5699_v45 = vadd.f32 %v5698_v62, %v5444_v41  ;;  %v2780_v25 = vadd.f32 %v11144_v27, %v2779_v47  ;;  %v5456_v62 = vand.u32 2147483647, %v11101_v15  ;;  %v5208_v15 = vsub.f32 %v3928_v5, %v3672_v49 }
 0x574   :  { %v5212_v49 = vsub.f32 %v3932_v29, %v3676_v17  ;;  %v5467_v57 = vand.u32 2147483647, %v5211_v56 }
 0x575   :  { %v5700_v8 = vadd.f32 %v5699_v45, %v5445_v6  ;;  %v3419_v23 = vpop.f32.mrf.mxu3  ;;  %v3677_v28 = vmax.f32 %v2780_v25, 0.0  ;;  %v5464_v13 = vand.u32 2147483647, %v5208_v15 }
 0x576   :  { %v3420_v63 = vadd.f32 %v11144_v27, %v3419_v23  ;;  %v5450_v27 = vand.u32 2147483647, %v11032_v7  ;;  %v5457_v7 = vand.u32 2147483647, %v11103_v11  ;;  %v5468_v23 = vand.u32 2147483647, %v5212_v49 }
 0x577   :  { %v5701_v2 = vadd.f32 %v5700_v8, %v5446_v39  ;;  %v7716_v9 = vpack.c.bf16 %v3677_v28, %v3676_v17 }
 0x578   :  { %v3933_v44 = vmax.f32 %v3420_v63, 0.0 }
 0x579   :  { %v5702_v22 = vadd.f32 %v5701_v2, %v5447_v32  ;;  %8484 = vst [vmem:[%s11302_s3 + $0x3f8] sm:$0xff] %v7716_v9  }
 0x57a   :  { %v8356_v30 = vpack.c.bf16 %v3933_v44, %v3932_v29  ;;  %v5213_v25 = vsub.f32 %v3933_v44, %v3677_v28 }
 0x57b   :  { %v5703_v10 = vadd.f32 %v5702_v22, %v5448_v3 }
 0x57c   :  { %8612 = vst [vmem:[%s11302_s3 + $0x7f8] sm:$0xff] %v8356_v30   ;;  %v5469_v37 = vand.u32 2147483647, %v5213_v25  ;;  %s8673_s3 = smov [#allocation2]  }
 0x57d   :  { %v5704_v51 = vadd.f32 %v5703_v10, %v5449_v50  ;;  %s5745_s13 = sshll.u32 %s8673_s3, 4  ;;  %s5746_s13 = int_to_ptr.vmem [resolvable:$true] %s5745_s13 }
 0x57f   :  { %v5705_v48 = vadd.f32 %v5704_v51, %v5450_v27 }
 0x581   :  { %v5706_v40 = vadd.f32 %v5705_v48, %v5451_v26 }
 0x583   :  { %v5707_v21 = vadd.f32 %v5706_v40, %v5452_v53 }
 0x585   :  { %v5708_v18 = vadd.f32 %v5707_v21, %v5453_v34 }
 0x587   :  { %v5709_v46 = vadd.f32 %v5708_v18, %v5454_v58 }
 0x589   :  { %v5710_v20 = vadd.f32 %v5709_v46, %v5455_v38 }
 0x58b   :  { %v5711_v41 = vadd.f32 %v5710_v20, %v5456_v62 }
 0x58d   :  { %v5712_v45 = vadd.f32 %v5711_v41, %v5457_v7 }
 0x58f   :  { %v5713_v6 = vadd.f32 %v5712_v45, %v5458_v35 }
 0x591   :  { %v5714_v39 = vadd.f32 %v5713_v6, %v5459_v43 }
 0x593   :  { %v5715_v47 = vadd.f32 %v5714_v39, %v5460_v60 }
 0x595   :  { %v5716_v8 = vadd.f32 %v5715_v47, %v5461_v14 }
 0x597   :  { %v5717_v11 = vadd.f32 %v5716_v8, %v5462_v1 }
 0x599   :  { %v5718_v24 = vadd.f32 %v5717_v11, %v5463_v12 }
 0x59b   :  { %v5719_v31 = vadd.f32 %v5718_v24, %v5464_v13 }
 0x59d   :  { %v5720_v54 = vadd.f32 %v5719_v31, %v5465_v52 }
 0x59f   :  { %v5721_v5 = vadd.f32 %v5720_v54, %v5466_v59 }
 0x5a1   :  { %v5722_v32 = vadd.f32 %v5721_v5, %v5467_v57 }
 0x5a3   :  { %v5723_v63 = vadd.f32 %v5722_v32, %v5468_v23 }
 0x5a5   :  { %v5724_v19 = vadd.f32 %v5723_v63, %v5469_v37 }
 0x5a7   :  { %5725 = vadd.xlane.f32.xlu0 %v5724_v19 }
 0x61a   :  { %v5726_v61 = vpop.xlane.xlu0 %5725 }
 0x61b   :  { %v5727_v36 = vrot.slane %v5726_v61, 4 }
 0x61d   :  { %v5728_v0 = vadd.f32 %v5727_v36, %v5726_v61 }
 0x61f   :  { %v5729_v2 = vrot.slane %v5728_v0, 2 }
 0x621   :  { %v5730_v33 = vadd.f32 %v5729_v2, %v5728_v0 }
 0x623   :  { %v5731_v22 = vrot.slane %v5730_v33, 1 }
 0x625   :  { %v5732_v4 = vadd.f32 %v5731_v22, %v5730_v33 }
 0x627   :  { %8637 = vpush %v5732_v4 }
 0x658   :  { %s8638_s17 = spop %8637 }
 0x659   :  { %s5734_s18 = smul.f32 1.9073486e-05, %s8638_s17 }
 0x65b   :  { %v5735_v55 = vstv %s5734_s18 }
 0x65c   :  { %5737 = vst.msk [vmem:[#allocation2] sm:$0x1] %vm5736_vm0, %v5735_v55 }
 0x65d   :  { %5750 = dma.vmem_to_hbm [thread:$0]  %s5746_s13, 16, %s5748_s16, [#allocation3]  }
 0x65e   :  { %8671 = dma.done.wait [#allocation3], 16  }
 0x65f   :  { %8672 = vsyncadd [#allocation3], 4294967280 }
 0x660   :  { %5757 = vsyncpa [#allocation3], 1 }

// kernel: generator_loss.8
= control target key start
LH: loop header
LB: loop body
LE: loop exit
PB: predicated region body
PF: predicated region fallthrough
CT: control target
= control target key end

     0   :  { %s3110_s0 = inlined_call_operand.vmem [shape: bf16[1024,128], index: 0, kind: input, shape index: {}]   ;;  %s3111_s1 = inlined_call_operand.vmem [shape: bf16[128,128], index: 1, kind: input, shape index: {}]   ;;  %s3112_s2 = inlined_call_operand.vmem [shape: f32[1,128], index: 2, kind: input, shape index: {}]   ;;  %s3113_s3 = inlined_call_operand.vmem [shape: bf16[1024,128], index: 3, kind: output, shape index: {0}]   ;;  %s3114_s4 = inlined_call_operand.hbm [shape: f32[1,1], index: 4, kind: output, shape index: {1}]  }
   0x1   :  { %v1893_v0 = vld [vmem:[%s3111_s1 + $0x38] sm:$0xff]  ;;  %v1892_v1 = vld [vmem:[%s3111_s1 + $0x30] sm:$0xff] }
   0x2   :  { %597 = vmatpush.bf16.msra.mxu0 %v1893_v0  ;;  %2278 = vmatpush.bf16.msra.mxu2 %v1893_v0 }
   0x3   :  { %2279 = vmatpush.bf16.msra.mxu3 %v1893_v0  ;;  %2277 = vmatpush.bf16.msra.mxu1 %v1893_v0 }
   0x4   :  { %10 = vsyncpa [#allocation3], 0  ;;  %v1891_v2 = vld [vmem:[%s3111_s1 + $0x28] sm:$0xff]  ;;  %v1890_v3 = vld [vmem:[%s3111_s1 + $0x20] sm:$0xff]  ;;  %s1523_s19 = sshll.u32 %s3114_s4, 4  ;;  %vm1512_vm0 = vcmask 0   ;;  %s1524_s19 = int_to_ptr.hbm [resolvable:$true] %s1523_s19 }
   0x5   :  { %v1889_v4 = vld [vmem:[%s3111_s1 + $0x18] sm:$0xff]  ;;  %v1888_v5 = vld [vmem:[%s3111_s1 + $0x10] sm:$0xff]  ;;  %v1887_v6 = vld [vmem:[%s3111_s1 + $0x8] sm:$0xff] }
   0x6   :  { %598 = vmatpush.bf16.msra.mxu0 %v1892_v1  ;;  %2281 = vmatpush.bf16.msra.mxu2 %v1892_v1  ;;  %v1886_v7 = vld [vmem:[%s3111_s1] sm:$0xff]  ;;  %v1823_v10 = vld [vmem:[%s3110_s0 + $0x8] sm:$0xff]  ;;  %v1824_v14 = vld [vmem:[%s3110_s0 + $0x10] sm:$0xff] }
   0x7   :  { %2282 = vmatpush.bf16.msra.mxu3 %v1892_v1  ;;  %2280 = vmatpush.bf16.msra.mxu1 %v1892_v1  ;;  %v1822_v8 = vld [vmem:[%s3110_s0] sm:$0xff]  ;;  %v1855_v11 = vld [vmem:[%s3110_s0 + $0x108] sm:$0xff]  ;;  %v1856_v15 = vld [vmem:[%s3110_s0 + $0x110] sm:$0xff] }
   0x8   :  { %v1854_v9 = vld [vmem:[%s3110_s0 + $0x100] sm:$0xff]  ;;  %v1871_v16 = vld [vmem:[%s3110_s0 + $0x188] sm:$0xff]  ;;  %v1825_v18 = vld [vmem:[%s3110_s0 + $0x18] sm:$0xff] }
   0x9   :  { %v1870_v12 = vld [vmem:[%s3110_s0 + $0x180] sm:$0xff]  ;;  %v1839_v17 = vld [vmem:[%s3110_s0 + $0x88] sm:$0xff]  ;;  %v1857_v19 = vld [vmem:[%s3110_s0 + $0x118] sm:$0xff] }
   0xa   :  { %599 = vmatpush.bf16.msra.mxu0 %v1891_v2  ;;  %2284 = vmatpush.bf16.msra.mxu2 %v1891_v2  ;;  %v1838_v13 = vld [vmem:[%s3110_s0 + $0x80] sm:$0xff]  ;;  %v1872_v20 = vld [vmem:[%s3110_s0 + $0x190] sm:$0xff]  ;;  %v1873_v24 = vld [vmem:[%s3110_s0 + $0x198] sm:$0xff] }
   0xb   :  { %2285 = vmatpush.bf16.msra.mxu3 %v1891_v2  ;;  %2283 = vmatpush.bf16.msra.mxu1 %v1891_v2  ;;  %v1840_v21 = vld [vmem:[%s3110_s0 + $0x90] sm:$0xff]  ;;  %v1826_v22 = vld [vmem:[%s3110_s0 + $0x20] sm:$0xff]  ;;  %v1841_v25 = vld [vmem:[%s3110_s0 + $0x98] sm:$0xff] }
   0xc   :  { %v1858_v23 = vld [vmem:[%s3110_s0 + $0x120] sm:$0xff]  ;;  %v1827_v26 = vld [vmem:[%s3110_s0 + $0x28] sm:$0xff]  ;;  %v1828_v29 = vld [vmem:[%s3110_s0 + $0x30] sm:$0xff] }
   0xd   :  { %v1859_v27 = vld [vmem:[%s3110_s0 + $0x128] sm:$0xff]  ;;  %v1874_v28 = vld [vmem:[%s3110_s0 + $0x1a0] sm:$0xff]  ;;  %v1860_v30 = vld [vmem:[%s3110_s0 + $0x130] sm:$0xff] }
   0xe   :  { %600 = vmatpush.bf16.msra.mxu0 %v1890_v3  ;;  %2287 = vmatpush.bf16.msra.mxu2 %v1890_v3  ;;  %v1842_v31 = vld [vmem:[%s3110_s0 + $0xa0] sm:$0xff]  ;;  %v1875_v32 = vld [vmem:[%s3110_s0 + $0x1a8] sm:$0xff]  ;;  %v1829_v33 = vld [vmem:[%s3110_s0 + $0x38] sm:$0xff] }
   0xf   :  { %2288 = vmatpush.bf16.msra.mxu3 %v1890_v3  ;;  %2286 = vmatpush.bf16.msra.mxu1 %v1890_v3  ;;  %v1861_v34 = vld [vmem:[%s3110_s0 + $0x138] sm:$0xff]  ;;  %v1843_v35 = vld [vmem:[%s3110_s0 + $0xa8] sm:$0xff]  ;;  %v1876_v36 = vld [vmem:[%s3110_s0 + $0x1b0] sm:$0xff] }
  0x10   :  { %v2472_v37 = vld [vmem:[%s3112_s2] ss:$0 sm:$0xff]  ;;  %v1844_v40 = vld [vmem:[%s3110_s0 + $0xb0] sm:$0xff]  ;;  %v1877_v49 = vld [vmem:[%s3110_s0 + $0x1b8] sm:$0xff] }
  0x11   :  { %v1830_v38 = vld [vmem:[%s3110_s0 + $0x40] sm:$0xff]  ;;  %v1831_v55 = vld [vmem:[%s3110_s0 + $0x48] sm:$0xff]  ;;  %v1845_v57 = vld [vmem:[%s3110_s0 + $0xb8] sm:$0xff] }
  0x12   :  { %601 = vmatpush.bf16.msra.mxu0 %v1889_v4  ;;  %2290 = vmatpush.bf16.msra.mxu2 %v1889_v4  ;;  %v1862_v39 = vld [vmem:[%s3110_s0 + $0x140] sm:$0xff]  ;;  %v1863_v56 = vld [vmem:[%s3110_s0 + $0x148] sm:$0xff] }
  0x13   :  { %2291 = vmatpush.bf16.msra.mxu3 %v1889_v4  ;;  %2289 = vmatpush.bf16.msra.mxu1 %v1889_v4 }
  0x16   :  { %602 = vmatpush.bf16.msra.mxu0 %v1888_v5  ;;  %2293 = vmatpush.bf16.msra.mxu2 %v1888_v5 }
  0x17   :  { %2294 = vmatpush.bf16.msra.mxu3 %v1888_v5  ;;  %2292 = vmatpush.bf16.msra.mxu1 %v1888_v5 }
  0x1a   :  { %603 = vmatpush.bf16.msra.mxu0 %v1887_v6  ;;  %2296 = vmatpush.bf16.msra.mxu2 %v1887_v6 }
  0x1b   :  { %2297 = vmatpush.bf16.msra.mxu3 %v1887_v6  ;;  %2295 = vmatpush.bf16.msra.mxu1 %v1887_v6 }
  0x1e   :  { %604 = vmatpush.bf16.msra.mxu0 %v1886_v7  ;;  %2299 = vmatpush.bf16.msra.mxu2 %v1886_v7 }
  0x1f   :  { %2300 = vmatpush.bf16.msra.mxu3 %v1886_v7  ;;  %2298 = vmatpush.bf16.msra.mxu1 %v1886_v7 }
  0x21   :  { %605 = vmatmul.bf16.vlgmr.msra.gmra.mxu0 %v1822_v8  ;;  %765 = vmatmul.bf16.vlgmr.msra.gmra.mxu2 %v1854_v9  ;;  %v1878_v8 = vld [vmem:[%s3110_s0 + $0x1c0] sm:$0xff] }
  0x22   :  { %845 = vmatmul.bf16.vlgmr.msra.gmra.mxu3 %v1870_v12  ;;  %685 = vmatmul.bf16.vlgmr.msra.gmra.mxu1 %v1838_v13 }
  0x31   :  { %610 = vmatmul.bf16.gmra.mxu0 %v1823_v10  ;;  %770 = vmatmul.bf16.gmra.mxu2 %v1855_v11 }
  0x32   :  { %850 = vmatmul.bf16.gmra.mxu3 %v1871_v16  ;;  %690 = vmatmul.bf16.gmra.mxu1 %v1839_v17  ;;  %v1832_v17 = vld [vmem:[%s3110_s0 + $0x50] sm:$0xff] }
  0x41   :  { %615 = vmatmul.bf16.gmra.mxu0 %v1824_v14  ;;  %775 = vmatmul.bf16.gmra.mxu2 %v1856_v15 }
  0x42   :  { %855 = vmatmul.bf16.gmra.mxu3 %v1872_v20  ;;  %695 = vmatmul.bf16.gmra.mxu1 %v1840_v21  ;;  %v1846_v20 = vld [vmem:[%s3110_s0 + $0xc0] sm:$0xff] }
  0x51   :  { %620 = vmatmul.bf16.gmra.mxu0 %v1825_v18  ;;  %780 = vmatmul.bf16.gmra.mxu2 %v1857_v19  ;;  %v1864_v18 = vld [vmem:[%s3110_s0 + $0x150] sm:$0xff] }
  0x52   :  { %860 = vmatmul.bf16.gmra.mxu3 %v1873_v24  ;;  %700 = vmatmul.bf16.gmra.mxu1 %v1841_v25 }
  0x61   :  { %625 = vmatmul.bf16.gmra.mxu0 %v1826_v22  ;;  %785 = vmatmul.bf16.gmra.mxu2 %v1858_v23 }
  0x62   :  { %865 = vmatmul.bf16.gmra.mxu3 %v1874_v28  ;;  %705 = vmatmul.bf16.gmra.mxu1 %v1842_v31 }
  0x71   :  { %630 = vmatmul.bf16.gmra.mxu0 %v1827_v26  ;;  %790 = vmatmul.bf16.gmra.mxu2 %v1859_v27 }
  0x72   :  { %870 = vmatmul.bf16.gmra.mxu3 %v1875_v32  ;;  %710 = vmatmul.bf16.gmra.mxu1 %v1843_v35 }
  0x81   :  { %635 = vmatmul.bf16.gmra.mxu0 %v1828_v29  ;;  %795 = vmatmul.bf16.gmra.mxu2 %v1860_v30 }
  0x82   :  { %875 = vmatmul.bf16.gmra.mxu3 %v1876_v36  ;;  %715 = vmatmul.bf16.gmra.mxu1 %v1844_v40 }
  0x91   :  { %640 = vmatmul.bf16.gmra.mxu0 %v1829_v33  ;;  %800 = vmatmul.bf16.gmra.mxu2 %v1861_v34 }
  0x92   :  { %880 = vmatmul.bf16.gmra.mxu3 %v1877_v49  ;;  %720 = vmatmul.bf16.gmra.mxu1 %v1845_v57 }
  0x9e   :  { %v606_v41 = vpop.f32.mrf.mxu0 }
  0x9f   :  { %v607_v42 = vadd.f32 %v2472_v37, %v606_v41  ;;  %v686_v14 = vpop.f32.mrf.mxu1 }
  0xa0   :  { %v687_v24 = vadd.f32 %v2472_v37, %v686_v14 }
  0xa1   :  { %645 = vmatmul.bf16.gmra.mxu0 %v1830_v38  ;;  %805 = vmatmul.bf16.gmra.mxu2 %v1862_v39  ;;  %v926_v44 = vmax.f32 %v607_v42, 0.0 }
  0xa2   :  { %885 = vmatmul.bf16.gmra.mxu3 %v1878_v8  ;;  %725 = vmatmul.bf16.gmra.mxu1 %v1846_v20  ;;  %v958_v30 = vmax.f32 %v687_v24, 0.0  ;;  %v1880_v20 = vld [vmem:[%s3110_s0 + $0x1d0] sm:$0xff] }
  0xa4   :  { %v766_v43 = vpop.f32.mrf.mxu2 }
  0xa5   :  { %v767_v45 = vadd.f32 %v2472_v37, %v766_v43  ;;  %v846_v19 = vpop.f32.mrf.mxu3 }
  0xa6   :  { %v608_v46 = vpop.f32.mrf.mxu0  ;;  %v847_v34 = vadd.f32 %v2472_v37, %v846_v19 }
  0xa7   :  { %v990_v47 = vmax.f32 %v767_v45, 0.0  ;;  %v609_v48 = vadd.f32 %v2472_v37, %v608_v46  ;;  %v688_v31 = vpop.f32.mrf.mxu1 }
  0xa8   :  { %v689_v35 = vadd.f32 %v2472_v37, %v688_v31  ;;  %v1022_v42 = vmax.f32 %v847_v34, 0.0  ;;  %v1834_v34 = vld [vmem:[%s3110_s0 + $0x60] sm:$0xff] }
  0xa9   :  { %v1310_v50 = vsub.f32 %v990_v47, %v926_v44  ;;  %v927_v51 = vmax.f32 %v609_v48, 0.0 }
  0xaa   :  { %v959_v43 = vmax.f32 %v689_v35, 0.0  ;;  %v2537_v48 = vsub.f32 %v1022_v42, %v958_v30  ;;  %v1866_v35 = vld [vmem:[%s3110_s0 + $0x160] sm:$0xff] }
  0xab   :  { %v1897_v52 = vpack.c.bf16 %v927_v51, %v926_v44  ;;  %v1374_v63 = vand.u32 2147483647, %v1310_v50  ;;  %v1879_v44 = vld [vmem:[%s3110_s0 + $0x1c8] sm:$0xff] }
  0xac   :  { %v768_v53 = vpop.f32.mrf.mxu2  ;;  %v1977_v49 = vpack.c.bf16 %v959_v43, %v958_v30 }
  0xad   :  { %1898 = vst [vmem:[%s3113_s3] sm:$0xff] %v1897_v52   ;;  %v769_v54 = vadd.f32 %v2472_v37, %v768_v53  ;;  %v848_v36 = vpop.f32.mrf.mxu3 }
  0xae   :  { %v611_v58 = vpop.f32.mrf.mxu0  ;;  %v849_v39 = vadd.f32 %v2472_v37, %v848_v36  ;;  %2229 = vst [vmem:[%s3113_s3 + $0x80] sm:$0xff] %v1977_v49  }
  0xaf   :  { %v991_v59 = vmax.f32 %v769_v54, 0.0  ;;  %v612_v62 = vadd.f32 %v2472_v37, %v611_v58  ;;  %v1833_v58 = vld [vmem:[%s3110_s0 + $0x58] sm:$0xff] }
  0xb0   :  { %v1023_v45 = vmax.f32 %v849_v39, 0.0 }
  0xb1   :  { %v2057_v60 = vpack.c.bf16 %v991_v59, %v990_v47  ;;  %v1311_v61 = vsub.f32 %v991_v59, %v927_v51  ;;  %650 = vmatmul.bf16.gmra.mxu0 %v1831_v55  ;;  %810 = vmatmul.bf16.gmra.mxu2 %v1863_v56  ;;  %v928_v3 = vmax.f32 %v612_v62, 0.0  ;;  %v691_v55 = vpop.f32.mrf.mxu1  ;;  %v1865_v59 = vld [vmem:[%s3110_s0 + $0x158] sm:$0xff] }
  0xb2   :  { %890 = vmatmul.bf16.gmra.mxu3 %v1879_v44  ;;  %v2137_v50 = vpack.c.bf16 %v1023_v45, %v1022_v42  ;;  %v2539_v51 = vsub.f32 %v1023_v45, %v959_v43 }
  0xb3   :  { %2245 = vst [vmem:[%s3113_s3 + $0x100] sm:$0xff] %v2057_v60   ;;  %v1375_v0 = vand.u32 2147483647, %v1311_v61  ;;  %v1847_v61 = vld [vmem:[%s3110_s0 + $0xc8] sm:$0xff] }
  0xb4   :  { %v771_v1 = vpop.f32.mrf.mxu2  ;;  %2261 = vst [vmem:[%s3113_s3 + $0x180] sm:$0xff] %v2137_v50   ;;  %730 = vmatmul.bf16.gmra.mxu1 %v1847_v61 }
  0xb5   :  { %v1438_v2 = vadd.f32 %v1375_v0, %v1374_v63  ;;  %v772_v4 = vadd.f32 %v2472_v37, %v771_v1  ;;  %v851_v60 = vpop.f32.mrf.mxu3  ;;  %v692_v1 = vadd.f32 %v2472_v37, %v691_v55 }
  0xb6   :  { %v613_v5 = vpop.f32.mrf.mxu0 }
  0xb7   :  { %v992_v6 = vmax.f32 %v772_v4, 0.0  ;;  %v614_v7 = vadd.f32 %v2472_v37, %v613_v5 }
  0xb9   :  { %v1312_v9 = vsub.f32 %v992_v6, %v928_v3  ;;  %v929_v10 = vmax.f32 %v614_v7, 0.0  ;;  %v960_v7 = vmax.f32 %v692_v1, 0.0  ;;  %v693_v8 = vpop.f32.mrf.mxu1 }
  0xbb   :  { %v1376_v11 = vand.u32 2147483647, %v1312_v9  ;;  %v1902_v12 = vpack.c.bf16 %v929_v10, %v928_v3 }
  0xbc   :  { %v773_v13 = vpop.f32.mrf.mxu2 }
  0xbd   :  { %v1439_v15 = vadd.f32 %v1438_v2, %v1376_v11  ;;  %2214 = vst [vmem:[%s3113_s3 + $0x8] sm:$0xff] %v1902_v12   ;;  %v774_v16 = vadd.f32 %v2472_v37, %v773_v13  ;;  %v852_v11 = vadd.f32 %v2472_v37, %v851_v60  ;;  %v694_v12 = vadd.f32 %v2472_v37, %v693_v8  ;;  %v853_v13 = vpop.f32.mrf.mxu3 }
  0xbe   :  { %v616_v21 = vpop.f32.mrf.mxu0 }
  0xbf   :  { %v993_v22 = vmax.f32 %v774_v16, 0.0  ;;  %v617_v23 = vadd.f32 %v2472_v37, %v616_v21  ;;  %v961_v19 = vmax.f32 %v694_v12, 0.0 }
  0xc1   :  { %v2062_v25 = vpack.c.bf16 %v993_v22, %v992_v6  ;;  %v1313_v26 = vsub.f32 %v993_v22, %v929_v10  ;;  %655 = vmatmul.bf16.gmra.mxu0 %v1832_v17  ;;  %815 = vmatmul.bf16.gmra.mxu2 %v1864_v18  ;;  %v930_v28 = vmax.f32 %v617_v23, 0.0  ;;  %v1024_v18 = vmax.f32 %v852_v11, 0.0  ;;  %v696_v31 = vpop.f32.mrf.mxu1 }
  0xc2   :  { %895 = vmatmul.bf16.gmra.mxu3 %v1880_v20  ;;  %v697_v42 = vadd.f32 %v2472_v37, %v696_v31 }
  0xc3   :  { %2246 = vst [vmem:[%s3113_s3 + $0x108] sm:$0xff] %v2062_v25   ;;  %v1377_v27 = vand.u32 2147483647, %v1313_v26  ;;  %v2573_v24 = vsub.f32 %v1024_v18, %v960_v7  ;;  %v1982_v25 = vpack.c.bf16 %v961_v19, %v960_v7 }
  0xc4   :  { %v776_v29 = vpop.f32.mrf.mxu2  ;;  %v962_v49 = vmax.f32 %v697_v42, 0.0  ;;  %v1882_v42 = vld [vmem:[%s3110_s0 + $0x1e0] sm:$0xff] }
  0xc5   :  { %v1440_v32 = vadd.f32 %v1439_v15, %v1377_v27  ;;  %v777_v33 = vadd.f32 %v2472_v37, %v776_v29  ;;  %v854_v15 = vadd.f32 %v2472_v37, %v853_v13  ;;  %2230 = vst [vmem:[%s3113_s3 + $0x88] sm:$0xff] %v1982_v25   ;;  %v856_v36 = vpop.f32.mrf.mxu3  ;;  %v1835_v13 = vld [vmem:[%s3110_s0 + $0x68] sm:$0xff] }
  0xc6   :  { %v618_v38 = vpop.f32.mrf.mxu0 }
  0xc7   :  { %v994_v40 = vmax.f32 %v777_v33, 0.0  ;;  %v619_v41 = vadd.f32 %v2472_v37, %v618_v38  ;;  %v1025_v21 = vmax.f32 %v854_v15, 0.0  ;;  %v1848_v38 = vld [vmem:[%s3110_s0 + $0xd0] sm:$0xff] }
  0xc8   :  { %735 = vmatmul.bf16.gmra.mxu1 %v1848_v38 }
  0xc9   :  { %v1314_v46 = vsub.f32 %v994_v40, %v930_v28  ;;  %v931_v47 = vmax.f32 %v619_v41, 0.0  ;;  %v2142_v26 = vpack.c.bf16 %v1025_v21, %v1024_v18  ;;  %v2575_v27 = vsub.f32 %v1025_v21, %v961_v19  ;;  %v698_v50 = vpop.f32.mrf.mxu1 }
  0xca   :  { %v699_v55 = vadd.f32 %v2472_v37, %v698_v50 }
  0xcb   :  { %v1378_v52 = vand.u32 2147483647, %v1314_v46  ;;  %v1907_v53 = vpack.c.bf16 %v931_v47, %v930_v28  ;;  %2262 = vst [vmem:[%s3113_s3 + $0x188] sm:$0xff] %v2142_v26  }
  0xcc   :  { %v778_v54 = vpop.f32.mrf.mxu2 }
  0xcd   :  { %v1441_v56 = vadd.f32 %v1440_v32, %v1378_v52  ;;  %2215 = vst [vmem:[%s3113_s3 + $0x10] sm:$0xff] %v1907_v53   ;;  %v779_v57 = vadd.f32 %v2472_v37, %v778_v54  ;;  %v857_v54 = vadd.f32 %v2472_v37, %v856_v36 }
  0xce   :  { %v621_v62 = vpop.f32.mrf.mxu0 }
  0xcf   :  { %v995_v63 = vmax.f32 %v779_v57, 0.0  ;;  %v622_v0 = vadd.f32 %v2472_v37, %v621_v62  ;;  %v1026_v61 = vmax.f32 %v857_v54, 0.0  ;;  %v963_v62 = vmax.f32 %v699_v55, 0.0 }
  0xd1   :  { %v2067_v2 = vpack.c.bf16 %v995_v63, %v994_v40  ;;  %v1315_v3 = vsub.f32 %v995_v63, %v931_v47  ;;  %660 = vmatmul.bf16.gmra.mxu0 %v1833_v58  ;;  %820 = vmatmul.bf16.gmra.mxu2 %v1865_v59  ;;  %v932_v5 = vmax.f32 %v622_v0, 0.0  ;;  %v1881_v63 = vld [vmem:[%s3110_s0 + $0x1d8] sm:$0xff] }
  0xd2   :  { %900 = vmatmul.bf16.gmra.mxu3 %v1881_v63 }
  0xd3   :  { %2247 = vst [vmem:[%s3113_s3 + $0x110] sm:$0xff] %v2067_v2   ;;  %v1379_v4 = vand.u32 2147483647, %v1315_v3  ;;  %v2609_v3 = vsub.f32 %v1026_v61, %v962_v49 }
  0xd4   :  { %v781_v6 = vpop.f32.mrf.mxu2 }
  0xd5   :  { %v1442_v9 = vadd.f32 %v1441_v56, %v1379_v4  ;;  %v782_v10 = vadd.f32 %v2472_v37, %v781_v6  ;;  %v858_v56 = vpop.f32.mrf.mxu3  ;;  %v1987_v4 = vpack.c.bf16 %v963_v62, %v962_v49 }
  0xd6   :  { %v623_v14 = vpop.f32.mrf.mxu0  ;;  %v859_v58 = vadd.f32 %v2472_v37, %v858_v56 }
  0xd7   :  { %v996_v16 = vmax.f32 %v782_v10, 0.0  ;;  %v624_v17 = vadd.f32 %v2472_v37, %v623_v14  ;;  %2231 = vst [vmem:[%s3113_s3 + $0x90] sm:$0xff] %v1987_v4   ;;  %v701_v10 = vpop.f32.mrf.mxu1  ;;  %v1867_v14 = vld [vmem:[%s3110_s0 + $0x168] sm:$0xff] }
  0xd8   :  { %v1027_v0 = vmax.f32 %v859_v58, 0.0  ;;  %v702_v20 = vadd.f32 %v2472_v37, %v701_v10  ;;  %v1836_v58 = vld [vmem:[%s3110_s0 + $0x70] sm:$0xff] }
  0xd9   :  { %v1316_v22 = vsub.f32 %v996_v16, %v932_v5  ;;  %v933_v23 = vmax.f32 %v624_v17, 0.0 }
  0xda   :  { %v2611_v6 = vsub.f32 %v1027_v0, %v963_v62 }
  0xdb   :  { %v1380_v28 = vand.u32 2147483647, %v1316_v22  ;;  %v1912_v29 = vpack.c.bf16 %v933_v23, %v932_v5  ;;  %v2147_v5 = vpack.c.bf16 %v1027_v0, %v1026_v61  ;;  %v1850_v61 = vld [vmem:[%s3110_s0 + $0xe0] sm:$0xff] }
  0xdc   :  { %v783_v30 = vpop.f32.mrf.mxu2 }
  0xdd   :  { %v1443_v32 = vadd.f32 %v1442_v9, %v1380_v28  ;;  %2216 = vst [vmem:[%s3113_s3 + $0x18] sm:$0xff] %v1912_v29   ;;  %v784_v33 = vadd.f32 %v2472_v37, %v783_v30  ;;  %v861_v15 = vpop.f32.mrf.mxu3  ;;  %v964_v28 = vmax.f32 %v702_v20, 0.0 }
  0xde   :  { %v626_v39 = vpop.f32.mrf.mxu0  ;;  %2263 = vst [vmem:[%s3113_s3 + $0x190] sm:$0xff] %v2147_v5  }
  0xdf   :  { %v997_v40 = vmax.f32 %v784_v33, 0.0  ;;  %v627_v41 = vadd.f32 %v2472_v37, %v626_v39  ;;  %v703_v29 = vpop.f32.mrf.mxu1 }
  0xe0   :  { %v704_v33 = vadd.f32 %v2472_v37, %v703_v29 }
  0xe1   :  { %v2072_v43 = vpack.c.bf16 %v997_v40, %v996_v16  ;;  %v1317_v44 = vsub.f32 %v997_v40, %v933_v23  ;;  %665 = vmatmul.bf16.gmra.mxu0 %v1834_v34  ;;  %825 = vmatmul.bf16.gmra.mxu2 %v1866_v35  ;;  %v934_v46 = vmax.f32 %v627_v41, 0.0  ;;  %v1849_v16 = vld [vmem:[%s3110_s0 + $0xd8] sm:$0xff] }
  0xe2   :  { %740 = vmatmul.bf16.gmra.mxu1 %v1849_v16  ;;  %v965_v41 = vmax.f32 %v704_v33, 0.0  ;;  %905 = vmatmul.bf16.gmra.mxu3 %v1882_v42  ;;  %v1851_v42 = vld [vmem:[%s3110_s0 + $0xe8] sm:$0xff] }
  0xe3   :  { %2248 = vst [vmem:[%s3113_s3 + $0x118] sm:$0xff] %v2072_v43   ;;  %v1381_v45 = vand.u32 2147483647, %v1317_v44 }
  0xe4   :  { %v786_v47 = vpop.f32.mrf.mxu2 }
  0xe5   :  { %v1444_v52 = vadd.f32 %v1443_v32, %v1381_v45  ;;  %v787_v53 = vadd.f32 %v2472_v37, %v786_v47  ;;  %v862_v32 = vadd.f32 %v2472_v37, %v861_v15  ;;  %v863_v34 = vpop.f32.mrf.mxu3  ;;  %v1992_v47 = vpack.c.bf16 %v965_v41, %v964_v28 }
  0xe6   :  { %v628_v57 = vpop.f32.mrf.mxu0  ;;  %v864_v36 = vadd.f32 %v2472_v37, %v863_v34 }
  0xe7   :  { %v998_v59 = vmax.f32 %v787_v53, 0.0  ;;  %v629_v60 = vadd.f32 %v2472_v37, %v628_v57  ;;  %v1028_v40 = vmax.f32 %v862_v32, 0.0  ;;  %2232 = vst [vmem:[%s3113_s3 + $0x98] sm:$0xff] %v1992_v47   ;;  %v706_v55 = vpop.f32.mrf.mxu1 }
  0xe8   :  { %v1029_v43 = vmax.f32 %v864_v36, 0.0 }
  0xe9   :  { %v1318_v1 = vsub.f32 %v998_v59, %v934_v46  ;;  %v935_v2 = vmax.f32 %v629_v60, 0.0 }
  0xea   :  { %v2152_v49 = vpack.c.bf16 %v1029_v43, %v1028_v40  ;;  %v2647_v50 = vsub.f32 %v1029_v43, %v965_v41 }
  0xeb   :  { %v1382_v7 = vand.u32 2147483647, %v1318_v1  ;;  %v1917_v8 = vpack.c.bf16 %v935_v2, %v934_v46  ;;  %v2645_v46 = vsub.f32 %v1028_v40, %v964_v28  ;;  %v707_v1 = vadd.f32 %v2472_v37, %v706_v55  ;;  %v1869_v40 = vld [vmem:[%s3110_s0 + $0x178] sm:$0xff] }
  0xec   :  { %v788_v9 = vpop.f32.mrf.mxu2  ;;  %2264 = vst [vmem:[%s3113_s3 + $0x198] sm:$0xff] %v2152_v49  }
  0xed   :  { %v1445_v11 = vadd.f32 %v1444_v52, %v1382_v7  ;;  %2217 = vst [vmem:[%s3113_s3 + $0x20] sm:$0xff] %v1917_v8   ;;  %v789_v12 = vadd.f32 %v2472_v37, %v788_v9  ;;  %v866_v60 = vpop.f32.mrf.mxu3  ;;  %v966_v9 = vmax.f32 %v707_v1, 0.0 }
  0xee   :  { %v631_v17 = vpop.f32.mrf.mxu0 }
  0xef   :  { %v999_v18 = vmax.f32 %v789_v12, 0.0  ;;  %v632_v19 = vadd.f32 %v2472_v37, %v631_v17  ;;  %v708_v10 = vpop.f32.mrf.mxu1 }
  0xf1   :  { %v2077_v21 = vpack.c.bf16 %v999_v18, %v998_v59  ;;  %v1319_v22 = vsub.f32 %v999_v18, %v935_v2  ;;  %670 = vmatmul.bf16.gmra.mxu0 %v1835_v13  ;;  %830 = vmatmul.bf16.gmra.mxu2 %v1867_v14  ;;  %v936_v25 = vmax.f32 %v632_v19, 0.0  ;;  %v1868_v59 = vld [vmem:[%s3110_s0 + $0x170] sm:$0xff]  ;;  %v867_v13 = vadd.f32 %v2472_v37, %v866_v60 }
  0xf2   :  { %745 = vmatmul.bf16.gmra.mxu1 %v1850_v61  ;;  %v709_v14 = vadd.f32 %v2472_v37, %v708_v10 }
  0xf3   :  { %2249 = vst [vmem:[%s3113_s3 + $0x120] sm:$0xff] %v2077_v21   ;;  %v1383_v23 = vand.u32 2147483647, %v1319_v22  ;;  %v1030_v20 = vmax.f32 %v867_v13, 0.0  ;;  %v1883_v22 = vld [vmem:[%s3110_s0 + $0x1e8] sm:$0xff] }
  0xf4   :  { %v791_v26 = vpop.f32.mrf.mxu2  ;;  %v967_v21 = vmax.f32 %v709_v14, 0.0  ;;  %910 = vmatmul.bf16.gmra.mxu3 %v1883_v22  ;;  %v1852_v22 = vld [vmem:[%s3110_s0 + $0xf0] sm:$0xff] }
  0xf5   :  { %v1446_v30 = vadd.f32 %v1445_v11, %v1383_v23  ;;  %v792_v31 = vadd.f32 %v2472_v37, %v791_v26  ;;  %v868_v15 = vpop.f32.mrf.mxu3  ;;  %v2681_v28 = vsub.f32 %v1030_v20, %v966_v9 }
  0xf6   :  { %v633_v35 = vpop.f32.mrf.mxu0  ;;  %v869_v17 = vadd.f32 %v2472_v37, %v868_v15  ;;  %v1997_v29 = vpack.c.bf16 %v967_v21, %v966_v9 }
  0xf7   :  { %v1000_v38 = vmax.f32 %v792_v31, 0.0  ;;  %v634_v39 = vadd.f32 %v2472_v37, %v633_v35  ;;  %v711_v35 = vpop.f32.mrf.mxu1 }
  0xf8   :  { %v1031_v23 = vmax.f32 %v869_v17, 0.0  ;;  %2233 = vst [vmem:[%s3113_s3 + $0xa0] sm:$0xff] %v1997_v29   ;;  %v712_v47 = vadd.f32 %v2472_v37, %v711_v35 }
  0xf9   :  { %v1320_v44 = vsub.f32 %v1000_v38, %v936_v25  ;;  %v937_v45 = vmax.f32 %v634_v39, 0.0  ;;  %v1837_v39 = vld [vmem:[%s3110_s0 + $0x78] sm:$0xff] }
  0xfa   :  { %v2683_v31 = vsub.f32 %v1031_v23, %v967_v21 }
  0xfb   :  { %v1384_v52 = vand.u32 2147483647, %v1320_v44  ;;  %v1922_v53 = vpack.c.bf16 %v937_v45, %v936_v25 }
  0xfc   :  { %v793_v54 = vpop.f32.mrf.mxu2 }
  0xfd   :  { %v1447_v56 = vadd.f32 %v1446_v30, %v1384_v52  ;;  %2218 = vst [vmem:[%s3113_s3 + $0x28] sm:$0xff] %v1922_v53   ;;  %v794_v57 = vadd.f32 %v2472_v37, %v793_v54  ;;  %v2157_v30 = vpack.c.bf16 %v1031_v23, %v1030_v20  ;;  %v871_v41 = vpop.f32.mrf.mxu3 }
  0xfe   :  { %v636_v62 = vpop.f32.mrf.mxu0  ;;  %v872_v60 = vadd.f32 %v2472_v37, %v871_v41 }
  0xff   :  { %v1001_v63 = vmax.f32 %v794_v57, 0.0  ;;  %v637_v0 = vadd.f32 %v2472_v37, %v636_v62  ;;  %2265 = vst [vmem:[%s3113_s3 + $0x1a0] sm:$0xff] %v2157_v30   ;;  %v713_v57 = vpop.f32.mrf.mxu1 }
 0x100   :  { %v714_v61 = vadd.f32 %v2472_v37, %v713_v57 }
 0x101   :  { %v2082_v2 = vpack.c.bf16 %v1001_v63, %v1000_v38  ;;  %v1321_v4 = vsub.f32 %v1001_v63, %v937_v45  ;;  %675 = vmatmul.bf16.gmra.mxu0 %v1836_v58  ;;  %835 = vmatmul.bf16.gmra.mxu2 %v1868_v59  ;;  %v938_v7 = vmax.f32 %v637_v0, 0.0 }
 0x102   :  { %750 = vmatmul.bf16.gmra.mxu1 %v1851_v42 }
 0x103   :  { %2250 = vst [vmem:[%s3113_s3 + $0x128] sm:$0xff] %v2082_v2   ;;  %v1385_v5 = vand.u32 2147483647, %v1321_v4  ;;  %v1032_v4 = vmax.f32 %v872_v60, 0.0 }
 0x104   :  { %v796_v8 = vpop.f32.mrf.mxu2 }
 0x105   :  { %v1448_v11 = vadd.f32 %v1447_v56, %v1385_v5  ;;  %v797_v12 = vadd.f32 %v2472_v37, %v796_v8  ;;  %v968_v56 = vmax.f32 %v712_v47, 0.0  ;;  %v873_v62 = vpop.f32.mrf.mxu3  ;;  %v969_v5 = vmax.f32 %v714_v61, 0.0 }
 0x106   :  { %v638_v16 = vpop.f32.mrf.mxu0  ;;  %v874_v0 = vadd.f32 %v2472_v37, %v873_v62 }
 0x107   :  { %v1002_v18 = vmax.f32 %v797_v12, 0.0  ;;  %v639_v19 = vadd.f32 %v2472_v37, %v638_v16  ;;  %v2002_v12 = vpack.c.bf16 %v969_v5, %v968_v56 }
 0x108   :  { %v1033_v8 = vmax.f32 %v874_v0, 0.0 }
 0x109   :  { %v1322_v25 = vsub.f32 %v1002_v18, %v938_v7  ;;  %v939_v26 = vmax.f32 %v639_v19, 0.0  ;;  %2234 = vst [vmem:[%s3113_s3 + $0xa8] sm:$0xff] %v2002_v12  }
 0x10a   :  { %v2162_v13 = vpack.c.bf16 %v1033_v8, %v1032_v4  ;;  %v2719_v14 = vsub.f32 %v1033_v8, %v969_v5 }
 0x10b   :  { %v1386_v32 = vand.u32 2147483647, %v1322_v25  ;;  %v1927_v33 = vpack.c.bf16 %v939_v26, %v938_v7  ;;  %v1884_v7 = vld [vmem:[%s3110_s0 + $0x1f0] sm:$0xff] }
 0x10c   :  { %v798_v34 = vpop.f32.mrf.mxu2  ;;  %915 = vmatmul.bf16.gmra.mxu3 %v1884_v7  ;;  %2266 = vst [vmem:[%s3113_s3 + $0x1a8] sm:$0xff] %v2162_v13   ;;  %v1853_v7 = vld [vmem:[%s3110_s0 + $0xf8] sm:$0xff] }
 0x10d   :  { %v1449_v36 = vadd.f32 %v1448_v11, %v1386_v32  ;;  %2219 = vst [vmem:[%s3113_s3 + $0x30] sm:$0xff] %v1927_v33   ;;  %v799_v38 = vadd.f32 %v2472_v37, %v798_v34  ;;  %v2717_v11 = vsub.f32 %v1032_v4, %v968_v56  ;;  %v876_v21 = vpop.f32.mrf.mxu3 }
 0x10e   :  { %v641_v43 = vpop.f32.mrf.mxu0  ;;  %v877_v41 = vadd.f32 %v2472_v37, %v876_v21 }
 0x10f   :  { %v1003_v44 = vmax.f32 %v799_v38, 0.0  ;;  %v642_v45 = vadd.f32 %v2472_v37, %v641_v43 }
 0x111   :  { %v2087_v49 = vpack.c.bf16 %v1003_v44, %v1002_v18  ;;  %v1323_v52 = vsub.f32 %v1003_v44, %v939_v26  ;;  %680 = vmatmul.bf16.gmra.mxu0 %v1837_v39  ;;  %840 = vmatmul.bf16.gmra.mxu2 %v1869_v40  ;;  %v940_v54 = vmax.f32 %v642_v45, 0.0  ;;  %v716_v18 = vpop.f32.mrf.mxu1 }
 0x112   :  { %755 = vmatmul.bf16.gmra.mxu1 %v1852_v22  ;;  %v717_v29 = vadd.f32 %v2472_v37, %v716_v18 }
 0x113   :  { %2251 = vst [vmem:[%s3113_s3 + $0x130] sm:$0xff] %v2087_v49   ;;  %v1387_v53 = vand.u32 2147483647, %v1323_v52  ;;  %v1034_v52 = vmax.f32 %v877_v41, 0.0 }
 0x114   :  { %v801_v55 = vpop.f32.mrf.mxu2 }
 0x115   :  { %v1450_v58 = vadd.f32 %v1449_v36, %v1387_v53  ;;  %v802_v59 = vadd.f32 %v2472_v37, %v801_v55  ;;  %v970_v36 = vmax.f32 %v717_v29, 0.0  ;;  %v878_v43 = vpop.f32.mrf.mxu3 }
 0x116   :  { %v643_v63 = vpop.f32.mrf.mxu0  ;;  %v879_v45 = vadd.f32 %v2472_v37, %v878_v43 }
 0x117   :  { %v1004_v1 = vmax.f32 %v802_v59, 0.0  ;;  %v644_v2 = vadd.f32 %v2472_v37, %v643_v63 }
 0x118   :  { %v1035_v55 = vmax.f32 %v879_v45, 0.0 }
 0x119   :  { %v1324_v9 = vsub.f32 %v1004_v1, %v940_v54  ;;  %v941_v10 = vmax.f32 %v644_v2, 0.0  ;;  %v718_v38 = vpop.f32.mrf.mxu1 }
 0x11a   :  { %v719_v42 = vadd.f32 %v2472_v37, %v718_v38  ;;  %v2167_v60 = vpack.c.bf16 %v1035_v55, %v1034_v52 }
 0x11b   :  { %v1388_v15 = vand.u32 2147483647, %v1324_v9  ;;  %v1932_v16 = vpack.c.bf16 %v941_v10, %v940_v54  ;;  %v1885_v54 = vld [vmem:[%s3110_s0 + $0x1f8] sm:$0xff] }
 0x11c   :  { %v803_v17 = vpop.f32.mrf.mxu2  ;;  %v971_v53 = vmax.f32 %v719_v42, 0.0  ;;  %920 = vmatmul.bf16.gmra.mxu3 %v1885_v54  ;;  %2267 = vst [vmem:[%s3113_s3 + $0x1b0] sm:$0xff] %v2167_v60  }
 0x11d   :  { %v1451_v19 = vadd.f32 %v1450_v58, %v1388_v15  ;;  %2220 = vst [vmem:[%s3113_s3 + $0x38] sm:$0xff] %v1932_v16   ;;  %v804_v20 = vadd.f32 %v2472_v37, %v803_v17  ;;  %v2747_v58 = vsub.f32 %v1034_v52, %v970_v36  ;;  %v881_v5 = vpop.f32.mrf.mxu3 }
 0x11e   :  { %v646_v23 = vpop.f32.mrf.mxu0  ;;  %v2007_v59 = vpack.c.bf16 %v971_v53, %v970_v36  ;;  %v2749_v61 = vsub.f32 %v1035_v55, %v971_v53 }
 0x11f   :  { %v1005_v25 = vmax.f32 %v804_v20, 0.0  ;;  %v647_v26 = vadd.f32 %v2472_v37, %v646_v23  ;;  %v882_v23 = vadd.f32 %v2472_v37, %v881_v5 }
 0x120   :  { %2235 = vst [vmem:[%s3113_s3 + $0xb0] sm:$0xff] %v2007_v59  }
 0x121   :  { %v2092_v30 = vpack.c.bf16 %v1005_v25, %v1004_v1  ;;  %v1325_v32 = vsub.f32 %v1005_v25, %v941_v10  ;;  %v942_v34 = vmax.f32 %v647_v26, 0.0  ;;  %v721_v1 = vpop.f32.mrf.mxu1 }
 0x122   :  { %760 = vmatmul.bf16.gmra.mxu1 %v1853_v7  ;;  %v722_v12 = vadd.f32 %v2472_v37, %v721_v1 }
 0x123   :  { %2252 = vst [vmem:[%s3113_s3 + $0x138] sm:$0xff] %v2092_v30   ;;  %v1389_v33 = vand.u32 2147483647, %v1325_v32 }
 0x124   :  { %v806_v35 = vpop.f32.mrf.mxu2 }
 0x125   :  { %v1452_v39 = vadd.f32 %v1451_v19, %v1389_v33  ;;  %v807_v40 = vadd.f32 %v2472_v37, %v806_v35  ;;  %v972_v19 = vmax.f32 %v722_v12, 0.0  ;;  %v883_v26 = vpop.f32.mrf.mxu3 }
 0x126   :  { %v648_v44 = vpop.f32.mrf.mxu0  ;;  %v884_v30 = vadd.f32 %v2472_v37, %v883_v26 }
 0x127   :  { %v1006_v47 = vmax.f32 %v807_v40, 0.0  ;;  %v649_v49 = vadd.f32 %v2472_v37, %v648_v44 }
 0x128   :  { %v1037_v36 = vmax.f32 %v884_v30, 0.0 }
 0x129   :  { %v1326_v56 = vsub.f32 %v1006_v47, %v942_v34  ;;  %v943_v57 = vmax.f32 %v649_v49, 0.0  ;;  %v723_v20 = vpop.f32.mrf.mxu1 }
 0x12a   :  { %v724_v25 = vadd.f32 %v2472_v37, %v723_v20 }
 0x12b   :  { %v1390_v62 = vand.u32 2147483647, %v1326_v56  ;;  %v1937_v63 = vpack.c.bf16 %v943_v57, %v942_v34  ;;  %v1036_v34 = vmax.f32 %v882_v23, 0.0 }
 0x12c   :  { %v808_v0 = vpop.f32.mrf.mxu2  ;;  %v973_v35 = vmax.f32 %v724_v25, 0.0 }
 0x12d   :  { %v1453_v2 = vadd.f32 %v1452_v39, %v1390_v62  ;;  %2221 = vst [vmem:[%s3113_s3 + $0x40] sm:$0xff] %v1937_v63   ;;  %v809_v4 = vadd.f32 %v2472_v37, %v808_v0  ;;  %v2774_v40 = vsub.f32 %v1036_v34, %v972_v19  ;;  %v2172_v42 = vpack.c.bf16 %v1037_v36, %v1036_v34  ;;  %v886_v54 = vpop.f32.mrf.mxu3 }
 0x12e   :  { %v651_v8 = vpop.f32.mrf.mxu0  ;;  %v2012_v41 = vpack.c.bf16 %v973_v35, %v972_v19  ;;  %v2776_v43 = vsub.f32 %v1037_v36, %v973_v35 }
 0x12f   :  { %v1007_v9 = vmax.f32 %v809_v4, 0.0  ;;  %v652_v10 = vadd.f32 %v2472_v37, %v651_v8  ;;  %2268 = vst [vmem:[%s3113_s3 + $0x1b8] sm:$0xff] %v2172_v42   ;;  %v887_v8 = vadd.f32 %v2472_v37, %v886_v54 }
 0x130   :  { %2236 = vst [vmem:[%s3113_s3 + $0xb8] sm:$0xff] %v2012_v41  }
 0x131   :  { %v2097_v13 = vpack.c.bf16 %v1007_v9, %v1006_v47  ;;  %v1327_v15 = vsub.f32 %v1007_v9, %v943_v57  ;;  %v944_v17 = vmax.f32 %v652_v10, 0.0  ;;  %v726_v49 = vpop.f32.mrf.mxu1 }
 0x132   :  { %v727_v59 = vadd.f32 %v2472_v37, %v726_v49 }
 0x133   :  { %2253 = vst [vmem:[%s3113_s3 + $0x140] sm:$0xff] %v2097_v13   ;;  %v1391_v16 = vand.u32 2147483647, %v1327_v15 }
 0x134   :  { %v811_v18 = vpop.f32.mrf.mxu2 }
 0x135   :  { %v1454_v21 = vadd.f32 %v1453_v2, %v1391_v16  ;;  %v812_v22 = vadd.f32 %v2472_v37, %v811_v18  ;;  %v974_v2 = vmax.f32 %v727_v59, 0.0  ;;  %v888_v10 = vpop.f32.mrf.mxu3 }
 0x136   :  { %v653_v29 = vpop.f32.mrf.mxu0  ;;  %v889_v13 = vadd.f32 %v2472_v37, %v888_v10 }
 0x137   :  { %v1008_v32 = vmax.f32 %v812_v22, 0.0  ;;  %v654_v33 = vadd.f32 %v2472_v37, %v653_v29 }
 0x138   :  { %v1039_v19 = vmax.f32 %v889_v13, 0.0 }
 0x139   :  { %v1328_v38 = vsub.f32 %v1008_v32, %v944_v17  ;;  %v945_v39 = vmax.f32 %v654_v33, 0.0  ;;  %v728_v4 = vpop.f32.mrf.mxu1 }
 0x13a   :  { %v729_v9 = vadd.f32 %v2472_v37, %v728_v4 }
 0x13b   :  { %v1392_v44 = vand.u32 2147483647, %v1328_v38  ;;  %v1942_v45 = vpack.c.bf16 %v945_v39, %v944_v17  ;;  %v1038_v17 = vmax.f32 %v887_v8, 0.0 }
 0x13c   :  { %v813_v47 = vpop.f32.mrf.mxu2  ;;  %v975_v18 = vmax.f32 %v729_v9, 0.0 }
 0x13d   :  { %v1455_v52 = vadd.f32 %v1454_v21, %v1392_v44  ;;  %2222 = vst [vmem:[%s3113_s3 + $0x48] sm:$0xff] %v1942_v45   ;;  %v814_v53 = vadd.f32 %v2472_v37, %v813_v47  ;;  %v2798_v22 = vsub.f32 %v1038_v17, %v974_v2  ;;  %v2177_v25 = vpack.c.bf16 %v1039_v19, %v1038_v17  ;;  %v891_v36 = vpop.f32.mrf.mxu3 }
 0x13e   :  { %v656_v55 = vpop.f32.mrf.mxu0  ;;  %v2017_v23 = vpack.c.bf16 %v975_v18, %v974_v2  ;;  %v2800_v26 = vsub.f32 %v1039_v19, %v975_v18 }
 0x13f   :  { %v1009_v56 = vmax.f32 %v814_v53, 0.0  ;;  %v657_v57 = vadd.f32 %v2472_v37, %v656_v55  ;;  %2269 = vst [vmem:[%s3113_s3 + $0x1c0] sm:$0xff] %v2177_v25   ;;  %v892_v55 = vadd.f32 %v2472_v37, %v891_v36 }
 0x140   :  { %2237 = vst [vmem:[%s3113_s3 + $0xc0] sm:$0xff] %v2017_v23  }
 0x141   :  { %v2102_v60 = vpack.c.bf16 %v1009_v56, %v1008_v32  ;;  %v1329_v62 = vsub.f32 %v1009_v56, %v945_v39  ;;  %v946_v0 = vmax.f32 %v657_v57, 0.0  ;;  %v731_v33 = vpop.f32.mrf.mxu1 }
 0x142   :  { %v732_v44 = vadd.f32 %v2472_v37, %v731_v33 }
 0x143   :  { %2254 = vst [vmem:[%s3113_s3 + $0x148] sm:$0xff] %v2102_v60   ;;  %v1393_v63 = vand.u32 2147483647, %v1329_v62 }
 0x144   :  { %v816_v1 = vpop.f32.mrf.mxu2  ;;  %v976_v54 = vmax.f32 %v732_v44, 0.0 }
 0x145   :  { %v1456_v5 = vadd.f32 %v1455_v52, %v1393_v63  ;;  %v817_v7 = vadd.f32 %v2472_v37, %v816_v1  ;;  %v893_v57 = vpop.f32.mrf.mxu3  ;;  %v1040_v63 = vmax.f32 %v892_v55, 0.0 }
 0x146   :  { %v658_v12 = vpop.f32.mrf.mxu0  ;;  %v894_v60 = vadd.f32 %v2472_v37, %v893_v57 }
 0x147   :  { %v1010_v15 = vmax.f32 %v817_v7, 0.0  ;;  %v659_v16 = vadd.f32 %v2472_v37, %v658_v12 }
 0x148   :  { %v1041_v1 = vmax.f32 %v894_v60, 0.0 }
 0x149   :  { %v1330_v20 = vsub.f32 %v1010_v15, %v946_v0  ;;  %v947_v21 = vmax.f32 %v659_v16, 0.0  ;;  %v733_v52 = vpop.f32.mrf.mxu1 }
 0x14a   :  { %v734_v56 = vadd.f32 %v2472_v37, %v733_v52  ;;  %v2182_v8 = vpack.c.bf16 %v1041_v1, %v1040_v63 }
 0x14b   :  { %v1394_v29 = vand.u32 2147483647, %v1330_v20  ;;  %v1947_v30 = vpack.c.bf16 %v947_v21, %v946_v0 }
 0x14c   :  { %v818_v32 = vpop.f32.mrf.mxu2  ;;  %v977_v0 = vmax.f32 %v734_v56, 0.0  ;;  %2270 = vst [vmem:[%s3113_s3 + $0x1c8] sm:$0xff] %v2182_v8  }
 0x14d   :  { %v1457_v34 = vadd.f32 %v1456_v5, %v1394_v29  ;;  %2223 = vst [vmem:[%s3113_s3 + $0x50] sm:$0xff] %v1947_v30   ;;  %v819_v35 = vadd.f32 %v2472_v37, %v818_v32  ;;  %v2829_v5 = vsub.f32 %v1040_v63, %v976_v54  ;;  %v896_v17 = vpop.f32.mrf.mxu3  ;;  %v2865_v30 = vld [vmem:[%s3112_s2] ss:$0 sm:$0xff] }
 0x14e   :  { %v661_v38 = vpop.f32.mrf.mxu0  ;;  %v2022_v7 = vpack.c.bf16 %v977_v0, %v976_v54  ;;  %v2831_v9 = vsub.f32 %v1041_v1, %v977_v0 }
 0x14f   :  { %v1011_v39 = vmax.f32 %v819_v35, 0.0  ;;  %v2817_v47 = vadd.f32 %v2472_v37, %v661_v38 }
 0x150   :  { %2238 = vst [vmem:[%s3113_s3 + $0xc8] sm:$0xff] %v2022_v7  }
 0x151   :  { %v2107_v41 = vpack.c.bf16 %v1011_v39, %v1010_v15  ;;  %v1331_v42 = vsub.f32 %v1011_v39, %v947_v21  ;;  %v948_v2 = vmax.f32 %v2817_v47, 0.0  ;;  %v736_v15 = vpop.f32.mrf.mxu1 }
 0x152   :  { %v737_v23 = vadd.f32 %v2472_v37, %v736_v15 }
 0x153   :  { %2255 = vst [vmem:[%s3113_s3 + $0x150] sm:$0xff] %v2107_v41   ;;  %v1395_v45 = vand.u32 2147483647, %v1331_v42 }
 0x154   :  { %v821_v49 = vpop.f32.mrf.mxu2  ;;  %v978_v33 = vmax.f32 %v737_v23, 0.0 }
 0x155   :  { %v2819_v53 = vadd.f32 %v1457_v34, %v1395_v45  ;;  %v2834_v10 = vadd.f32 %v2472_v37, %v821_v49  ;;  %v897_v34 = vadd.f32 %v2865_v30, %v896_v17 }
 0x156   :  { %v663_v59 = vpop.f32.mrf.mxu0 }
 0x157   :  { %v2825_v62 = vadd.f32 %v2472_v37, %v663_v59  ;;  %v1012_v19 = vmax.f32 %v2834_v10, 0.0  ;;  %v1042_v41 = vmax.f32 %v897_v34, 0.0 }
 0x159   :  { %v949_v4 = vmax.f32 %v2825_v62, 0.0  ;;  %v738_v29 = vpop.f32.mrf.mxu1  ;;  %v2878_v52 = vsub.f32 %v1042_v41, %v978_v33 }
 0x15a   :  { %v739_v35 = vadd.f32 %v2865_v30, %v738_v29 }
 0x15b   :  { %v1952_v12 = vpack.c.bf16 %v949_v4, %v948_v2 }
 0x15c   :  { %v823_v13 = vpop.f32.mrf.mxu2  ;;  %v979_v42 = vmax.f32 %v739_v35, 0.0 }
 0x15d   :  { %2224 = vst [vmem:[%s3113_s3 + $0x58] sm:$0xff] %v1952_v12   ;;  %v2850_v16 = vadd.f32 %v2472_v37, %v823_v13  ;;  %v898_v37 = vpop.f32.mrf.mxu3 }
 0x15e   :  { %v666_v18 = vpop.f32.mrf.mxu0  ;;  %v899_v38 = vadd.f32 %v2865_v30, %v898_v37  ;;  %v2027_v54 = vpack.c.bf16 %v979_v42, %v978_v33 }
 0x15f   :  { %v1013_v20 = vmax.f32 %v2850_v16, 0.0  ;;  %v2868_v32 = vadd.f32 %v2865_v30, %v666_v18 }
 0x160   :  { %v1043_v44 = vmax.f32 %v899_v38, 0.0  ;;  %2239 = vst [vmem:[%s3113_s3 + $0xd0] sm:$0xff] %v2027_v54  }
 0x161   :  { %v2112_v21 = vpack.c.bf16 %v1013_v20, %v1012_v19  ;;  %v950_v45 = vmax.f32 %v2868_v32, 0.0  ;;  %v741_v63 = vpop.f32.mrf.mxu1 }
 0x162   :  { %v2187_v55 = vpack.c.bf16 %v1043_v44, %v1042_v41  ;;  %v2880_v56 = vsub.f32 %v1043_v44, %v979_v42  ;;  %v742_v15 = vadd.f32 %v2865_v30, %v741_v63 }
 0x163   :  { %2256 = vst [vmem:[%s3113_s3 + $0x158] sm:$0xff] %v2112_v21  }
 0x164   :  { %v826_v25 = vpop.f32.mrf.mxu2  ;;  %2271 = vst [vmem:[%s3113_s3 + $0x1d0] sm:$0xff] %v2187_v55   ;;  %v980_v23 = vmax.f32 %v742_v15, 0.0 }
 0x165   :  { %v2883_v57 = vadd.f32 %v2865_v30, %v826_v25  ;;  %v901_v1 = vpop.f32.mrf.mxu3 }
 0x166   :  { %v668_v36 = vpop.f32.mrf.mxu0  ;;  %v902_v25 = vadd.f32 %v2865_v30, %v901_v1 }
 0x167   :  { %v2874_v39 = vadd.f32 %v2865_v30, %v668_v36  ;;  %v1014_v8 = vmax.f32 %v2883_v57, 0.0 }
 0x168   :  { %v1044_v36 = vmax.f32 %v902_v25, 0.0 }
 0x169   :  { %v951_v49 = vmax.f32 %v2874_v39, 0.0  ;;  %v743_v18 = vpop.f32.mrf.mxu1  ;;  %v1334_v10 = vsub.f32 %v1014_v8, %v950_v45 }
 0x16a   :  { %v744_v29 = vadd.f32 %v2865_v30, %v743_v18  ;;  %v2922_v54 = vsub.f32 %v1044_v36, %v980_v23 }
 0x16b   :  { %v1957_v59 = vpack.c.bf16 %v951_v49, %v950_v45  ;;  %v1398_v45 = vand.u32 2147483647, %v1334_v10 }
 0x16c   :  { %v828_v60 = vpop.f32.mrf.mxu2  ;;  %v981_v38 = vmax.f32 %v744_v29, 0.0 }
 0x16d   :  { %2225 = vst [vmem:[%s3113_s3 + $0x60] sm:$0xff] %v1957_v59   ;;  %v2899_v0 = vadd.f32 %v2865_v30, %v828_v60  ;;  %v903_v33 = vpop.f32.mrf.mxu3 }
 0x16e   :  { %v671_v7 = vpop.f32.mrf.mxu0  ;;  %v904_v35 = vadd.f32 %v2865_v30, %v903_v33  ;;  %v2032_v55 = vpack.c.bf16 %v981_v38, %v980_v23 }
 0x16f   :  { %v1015_v12 = vmax.f32 %v2899_v0, 0.0  ;;  %v2912_v21 = vadd.f32 %v2865_v30, %v671_v7 }
 0x170   :  { %v1045_v41 = vmax.f32 %v904_v35, 0.0  ;;  %2240 = vst [vmem:[%s3113_s3 + $0xd8] sm:$0xff] %v2032_v55  }
 0x171   :  { %v2117_v13 = vpack.c.bf16 %v1015_v12, %v1014_v8  ;;  %v952_v42 = vmax.f32 %v2912_v21, 0.0  ;;  %v1335_v8 = vsub.f32 %v1015_v12, %v951_v49 }
 0x172   :  { %v2192_v59 = vpack.c.bf16 %v1045_v41, %v1044_v36  ;;  %v2924_v60 = vsub.f32 %v1045_v41, %v981_v38 }
 0x173   :  { %2257 = vst [vmem:[%s3113_s3 + $0x160] sm:$0xff] %v2117_v13   ;;  %v746_v13 = vpop.f32.mrf.mxu1 }
 0x174   :  { %v831_v17 = vpop.f32.mrf.mxu2  ;;  %2272 = vst [vmem:[%s3113_s3 + $0x1d8] sm:$0xff] %v2192_v59   ;;  %v747_v29 = vadd.f32 %v2865_v30, %v746_v13 }
 0x175   :  { %v832_v63 = vadd.f32 %v2865_v30, %v831_v17  ;;  %v906_v17 = vpop.f32.mrf.mxu3 }
 0x176   :  { %v673_v34 = vpop.f32.mrf.mxu0  ;;  %v982_v36 = vmax.f32 %v747_v29, 0.0  ;;  %v907_v38 = vadd.f32 %v2865_v30, %v906_v17 }
 0x177   :  { %v2918_v37 = vadd.f32 %v2865_v30, %v673_v34  ;;  %v1016_v21 = vmax.f32 %v832_v63, 0.0 }
 0x179   :  { %v3115_v44 = vmax.f32 %v2918_v37, 0.0 }
 0x17b   :  { %v1962_v1 = vpack.c.bf16 %v3115_v44, %v952_v42  ;;  %v748_v34 = vpop.f32.mrf.mxu1 }
 0x17c   :  { %v833_v7 = vpop.f32.mrf.mxu2  ;;  %v749_v41 = vadd.f32 %v2865_v30, %v748_v34  ;;  %v1333_v34 = vsub.f32 %v1013_v20, %v949_v4 }
 0x17d   :  { %2226 = vst [vmem:[%s3113_s3 + $0x68] sm:$0xff] %v1962_v1   ;;  %v834_v15 = vadd.f32 %v2865_v30, %v833_v7  ;;  %v908_v55 = vpop.f32.mrf.mxu3  ;;  %v1046_v7 = vmax.f32 %v907_v38, 0.0 }
 0x17e   :  { %v676_v18 = vpop.f32.mrf.mxu0  ;;  %v909_v63 = vadd.f32 %v2865_v30, %v908_v55  ;;  %v983_v13 = vmax.f32 %v749_v41, 0.0  ;;  %v1397_v20 = vand.u32 2147483647, %v1333_v34 }
 0x17f   :  { %v1017_v23 = vmax.f32 %v834_v15, 0.0  ;;  %v677_v35 = vadd.f32 %v2865_v30, %v676_v18  ;;  %v1332_v15 = vsub.f32 %v1012_v19, %v948_v2  ;;  %v2952_v44 = vsub.f32 %v1046_v7, %v982_v36 }
 0x180   :  { %v2037_v17 = vpack.c.bf16 %v983_v13, %v982_v36  ;;  %v1336_v36 = vsub.f32 %v1016_v21, %v952_v42 }
 0x181   :  { %v2122_v25 = vpack.c.bf16 %v1017_v23, %v1016_v21  ;;  %v954_v18 = vmax.f32 %v677_v35, 0.0  ;;  %v1396_v2 = vand.u32 2147483647, %v1332_v15 }
 0x182   :  { %2241 = vst [vmem:[%s3113_s3 + $0xe0] sm:$0xff] %v2037_v17   ;;  %v1400_v15 = vand.u32 2147483647, %v1336_v36  ;;  %v3116_v17 = vmax.f32 %v2918_v37, 0.0 }
 0x183   :  { %2258 = vst [vmem:[%s3113_s3 + $0x168] sm:$0xff] %v2122_v25   ;;  %v1047_v25 = vmax.f32 %v909_v63, 0.0  ;;  %v751_v4 = vpop.f32.mrf.mxu1  ;;  %v1459_v57 = vadd.f32 %v2819_v53, %v1396_v2 }
 0x184   :  { %v836_v33 = vpop.f32.mrf.mxu2  ;;  %v1337_v39 = vsub.f32 %v1017_v23, %v3116_v17  ;;  %v2988_v49 = vadd.f32 %v2865_v30, %v751_v4 }
 0x185   :  { %v2197_v55 = vpack.c.bf16 %v1047_v25, %v1046_v7  ;;  %v837_v38 = vadd.f32 %v2865_v30, %v836_v33  ;;  %v911_v19 = vpop.f32.mrf.mxu3  ;;  %v1460_v63 = vadd.f32 %v1459_v57, %v1397_v20 }
 0x186   :  { %v678_v59 = vpop.f32.mrf.mxu0  ;;  %v2991_v12 = vadd.f32 %v2865_v30, %v911_v19  ;;  %v984_v2 = vmax.f32 %v2988_v49, 0.0 }
 0x187   :  { %v679_v1 = vadd.f32 %v2865_v30, %v678_v59  ;;  %v2958_v59 = vsub.f32 %v1047_v25, %v983_v13  ;;  %2273 = vst [vmem:[%s3113_s3 + $0x1e0] sm:$0xff] %v2197_v55   ;;  %v1018_v35 = vmax.f32 %v837_v38, 0.0  ;;  %v1461_v7 = vadd.f32 %v1460_v63, %v1398_v45 }
 0x188   :  { %v1399_v13 = vand.u32 2147483647, %v1335_v8  ;;  %v1048_v10 = vmax.f32 %v2991_v12, 0.0 }
 0x189   :  { %v955_v29 = vmax.f32 %v679_v1, 0.0  ;;  %v1338_v21 = vsub.f32 %v1018_v35, %v954_v18 }
 0x18b   :  { %v1967_v47 = vpack.c.bf16 %v955_v29, %v954_v18  ;;  %v753_v53 = vpop.f32.mrf.mxu1  ;;  %v1462_v18 = vadd.f32 %v1461_v7, %v1399_v13  ;;  %v1402_v45 = vand.u32 2147483647, %v1338_v21  ;;  %v1406_v21 = vand.u32 2147483647, %v2537_v48 }
 0x18c   :  { %v838_v62 = vpop.f32.mrf.mxu2  ;;  %v2994_v38 = vadd.f32 %v2865_v30, %v753_v53 }
 0x18d   :  { %2227 = vst [vmem:[%s3113_s3 + $0x70] sm:$0xff] %v1967_v47   ;;  %v839_v16 = vadd.f32 %v2865_v30, %v838_v62  ;;  %v913_v42 = vpop.f32.mrf.mxu3  ;;  %v1463_v57 = vadd.f32 %v1462_v18, %v1400_v15 }
 0x18e   :  { %v681_v33 = vpop.f32.mrf.mxu0  ;;  %v2997_v47 = vadd.f32 %v2865_v30, %v913_v42  ;;  %v985_v62 = vmax.f32 %v2994_v38, 0.0 }
 0x18f   :  { %v1019_v32 = vmax.f32 %v839_v16, 0.0  ;;  %v682_v1 = vadd.f32 %v2865_v30, %v681_v33  ;;  %v1401_v16 = vand.u32 2147483647, %v1337_v39 }
 0x190   :  { %v1049_v4 = vmax.f32 %v2997_v47, 0.0  ;;  %v2042_v33 = vpack.c.bf16 %v985_v62, %v984_v2 }
 0x191   :  { %v2127_v41 = vpack.c.bf16 %v1019_v32, %v1018_v35  ;;  %v956_v34 = vmax.f32 %v682_v1, 0.0  ;;  %v1339_v19 = vsub.f32 %v1019_v32, %v955_v29  ;;  %v1464_v32 = vadd.f32 %v1463_v57, %v1401_v16 }
 0x192   :  { %v2202_v35 = vpack.c.bf16 %v1049_v4, %v1048_v10  ;;  %2242 = vst [vmem:[%s3113_s3 + $0xe8] sm:$0xff] %v2042_v33  }
 0x193   :  { %2259 = vst [vmem:[%s3113_s3 + $0x170] sm:$0xff] %v2127_v41   ;;  %v756_v29 = vpop.f32.mrf.mxu1  ;;  %v1403_v63 = vand.u32 2147483647, %v1339_v19  ;;  %v1465_v13 = vadd.f32 %v1464_v32, %v1402_v45  ;;  %v1407_v19 = vand.u32 2147483647, %v2539_v51 }
 0x194   :  { %v841_v25 = vpop.f32.mrf.mxu2  ;;  %2274 = vst [vmem:[%s3113_s3 + $0x1e8] sm:$0xff] %v2202_v35  }
 0x195   :  { %v842_v0 = vadd.f32 %v2865_v30, %v841_v25  ;;  %v916_v7 = vpop.f32.mrf.mxu3  ;;  %v1466_v53 = vadd.f32 %v1465_v13, %v1403_v63  ;;  %v1410_v63 = vand.u32 2147483647, %v2609_v3  ;;  %v1411_v13 = vand.u32 2147483647, %v2611_v6 }
 0x196   :  { %v683_v55 = vpop.f32.mrf.mxu0  ;;  %v3030_v18 = vadd.f32 %v2865_v30, %v916_v7  ;;  %v1415_v6 = vand.u32 2147483647, %v2683_v31  ;;  %v1418_v31 = vand.u32 2147483647, %v2747_v58  ;;  %v1425_v58 = vand.u32 2147483647, %v2831_v9 }
 0x197   :  { %v1020_v37 = vmax.f32 %v842_v0, 0.0  ;;  %v684_v23 = vadd.f32 %v2865_v30, %v683_v55 }
 0x198   :  { %v1050_v35 = vmax.f32 %v3030_v18, 0.0 }
 0x199   :  { %v957_v20 = vmax.f32 %v684_v23, 0.0  ;;  %v1340_v8 = vsub.f32 %v1020_v37, %v956_v34  ;;  %v3027_v23 = vadd.f32 %v2865_v30, %v756_v29  ;;  %v1409_v29 = vand.u32 2147483647, %v2575_v27 }
 0x19b   :  { %v1972_v36 = vpack.c.bf16 %v957_v20, %v956_v34  ;;  %v1404_v15 = vand.u32 2147483647, %v1340_v8  ;;  %v758_v34 = vpop.f32.mrf.mxu1  ;;  %v986_v48 = vmax.f32 %v3027_v23, 0.0  ;;  %v1408_v8 = vand.u32 2147483647, %v2573_v24 }
 0x19c   :  { %v843_v41 = vpop.f32.mrf.mxu2  ;;  %v3033_v16 = vadd.f32 %v2865_v30, %v758_v34 }
 0x19d   :  { %2228 = vst [vmem:[%s3113_s3 + $0x78] sm:$0xff] %v1972_v36   ;;  %v844_v1 = vadd.f32 %v2865_v30, %v843_v41  ;;  %v1467_v0 = vadd.f32 %v1466_v53, %v1404_v15  ;;  %v1413_v53 = vand.u32 2147483647, %v2647_v50 }
 0x19e   :  { %v987_v57 = vmax.f32 %v3033_v16, 0.0 }
 0x19f   :  { %v1021_v25 = vmax.f32 %v844_v1, 0.0 }
 0x1a0   :  { %v2047_v51 = vpack.c.bf16 %v987_v57, %v986_v48 }
 0x1a1   :  { %v2132_v17 = vpack.c.bf16 %v1021_v25, %v1020_v37  ;;  %v1341_v39 = vsub.f32 %v1021_v25, %v957_v20  ;;  %v918_v37 = vpop.f32.mrf.mxu3  ;;  %v1412_v25 = vand.u32 2147483647, %v2645_v46 }
 0x1a2   :  { %v3037_v20 = vadd.f32 %v2865_v30, %v918_v37  ;;  %2243 = vst [vmem:[%s3113_s3 + $0xf0] sm:$0xff] %v2047_v51  }
 0x1a3   :  { %2260 = vst [vmem:[%s3113_s3 + $0x178] sm:$0xff] %v2132_v17   ;;  %v1405_v42 = vand.u32 2147483647, %v1341_v39  ;;  %v761_v24 = vpop.f32.mrf.mxu1  ;;  %v1414_v39 = vand.u32 2147483647, %v2681_v28 }
 0x1a4   :  { %v1051_v45 = vmax.f32 %v3037_v20, 0.0  ;;  %v1416_v28 = vand.u32 2147483647, %v2717_v11 }
 0x1a5   :  { %v1468_v55 = vadd.f32 %v1467_v0, %v1405_v42 }
 0x1a6   :  { %v2207_v41 = vpack.c.bf16 %v1051_v45, %v1050_v35  ;;  %v1371_v12 = vsub.f32 %v1051_v45, %v987_v57 }
 0x1a7   :  { %v1469_v33 = vadd.f32 %v1468_v55, %v1406_v21  ;;  %v762_v21 = vadd.f32 %v2865_v30, %v761_v24  ;;  %v1419_v24 = vand.u32 2147483647, %v2749_v61  ;;  %v1426_v61 = vand.u32 2147483647, %v2878_v52 }
 0x1a8   :  { %2275 = vst [vmem:[%s3113_s3 + $0x1f0] sm:$0xff] %v2207_v41   ;;  %v1431_v52 = vand.u32 2147483647, %v2958_v59  ;;  %v1435_v47 = vand.u32 2147483647, %v1371_v12 }
 0x1a9   :  { %v1470_v36 = vadd.f32 %v1469_v33, %v1407_v19  ;;  %v921_v7 = vpop.f32.mrf.mxu3  ;;  %v988_v19 = vmax.f32 %v762_v21, 0.0 }
 0x1aa   :  { %v922_v34 = vadd.f32 %v2865_v30, %v921_v7 }
 0x1ab   :  { %v1471_v32 = vadd.f32 %v1470_v36, %v1408_v8  ;;  %v763_v0 = vpop.f32.mrf.mxu1 }
 0x1ac   :  { %v764_v3 = vadd.f32 %v2865_v30, %v763_v0  ;;  %v1052_v33 = vmax.f32 %v922_v34, 0.0 }
 0x1ad   :  { %v1472_v1 = vadd.f32 %v1471_v32, %v1409_v29  ;;  %v1417_v29 = vand.u32 2147483647, %v2719_v14  ;;  %v1421_v14 = vand.u32 2147483647, %v2776_v43  ;;  %v1428_v43 = vand.u32 2147483647, %v2922_v54 }
 0x1ae   :  { %v989_v50 = vmax.f32 %v764_v3, 0.0  ;;  %v1372_v38 = vsub.f32 %v1052_v33, %v988_v19 }
 0x1af   :  { %v1473_v15 = vadd.f32 %v1472_v1, %v1410_v63  ;;  %v1420_v63 = vand.u32 2147483647, %v2774_v40  ;;  %v1427_v40 = vand.u32 2147483647, %v2880_v56  ;;  %v1369_v56 = vsub.f32 %v1049_v4, %v985_v62 }
 0x1b0   :  { %v2052_v51 = vpack.c.bf16 %v989_v50, %v988_v19  ;;  %v1436_v4 = vand.u32 2147483647, %v1372_v38 }
 0x1b1   :  { %v1474_v27 = vadd.f32 %v1473_v15, %v1411_v13  ;;  %v923_v55 = vpop.f32.mrf.mxu3  ;;  %v1422_v13 = vand.u32 2147483647, %v2798_v22  ;;  %v1429_v22 = vand.u32 2147483647, %v2924_v60  ;;  %v1433_v49 = vand.u32 2147483647, %v1369_v56 }
 0x1b2   :  { %v924_v37 = vadd.f32 %v2865_v30, %v923_v55  ;;  %2244 = vst [vmem:[%s3113_s3 + $0xf8] sm:$0xff] %v2052_v51  }
 0x1b3   :  { %v1475_v17 = vadd.f32 %v1474_v27, %v1412_v25  ;;  %v1423_v25 = vand.u32 2147483647, %v2800_v26  ;;  %v1430_v26 = vand.u32 2147483647, %v2952_v44  ;;  %v1370_v44 = vsub.f32 %v1050_v35, %v986_v48 }
 0x1b4   :  { %v1053_v8 = vmax.f32 %v924_v37, 0.0 }
 0x1b5   :  { %v1476_v42 = vadd.f32 %v1475_v17, %v1413_v53  ;;  %v1424_v53 = vand.u32 2147483647, %v2829_v5  ;;  %v1368_v5 = vsub.f32 %v1048_v10, %v984_v2  ;;  %v1434_v2 = vand.u32 2147483647, %v1370_v44 }
 0x1b6   :  { %v2212_v41 = vpack.c.bf16 %v1053_v8, %v1052_v33  ;;  %v1373_v62 = vsub.f32 %v1053_v8, %v989_v50 }
 0x1b7   :  { %v1477_v46 = vadd.f32 %v1476_v42, %v1414_v39  ;;  %v1432_v55 = vand.u32 2147483647, %v1368_v5 }
 0x1b8   :  { %2276 = vst [vmem:[%s3113_s3 + $0x1f8] sm:$0xff] %v2212_v41   ;;  %v1437_v37 = vand.u32 2147483647, %v1373_v62  ;;  %s2332_s3 = smov [#allocation2]  }
 0x1b9   :  { %v1478_v36 = vadd.f32 %v1477_v46, %v1415_v6  ;;  %s1521_s16 = sshll.u32 %s2332_s3, 4  ;;  %s1522_s16 = int_to_ptr.vmem [resolvable:$true] %s1521_s16 }
 0x1bb   :  { %v1479_v32 = vadd.f32 %v1478_v36, %v1416_v28 }
 0x1bd   :  { %v1480_v30 = vadd.f32 %v1479_v32, %v1417_v29 }
 0x1bf   :  { %v1481_v11 = vadd.f32 %v1480_v30, %v1418_v31 }
 0x1c1   :  { %v1482_v1 = vadd.f32 %v1481_v11, %v1419_v24 }
 0x1c3   :  { %v1483_v7 = vadd.f32 %v1482_v1, %v1420_v63 }
 0x1c5   :  { %v1484_v15 = vadd.f32 %v1483_v7, %v1421_v14 }
 0x1c7   :  { %v1485_v27 = vadd.f32 %v1484_v15, %v1422_v13 }
 0x1c9   :  { %v1486_v17 = vadd.f32 %v1485_v27, %v1423_v25 }
 0x1cb   :  { %v1487_v39 = vadd.f32 %v1486_v17, %v1424_v53 }
 0x1cd   :  { %v1488_v0 = vadd.f32 %v1487_v39, %v1425_v58 }
 0x1cf   :  { %v1489_v42 = vadd.f32 %v1488_v0, %v1426_v61 }
 0x1d1   :  { %v1490_v21 = vadd.f32 %v1489_v42, %v1427_v40 }
 0x1d3   :  { %v1491_v34 = vadd.f32 %v1490_v21, %v1428_v43 }
 0x1d5   :  { %v1492_v3 = vadd.f32 %v1491_v34, %v1429_v22 }
 0x1d7   :  { %v1493_v9 = vadd.f32 %v1492_v3, %v1430_v26 }
 0x1d9   :  { %v1494_v54 = vadd.f32 %v1493_v9, %v1431_v52 }
 0x1db   :  { %v1495_v60 = vadd.f32 %v1494_v54, %v1432_v55 }
 0x1dd   :  { %v1496_v59 = vadd.f32 %v1495_v60, %v1433_v49 }
 0x1df   :  { %v1497_v10 = vadd.f32 %v1496_v59, %v1434_v2 }
 0x1e1   :  { %v1498_v6 = vadd.f32 %v1497_v10, %v1435_v47 }
 0x1e3   :  { %v1499_v23 = vadd.f32 %v1498_v6, %v1436_v4 }
 0x1e5   :  { %v1500_v46 = vadd.f32 %v1499_v23, %v1437_v37 }
 0x1e7   :  { %1501 = vadd.xlane.f32.xlu0 %v1500_v46 }
 0x25a   :  { %v1502_v18 = vpop.xlane.xlu0 %1501 }
 0x25b   :  { %v1503_v48 = vrot.slane %v1502_v18, 4 }
 0x25d   :  { %v1504_v35 = vadd.f32 %v1503_v48, %v1502_v18 }
 0x25f   :  { %v1505_v28 = vrot.slane %v1504_v35, 2 }
 0x261   :  { %v1506_v16 = vadd.f32 %v1505_v28, %v1504_v35 }
 0x263   :  { %v1507_v36 = vrot.slane %v1506_v16, 1 }
 0x265   :  { %v1508_v20 = vadd.f32 %v1507_v36, %v1506_v16 }
 0x267   :  { %2301 = vpush %v1508_v20 }
 0x298   :  { %s2302_s20 = spop %2301 }
 0x299   :  { %s1510_s21 = smul.f32 7.6293945e-05, %s2302_s20 }
 0x29b   :  { %v1511_v57 = vstv %s1510_s21 }
 0x29c   :  { %1513 = vst.msk [vmem:[#allocation2] sm:$0x1] %vm1512_vm0, %v1511_v57 }
 0x29d   :  { %1526 = dma.vmem_to_hbm [thread:$0]  %s1522_s16, 16, %s1524_s19, [#allocation3]  }
 0x29e   :  { %2330 = dma.done.wait [#allocation3], 16  }
 0x29f   :  { %2331 = vsyncadd [#allocation3], 4294967280 }
 0x2a0   :  { %1533 = vsyncpa [#allocation3], 1 }

// kernel: generator_loss.9
= control target key start
LH: loop header
LB: loop body
LE: loop exit
PB: predicated region body
PF: predicated region fallthrough
CT: control target
= control target key end

     0   :  { %s1471_s0 = inlined_call_operand.vmem [shape: bf16[256,256], index: 0, kind: input, shape index: {}]   ;;  %s1472_s1 = inlined_call_operand.vmem [shape: bf16[256,128], index: 1, kind: input, shape index: {}]   ;;  %s1473_s2 = inlined_call_operand.vmem [shape: f32[1,128], index: 2, kind: input, shape index: {}]   ;;  %s1474_s3 = inlined_call_operand.vmem [shape: bf16[256,128], index: 3, kind: output, shape index: {0}]   ;;  %s1475_s4 = inlined_call_operand.hbm [shape: f32[1,1], index: 4, kind: output, shape index: {1}]  }
   0x1   :  { %v926_v0 = vld [vmem:[%s1472_s1 + $0x38] sm:$0xff]  ;;  %v925_v2 = vld [vmem:[%s1472_s1 + $0x30] sm:$0xff]  ;;  %v924_v4 = vld [vmem:[%s1472_s1 + $0x28] sm:$0xff] }
   0x2   :  { %v934_v1 = vld [vmem:[%s1472_s1 + $0x78] sm:$0xff]  ;;  %341 = vmatpush.bf16.msra.mxu0 %v926_v0  ;;  %1030 = vmatpush.bf16.msra.mxu2 %v926_v0  ;;  %v933_v3 = vld [vmem:[%s1472_s1 + $0x70] sm:$0xff]  ;;  %v932_v5 = vld [vmem:[%s1472_s1 + $0x68] sm:$0xff] }
   0x3   :  { %430 = vmatpush.bf16.msra.mxu1 %v934_v1  ;;  %1038 = vmatpush.bf16.msra.mxu3 %v934_v1 }
   0x6   :  { %342 = vmatpush.bf16.msra.mxu0 %v925_v2  ;;  %1031 = vmatpush.bf16.msra.mxu2 %v925_v2 }
   0x7   :  { %431 = vmatpush.bf16.msra.mxu1 %v933_v3  ;;  %1039 = vmatpush.bf16.msra.mxu3 %v933_v3 }
   0x8   :  { %10 = vsyncpa [#allocation3], 0  ;;  %v923_v6 = vld [vmem:[%s1472_s1 + $0x20] sm:$0xff]  ;;  %v922_v8 = vld [vmem:[%s1472_s1 + $0x18] sm:$0xff]  ;;  %s1076_s17 = smov [#allocation2]   ;;  %s684_s21 = sshll.u32 %s1475_s4, 4  ;;  %s685_s21 = int_to_ptr.hbm [resolvable:$true] %s684_s21 }
   0x9   :  { %v931_v7 = vld [vmem:[%s1472_s1 + $0x60] sm:$0xff]  ;;  %v930_v9 = vld [vmem:[%s1472_s1 + $0x58] sm:$0xff]  ;;  %v921_v10 = vld [vmem:[%s1472_s1 + $0x10] sm:$0xff]  ;;  %s682_s18 = sshll.u32 %s1076_s17, 4  ;;  %vm673_vm0 = vcmask 0   ;;  %s683_s18 = int_to_ptr.vmem [resolvable:$true] %s682_s18 }
   0xa   :  { %343 = vmatpush.bf16.msra.mxu0 %v924_v4  ;;  %1032 = vmatpush.bf16.msra.mxu2 %v924_v4  ;;  %v929_v11 = vld [vmem:[%s1472_s1 + $0x50] sm:$0xff]  ;;  %v920_v12 = vld [vmem:[%s1472_s1 + $0x8] sm:$0xff]  ;;  %v919_v14 = vld [vmem:[%s1472_s1] sm:$0xff] }
   0xb   :  { %432 = vmatpush.bf16.msra.mxu1 %v932_v5  ;;  %1040 = vmatpush.bf16.msra.mxu3 %v932_v5  ;;  %v928_v13 = vld [vmem:[%s1472_s1 + $0x48] sm:$0xff]  ;;  %v927_v15 = vld [vmem:[%s1472_s1 + $0x40] sm:$0xff]  ;;  %v705_v28 = vld [vmem:[%s1471_s0 + $0x10] sm:$0xf] }
   0xc   :  { %v697_v16 = vld [vmem:[%s1471_s0] sm:$0xf]  ;;  %v888_v17 = vld [vmem:[%s1471_s0 + $0x4] sm:$0xf0]  ;;  %v887_v20 = vld [vmem:[%s1471_s0 + $0x4] sm:$0xf] }
   0xd   :  { %v761_v18 = vld [vmem:[%s1471_s0 + $0x80] sm:$0xf]  ;;  %v904_v19 = vld [vmem:[%s1471_s0 + $0x84] sm:$0xf0]  ;;  %v699_v21 = vld [vmem:[%s1471_s0 + $0x8] sm:$0xf0]  ;;  %v698_v24 = vor.u32 %v888_v17, %v697_v16 }
   0xe   :  { %344 = vmatpush.bf16.msra.mxu0 %v923_v6  ;;  %1033 = vmatpush.bf16.msra.mxu2 %v923_v6  ;;  %v903_v22 = vld [vmem:[%s1471_s0 + $0x84] sm:$0xf]  ;;  %v763_v23 = vld [vmem:[%s1471_s0 + $0x88] sm:$0xf0]  ;;  %v762_v25 = vor.u32 %v904_v19, %v761_v18  ;;  %v702_v26 = vor.u32 %v887_v20, %v699_v21  ;;  %v890_v29 = vld [vmem:[%s1471_s0 + $0x14] sm:$0xf0] }
   0xf   :  { %433 = vmatpush.bf16.msra.mxu1 %v931_v7  ;;  %1041 = vmatpush.bf16.msra.mxu3 %v931_v7  ;;  %v766_v27 = vor.u32 %v903_v22, %v763_v23  ;;  %v769_v30 = vld [vmem:[%s1471_s0 + $0x90] sm:$0xf]  ;;  %v906_v31 = vld [vmem:[%s1471_s0 + $0x94] sm:$0xf0]  ;;  %v889_v32 = vld [vmem:[%s1471_s0 + $0x14] sm:$0xf]  ;;  %v706_v36 = vor.u32 %v890_v29, %v705_v28 }
  0x10   :  { %v707_v33 = vld [vmem:[%s1471_s0 + $0x18] sm:$0xf0]  ;;  %v905_v34 = vld [vmem:[%s1471_s0 + $0x94] sm:$0xf]  ;;  %v770_v37 = vor.u32 %v906_v31, %v769_v30  ;;  %v713_v40 = vld [vmem:[%s1471_s0 + $0x20] sm:$0xf] }
  0x11   :  { %v771_v35 = vld [vmem:[%s1471_s0 + $0x98] sm:$0xf0]  ;;  %v710_v38 = vor.u32 %v889_v32, %v707_v33  ;;  %v892_v41 = vld [vmem:[%s1471_s0 + $0x24] sm:$0xf0]  ;;  %v777_v42 = vld [vmem:[%s1471_s0 + $0xa0] sm:$0xf] }
  0x12   :  { %345 = vmatpush.bf16.msra.mxu0 %v922_v8  ;;  %1034 = vmatpush.bf16.msra.mxu2 %v922_v8  ;;  %v774_v39 = vor.u32 %v905_v34, %v771_v35  ;;  %v908_v43 = vld [vmem:[%s1471_s0 + $0xa4] sm:$0xf0]  ;;  %v891_v44 = vld [vmem:[%s1471_s0 + $0x24] sm:$0xf]  ;;  %v715_v45 = vld [vmem:[%s1471_s0 + $0x28] sm:$0xf0]  ;;  %v714_v48 = vor.u32 %v892_v41, %v713_v40 }
  0x13   :  { %434 = vmatpush.bf16.msra.mxu1 %v930_v9  ;;  %1042 = vmatpush.bf16.msra.mxu3 %v930_v9  ;;  %v907_v46 = vld [vmem:[%s1471_s0 + $0xa4] sm:$0xf]  ;;  %v779_v47 = vld [vmem:[%s1471_s0 + $0xa8] sm:$0xf0]  ;;  %v778_v49 = vor.u32 %v908_v43, %v777_v42  ;;  %v718_v50 = vor.u32 %v891_v44, %v715_v45  ;;  %v721_v52 = vld [vmem:[%s1471_s0 + $0x30] sm:$0xf] }
  0x14   :  { %v782_v51 = vor.u32 %v907_v46, %v779_v47  ;;  %v894_v53 = vld [vmem:[%s1471_s0 + $0x34] sm:$0xf0]  ;;  %v785_v54 = vld [vmem:[%s1471_s0 + $0xb0] sm:$0xf]  ;;  %v893_v56 = vld [vmem:[%s1471_s0 + $0x34] sm:$0xf] }
  0x15   :  { %v910_v55 = vld [vmem:[%s1471_s0 + $0xb4] sm:$0xf0]  ;;  %v723_v57 = vld [vmem:[%s1471_s0 + $0x38] sm:$0xf0]  ;;  %v909_v58 = vld [vmem:[%s1471_s0 + $0xb4] sm:$0xf]  ;;  %v722_v60 = vor.u32 %v894_v53, %v721_v52 }
  0x16   :  { %346 = vmatpush.bf16.msra.mxu0 %v921_v10  ;;  %1035 = vmatpush.bf16.msra.mxu2 %v921_v10  ;;  %v787_v59 = vld [vmem:[%s1471_s0 + $0xb8] sm:$0xf0]  ;;  %v786_v61 = vor.u32 %v910_v55, %v785_v54  ;;  %v726_v62 = vor.u32 %v893_v56, %v723_v57  ;;  %v729_v0 = vld [vmem:[%s1471_s0 + $0x40] sm:$0xf]  ;;  %v896_v1 = vld [vmem:[%s1471_s0 + $0x44] sm:$0xf0] }
  0x17   :  { %435 = vmatpush.bf16.msra.mxu1 %v929_v11  ;;  %1043 = vmatpush.bf16.msra.mxu3 %v929_v11  ;;  %v790_v63 = vor.u32 %v909_v58, %v787_v59  ;;  %v793_v2 = vld [vmem:[%s1471_s0 + $0xc0] sm:$0xf]  ;;  %v912_v3 = vld [vmem:[%s1471_s0 + $0xc4] sm:$0xf0]  ;;  %v895_v4 = vld [vmem:[%s1471_s0 + $0x44] sm:$0xf]  ;;  %v730_v8 = vor.u32 %v896_v1, %v729_v0 }
  0x18   :  { %v731_v5 = vld [vmem:[%s1471_s0 + $0x48] sm:$0xf0]  ;;  %v911_v6 = vld [vmem:[%s1471_s0 + $0xc4] sm:$0xf]  ;;  %v794_v9 = vor.u32 %v912_v3, %v793_v2  ;;  %v897_v16 = vld [vmem:[%s1471_s0 + $0x54] sm:$0xf] }
  0x19   :  { %v795_v7 = vld [vmem:[%s1471_s0 + $0xc8] sm:$0xf0]  ;;  %v734_v10 = vor.u32 %v895_v4, %v731_v5  ;;  %v739_v17 = vld [vmem:[%s1471_s0 + $0x58] sm:$0xf0]  ;;  %v913_v18 = vld [vmem:[%s1471_s0 + $0xd4] sm:$0xf] }
  0x1a   :  { %347 = vmatpush.bf16.msra.mxu0 %v920_v12  ;;  %1036 = vmatpush.bf16.msra.mxu2 %v920_v12  ;;  %v798_v11 = vor.u32 %v911_v6, %v795_v7  ;;  %v737_v12 = vld [vmem:[%s1471_s0 + $0x50] sm:$0xf]  ;;  %v803_v19 = vld [vmem:[%s1471_s0 + $0xd8] sm:$0xf0]  ;;  %v742_v22 = vor.u32 %v897_v16, %v739_v17  ;;  %v899_v28 = vld [vmem:[%s1471_s0 + $0x64] sm:$0xf] }
  0x1b   :  { %436 = vmatpush.bf16.msra.mxu1 %v928_v13  ;;  %1044 = vmatpush.bf16.msra.mxu3 %v928_v13  ;;  %v898_v13 = vld [vmem:[%s1471_s0 + $0x54] sm:$0xf0]  ;;  %v806_v23 = vor.u32 %v913_v18, %v803_v19  ;;  %v747_v29 = vld [vmem:[%s1471_s0 + $0x68] sm:$0xf0]  ;;  %v915_v30 = vld [vmem:[%s1471_s0 + $0xe4] sm:$0xf] }
  0x1c   :  { %v738_v20 = vor.u32 %v898_v13, %v737_v12  ;;  %v811_v31 = vld [vmem:[%s1471_s0 + $0xe8] sm:$0xf0]  ;;  %v750_v34 = vor.u32 %v899_v28, %v747_v29  ;;  %v901_v40 = vld [vmem:[%s1471_s0 + $0x74] sm:$0xf]  ;;  %v755_v41 = vld [vmem:[%s1471_s0 + $0x78] sm:$0xf0] }
  0x1d   :  { %v814_v35 = vor.u32 %v915_v30, %v811_v31  ;;  %v917_v42 = vld [vmem:[%s1471_s0 + $0xf4] sm:$0xf]  ;;  %v819_v43 = vld [vmem:[%s1471_s0 + $0xf8] sm:$0xf0]  ;;  %v758_v46 = vor.u32 %v901_v40, %v755_v41 }
  0x1e   :  { %348 = vmatpush.bf16.msra.mxu0 %v919_v14  ;;  %1037 = vmatpush.bf16.msra.mxu2 %v919_v14  ;;  %v801_v14 = vld [vmem:[%s1471_s0 + $0xd0] sm:$0xf]  ;;  %v822_v47 = vor.u32 %v917_v42, %v819_v43 }
  0x1f   :  { %437 = vmatpush.bf16.msra.mxu1 %v927_v15  ;;  %1045 = vmatpush.bf16.msra.mxu3 %v927_v15  ;;  %v914_v15 = vld [vmem:[%s1471_s0 + $0xd4] sm:$0xf0] }
  0x20   :  { %v802_v21 = vor.u32 %v914_v15, %v801_v14 }
  0x21   :  { %349 = vmatmul.bf16.vlgmr.msra.gmra.mxu0 %v698_v24  ;;  %389 = vmatmul.bf16.vlgmr.msra.gmra.mxu2 %v762_v25  ;;  %v745_v24 = vld [vmem:[%s1471_s0 + $0x60] sm:$0xf]  ;;  %v900_v25 = vld [vmem:[%s1471_s0 + $0x64] sm:$0xf0] }
  0x22   :  { %438 = vmatmul.bf16.vlgmr.msra.gmra.mxu1 %v702_v26  ;;  %478 = vmatmul.bf16.vlgmr.msra.gmra.mxu3 %v766_v27  ;;  %v809_v26 = vld [vmem:[%s1471_s0 + $0xe0] sm:$0xf]  ;;  %v916_v27 = vld [vmem:[%s1471_s0 + $0xe4] sm:$0xf0]  ;;  %v746_v32 = vor.u32 %v900_v25, %v745_v24 }
  0x23   :  { %v810_v33 = vor.u32 %v916_v27, %v809_v26 }
  0x31   :  { %354 = vmatmul.bf16.gmra.mxu0 %v706_v36  ;;  %394 = vmatmul.bf16.gmra.mxu2 %v770_v37  ;;  %v753_v36 = vld [vmem:[%s1471_s0 + $0x70] sm:$0xf]  ;;  %v902_v37 = vld [vmem:[%s1471_s0 + $0x74] sm:$0xf0] }
  0x32   :  { %443 = vmatmul.bf16.gmra.mxu1 %v710_v38  ;;  %483 = vmatmul.bf16.gmra.mxu3 %v774_v39  ;;  %v817_v38 = vld [vmem:[%s1471_s0 + $0xf0] sm:$0xf]  ;;  %v918_v39 = vld [vmem:[%s1471_s0 + $0xf4] sm:$0xf0]  ;;  %v754_v44 = vor.u32 %v902_v37, %v753_v36 }
  0x33   :  { %v818_v45 = vor.u32 %v918_v39, %v817_v38 }
  0x41   :  { %359 = vmatmul.bf16.gmra.mxu0 %v714_v48  ;;  %399 = vmatmul.bf16.gmra.mxu2 %v778_v49  ;;  %v1345_v48 = vld [vmem:[%s1473_s2] ss:$0 sm:$0xff] }
  0x42   :  { %448 = vmatmul.bf16.gmra.mxu1 %v718_v50  ;;  %488 = vmatmul.bf16.gmra.mxu3 %v782_v51 }
  0x51   :  { %364 = vmatmul.bf16.gmra.mxu0 %v722_v60  ;;  %404 = vmatmul.bf16.gmra.mxu2 %v786_v61 }
  0x52   :  { %453 = vmatmul.bf16.gmra.mxu1 %v726_v62  ;;  %493 = vmatmul.bf16.gmra.mxu3 %v790_v63 }
  0x61   :  { %369 = vmatmul.bf16.gmra.mxu0 %v730_v8  ;;  %409 = vmatmul.bf16.gmra.mxu2 %v794_v9 }
  0x62   :  { %458 = vmatmul.bf16.gmra.mxu1 %v734_v10  ;;  %498 = vmatmul.bf16.gmra.mxu3 %v798_v11 }
  0x71   :  { %374 = vmatmul.bf16.gmra.mxu0 %v738_v20  ;;  %414 = vmatmul.bf16.gmra.mxu2 %v802_v21 }
  0x72   :  { %463 = vmatmul.bf16.gmra.mxu1 %v742_v22  ;;  %503 = vmatmul.bf16.gmra.mxu3 %v806_v23 }
  0x81   :  { %379 = vmatmul.bf16.gmra.mxu0 %v746_v32  ;;  %419 = vmatmul.bf16.gmra.mxu2 %v810_v33 }
  0x82   :  { %468 = vmatmul.bf16.gmra.mxu1 %v750_v34  ;;  %508 = vmatmul.bf16.gmra.mxu3 %v814_v35 }
  0x91   :  { %384 = vmatmul.bf16.gmra.mxu0 %v754_v44  ;;  %424 = vmatmul.bf16.gmra.mxu2 %v818_v45 }
  0x92   :  { %473 = vmatmul.bf16.gmra.mxu1 %v758_v46  ;;  %513 = vmatmul.bf16.gmra.mxu3 %v822_v47 }
  0x9e   :  { %v350_v49 = vpop.f32.mrf.mxu0 }
  0x9f   :  { %v351_v50 = vadd.f32 %v1345_v48, %v350_v49  ;;  %v439_v51 = vpop.f32.mrf.mxu1 }
  0xa1   :  { %v440_v52 = vadd.f32 %v439_v51, %v351_v50 }
  0xa3   :  { %v519_v57 = vmax.f32 %v440_v52, 0.0 }
  0xa4   :  { %v390_v53 = vpop.f32.mrf.mxu2 }
  0xa5   :  { %v391_v54 = vadd.f32 %v1345_v48, %v390_v53  ;;  %v479_v55 = vpop.f32.mrf.mxu3 }
  0xa6   :  { %v352_v56 = vpop.f32.mrf.mxu0 }
  0xa7   :  { %v480_v58 = vadd.f32 %v479_v55, %v391_v54  ;;  %v353_v59 = vadd.f32 %v1345_v48, %v352_v56  ;;  %v441_v60 = vpop.f32.mrf.mxu1 }
  0xa9   :  { %v535_v61 = vmax.f32 %v480_v58, 0.0  ;;  %v442_v62 = vadd.f32 %v441_v60, %v353_v59 }
  0xab   :  { %v615_v63 = vsub.f32 %v535_v61, %v519_v57  ;;  %v520_v0 = vmax.f32 %v442_v62, 0.0 }
  0xac   :  { %v392_v1 = vpop.f32.mrf.mxu2 }
  0xad   :  { %v938_v2 = vpack.c.bf16 %v520_v0, %v519_v57  ;;  %v393_v3 = vadd.f32 %v1345_v48, %v392_v1  ;;  %v481_v4 = vpop.f32.mrf.mxu3  ;;  %v631_v14 = vand.u32 2147483647, %v615_v63 }
  0xae   :  { %v355_v5 = vpop.f32.mrf.mxu0 }
  0xaf   :  { %939 = vst [vmem:[%s1474_s3] sm:$0xff] %v938_v2   ;;  %v482_v6 = vadd.f32 %v481_v4, %v393_v3  ;;  %v356_v7 = vadd.f32 %v1345_v48, %v355_v5  ;;  %v444_v8 = vpop.f32.mrf.mxu1 }
  0xb1   :  { %v536_v9 = vmax.f32 %v482_v6, 0.0  ;;  %v445_v12 = vadd.f32 %v444_v8, %v356_v7 }
  0xb3   :  { %v978_v10 = vpack.c.bf16 %v536_v9, %v535_v61  ;;  %v616_v11 = vsub.f32 %v536_v9, %v520_v0  ;;  %v521_v20 = vmax.f32 %v445_v12, 0.0 }
  0xb4   :  { %v395_v13 = vpop.f32.mrf.mxu2 }
  0xb5   :  { %1022 = vst [vmem:[%s1474_s3 + $0x40] sm:$0xff] %v978_v10   ;;  %v632_v15 = vand.u32 2147483647, %v616_v11  ;;  %v396_v16 = vadd.f32 %v1345_v48, %v395_v13  ;;  %v484_v17 = vpop.f32.mrf.mxu3 }
  0xb6   :  { %v357_v18 = vpop.f32.mrf.mxu0 }
  0xb7   :  { %v647_v19 = vadd.f32 %v632_v15, %v631_v14  ;;  %v485_v21 = vadd.f32 %v484_v17, %v396_v16  ;;  %v358_v22 = vadd.f32 %v1345_v48, %v357_v18  ;;  %v446_v23 = vpop.f32.mrf.mxu1 }
  0xb9   :  { %v537_v24 = vmax.f32 %v485_v21, 0.0  ;;  %v447_v25 = vadd.f32 %v446_v23, %v358_v22 }
  0xbb   :  { %v617_v26 = vsub.f32 %v537_v24, %v521_v20  ;;  %v522_v27 = vmax.f32 %v447_v25, 0.0 }
  0xbc   :  { %v397_v28 = vpop.f32.mrf.mxu2 }
  0xbd   :  { %v633_v29 = vand.u32 2147483647, %v617_v26  ;;  %v943_v30 = vpack.c.bf16 %v522_v27, %v521_v20  ;;  %v398_v31 = vadd.f32 %v1345_v48, %v397_v28  ;;  %v486_v32 = vpop.f32.mrf.mxu3 }
  0xbe   :  { %v360_v33 = vpop.f32.mrf.mxu0 }
  0xbf   :  { %v648_v34 = vadd.f32 %v647_v19, %v633_v29  ;;  %1015 = vst [vmem:[%s1474_s3 + $0x8] sm:$0xff] %v943_v30   ;;  %v487_v35 = vadd.f32 %v486_v32, %v398_v31  ;;  %v361_v36 = vadd.f32 %v1345_v48, %v360_v33  ;;  %v449_v37 = vpop.f32.mrf.mxu1 }
  0xc1   :  { %v538_v38 = vmax.f32 %v487_v35, 0.0  ;;  %v450_v41 = vadd.f32 %v449_v37, %v361_v36 }
  0xc3   :  { %v983_v39 = vpack.c.bf16 %v538_v38, %v537_v24  ;;  %v618_v40 = vsub.f32 %v538_v38, %v522_v27  ;;  %v523_v49 = vmax.f32 %v450_v41, 0.0 }
  0xc4   :  { %v400_v42 = vpop.f32.mrf.mxu2 }
  0xc5   :  { %1023 = vst [vmem:[%s1474_s3 + $0x48] sm:$0xff] %v983_v39   ;;  %v634_v43 = vand.u32 2147483647, %v618_v40  ;;  %v401_v44 = vadd.f32 %v1345_v48, %v400_v42  ;;  %v489_v45 = vpop.f32.mrf.mxu3 }
  0xc6   :  { %v362_v46 = vpop.f32.mrf.mxu0 }
  0xc7   :  { %v649_v47 = vadd.f32 %v648_v34, %v634_v43  ;;  %v490_v50 = vadd.f32 %v489_v45, %v401_v44  ;;  %v363_v51 = vadd.f32 %v1345_v48, %v362_v46  ;;  %v451_v52 = vpop.f32.mrf.mxu1 }
  0xc9   :  { %v539_v53 = vmax.f32 %v490_v50, 0.0  ;;  %v452_v54 = vadd.f32 %v451_v52, %v363_v51 }
  0xcb   :  { %v619_v55 = vsub.f32 %v539_v53, %v523_v49  ;;  %v524_v56 = vmax.f32 %v452_v54, 0.0 }
  0xcc   :  { %v402_v57 = vpop.f32.mrf.mxu2 }
  0xcd   :  { %v635_v58 = vand.u32 2147483647, %v619_v55  ;;  %v948_v59 = vpack.c.bf16 %v524_v56, %v523_v49  ;;  %v403_v60 = vadd.f32 %v1345_v48, %v402_v57  ;;  %v491_v61 = vpop.f32.mrf.mxu3 }
  0xce   :  { %v365_v62 = vpop.f32.mrf.mxu0 }
  0xcf   :  { %v650_v63 = vadd.f32 %v649_v47, %v635_v58  ;;  %1016 = vst [vmem:[%s1474_s3 + $0x10] sm:$0xff] %v948_v59   ;;  %v492_v0 = vadd.f32 %v491_v61, %v403_v60  ;;  %v454_v1 = vpop.f32.mrf.mxu1  ;;  %v366_v5 = vadd.f32 %v1345_v48, %v365_v62 }
  0xd1   :  { %v540_v2 = vmax.f32 %v492_v0, 0.0  ;;  %v1380_v11 = vadd.f32 %v454_v1, %v366_v5 }
  0xd3   :  { %v988_v3 = vpack.c.bf16 %v540_v2, %v539_v53  ;;  %v620_v4 = vsub.f32 %v540_v2, %v524_v56  ;;  %v525_v16 = vmax.f32 %v1380_v11, 0.0 }
  0xd4   :  { %v405_v6 = vpop.f32.mrf.mxu2 }
  0xd5   :  { %1024 = vst [vmem:[%s1474_s3 + $0x50] sm:$0xff] %v988_v3   ;;  %v636_v7 = vand.u32 2147483647, %v620_v4  ;;  %v494_v8 = vpop.f32.mrf.mxu3  ;;  %v406_v14 = vadd.f32 %v1345_v48, %v405_v6 }
  0xd6   :  { %v367_v9 = vpop.f32.mrf.mxu0 }
  0xd7   :  { %v1378_v10 = vadd.f32 %v650_v63, %v636_v7  ;;  %v368_v12 = vadd.f32 %v1345_v48, %v367_v9  ;;  %v456_v13 = vpop.f32.mrf.mxu1  ;;  %v1388_v19 = vadd.f32 %v494_v8, %v406_v14 }
  0xd9   :  { %v1384_v15 = vadd.f32 %v456_v13, %v368_v12  ;;  %v541_v26 = vmax.f32 %v1388_v19, 0.0 }
  0xdb   :  { %v526_v17 = vmax.f32 %v1384_v15, 0.0 }
  0xdc   :  { %v407_v18 = vpop.f32.mrf.mxu2 }
  0xdd   :  { %v953_v20 = vpack.c.bf16 %v526_v17, %v525_v16  ;;  %v408_v21 = vadd.f32 %v1345_v48, %v407_v18  ;;  %v496_v22 = vpop.f32.mrf.mxu3 }
  0xde   :  { %v370_v23 = vpop.f32.mrf.mxu0 }
  0xdf   :  { %1017 = vst [vmem:[%s1474_s3 + $0x18] sm:$0xff] %v953_v20   ;;  %v1398_v24 = vadd.f32 %v496_v22, %v408_v21  ;;  %v459_v25 = vpop.f32.mrf.mxu1  ;;  %v371_v29 = vadd.f32 %v1345_v48, %v370_v23 }
  0xe1   :  { %v542_v27 = vmax.f32 %v1398_v24, 0.0  ;;  %v1410_v33 = vadd.f32 %v459_v25, %v371_v29 }
  0xe3   :  { %v993_v28 = vpack.c.bf16 %v542_v27, %v541_v26  ;;  %v527_v38 = vmax.f32 %v1410_v33, 0.0 }
  0xe4   :  { %v410_v30 = vpop.f32.mrf.mxu2 }
  0xe5   :  { %1025 = vst [vmem:[%s1474_s3 + $0x58] sm:$0xff] %v993_v28   ;;  %v499_v31 = vpop.f32.mrf.mxu3  ;;  %v411_v36 = vadd.f32 %v1345_v48, %v410_v30  ;;  %v621_v30 = vsub.f32 %v541_v26, %v525_v16 }
  0xe6   :  { %v372_v32 = vpop.f32.mrf.mxu0 }
  0xe7   :  { %v373_v34 = vadd.f32 %v1345_v48, %v372_v32  ;;  %v461_v35 = vpop.f32.mrf.mxu1  ;;  %v500_v41 = vadd.f32 %v499_v31, %v411_v36  ;;  %v622_v36 = vsub.f32 %v542_v27, %v526_v17  ;;  %v637_v19 = vand.u32 2147483647, %v621_v30 }
  0xe9   :  { %v1414_v37 = vadd.f32 %v461_v35, %v373_v34  ;;  %v543_v49 = vmax.f32 %v500_v41, 0.0  ;;  %v652_v17 = vadd.f32 %v1378_v10, %v637_v19 }
  0xeb   :  { %v528_v39 = vmax.f32 %v1414_v37, 0.0  ;;  %v623_v16 = vsub.f32 %v543_v49, %v527_v38 }
  0xec   :  { %v412_v40 = vpop.f32.mrf.mxu2 }
  0xed   :  { %v958_v42 = vpack.c.bf16 %v528_v39, %v527_v38  ;;  %v413_v43 = vadd.f32 %v1345_v48, %v412_v40  ;;  %v501_v44 = vpop.f32.mrf.mxu3  ;;  %v639_v24 = vand.u32 2147483647, %v623_v16 }
  0xee   :  { %v375_v45 = vpop.f32.mrf.mxu0 }
  0xef   :  { %1018 = vst [vmem:[%s1474_s3 + $0x20] sm:$0xff] %v958_v42   ;;  %v502_v46 = vadd.f32 %v501_v44, %v413_v43  ;;  %v464_v47 = vpop.f32.mrf.mxu1  ;;  %v376_v52 = vadd.f32 %v1345_v48, %v375_v45  ;;  %v638_v44 = vand.u32 2147483647, %v622_v36 }
  0xf1   :  { %v544_v50 = vmax.f32 %v502_v46, 0.0  ;;  %v465_v56 = vadd.f32 %v464_v47, %v376_v52 }
  0xf3   :  { %v998_v51 = vpack.c.bf16 %v544_v50, %v543_v49  ;;  %v529_v61 = vmax.f32 %v465_v56, 0.0  ;;  %v624_v15 = vsub.f32 %v544_v50, %v528_v39 }
  0xf4   :  { %v415_v53 = vpop.f32.mrf.mxu2 }
  0xf5   :  { %1026 = vst [vmem:[%s1474_s3 + $0x60] sm:$0xff] %v998_v51   ;;  %v504_v54 = vpop.f32.mrf.mxu3  ;;  %v416_v59 = vadd.f32 %v1345_v48, %v415_v53  ;;  %v653_v51 = vadd.f32 %v652_v17, %v638_v44  ;;  %v640_v52 = vand.u32 2147483647, %v624_v15 }
  0xf6   :  { %v377_v55 = vpop.f32.mrf.mxu0 }
  0xf7   :  { %v378_v57 = vadd.f32 %v1345_v48, %v377_v55  ;;  %v466_v58 = vpop.f32.mrf.mxu1  ;;  %v505_v0 = vadd.f32 %v504_v54, %v416_v59  ;;  %v654_v50 = vadd.f32 %v653_v51, %v639_v24 }
  0xf9   :  { %v467_v60 = vadd.f32 %v466_v58, %v378_v57  ;;  %v545_v7 = vmax.f32 %v505_v0, 0.0 }
  0xfb   :  { %v530_v62 = vmax.f32 %v467_v60, 0.0  ;;  %v625_v27 = vsub.f32 %v545_v7, %v529_v61  ;;  %v655_v60 = vadd.f32 %v654_v50, %v640_v52 }
  0xfc   :  { %v417_v63 = vpop.f32.mrf.mxu2 }
  0xfd   :  { %v963_v1 = vpack.c.bf16 %v530_v62, %v529_v61  ;;  %v418_v2 = vadd.f32 %v1345_v48, %v417_v63  ;;  %v506_v3 = vpop.f32.mrf.mxu3  ;;  %v641_v10 = vand.u32 2147483647, %v625_v27 }
  0xfe   :  { %v380_v4 = vpop.f32.mrf.mxu0 }
  0xff   :  { %1019 = vst [vmem:[%s1474_s3 + $0x28] sm:$0xff] %v963_v1   ;;  %v507_v5 = vadd.f32 %v506_v3, %v418_v2  ;;  %v469_v6 = vpop.f32.mrf.mxu1  ;;  %v381_v12 = vadd.f32 %v1345_v48, %v380_v4  ;;  %v656_v1 = vadd.f32 %v655_v60, %v641_v10 }
 0x101   :  { %v546_v8 = vmax.f32 %v507_v5, 0.0  ;;  %v470_v20 = vadd.f32 %v469_v6, %v381_v12 }
 0x103   :  { %v1003_v9 = vpack.c.bf16 %v546_v8, %v545_v7  ;;  %v531_v28 = vmax.f32 %v470_v20, 0.0  ;;  %v626_v54 = vsub.f32 %v546_v8, %v530_v62 }
 0x104   :  { %v420_v13 = vpop.f32.mrf.mxu2 }
 0x105   :  { %1027 = vst [vmem:[%s1474_s3 + $0x68] sm:$0xff] %v1003_v9   ;;  %v509_v14 = vpop.f32.mrf.mxu3  ;;  %v421_v23 = vadd.f32 %v1345_v48, %v420_v13  ;;  %v642_v61 = vand.u32 2147483647, %v626_v54 }
 0x106   :  { %v382_v18 = vpop.f32.mrf.mxu0 }
 0x107   :  { %v383_v21 = vadd.f32 %v1345_v48, %v382_v18  ;;  %v471_v22 = vpop.f32.mrf.mxu1  ;;  %v510_v32 = vadd.f32 %v509_v14, %v421_v23  ;;  %v657_v7 = vadd.f32 %v656_v1, %v642_v61 }
 0x109   :  { %v472_v25 = vadd.f32 %v471_v22, %v383_v21  ;;  %v547_v26 = vmax.f32 %v510_v32, 0.0 }
 0x10b   :  { %v532_v29 = vmax.f32 %v472_v25, 0.0  ;;  %v627_v56 = vsub.f32 %v547_v26, %v531_v28 }
 0x10c   :  { %v422_v31 = vpop.f32.mrf.mxu2 }
 0x10d   :  { %v968_v33 = vpack.c.bf16 %v532_v29, %v531_v28  ;;  %v423_v34 = vadd.f32 %v1345_v48, %v422_v31  ;;  %v511_v35 = vpop.f32.mrf.mxu3  ;;  %v643_v3 = vand.u32 2147483647, %v627_v56 }
 0x10e   :  { %v385_v40 = vpop.f32.mrf.mxu0 }
 0x10f   :  { %1020 = vst [vmem:[%s1474_s3 + $0x30] sm:$0xff] %v968_v33   ;;  %v512_v11 = vadd.f32 %v511_v35, %v423_v34  ;;  %v474_v41 = vpop.f32.mrf.mxu1  ;;  %v386_v43 = vadd.f32 %v1345_v48, %v385_v40  ;;  %v658_v12 = vadd.f32 %v657_v7, %v643_v3 }
 0x111   :  { %v548_v42 = vmax.f32 %v512_v11, 0.0  ;;  %v475_v47 = vadd.f32 %v474_v41, %v386_v43 }
 0x113   :  { %v1008_v45 = vpack.c.bf16 %v548_v42, %v547_v26  ;;  %v533_v57 = vmax.f32 %v475_v47, 0.0  ;;  %v628_v63 = vsub.f32 %v548_v42, %v532_v29 }
 0x114   :  { %v425_v46 = vpop.f32.mrf.mxu2 }
 0x115   :  { %1028 = vst [vmem:[%s1474_s3 + $0x70] sm:$0xff] %v1008_v45   ;;  %v426_v38 = vadd.f32 %v1345_v48, %v425_v46  ;;  %v514_v49 = vpop.f32.mrf.mxu3  ;;  %v644_v8 = vand.u32 2147483647, %v628_v63 }
 0x116   :  { %v387_v53 = vpop.f32.mrf.mxu0 }
 0x117   :  { %v515_v37 = vadd.f32 %v514_v49, %v426_v38  ;;  %v388_v39 = vadd.f32 %v1345_v48, %v387_v53  ;;  %v476_v55 = vpop.f32.mrf.mxu1  ;;  %v659_v21 = vadd.f32 %v658_v12, %v644_v8 }
 0x119   :  { %v549_v58 = vmax.f32 %v515_v37, 0.0  ;;  %v477_v59 = vadd.f32 %v476_v55, %v388_v39 }
 0x11b   :  { %v534_v0 = vmax.f32 %v477_v59, 0.0  ;;  %v629_v4 = vsub.f32 %v549_v58, %v533_v57 }
 0x11c   :  { %v427_v2 = vpop.f32.mrf.mxu2 }
 0x11d   :  { %v973_v5 = vpack.c.bf16 %v534_v0, %v533_v57  ;;  %v428_v62 = vadd.f32 %v1345_v48, %v427_v2  ;;  %v516_v6 = vpop.f32.mrf.mxu3  ;;  %v645_v13 = vand.u32 2147483647, %v629_v4 }
 0x11f   :  { %1021 = vst [vmem:[%s1474_s3 + $0x38] sm:$0xff] %v973_v5   ;;  %v517_v9 = vadd.f32 %v516_v6, %v428_v62  ;;  %v660_v48 = vadd.f32 %v659_v21, %v645_v13 }
 0x121   :  { %v550_v14 = vmax.f32 %v517_v9, 0.0 }
 0x123   :  { %v1013_v18 = vpack.c.bf16 %v550_v14, %v549_v58  ;;  %v630_v20 = vsub.f32 %v550_v14, %v534_v0 }
 0x125   :  { %1029 = vst [vmem:[%s1474_s3 + $0x78] sm:$0xff] %v1013_v18   ;;  %v646_v22 = vand.u32 2147483647, %v630_v20 }
 0x127   :  { %v661_v23 = vadd.f32 %v660_v48, %v646_v22 }
 0x129   :  { %662 = vadd.xlane.f32.xlu0 %v661_v23 }
 0x19c   :  { %v663_v25 = vpop.xlane.xlu0 %662 }
 0x19d   :  { %v664_v28 = vrot.slane %v663_v25, 4 }
 0x19f   :  { %v665_v29 = vadd.f32 %v664_v28, %v663_v25 }
 0x1a1   :  { %v666_v30 = vrot.slane %v665_v29, 2 }
 0x1a3   :  { %v667_v31 = vadd.f32 %v666_v30, %v665_v29 }
 0x1a5   :  { %v668_v32 = vrot.slane %v667_v31, 1 }
 0x1a7   :  { %v669_v33 = vadd.f32 %v668_v32, %v667_v31 }
 0x1a9   :  { %1046 = vpush %v669_v33 }
 0x1da   :  { %s1047_s22 = spop %1046 }
 0x1db   :  { %s671_s3 = smul.f32 0.00061035156, %s1047_s22 }
 0x1dd   :  { %v672_v34 = vstv %s671_s3 }
 0x1de   :  { %674 = vst.msk [vmem:[#allocation2] sm:$0x1] %vm673_vm0, %v672_v34 }
 0x1df   :  { %687 = dma.vmem_to_hbm [thread:$0]  %s683_s18, 16, %s685_s21, [#allocation3]  }
 0x1e0   :  { %1074 = dma.done.wait [#allocation3], 16  }
 0x1e1   :  { %1075 = vsyncadd [#allocation3], 4294967280 }
 0x1e2   :  { %694 = vsyncpa [#allocation3], 1 }

// kernel: generator_loss.10
= control target key start
LH: loop header
LB: loop body
LE: loop exit
PB: predicated region body
PF: predicated region fallthrough
CT: control target
= control target key end

     0   :  { %s652_s0 = inlined_call_operand.vmem [shape: bf16[64,256], index: 0, kind: input, shape index: {}]   ;;  %s653_s1 = inlined_call_operand.vmem [shape: bf16[256,128], index: 1, kind: input, shape index: {}]   ;;  %s654_s2 = inlined_call_operand.vmem [shape: f32[1,128], index: 2, kind: input, shape index: {}]   ;;  %s655_s3 = inlined_call_operand.vmem [shape: bf16[64,128], index: 3, kind: output, shape index: {0}]   ;;  %s656_s4 = inlined_call_operand.hbm [shape: f32[1,1], index: 4, kind: output, shape index: {1}]  }
   0x1   :  { %v434_v0 = vld [vmem:[%s653_s1 + $0x38] sm:$0xff]  ;;  %v433_v2 = vld [vmem:[%s653_s1 + $0x30] sm:$0xff]  ;;  %v432_v4 = vld [vmem:[%s653_s1 + $0x28] sm:$0xff] }
   0x2   :  { %v442_v1 = vld [vmem:[%s653_s1 + $0x78] sm:$0xff]  ;;  %197 = vmatpush.bf16.msra.mxu0 %v434_v0  ;;  %466 = vmatpush.bf16.msra.mxu2 %v434_v0  ;;  %v441_v3 = vld [vmem:[%s653_s1 + $0x70] sm:$0xff]  ;;  %v440_v5 = vld [vmem:[%s653_s1 + $0x68] sm:$0xff] }
   0x3   :  { %226 = vmatpush.bf16.msra.mxu1 %v442_v1  ;;  %474 = vmatpush.bf16.msra.mxu3 %v442_v1 }
   0x6   :  { %198 = vmatpush.bf16.msra.mxu0 %v433_v2  ;;  %467 = vmatpush.bf16.msra.mxu2 %v433_v2 }
   0x7   :  { %227 = vmatpush.bf16.msra.mxu1 %v441_v3  ;;  %475 = vmatpush.bf16.msra.mxu3 %v441_v3 }
   0x8   :  { %10 = vsyncpa [#allocation3], 0  ;;  %v431_v6 = vld [vmem:[%s653_s1 + $0x20] sm:$0xff]  ;;  %v430_v8 = vld [vmem:[%s653_s1 + $0x18] sm:$0xff]  ;;  %s512_s7 = smov [#allocation2]   ;;  %s312_s11 = sshll.u32 %s656_s4, 4  ;;  %s313_s11 = int_to_ptr.hbm [resolvable:$true] %s312_s11 }
   0x9   :  { %v439_v7 = vld [vmem:[%s653_s1 + $0x60] sm:$0xff]  ;;  %v438_v9 = vld [vmem:[%s653_s1 + $0x58] sm:$0xff]  ;;  %v429_v10 = vld [vmem:[%s653_s1 + $0x10] sm:$0xff]  ;;  %s310_s8 = sshll.u32 %s512_s7, 4  ;;  %vm301_vm0 = vcmask 0   ;;  %s311_s8 = int_to_ptr.vmem [resolvable:$true] %s310_s8 }
   0xa   :  { %199 = vmatpush.bf16.msra.mxu0 %v432_v4  ;;  %468 = vmatpush.bf16.msra.mxu2 %v432_v4  ;;  %v437_v11 = vld [vmem:[%s653_s1 + $0x50] sm:$0xff]  ;;  %v428_v12 = vld [vmem:[%s653_s1 + $0x8] sm:$0xff]  ;;  %v427_v14 = vld [vmem:[%s653_s1] sm:$0xff] }
   0xb   :  { %228 = vmatpush.bf16.msra.mxu1 %v440_v5  ;;  %476 = vmatpush.bf16.msra.mxu3 %v440_v5  ;;  %v436_v13 = vld [vmem:[%s653_s1 + $0x48] sm:$0xff]  ;;  %v435_v15 = vld [vmem:[%s653_s1 + $0x40] sm:$0xff]  ;;  %v333_v28 = vld [vmem:[%s652_s0 + $0x10] sm:$0xf] }
   0xc   :  { %v325_v16 = vld [vmem:[%s652_s0] sm:$0xf]  ;;  %v420_v17 = vld [vmem:[%s652_s0 + $0x4] sm:$0xf0]  ;;  %v419_v20 = vld [vmem:[%s652_s0 + $0x4] sm:$0xf] }
   0xd   :  { %v341_v18 = vld [vmem:[%s652_s0 + $0x20] sm:$0xf]  ;;  %v424_v19 = vld [vmem:[%s652_s0 + $0x24] sm:$0xf0]  ;;  %v327_v21 = vld [vmem:[%s652_s0 + $0x8] sm:$0xf0]  ;;  %v326_v24 = vor.u32 %v420_v17, %v325_v16 }
   0xe   :  { %200 = vmatpush.bf16.msra.mxu0 %v431_v6  ;;  %469 = vmatpush.bf16.msra.mxu2 %v431_v6  ;;  %v423_v22 = vld [vmem:[%s652_s0 + $0x24] sm:$0xf]  ;;  %v343_v23 = vld [vmem:[%s652_s0 + $0x28] sm:$0xf0]  ;;  %v342_v25 = vor.u32 %v424_v19, %v341_v18  ;;  %v330_v26 = vor.u32 %v419_v20, %v327_v21  ;;  %v422_v29 = vld [vmem:[%s652_s0 + $0x14] sm:$0xf0] }
   0xf   :  { %229 = vmatpush.bf16.msra.mxu1 %v439_v7  ;;  %477 = vmatpush.bf16.msra.mxu3 %v439_v7  ;;  %v346_v27 = vor.u32 %v423_v22, %v343_v23  ;;  %v349_v30 = vld [vmem:[%s652_s0 + $0x30] sm:$0xf]  ;;  %v426_v31 = vld [vmem:[%s652_s0 + $0x34] sm:$0xf0]  ;;  %v421_v32 = vld [vmem:[%s652_s0 + $0x14] sm:$0xf]  ;;  %v334_v36 = vor.u32 %v422_v29, %v333_v28 }
  0x10   :  { %v335_v33 = vld [vmem:[%s652_s0 + $0x18] sm:$0xf0]  ;;  %v425_v34 = vld [vmem:[%s652_s0 + $0x34] sm:$0xf]  ;;  %v350_v37 = vor.u32 %v426_v31, %v349_v30  ;;  %v485_v41 = vld [vmem:[%s654_s2] ss:$0 sm:$0xff] }
  0x11   :  { %v351_v35 = vld [vmem:[%s652_s0 + $0x38] sm:$0xf0]  ;;  %v338_v38 = vor.u32 %v421_v32, %v335_v33 }
  0x12   :  { %201 = vmatpush.bf16.msra.mxu0 %v430_v8  ;;  %470 = vmatpush.bf16.msra.mxu2 %v430_v8  ;;  %v354_v39 = vor.u32 %v425_v34, %v351_v35 }
  0x13   :  { %230 = vmatpush.bf16.msra.mxu1 %v438_v9  ;;  %478 = vmatpush.bf16.msra.mxu3 %v438_v9 }
  0x16   :  { %202 = vmatpush.bf16.msra.mxu0 %v429_v10  ;;  %471 = vmatpush.bf16.msra.mxu2 %v429_v10 }
  0x17   :  { %231 = vmatpush.bf16.msra.mxu1 %v437_v11  ;;  %479 = vmatpush.bf16.msra.mxu3 %v437_v11 }
  0x1a   :  { %203 = vmatpush.bf16.msra.mxu0 %v428_v12  ;;  %472 = vmatpush.bf16.msra.mxu2 %v428_v12 }
  0x1b   :  { %232 = vmatpush.bf16.msra.mxu1 %v436_v13  ;;  %480 = vmatpush.bf16.msra.mxu3 %v436_v13 }
  0x1e   :  { %204 = vmatpush.bf16.msra.mxu0 %v427_v14  ;;  %473 = vmatpush.bf16.msra.mxu2 %v427_v14 }
  0x1f   :  { %233 = vmatpush.bf16.msra.mxu1 %v435_v15  ;;  %481 = vmatpush.bf16.msra.mxu3 %v435_v15 }
  0x21   :  { %205 = vmatmul.bf16.vlgmr.msra.gmra.mxu0 %v326_v24  ;;  %215 = vmatmul.bf16.vlgmr.msra.gmra.mxu2 %v342_v25 }
  0x22   :  { %234 = vmatmul.bf16.vlgmr.msra.gmra.mxu1 %v330_v26  ;;  %244 = vmatmul.bf16.vlgmr.msra.gmra.mxu3 %v346_v27 }
  0x31   :  { %210 = vmatmul.bf16.gmra.mxu0 %v334_v36  ;;  %220 = vmatmul.bf16.gmra.mxu2 %v350_v37 }
  0x32   :  { %239 = vmatmul.bf16.gmra.mxu1 %v338_v38  ;;  %249 = vmatmul.bf16.gmra.mxu3 %v354_v39 }
  0x9e   :  { %v206_v40 = vpop.f32.mrf.mxu0 }
  0x9f   :  { %v235_v42 = vpop.f32.mrf.mxu1  ;;  %v207_v43 = vadd.f32 %v485_v41, %v206_v40 }
  0xa1   :  { %v236_v47 = vadd.f32 %v235_v42, %v207_v43 }
  0xa3   :  { %v255_v52 = vmax.f32 %v236_v47, 0.0 }
  0xa4   :  { %v216_v44 = vpop.f32.mrf.mxu2 }
  0xa5   :  { %v245_v45 = vpop.f32.mrf.mxu3  ;;  %v217_v50 = vadd.f32 %v485_v41, %v216_v44 }
  0xa6   :  { %v208_v46 = vpop.f32.mrf.mxu0 }
  0xa7   :  { %v209_v48 = vadd.f32 %v485_v41, %v208_v46  ;;  %v237_v49 = vpop.f32.mrf.mxu1  ;;  %v246_v55 = vadd.f32 %v245_v45, %v217_v50 }
  0xa9   :  { %v238_v51 = vadd.f32 %v237_v49, %v209_v48  ;;  %v259_v62 = vmax.f32 %v246_v55, 0.0 }
  0xab   :  { %v256_v53 = vmax.f32 %v238_v51, 0.0  ;;  %v279_v16 = vsub.f32 %v259_v62, %v255_v52 }
  0xac   :  { %v218_v54 = vpop.f32.mrf.mxu2 }
  0xad   :  { %v446_v56 = vpack.c.bf16 %v256_v53, %v255_v52  ;;  %v219_v57 = vadd.f32 %v485_v41, %v218_v54  ;;  %v247_v58 = vpop.f32.mrf.mxu3  ;;  %v283_v23 = vand.u32 2147483647, %v279_v16 }
  0xae   :  { %v211_v59 = vpop.f32.mrf.mxu0 }
  0xaf   :  { %447 = vst [vmem:[%s655_s3] sm:$0xff] %v446_v56   ;;  %v248_v60 = vadd.f32 %v247_v58, %v219_v57  ;;  %v240_v61 = vpop.f32.mrf.mxu1  ;;  %v212_v0 = vadd.f32 %v485_v41, %v211_v59 }
  0xb1   :  { %v260_v63 = vmax.f32 %v248_v60, 0.0  ;;  %v241_v3 = vadd.f32 %v240_v61, %v212_v0 }
  0xb3   :  { %v456_v1 = vpack.c.bf16 %v260_v63, %v259_v62  ;;  %v257_v10 = vmax.f32 %v241_v3, 0.0  ;;  %v280_v13 = vsub.f32 %v260_v63, %v256_v53 }
  0xb4   :  { %v221_v2 = vpop.f32.mrf.mxu2 }
  0xb5   :  { %464 = vst [vmem:[%s655_s3 + $0x10] sm:$0xff] %v456_v1   ;;  %v222_v4 = vadd.f32 %v485_v41, %v221_v2  ;;  %v250_v5 = vpop.f32.mrf.mxu3  ;;  %v284_v21 = vand.u32 2147483647, %v280_v13 }
  0xb6   :  { %v213_v6 = vpop.f32.mrf.mxu0 }
  0xb7   :  { %v251_v7 = vadd.f32 %v250_v5, %v222_v4  ;;  %v214_v8 = vadd.f32 %v485_v41, %v213_v6  ;;  %v242_v9 = vpop.f32.mrf.mxu1  ;;  %v287_v28 = vadd.f32 %v284_v21, %v283_v23 }
  0xb9   :  { %v261_v11 = vmax.f32 %v251_v7, 0.0  ;;  %v243_v12 = vadd.f32 %v242_v9, %v214_v8 }
  0xbb   :  { %v258_v14 = vmax.f32 %v243_v12, 0.0  ;;  %v281_v17 = vsub.f32 %v261_v11, %v257_v10 }
  0xbc   :  { %v223_v15 = vpop.f32.mrf.mxu2 }
  0xbd   :  { %v451_v18 = vpack.c.bf16 %v258_v14, %v257_v10  ;;  %v224_v19 = vadd.f32 %v485_v41, %v223_v15  ;;  %v252_v20 = vpop.f32.mrf.mxu3  ;;  %v285_v24 = vand.u32 2147483647, %v281_v17 }
  0xbf   :  { %463 = vst [vmem:[%s655_s3 + $0x8] sm:$0xff] %v451_v18   ;;  %v253_v22 = vadd.f32 %v252_v20, %v224_v19  ;;  %v288_v30 = vadd.f32 %v287_v28, %v285_v24 }
  0xc1   :  { %v262_v25 = vmax.f32 %v253_v22, 0.0 }
  0xc3   :  { %v461_v26 = vpack.c.bf16 %v262_v25, %v261_v11  ;;  %v282_v27 = vsub.f32 %v262_v25, %v258_v14 }
  0xc5   :  { %465 = vst [vmem:[%s655_s3 + $0x18] sm:$0xff] %v461_v26   ;;  %v286_v29 = vand.u32 2147483647, %v282_v27 }
  0xc7   :  { %v289_v31 = vadd.f32 %v288_v30, %v286_v29 }
  0xc9   :  { %290 = vadd.xlane.f32.xlu0 %v289_v31 }
 0x13c   :  { %v291_v32 = vpop.xlane.xlu0 %290 }
 0x13d   :  { %v292_v33 = vrot.slane %v291_v32, 4 }
 0x13f   :  { %v293_v34 = vadd.f32 %v292_v33, %v291_v32 }
 0x141   :  { %v294_v35 = vrot.slane %v293_v34, 2 }
 0x143   :  { %v295_v36 = vadd.f32 %v294_v35, %v293_v34 }
 0x145   :  { %v296_v37 = vrot.slane %v295_v36, 1 }
 0x147   :  { %v297_v38 = vadd.f32 %v296_v37, %v295_v36 }
 0x149   :  { %482 = vpush %v297_v38 }
 0x17a   :  { %s483_s12 = spop %482 }
 0x17b   :  { %s299_s3 = smul.f32 0.0024414063, %s483_s12 }
 0x17d   :  { %v300_v39 = vstv %s299_s3 }
 0x17e   :  { %302 = vst.msk [vmem:[#allocation2] sm:$0x1] %vm301_vm0, %v300_v39 }
 0x17f   :  { %315 = dma.vmem_to_hbm [thread:$0]  %s311_s8, 16, %s313_s11, [#allocation3]  }
 0x180   :  { %510 = dma.done.wait [#allocation3], 16  }
 0x181   :  { %511 = vsyncadd [#allocation3], 4294967280 }
 0x182   :  { %322 = vsyncpa [#allocation3], 1 }

// kernel: generator_loss.11
= control target key start
LH: loop header
LB: loop body
LE: loop exit
PB: predicated region body
PF: predicated region fallthrough
CT: control target
= control target key end

     0   :  { %10 = vsyncpa [#allocation3], 0  ;;  %s658_s0 = inlined_call_operand.vmem [shape: bf16[16,384], index: 0, kind: input, shape index: {}]   ;;  %s659_s1 = inlined_call_operand.vmem [shape: bf16[384,128], index: 1, kind: input, shape index: {}]   ;;  %s660_s2 = inlined_call_operand.vmem [shape: f32[1,128], index: 2, kind: input, shape index: {}]   ;;  %s661_s3 = inlined_call_operand.hbm [shape: bf16[16,128], index: 3, kind: output, shape index: {0}]   ;;  %s662_s4 = inlined_call_operand.hbm [shape: f32[1,1], index: 4, kind: output, shape index: {1}]  }
   0x1   :  { %v449_v0 = vld [vmem:[%s659_s1 + $0x38] sm:$0xff]  ;;  %v448_v3 = vld [vmem:[%s659_s1 + $0x30] sm:$0xff]  ;;  %v447_v6 = vld [vmem:[%s659_s1 + $0x28] sm:$0xff] }
   0x2   :  { %v457_v1 = vld [vmem:[%s659_s1 + $0x78] sm:$0xff]  ;;  %234 = vmatpush.bf16.msra.mxu0 %v449_v0  ;;  %v456_v4 = vld [vmem:[%s659_s1 + $0x70] sm:$0xff]  ;;  %v455_v7 = vld [vmem:[%s659_s1 + $0x68] sm:$0xff] }
   0x3   :  { %v465_v2 = vld [vmem:[%s659_s1 + $0xb8] sm:$0xff]  ;;  %248 = vmatpush.bf16.msra.mxu1 %v457_v1  ;;  %v464_v5 = vld [vmem:[%s659_s1 + $0xb0] sm:$0xff]  ;;  %v463_v8 = vld [vmem:[%s659_s1 + $0xa8] sm:$0xff] }
   0x4   :  { %262 = vmatpush.bf16.msra.mxu2 %v465_v2  ;;  %v446_v9 = vld [vmem:[%s659_s1 + $0x20] sm:$0xff] }
   0x5   :  { %v454_v10 = vld [vmem:[%s659_s1 + $0x60] sm:$0xff] }
   0x6   :  { %235 = vmatpush.bf16.msra.mxu0 %v448_v3 }
   0x7   :  { %249 = vmatpush.bf16.msra.mxu1 %v456_v4 }
   0x8   :  { %263 = vmatpush.bf16.msra.mxu2 %v464_v5 }
   0xa   :  { %236 = vmatpush.bf16.msra.mxu0 %v447_v6 }
   0xb   :  { %250 = vmatpush.bf16.msra.mxu1 %v455_v7 }
   0xc   :  { %11 = vsyncpa [#allocation5], 0  ;;  %264 = vmatpush.bf16.msra.mxu2 %v463_v8  ;;  %v462_v11 = vld [vmem:[%s659_s1 + $0xa0] sm:$0xff]  ;;  %v445_v12 = vld [vmem:[%s659_s1 + $0x18] sm:$0xff]  ;;  %s303_s26 = sshll.u32 %s661_s3, 4  ;;  %s531_s27 = smov 64   ;;  %s304_s26 = int_to_ptr.hbm [resolvable:$true] %s303_s26 }
   0xd   :  { %v453_v13 = vld [vmem:[%s659_s1 + $0x58] sm:$0xff]  ;;  %v444_v15 = vld [vmem:[%s659_s1 + $0x10] sm:$0xff]  ;;  %v443_v18 = vld [vmem:[%s659_s1 + $0x8] sm:$0xff]  ;;  %s532_s28 = smov 4   ;;  %s533_s29 = smov [#allocation4]   ;;  %vm295_vm0 = vcmask 0  }
   0xe   :  { %237 = vmatpush.bf16.msra.mxu0 %v446_v9  ;;  %v461_v14 = vld [vmem:[%s659_s1 + $0x98] sm:$0xff]  ;;  %v452_v16 = vld [vmem:[%s659_s1 + $0x50] sm:$0xff]  ;;  %v451_v19 = vld [vmem:[%s659_s1 + $0x48] sm:$0xff]  ;;  %s315_s30 = sshll.u32 %s533_s29, 4  ;;  %s317_s7 = sshll.u32 %s662_s4, 4  ;;  %s316_s30 = int_to_ptr.vmem [resolvable:$true] %s315_s30  ;;  %s318_s7 = int_to_ptr.hbm [resolvable:$true] %s317_s7 }
   0xf   :  { %251 = vmatpush.bf16.msra.mxu1 %v454_v10  ;;  %v460_v17 = vld [vmem:[%s659_s1 + $0x90] sm:$0xff]  ;;  %v459_v20 = vld [vmem:[%s659_s1 + $0x88] sm:$0xff]  ;;  %v442_v21 = vld [vmem:[%s659_s1] sm:$0xff] }
  0x10   :  { %265 = vmatpush.bf16.msra.mxu2 %v462_v11  ;;  %v450_v22 = vld [vmem:[%s659_s1 + $0x40] sm:$0xff]  ;;  %v440_v24 = vld [vmem:[%s658_s0 + $0x8] sm:$0xf0]  ;;  %v335_v26 = vld [vmem:[%s658_s0 + $0xc] sm:$0xf0] }
  0x11   :  { %v333_v23 = vld [vmem:[%s658_s0] sm:$0xf]  ;;  %v439_v25 = vld [vmem:[%s658_s0 + $0x4] sm:$0xf]  ;;  %v341_v28 = vld [vmem:[%s658_s0 + $0x8] sm:$0xf] }
  0x12   :  { %238 = vmatpush.bf16.msra.mxu0 %v445_v12  ;;  %v458_v27 = vld [vmem:[%s659_s1 + $0x80] sm:$0xff]  ;;  %v441_v29 = vld [vmem:[%s658_s0 + $0x10] sm:$0xf0]  ;;  %v334_v30 = vor.u32 %v440_v24, %v333_v23  ;;  %v338_v31 = vor.u32 %v439_v25, %v335_v26  ;;  %s530_s0 = smov [#allocation2]  }
  0x13   :  { %252 = vmatpush.bf16.msra.mxu1 %v453_v13  ;;  %v342_v32 = vor.u32 %v441_v29, %v341_v28  ;;  %v477_v34 = vld [vmem:[%s660_s2] ss:$0 sm:$0xff]  ;;  %s301_s2 = sshll.u32 %s530_s0, 4  ;;  %s302_s2 = int_to_ptr.vmem [resolvable:$true] %s301_s2 }
  0x14   :  { %266 = vmatpush.bf16.msra.mxu2 %v461_v14 }
  0x16   :  { %239 = vmatpush.bf16.msra.mxu0 %v444_v15 }
  0x17   :  { %253 = vmatpush.bf16.msra.mxu1 %v452_v16 }
  0x18   :  { %267 = vmatpush.bf16.msra.mxu2 %v460_v17 }
  0x1a   :  { %240 = vmatpush.bf16.msra.mxu0 %v443_v18 }
  0x1b   :  { %254 = vmatpush.bf16.msra.mxu1 %v451_v19 }
  0x1c   :  { %268 = vmatpush.bf16.msra.mxu2 %v459_v20 }
  0x1e   :  { %241 = vmatpush.bf16.msra.mxu0 %v442_v21 }
  0x1f   :  { %255 = vmatpush.bf16.msra.mxu1 %v450_v22 }
  0x20   :  { %269 = vmatpush.bf16.msra.mxu2 %v458_v27 }
  0x21   :  { %242 = vmatmul.bf16.vlgmr.msra.gmra.mxu0 %v334_v30 }
  0x22   :  { %256 = vmatmul.bf16.vlgmr.msra.gmra.mxu1 %v338_v31 }
  0x23   :  { %270 = vmatmul.bf16.vlgmr.msra.gmra.mxu2 %v342_v32 }
  0x9e   :  { %v243_v33 = vpop.f32.mrf.mxu0 }
  0x9f   :  { %v257_v35 = vpop.f32.mrf.mxu1  ;;  %v244_v36 = vadd.f32 %v477_v34, %v243_v33 }
  0xa1   :  { %v258_v39 = vadd.f32 %v257_v35, %v244_v36 }
  0xa6   :  { %v271_v37 = vpop.f32.mrf.mxu2  ;;  %v245_v38 = vpop.f32.mrf.mxu0 }
  0xa7   :  { %v246_v40 = vadd.f32 %v477_v34, %v245_v38  ;;  %v259_v41 = vpop.f32.mrf.mxu1  ;;  %v272_v42 = vadd.f32 %v271_v37, %v258_v39 }
  0xa9   :  { %v260_v43 = vadd.f32 %v259_v41, %v246_v40  ;;  %v276_v46 = vmax.f32 %v272_v42, 0.0 }
  0xae   :  { %v273_v44 = vpop.f32.mrf.mxu2 }
  0xaf   :  { %v274_v45 = vadd.f32 %v273_v44, %v260_v43 }
  0xb1   :  { %v277_v47 = vmax.f32 %v274_v45, 0.0 }
  0xb3   :  { %v469_v48 = vpack.c.bf16 %v277_v47, %v276_v46  ;;  %v282_v49 = vsub.f32 %v277_v47, %v276_v46 }
  0xb5   :  { %470 = vst [vmem:[#allocation2] sm:$0xff] %v469_v48   ;;  %v283_v50 = vand.u32 2147483647, %v282_v49 }
  0xb6   :  { %309 = dma.vmem_to_hbm [thread:$0]  %s302_s2, 128, %s304_s26, [#allocation3], %s531_s27, %s531_s27, %s532_s28  }
  0xb7   :  { %284 = vadd.xlane.f32.xlu0 %v283_v50 }
 0x12a   :  { %v285_v51 = vpop.xlane.xlu0 %284 }
 0x12b   :  { %v286_v52 = vrot.slane %v285_v51, 4 }
 0x12d   :  { %v287_v53 = vadd.f32 %v286_v52, %v285_v51 }
 0x12f   :  { %v288_v54 = vrot.slane %v287_v53, 2 }
 0x131   :  { %v289_v55 = vadd.f32 %v288_v54, %v287_v53 }
 0x133   :  { %v290_v56 = vrot.slane %v289_v55, 1 }
 0x135   :  { %v291_v57 = vadd.f32 %v290_v56, %v289_v55 }
 0x137   :  { %471 = vpush %v291_v57 }
 0x168   :  { %s472_s3 = spop %471 }
 0x169   :  { %s293_s8 = smul.f32 0.0390625, %s472_s3 }
 0x16b   :  { %v294_v58 = vstv %s293_s8 }
 0x16c   :  { %296 = vst.msk [vmem:[#allocation4] sm:$0x1] %vm295_vm0, %v294_v58 }
 0x16d   :  { %320 = dma.vmem_to_hbm [thread:$0]  %s316_s30, 16, %s318_s7, [#allocation5]  }
 0x16e   :  { %526 = dma.done.wait [#allocation3], 128  }
 0x16f   :  { %527 = vsyncadd [#allocation3], 4294967168 }
 0x170   :  { %528 = dma.done.wait [#allocation5], 16  }
 0x171   :  { %529 = vsyncadd [#allocation5], 4294967280 }
 0x172   :  { %329 = vsyncpa [#allocation3], 1 }
 0x173   :  { %330 = vsyncpa [#allocation5], 1 }

</bundles_post_ra>
